<compile_context>
chip_gen: v6e
topology: v6e:2x2x1
jax: 0.10.0
libtpu: 0.0.40
codegen_flags: <defaults>
</compile_context>

<pallas_src>
import functools

import jax
import jax.numpy as jnp
from jax.experimental import pallas as pl
from jax.experimental.pallas import tpu as pltpu

_TAIL = 8  # extra zero rows appended to flattened buffers (covers shifted-window overreads)


# ------------------------------ Pallas kernel --------------------------------

def _fused_resblock_kernel(xb_ref, mask_ref, w1_ref, w2_ref, ws_ref, b1_ref,
                           bf_ref, s4_ref, out_ref, acc_ref, h1_ref, *,
                           W0p, R1, R2):
    """One (image, row-band) step of the fused DiscriminatorOptimizedResBlock.

    xb_ref  : (1, 1, R0*W0p + TAIL, Cin)   flattened zero-padded input band (bf16)
    mask_ref: (1, R1*W0p, 1)               1.0 where conv1 output is a real image
                                           pixel, 0.0 where conv2 needs zero padding
    w1_ref  : (9, Cin,  Cp)  conv1 taps    w2_ref: (9, Cp, Cp) conv2 taps
    ws_ref  : (Cin, Cp)      1x1 shortcut  b1_ref/bf_ref: (1, Cp) biases
    s4_ref  : (tp*Wh, R2*W0p) constant 0.25-selection matrix = fused AvgPool2d(2)
    out_ref : (1, 1, tp*Wh, Cp)            pooled, lane-dense output block
    acc_ref : (R1*W0p, Cp) f32 scratch     h1_ref: (R1*W0p + TAIL, Cp) bf16 scratch
    """
    L1 = R1 * W0p
    L2 = R2 * W0p

    # ---- conv1 (3x3, pad 1): 9 shifted matmuls over the flat band ----
    for t in range(9):
        dy, dx = divmod(t, 3)
        off = dy * W0p + dx
        contrib = jnp.dot(xb_ref[0, 0, off:off + L1, :], w1_ref[t],
                          preferred_element_type=jnp.float32)
        if t == 0:
            acc_ref[...] = contrib
        else:
            acc_ref[...] += contrib

    # bias + ReLU; zero the rows/cols that play the role of conv2's zero padding.
    h1 = jnp.maximum(acc_ref[...] + b1_ref[...], 0.0) * mask_ref[0]
    h1_ref[0:L1, :] = h1.astype(h1_ref.dtype)
    h1_ref[L1:, :] = jnp.zeros((h1_ref.shape[0] - L1, h1_ref.shape[1]),
                               h1_ref.dtype)

    # ---- 1x1 shortcut conv, evaluated pre-pool on the conv2 output grid ----
    acc_ref[0:L2, :] = jnp.dot(xb_ref[0, 0, 2 * W0p + 2:2 * W0p + 2 + L2, :],
                               ws_ref[...], preferred_element_type=jnp.float32)

    # ---- conv2 (3x3, pad 1): 9 shifted matmuls over the flat h1 scratch ----
    for t in range(9):
        dy, dx = divmod(t, 3)
        off = dy * W0p + dx
        acc_ref[0:L2, :] += jnp.dot(h1_ref[off:off + L2, :], w2_ref[t],
                                    preferred_element_type=jnp.float32)

    # ---- AvgPool2d(2) + discard of padding/garbage columns in one matmul ----
    pooled = jnp.dot(s4_ref[...], acc_ref[0:L2, :],
                     preferred_element_type=jnp.float32) + bf_ref[...]
    out_ref[0, 0, :, :] = pooled.astype(out_ref.dtype)


# ------------------------------- host wrapper ---------------------------------

def _pick_band_rows(Hh, W, max_flat_rows=2048):
    """Pooled rows per band: largest divisor of Hh whose f32 accumulator
    ((2*tp+2)*(W+4) rows x 128 lanes) stays comfortably inside VMEM on all gens."""
    W0p = W + 4
    tp = 1
    for cand in range(1, Hh + 1):
        if Hh % cand == 0 and (2 * cand + 2) * W0p <= max_flat_rows:
            tp = cand
    return tp


def disc_optimized_resblock(x_nchw, params, *, compute_dtype=jnp.bfloat16):
    w1, b1, w2, b2, ws, bs = params
    B, Cin, H, W = x_nchw.shape
    Cout = w1.shape[0]
    assert H % 2 == 0 and W % 2 == 0, "AvgPool2d(2) path assumes even H, W"
    Hh, Wh = H // 2, W // 2
    Cout_p = ((Cout + 127) // 128) * 128          # lane-dense output channels

    tp = _pick_band_rows(Hh, W)                   # pooled rows per band
    NB = Hh // tp                                 # bands per image
    W0p = W + 4                                   # padded width (= flat row stride)
    R0, R1, R2 = 2 * tp + 4, 2 * tp + 2, 2 * tp   # x / conv1 / conv2 rows per band
    L0, L1, L2 = R0 * W0p, R1 * W0p, R2 * W0p
    L0p = L0 + _TAIL
    Mo = tp * Wh                                  # pooled pixels per band

    # ---- activations: NHWC, pad by 2, cut into overlapping row bands, flatten ----
    x = jnp.transpose(x_nchw, (0, 2, 3, 1)).astype(jnp.float32)
    xp = jnp.pad(x, ((0, 0), (2, 2), (2, 2), (0, 0)))
    band_rows = jnp.arange(NB)[:, None] * (2 * tp) + jnp.arange(R0)[None, :]
    xb = xp[:, band_rows]                                    # (B, NB, R0, W0p, Cin)
    xb = xb.reshape(B, NB, L0, Cin)
    xb = jnp.pad(xb, ((0, 0), (0, 0), (0, _TAIL), (0, 0))).astype(compute_dtype)

    # ---- weights / biases: tap-major, output channels zero-padded to Cout_p ----
    def pad_out(a):
        return jnp.pad(a, [(0, 0)] * (a.ndim - 1) + [(0, Cout_p - Cout)])

    w1k = pad_out(jnp.transpose(w1, (2, 3, 1, 0)).reshape(9, Cin, Cout))
    w2k = pad_out(jnp.transpose(w2, (2, 3, 1, 0)).reshape(9, Cout, Cout))
    w2k = jnp.pad(w2k, ((0, 0), (0, Cout_p - Cout), (0, 0)))
    wsk = pad_out(jnp.transpose(ws.reshape(Cout, Cin)))
    w1k = w1k.astype(compute_dtype)
    w2k = w2k.astype(compute_dtype)
    wsk = wsk.astype(compute_dtype)
    b1k = pad_out(b1.reshape(1, Cout)).astype(jnp.float32)
    bfk = pad_out((b2 + bs).reshape(1, Cout)).astype(jnp.float32)   # folded conv2+shortcut bias

    # ---- per-band mask: zero conv1 rows/cols that sit on conv2's zero padding ----
    i_idx = jnp.arange(R1)[None, :, None]
    j_idx = jnp.arange(W0p)[None, None, :]
    r_idx = jnp.arange(NB)[:, None, None]
    row_img = 2 * tp * r_idx + i_idx - 1
    mask = (row_img >= 0) & (row_img < H) & (j_idx >= 1) & (j_idx <= W)
    mask = mask.astype(jnp.float32).reshape(NB, L1, 1)

    # ---- constant selection matrix: AvgPool2d(2) (0.25 folded) + garbage discard ----
    pq = jnp.arange(tp)[:, None, None, None]
    wq = jnp.arange(Wh)[None, :, None, None]
    dy2 = jnp.arange(2)[None, None, :, None]
    dx2 = jnp.arange(2)[None, None, None, :]
    gpos = ((2 * pq + dy2) * W0p + (2 * wq + dx2)).reshape(Mo, 4)
    s4 = jnp.zeros((Mo, L2), jnp.float32)
    s4 = s4.at[jnp.arange(Mo)[:, None], gpos].set(0.25)

    kernel = functools.partial(_fused_resblock_kernel, W0p=W0p, R1=R1, R2=R2)
    out = pl.pallas_call(
        kernel,
        out_shape=jax.ShapeDtypeStruct((B, NB, Mo, Cout_p), jnp.float32),
        grid=(B, NB),
        in_specs=[
            pl.BlockSpec((1, 1, L0p, Cin), lambda b, r: (b, r, 0, 0)),
            pl.BlockSpec((1, L1, 1), lambda b, r: (r, 0, 0)),
            pl.BlockSpec((9, Cin, Cout_p), lambda b, r: (0, 0, 0)),
            pl.BlockSpec((9, Cout_p, Cout_p), lambda b, r: (0, 0, 0)),
            pl.BlockSpec((Cin, Cout_p), lambda b, r: (0, 0)),
            pl.BlockSpec((1, Cout_p), lambda b, r: (0, 0)),
            pl.BlockSpec((1, Cout_p), lambda b, r: (0, 0)),
            pl.BlockSpec((Mo, L2), lambda b, r: (0, 0)),
        ],
        out_specs=pl.BlockSpec((1, 1, Mo, Cout_p), lambda b, r: (b, r, 0, 0)),
        scratch_shapes=[
            pltpu.VMEM((L1, Cout_p), jnp.float32),        # conv1 / conv2+shortcut accumulator
            pltpu.VMEM((L1 + _TAIL, Cout_p), compute_dtype),  # h1 (never touches HBM)
        ],
        compiler_params=pltpu.CompilerParams(
            dimension_semantics=("parallel", "parallel"),
            vmem_limit_bytes=32 * 1024 * 1024,
        ),
    )(xb, mask, w1k, w2k, wsk, b1k, bfk, s4)

    out = out.reshape(B, Hh, Wh, Cout_p)[..., :Cout]       # drop lane padding
    return jnp.transpose(out, (0, 3, 1, 2))                # back to NCHW


# ----------------------------- pure-JAX reference ------------------------------

def ref_forward(x_nchw, params):
    w1, b1, w2, b2, ws, bs = params

    def conv(x, w, b, pad):
        y = jax.lax.conv_general_dilated(
            x, w, (1, 1), pad, dimension_numbers=("NCHW", "OIHW", "NCHW"))
        return y + b.reshape(1, -1, 1, 1)

    def avgpool2(x):
        B, C, H, W = x.shape
        return x.reshape(B, C, H // 2, 2, W // 2, 2).mean(axis=(3, 5))

    res = conv(x_nchw, w1, b1, [(1, 1), (1, 1)])
    res = jnp.maximum(res, 0.0)
    res = conv(res, w2, b2, [(1, 1), (1, 1)])
    res = avgpool2(res)
    sc = conv(avgpool2(x_nchw), ws, bs, [(0, 0), (0, 0)])
    return res + sc


# --------------------------------- main ----------------------------------------

if __name__ == "__main__":
    B, Cin, Cout, H, W = 2, 4, 8, 16, 16

    key = jax.random.PRNGKey(0)
    ks = jax.random.split(key, 7)
    w1 = jax.random.normal(ks[0], (Cout, Cin, 3, 3), jnp.float32) * 0.1
    b1 = jax.random.normal(ks[1], (Cout,), jnp.float32) * 0.1
    w2 = jax.random.normal(ks[2], (Cout, Cout, 3, 3), jnp.float32) * 0.1
    b2 = jax.random.normal(ks[3], (Cout,), jnp.float32) * 0.1
    ws = jax.random.normal(ks[4], (Cout, Cin, 1, 1), jnp.float32) * 0.1
    bs = jax.random.normal(ks[5], (Cout,), jnp.float32) * 0.1
    params = (w1, b1, w2, b2, ws, bs)

    x = jax.random.normal(ks[6], (B, Cin, H, W), jnp.float32)

    out = jax.block_until_ready(jax.jit(disc_optimized_resblock)(x, params))
    ref = jax.block_until_ready(ref_forward(x, params))

    assert out.shape == (B, Cout, H // 2, W // 2), out.shape
    max_err = float(jnp.max(jnp.abs(out - ref)))
    # bf16 MXU operands with f32 accumulation vs a pure-f32 reference.
    assert jnp.allclose(out, ref, rtol=5e-2, atol=5e-2), max_err

    print("KERNEL_OK")
</pallas_src>

<mosaic_0001>
module attributes {stable_mosaic.version = 11 : i64} {
  func.func @_fused_resblock_kernel(%arg0: i32, %arg1: i32, %arg2: memref<1x1x408x4xbf16, #tpu.memory_space<vmem>>, %arg3: memref<1x360x1xf32, #tpu.memory_space<vmem>>, %arg4: memref<9x4x128xbf16, #tpu.memory_space<vmem>>, %arg5: memref<9x128x128xbf16, #tpu.memory_space<vmem>>, %arg6: memref<4x128xbf16, #tpu.memory_space<vmem>>, %arg7: memref<1x128xf32, #tpu.memory_space<vmem>>, %arg8: memref<1x128xf32, #tpu.memory_space<vmem>>, %arg9: memref<64x320xf32, #tpu.memory_space<vmem>>, %arg10: memref<1x1x64x128xf32, #tpu.memory_space<vmem>>, %arg11: memref<360x128xf32, #tpu.memory_space<vmem>>, %arg12: memref<368x128xbf16, #tpu.memory_space<vmem>>) attributes {dimension_semantics = [#tpu.dimension_semantics<parallel>, #tpu.dimension_semantics<parallel>], iteration_bounds = array<i64: 2, 1>, scalar_prefetch = 0 : i64, scratch_operands = 2 : i64, tpu.core_type = #tpu.core_type<tc>, window_params = [{transform_indices = @transform_0, window_bounds = array<i64: 1, 1, 408, 4>}, {transform_indices = @transform_1, window_bounds = array<i64: 1, 360, 1>}, {pipeline_mode = #tpu.pipeline_mode<synchronous>, transform_indices = @transform_2, window_bounds = array<i64: 9, 4, 128>}, {pipeline_mode = #tpu.pipeline_mode<synchronous>, transform_indices = @transform_3, window_bounds = array<i64: 9, 128, 128>}, {pipeline_mode = #tpu.pipeline_mode<synchronous>, transform_indices = @transform_4, window_bounds = array<i64: 4, 128>}, {pipeline_mode = #tpu.pipeline_mode<synchronous>, transform_indices = @transform_5, window_bounds = array<i64: 1, 128>}, {pipeline_mode = #tpu.pipeline_mode<synchronous>, transform_indices = @transform_6, window_bounds = array<i64: 1, 128>}, {pipeline_mode = #tpu.pipeline_mode<synchronous>, transform_indices = @transform_7, window_bounds = array<i64: 64, 320>}, {transform_indices = @transform_8, window_bounds = array<i64: 1, 1, 64, 128>}]} {
    %c0 = arith.constant 0 : index
    %c0_0 = arith.constant 0 : index
    %c0_1 = arith.constant 0 : index
    %c0_2 = arith.constant 0 : index
    %0 = vector.load %arg2[%c0, %c0_0, %c0_1, %c0_2] : memref<1x1x408x4xbf16, #tpu.memory_space<vmem>>, vector<1x1x360x4xbf16>
    %1 = vector.shape_cast %0 : vector<1x1x360x4xbf16> to vector<360x4xbf16>
    %c0_3 = arith.constant 0 : index
    %c0_4 = arith.constant 0 : index
    %c0_5 = arith.constant 0 : index
    %2 = vector.load %arg4[%c0_3, %c0_4, %c0_5] : memref<9x4x128xbf16, #tpu.memory_space<vmem>>, vector<1x4x128xbf16>
    %3 = vector.shape_cast %2 : vector<1x4x128xbf16> to vector<4x128xbf16>
    %cst = arith.constant dense<0.000000e+00> : vector<360x128xf32>
    %4 = tpu.matmul %1, %3, %cst {dimension_numbers = #tpu.dot_dimension_numbers<[1], [0], [0], [1], [0, 0, 1, 1], [], []>} : vector<360x4xbf16>, vector<4x128xbf16>, vector<360x128xf32> -> vector<360x128xf32>
    %c0_6 = arith.constant 0 : index
    %c0_7 = arith.constant 0 : index
    %5 = vector.load %arg11[%c0_6, %c0_7] : memref<360x128xf32, #tpu.memory_space<vmem>>, vector<360x128xf32>
    tpu.vector_store %arg11[%c0_6, %c0_7], %4 {strides = array<i32>} : memref<360x128xf32, #tpu.memory_space<vmem>>, vector<360x128xf32>,
    %c0_8 = arith.constant 0 : index
    %c0_9 = arith.constant 0 : index
    %c1 = arith.constant 1 : index
    %c0_10 = arith.constant 0 : index
    %6 = vector.load %arg2[%c0_8, %c0_9, %c1, %c0_10] : memref<1x1x408x4xbf16, #tpu.memory_space<vmem>>, vector<1x1x360x4xbf16>
    %7 = vector.shape_cast %6 : vector<1x1x360x4xbf16> to vector<360x4xbf16>
    %c1_11 = arith.constant 1 : index
    %c0_12 = arith.constant 0 : index
    %c0_13 = arith.constant 0 : index
    %8 = vector.load %arg4[%c1_11, %c0_12, %c0_13] : memref<9x4x128xbf16, #tpu.memory_space<vmem>>, vector<1x4x128xbf16>
    %9 = vector.shape_cast %8 : vector<1x4x128xbf16> to vector<4x128xbf16>
    %cst_14 = arith.constant dense<0.000000e+00> : vector<360x128xf32>
    %10 = tpu.matmul %7, %9, %cst_14 {dimension_numbers = #tpu.dot_dimension_numbers<[1], [0], [0], [1], [0, 0, 1, 1], [], []>} : vector<360x4xbf16>, vector<4x128xbf16>, vector<360x128xf32> -> vector<360x128xf32>
    %c0_15 = arith.constant 0 : index
    %c0_16 = arith.constant 0 : index
    %11 = vector.load %arg11[%c0_15, %c0_16] : memref<360x128xf32, #tpu.memory_space<vmem>>, vector<360x128xf32>
    %12 = arith.addf %11, %10 : vector<360x128xf32>
    %c0_17 = arith.constant 0 : index
    %c0_18 = arith.constant 0 : index
    %13 = vector.load %arg11[%c0_17, %c0_18] : memref<360x128xf32, #tpu.memory_space<vmem>>, vector<360x128xf32>
    tpu.vector_store %arg11[%c0_17, %c0_18], %12 {strides = array<i32>} : memref<360x128xf32, #tpu.memory_space<vmem>>, vector<360x128xf32>,
    %c0_19 = arith.constant 0 : index
    %c0_20 = arith.constant 0 : index
    %c2 = arith.constant 2 : index
    %c0_21 = arith.constant 0 : index
    %14 = vector.load %arg2[%c0_19, %c0_20, %c2, %c0_21] : memref<1x1x408x4xbf16, #tpu.memory_space<vmem>>, vector<1x1x360x4xbf16>
    %15 = vector.shape_cast %14 : vector<1x1x360x4xbf16> to vector<360x4xbf16>
    %c2_22 = arith.constant 2 : index
    %c0_23 = arith.constant 0 : index
    %c0_24 = arith.constant 0 : index
    %16 = vector.load %arg4[%c2_22, %c0_23, %c0_24] : memref<9x4x128xbf16, #tpu.memory_space<vmem>>, vector<1x4x128xbf16>
    %17 = vector.shape_cast %16 : vector<1x4x128xbf16> to vector<4x128xbf16>
    %cst_25 = arith.constant dense<0.000000e+00> : vector<360x128xf32>
    %18 = tpu.matmul %15, %17, %cst_25 {dimension_numbers = #tpu.dot_dimension_numbers<[1], [0], [0], [1], [0, 0, 1, 1], [], []>} : vector<360x4xbf16>, vector<4x128xbf16>, vector<360x128xf32> -> vector<360x128xf32>
    %c0_26 = arith.constant 0 : index
    %c0_27 = arith.constant 0 : index
    %19 = vector.load %arg11[%c0_26, %c0_27] : memref<360x128xf32, #tpu.memory_space<vmem>>, vector<360x128xf32>
    %20 = arith.addf %19, %18 : vector<360x128xf32>
    %c0_28 = arith.constant 0 : index
    %c0_29 = arith.constant 0 : index
    %21 = vector.load %arg11[%c0_28, %c0_29] : memref<360x128xf32, #tpu.memory_space<vmem>>, vector<360x128xf32>
    tpu.vector_store %arg11[%c0_28, %c0_29], %20 {strides = array<i32>} : memref<360x128xf32, #tpu.memory_space<vmem>>, vector<360x128xf32>,
    %c0_30 = arith.constant 0 : index
    %c0_31 = arith.constant 0 : index
    %c20 = arith.constant 20 : index
    %c0_32 = arith.constant 0 : index
    %22 = vector.load %arg2[%c0_30, %c0_31, %c20, %c0_32] : memref<1x1x408x4xbf16, #tpu.memory_space<vmem>>, vector<1x1x360x4xbf16>
    %23 = vector.shape_cast %22 : vector<1x1x360x4xbf16> to vector<360x4xbf16>
    %c3 = arith.constant 3 : index
    %c0_33 = arith.constant 0 : index
    %c0_34 = arith.constant 0 : index
    %24 = vector.load %arg4[%c3, %c0_33, %c0_34] : memref<9x4x128xbf16, #tpu.memory_space<vmem>>, vector<1x4x128xbf16>
    %25 = vector.shape_cast %24 : vector<1x4x128xbf16> to vector<4x128xbf16>
    %cst_35 = arith.constant dense<0.000000e+00> : vector<360x128xf32>
    %26 = tpu.matmul %23, %25, %cst_35 {dimension_numbers = #tpu.dot_dimension_numbers<[1], [0], [0], [1], [0, 0, 1, 1], [], []>} : vector<360x4xbf16>, vector<4x128xbf16>, vector<360x128xf32> -> vector<360x128xf32>
    %c0_36 = arith.constant 0 : index
    %c0_37 = arith.constant 0 : index
    %27 = vector.load %arg11[%c0_36, %c0_37] : memref<360x128xf32, #tpu.memory_space<vmem>>, vector<360x128xf32>
    %28 = arith.addf %27, %26 : vector<360x128xf32>
    %c0_38 = arith.constant 0 : index
    %c0_39 = arith.constant 0 : index
    %29 = vector.load %arg11[%c0_38, %c0_39] : memref<360x128xf32, #tpu.memory_space<vmem>>, vector<360x128xf32>
    tpu.vector_store %arg11[%c0_38, %c0_39], %28 {strides = array<i32>} : memref<360x128xf32, #tpu.memory_space<vmem>>, vector<360x128xf32>,
    %c0_40 = arith.constant 0 : index
    %c0_41 = arith.constant 0 : index
    %c21 = arith.constant 21 : index
    %c0_42 = arith.constant 0 : index
    %30 = vector.load %arg2[%c0_40, %c0_41, %c21, %c0_42] : memref<1x1x408x4xbf16, #tpu.memory_space<vmem>>, vector<1x1x360x4xbf16>
    %31 = vector.shape_cast %30 : vector<1x1x360x4xbf16> to vector<360x4xbf16>
    %c4 = arith.constant 4 : index
    %c0_43 = arith.constant 0 : index
    %c0_44 = arith.constant 0 : index
    %32 = vector.load %arg4[%c4, %c0_43, %c0_44] : memref<9x4x128xbf16, #tpu.memory_space<vmem>>, vector<1x4x128xbf16>
    %33 = vector.shape_cast %32 : vector<1x4x128xbf16> to vector<4x128xbf16>
    %cst_45 = arith.constant dense<0.000000e+00> : vector<360x128xf32>
    %34 = tpu.matmul %31, %33, %cst_45 {dimension_numbers = #tpu.dot_dimension_numbers<[1], [0], [0], [1], [0, 0, 1, 1], [], []>} : vector<360x4xbf16>, vector<4x128xbf16>, vector<360x128xf32> -> vector<360x128xf32>
    %c0_46 = arith.constant 0 : index
    %c0_47 = arith.constant 0 : index
    %35 = vector.load %arg11[%c0_46, %c0_47] : memref<360x128xf32, #tpu.memory_space<vmem>>, vector<360x128xf32>
    %36 = arith.addf %35, %34 : vector<360x128xf32>
    %c0_48 = arith.constant 0 : index
    %c0_49 = arith.constant 0 : index
    %37 = vector.load %arg11[%c0_48, %c0_49] : memref<360x128xf32, #tpu.memory_space<vmem>>, vector<360x128xf32>
    tpu.vector_store %arg11[%c0_48, %c0_49], %36 {strides = array<i32>} : memref<360x128xf32, #tpu.memory_space<vmem>>, vector<360x128xf32>,
    %c0_50 = arith.constant 0 : index
    %c0_51 = arith.constant 0 : index
    %c22 = arith.constant 22 : index
    %c0_52 = arith.constant 0 : index
    %38 = vector.load %arg2[%c0_50, %c0_51, %c22, %c0_52] : memref<1x1x408x4xbf16, #tpu.memory_space<vmem>>, vector<1x1x360x4xbf16>
    %39 = vector.shape_cast %38 : vector<1x1x360x4xbf16> to vector<360x4xbf16>
    %c5 = arith.constant 5 : index
    %c0_53 = arith.constant 0 : index
    %c0_54 = arith.constant 0 : index
    %40 = vector.load %arg4[%c5, %c0_53, %c0_54] : memref<9x4x128xbf16, #tpu.memory_space<vmem>>, vector<1x4x128xbf16>
    %41 = vector.shape_cast %40 : vector<1x4x128xbf16> to vector<4x128xbf16>
    %cst_55 = arith.constant dense<0.000000e+00> : vector<360x128xf32>
    %42 = tpu.matmul %39, %41, %cst_55 {dimension_numbers = #tpu.dot_dimension_numbers<[1], [0], [0], [1], [0, 0, 1, 1], [], []>} : vector<360x4xbf16>, vector<4x128xbf16>, vector<360x128xf32> -> vector<360x128xf32>
    %c0_56 = arith.constant 0 : index
    %c0_57 = arith.constant 0 : index
    %43 = vector.load %arg11[%c0_56, %c0_57] : memref<360x128xf32, #tpu.memory_space<vmem>>, vector<360x128xf32>
    %44 = arith.addf %43, %42 : vector<360x128xf32>
    %c0_58 = arith.constant 0 : index
    %c0_59 = arith.constant 0 : index
    %45 = vector.load %arg11[%c0_58, %c0_59] : memref<360x128xf32, #tpu.memory_space<vmem>>, vector<360x128xf32>
    tpu.vector_store %arg11[%c0_58, %c0_59], %44 {strides = array<i32>} : memref<360x128xf32, #tpu.memory_space<vmem>>, vector<360x128xf32>,
    %c0_60 = arith.constant 0 : index
    %c0_61 = arith.constant 0 : index
    %c40 = arith.constant 40 : index
    %c0_62 = arith.constant 0 : index
    %46 = vector.load %arg2[%c0_60, %c0_61, %c40, %c0_62] : memref<1x1x408x4xbf16, #tpu.memory_space<vmem>>, vector<1x1x360x4xbf16>
    %47 = vector.shape_cast %46 : vector<1x1x360x4xbf16> to vector<360x4xbf16>
    %c6 = arith.constant 6 : index
    %c0_63 = arith.constant 0 : index
    %c0_64 = arith.constant 0 : index
    %48 = vector.load %arg4[%c6, %c0_63, %c0_64] : memref<9x4x128xbf16, #tpu.memory_space<vmem>>, vector<1x4x128xbf16>
    %49 = vector.shape_cast %48 : vector<1x4x128xbf16> to vector<4x128xbf16>
    %cst_65 = arith.constant dense<0.000000e+00> : vector<360x128xf32>
    %50 = tpu.matmul %47, %49, %cst_65 {dimension_numbers = #tpu.dot_dimension_numbers<[1], [0], [0], [1], [0, 0, 1, 1], [], []>} : vector<360x4xbf16>, vector<4x128xbf16>, vector<360x128xf32> -> vector<360x128xf32>
    %c0_66 = arith.constant 0 : index
    %c0_67 = arith.constant 0 : index
    %51 = vector.load %arg11[%c0_66, %c0_67] : memref<360x128xf32, #tpu.memory_space<vmem>>, vector<360x128xf32>
    %52 = arith.addf %51, %50 : vector<360x128xf32>
    %c0_68 = arith.constant 0 : index
    %c0_69 = arith.constant 0 : index
    %53 = vector.load %arg11[%c0_68, %c0_69] : memref<360x128xf32, #tpu.memory_space<vmem>>, vector<360x128xf32>
    tpu.vector_store %arg11[%c0_68, %c0_69], %52 {strides = array<i32>} : memref<360x128xf32, #tpu.memory_space<vmem>>, vector<360x128xf32>,
    %c0_70 = arith.constant 0 : index
    %c0_71 = arith.constant 0 : index
    %c41 = arith.constant 41 : index
    %c0_72 = arith.constant 0 : index
    %54 = vector.load %arg2[%c0_70, %c0_71, %c41, %c0_72] : memref<1x1x408x4xbf16, #tpu.memory_space<vmem>>, vector<1x1x360x4xbf16>
    %55 = vector.shape_cast %54 : vector<1x1x360x4xbf16> to vector<360x4xbf16>
    %c7 = arith.constant 7 : index
    %c0_73 = arith.constant 0 : index
    %c0_74 = arith.constant 0 : index
    %56 = vector.load %arg4[%c7, %c0_73, %c0_74] : memref<9x4x128xbf16, #tpu.memory_space<vmem>>, vector<1x4x128xbf16>
    %57 = vector.shape_cast %56 : vector<1x4x128xbf16> to vector<4x128xbf16>
    %cst_75 = arith.constant dense<0.000000e+00> : vector<360x128xf32>
    %58 = tpu.matmul %55, %57, %cst_75 {dimension_numbers = #tpu.dot_dimension_numbers<[1], [0], [0], [1], [0, 0, 1, 1], [], []>} : vector<360x4xbf16>, vector<4x128xbf16>, vector<360x128xf32> -> vector<360x128xf32>
    %c0_76 = arith.constant 0 : index
    %c0_77 = arith.constant 0 : index
    %59 = vector.load %arg11[%c0_76, %c0_77] : memref<360x128xf32, #tpu.memory_space<vmem>>, vector<360x128xf32>
    %60 = arith.addf %59, %58 : vector<360x128xf32>
    %c0_78 = arith.constant 0 : index
    %c0_79 = arith.constant 0 : index
    %61 = vector.load %arg11[%c0_78, %c0_79] : memref<360x128xf32, #tpu.memory_space<vmem>>, vector<360x128xf32>
    tpu.vector_store %arg11[%c0_78, %c0_79], %60 {strides = array<i32>} : memref<360x128xf32, #tpu.memory_space<vmem>>, vector<360x128xf32>,
    %c0_80 = arith.constant 0 : index
    %c0_81 = arith.constant 0 : index
    %c42 = arith.constant 42 : index
    %c0_82 = arith.constant 0 : index
    %62 = vector.load %arg2[%c0_80, %c0_81, %c42, %c0_82] : memref<1x1x408x4xbf16, #tpu.memory_space<vmem>>, vector<1x1x360x4xbf16>
    %63 = vector.shape_cast %62 : vector<1x1x360x4xbf16> to vector<360x4xbf16>
    %c8 = arith.constant 8 : index
    %c0_83 = arith.constant 0 : index
    %c0_84 = arith.constant 0 : index
    %64 = vector.load %arg4[%c8, %c0_83, %c0_84] : memref<9x4x128xbf16, #tpu.memory_space<vmem>>, vector<1x4x128xbf16>
    %65 = vector.shape_cast %64 : vector<1x4x128xbf16> to vector<4x128xbf16>
    %cst_85 = arith.constant dense<0.000000e+00> : vector<360x128xf32>
    %66 = tpu.matmul %63, %65, %cst_85 {dimension_numbers = #tpu.dot_dimension_numbers<[1], [0], [0], [1], [0, 0, 1, 1], [], []>} : vector<360x4xbf16>, vector<4x128xbf16>, vector<360x128xf32> -> vector<360x128xf32>
    %c0_86 = arith.constant 0 : index
    %c0_87 = arith.constant 0 : index
    %67 = vector.load %arg11[%c0_86, %c0_87] : memref<360x128xf32, #tpu.memory_space<vmem>>, vector<360x128xf32>
    %68 = arith.addf %67, %66 : vector<360x128xf32>
    %c0_88 = arith.constant 0 : index
    %c0_89 = arith.constant 0 : index
    %69 = vector.load %arg11[%c0_88, %c0_89] : memref<360x128xf32, #tpu.memory_space<vmem>>, vector<360x128xf32>
    tpu.vector_store %arg11[%c0_88, %c0_89], %68 {strides = array<i32>} : memref<360x128xf32, #tpu.memory_space<vmem>>, vector<360x128xf32>,
    %c0_90 = arith.constant 0 : index
    %c0_91 = arith.constant 0 : index
    %70 = vector.load %arg11[%c0_90, %c0_91] : memref<360x128xf32, #tpu.memory_space<vmem>>, vector<360x128xf32>
    %c0_92 = arith.constant 0 : index
    %c0_93 = arith.constant 0 : index
    %71 = vector.load %arg7[%c0_92, %c0_93] : memref<1x128xf32, #tpu.memory_space<vmem>>, vector<1x128xf32>
    %72 = vector.broadcast %71 : vector<1x128xf32> to vector<360x128xf32>
    %73 = arith.addf %70, %72 : vector<360x128xf32>
    %cst_94 = arith.constant 0.000000e+00 : f32
    %74 = vector.broadcast %cst_94 : f32 to vector<360x128xf32>
    %75 = arith.maximumf %73, %74 : vector<360x128xf32>
    %c0_95 = arith.constant 0 : index
    %c0_96 = arith.constant 0 : index
    %c0_97 = arith.constant 0 : index
    %76 = vector.load %arg3[%c0_95, %c0_96, %c0_97] : memref<1x360x1xf32, #tpu.memory_space<vmem>>, vector<1x360x1xf32>
    %77 = vector.shape_cast %76 : vector<1x360x1xf32> to vector<360x1xf32>
    %78 = vector.broadcast %77 : vector<360x1xf32> to vector<360x128xf32>
    %79 = arith.mulf %75, %78 : vector<360x128xf32>
    %80 = arith.truncf %79 : vector<360x128xf32> to vector<360x128xbf16>
    %c0_98 = arith.constant 0 : index
    %c0_99 = arith.constant 0 : index
    %81 = vector.load %arg12[%c0_98, %c0_99] : memref<368x128xbf16, #tpu.memory_space<vmem>>, vector<360x128xbf16>
    tpu.vector_store %arg12[%c0_98, %c0_99], %80 {strides = array<i32>} : memref<368x128xbf16, #tpu.memory_space<vmem>>, vector<360x128xbf16>,
    %cst_100 = arith.constant 0.000000e+00 : bf16
    %82 = vector.broadcast %cst_100 : bf16 to vector<8x128xbf16>
    %c360 = arith.constant 360 : index
    %c0_101 = arith.constant 0 : index
    %83 = vector.load %arg12[%c360, %c0_101] : memref<368x128xbf16, #tpu.memory_space<vmem>>, vector<8x128xbf16>
    tpu.vector_store %arg12[%c360, %c0_101], %82 {strides = array<i32>} : memref<368x128xbf16, #tpu.memory_space<vmem>>, vector<8x128xbf16>,
    %c0_102 = arith.constant 0 : index
    %c0_103 = arith.constant 0 : index
    %c42_104 = arith.constant 42 : index
    %c0_105 = arith.constant 0 : index
    %84 = vector.load %arg2[%c0_102, %c0_103, %c42_104, %c0_105] : memref<1x1x408x4xbf16, #tpu.memory_space<vmem>>, vector<1x1x320x4xbf16>
    %85 = vector.shape_cast %84 : vector<1x1x320x4xbf16> to vector<320x4xbf16>
    %c0_106 = arith.constant 0 : index
    %c0_107 = arith.constant 0 : index
    %86 = vector.load %arg6[%c0_106, %c0_107] : memref<4x128xbf16, #tpu.memory_space<vmem>>, vector<4x128xbf16>
    %cst_108 = arith.constant dense<0.000000e+00> : vector<320x128xf32>
    %87 = tpu.matmul %85, %86, %cst_108 {dimension_numbers = #tpu.dot_dimension_numbers<[1], [0], [0], [1], [0, 0, 1, 1], [], []>} : vector<320x4xbf16>, vector<4x128xbf16>, vector<320x128xf32> -> vector<320x128xf32>
    %c0_109 = arith.constant 0 : index
    %c0_110 = arith.constant 0 : index
    %88 = vector.load %arg11[%c0_109, %c0_110] : memref<360x128xf32, #tpu.memory_space<vmem>>, vector<320x128xf32>
    tpu.vector_store %arg11[%c0_109, %c0_110], %87 {strides = array<i32>} : memref<360x128xf32, #tpu.memory_space<vmem>>, vector<320x128xf32>,
    %c0_111 = arith.constant 0 : index
    %c0_112 = arith.constant 0 : index
    %89 = vector.load %arg11[%c0_111, %c0_112] : memref<360x128xf32, #tpu.memory_space<vmem>>, vector<320x128xf32>
    %c0_113 = arith.constant 0 : index
    %c0_114 = arith.constant 0 : index
    %90 = vector.load %arg12[%c0_113, %c0_114] : memref<368x128xbf16, #tpu.memory_space<vmem>>, vector<320x128xbf16>
    %c0_115 = arith.constant 0 : index
    %c0_116 = arith.constant 0 : index
    %c0_117 = arith.constant 0 : index
    %91 = vector.load %arg5[%c0_115, %c0_116, %c0_117] : memref<9x128x128xbf16, #tpu.memory_space<vmem>>, vector<1x128x128xbf16>
    %92 = vector.shape_cast %91 : vector<1x128x128xbf16> to vector<128x128xbf16>
    %cst_118 = arith.constant dense<0.000000e+00> : vector<320x128xf32>
    %93 = tpu.matmul %90, %92, %cst_118 {dimension_numbers = #tpu.dot_dimension_numbers<[1], [0], [0], [1], [0, 0, 1, 1], [], []>} : vector<320x128xbf16>, vector<128x128xbf16>, vector<320x128xf32> -> vector<320x128xf32>
    %94 = arith.addf %89, %93 : vector<320x128xf32>
    %c0_119 = arith.constant 0 : index
    %c0_120 = arith.constant 0 : index
    %95 = vector.load %arg11[%c0_119, %c0_120] : memref<360x128xf32, #tpu.memory_space<vmem>>, vector<320x128xf32>
    tpu.vector_store %arg11[%c0_119, %c0_120], %94 {strides = array<i32>} : memref<360x128xf32, #tpu.memory_space<vmem>>, vector<320x128xf32>,
    %c0_121 = arith.constant 0 : index
    %c0_122 = arith.constant 0 : index
    %96 = vector.load %arg11[%c0_121, %c0_122] : memref<360x128xf32, #tpu.memory_space<vmem>>, vector<320x128xf32>
    %c1_123 = arith.constant 1 : index
    %c0_124 = arith.constant 0 : index
    %97 = vector.load %arg12[%c1_123, %c0_124] : memref<368x128xbf16, #tpu.memory_space<vmem>>, vector<320x128xbf16>
    %c1_125 = arith.constant 1 : index
    %c0_126 = arith.constant 0 : index
    %c0_127 = arith.constant 0 : index
    %98 = vector.load %arg5[%c1_125, %c0_126, %c0_127] : memref<9x128x128xbf16, #tpu.memory_space<vmem>>, vector<1x128x128xbf16>
    %99 = vector.shape_cast %98 : vector<1x128x128xbf16> to vector<128x128xbf16>
    %cst_128 = arith.constant dense<0.000000e+00> : vector<320x128xf32>
    %100 = tpu.matmul %97, %99, %cst_128 {dimension_numbers = #tpu.dot_dimension_numbers<[1], [0], [0], [1], [0, 0, 1, 1], [], []>} : vector<320x128xbf16>, vector<128x128xbf16>, vector<320x128xf32> -> vector<320x128xf32>
    %101 = arith.addf %96, %100 : vector<320x128xf32>
    %c0_129 = arith.constant 0 : index
    %c0_130 = arith.constant 0 : index
    %102 = vector.load %arg11[%c0_129, %c0_130] : memref<360x128xf32, #tpu.memory_space<vmem>>, vector<320x128xf32>
    tpu.vector_store %arg11[%c0_129, %c0_130], %101 {strides = array<i32>} : memref<360x128xf32, #tpu.memory_space<vmem>>, vector<320x128xf32>,
    %c0_131 = arith.constant 0 : index
    %c0_132 = arith.constant 0 : index
    %103 = vector.load %arg11[%c0_131, %c0_132] : memref<360x128xf32, #tpu.memory_space<vmem>>, vector<320x128xf32>
    %c2_133 = arith.constant 2 : index
    %c0_134 = arith.constant 0 : index
    %104 = vector.load %arg12[%c2_133, %c0_134] : memref<368x128xbf16, #tpu.memory_space<vmem>>, vector<320x128xbf16>
    %c2_135 = arith.constant 2 : index
    %c0_136 = arith.constant 0 : index
    %c0_137 = arith.constant 0 : index
    %105 = vector.load %arg5[%c2_135, %c0_136, %c0_137] : memref<9x128x128xbf16, #tpu.memory_space<vmem>>, vector<1x128x128xbf16>
    %106 = vector.shape_cast %105 : vector<1x128x128xbf16> to vector<128x128xbf16>
    %cst_138 = arith.constant dense<0.000000e+00> : vector<320x128xf32>
    %107 = tpu.matmul %104, %106, %cst_138 {dimension_numbers = #tpu.dot_dimension_numbers<[1], [0], [0], [1], [0, 0, 1, 1], [], []>} : vector<320x128xbf16>, vector<128x128xbf16>, vector<320x128xf32> -> vector<320x128xf32>
    %108 = arith.addf %103, %107 : vector<320x128xf32>
    %c0_139 = arith.constant 0 : index
    %c0_140 = arith.constant 0 : index
    %109 = vector.load %arg11[%c0_139, %c0_140] : memref<360x128xf32, #tpu.memory_space<vmem>>, vector<320x128xf32>
    tpu.vector_store %arg11[%c0_139, %c0_140], %108 {strides = array<i32>} : memref<360x128xf32, #tpu.memory_space<vmem>>, vector<320x128xf32>,
    %c0_141 = arith.constant 0 : index
    %c0_142 = arith.constant 0 : index
    %110 = vector.load %arg11[%c0_141, %c0_142] : memref<360x128xf32, #tpu.memory_space<vmem>>, vector<320x128xf32>
    %c20_143 = arith.constant 20 : index
    %c0_144 = arith.constant 0 : index
    %111 = vector.load %arg12[%c20_143, %c0_144] : memref<368x128xbf16, #tpu.memory_space<vmem>>, vector<320x128xbf16>
    %c3_145 = arith.constant 3 : index
    %c0_146 = arith.constant 0 : index
    %c0_147 = arith.constant 0 : index
    %112 = vector.load %arg5[%c3_145, %c0_146, %c0_147] : memref<9x128x128xbf16, #tpu.memory_space<vmem>>, vector<1x128x128xbf16>
    %113 = vector.shape_cast %112 : vector<1x128x128xbf16> to vector<128x128xbf16>
    %cst_148 = arith.constant dense<0.000000e+00> : vector<320x128xf32>
    %114 = tpu.matmul %111, %113, %cst_148 {dimension_numbers = #tpu.dot_dimension_numbers<[1], [0], [0], [1], [0, 0, 1, 1], [], []>} : vector<320x128xbf16>, vector<128x128xbf16>, vector<320x128xf32> -> vector<320x128xf32>
    %115 = arith.addf %110, %114 : vector<320x128xf32>
    %c0_149 = arith.constant 0 : index
    %c0_150 = arith.constant 0 : index
    %116 = vector.load %arg11[%c0_149, %c0_150] : memref<360x128xf32, #tpu.memory_space<vmem>>, vector<320x128xf32>
    tpu.vector_store %arg11[%c0_149, %c0_150], %115 {strides = array<i32>} : memref<360x128xf32, #tpu.memory_space<vmem>>, vector<320x128xf32>,
    %c0_151 = arith.constant 0 : index
    %c0_152 = arith.constant 0 : index
    %117 = vector.load %arg11[%c0_151, %c0_152] : memref<360x128xf32, #tpu.memory_space<vmem>>, vector<320x128xf32>
    %c21_153 = arith.constant 21 : index
    %c0_154 = arith.constant 0 : index
    %118 = vector.load %arg12[%c21_153, %c0_154] : memref<368x128xbf16, #tpu.memory_space<vmem>>, vector<320x128xbf16>
    %c4_155 = arith.constant 4 : index
    %c0_156 = arith.constant 0 : index
    %c0_157 = arith.constant 0 : index
    %119 = vector.load %arg5[%c4_155, %c0_156, %c0_157] : memref<9x128x128xbf16, #tpu.memory_space<vmem>>, vector<1x128x128xbf16>
    %120 = vector.shape_cast %119 : vector<1x128x128xbf16> to vector<128x128xbf16>
    %cst_158 = arith.constant dense<0.000000e+00> : vector<320x128xf32>
    %121 = tpu.matmul %118, %120, %cst_158 {dimension_numbers = #tpu.dot_dimension_numbers<[1], [0], [0], [1], [0, 0, 1, 1], [], []>} : vector<320x128xbf16>, vector<128x128xbf16>, vector<320x128xf32> -> vector<320x128xf32>
    %122 = arith.addf %117, %121 : vector<320x128xf32>
    %c0_159 = arith.constant 0 : index
    %c0_160 = arith.constant 0 : index
    %123 = vector.load %arg11[%c0_159, %c0_160] : memref<360x128xf32, #tpu.memory_space<vmem>>, vector<320x128xf32>
    tpu.vector_store %arg11[%c0_159, %c0_160], %122 {strides = array<i32>} : memref<360x128xf32, #tpu.memory_space<vmem>>, vector<320x128xf32>,
    %c0_161 = arith.constant 0 : index
    %c0_162 = arith.constant 0 : index
    %124 = vector.load %arg11[%c0_161, %c0_162] : memref<360x128xf32, #tpu.memory_space<vmem>>, vector<320x128xf32>
    %c22_163 = arith.constant 22 : index
    %c0_164 = arith.constant 0 : index
    %125 = vector.load %arg12[%c22_163, %c0_164] : memref<368x128xbf16, #tpu.memory_space<vmem>>, vector<320x128xbf16>
    %c5_165 = arith.constant 5 : index
    %c0_166 = arith.constant 0 : index
    %c0_167 = arith.constant 0 : index
    %126 = vector.load %arg5[%c5_165, %c0_166, %c0_167] : memref<9x128x128xbf16, #tpu.memory_space<vmem>>, vector<1x128x128xbf16>
    %127 = vector.shape_cast %126 : vector<1x128x128xbf16> to vector<128x128xbf16>
    %cst_168 = arith.constant dense<0.000000e+00> : vector<320x128xf32>
    %128 = tpu.matmul %125, %127, %cst_168 {dimension_numbers = #tpu.dot_dimension_numbers<[1], [0], [0], [1], [0, 0, 1, 1], [], []>} : vector<320x128xbf16>, vector<128x128xbf16>, vector<320x128xf32> -> vector<320x128xf32>
    %129 = arith.addf %124, %128 : vector<320x128xf32>
    %c0_169 = arith.constant 0 : index
    %c0_170 = arith.constant 0 : index
    %130 = vector.load %arg11[%c0_169, %c0_170] : memref<360x128xf32, #tpu.memory_space<vmem>>, vector<320x128xf32>
    tpu.vector_store %arg11[%c0_169, %c0_170], %129 {strides = array<i32>} : memref<360x128xf32, #tpu.memory_space<vmem>>, vector<320x128xf32>,
    %c0_171 = arith.constant 0 : index
    %c0_172 = arith.constant 0 : index
    %131 = vector.load %arg11[%c0_171, %c0_172] : memref<360x128xf32, #tpu.memory_space<vmem>>, vector<320x128xf32>
    %c40_173 = arith.constant 40 : index
    %c0_174 = arith.constant 0 : index
    %132 = vector.load %arg12[%c40_173, %c0_174] : memref<368x128xbf16, #tpu.memory_space<vmem>>, vector<320x128xbf16>
    %c6_175 = arith.constant 6 : index
    %c0_176 = arith.constant 0 : index
    %c0_177 = arith.constant 0 : index
    %133 = vector.load %arg5[%c6_175, %c0_176, %c0_177] : memref<9x128x128xbf16, #tpu.memory_space<vmem>>, vector<1x128x128xbf16>
    %134 = vector.shape_cast %133 : vector<1x128x128xbf16> to vector<128x128xbf16>
    %cst_178 = arith.constant dense<0.000000e+00> : vector<320x128xf32>
    %135 = tpu.matmul %132, %134, %cst_178 {dimension_numbers = #tpu.dot_dimension_numbers<[1], [0], [0], [1], [0, 0, 1, 1], [], []>} : vector<320x128xbf16>, vector<128x128xbf16>, vector<320x128xf32> -> vector<320x128xf32>
    %136 = arith.addf %131, %135 : vector<320x128xf32>
    %c0_179 = arith.constant 0 : index
    %c0_180 = arith.constant 0 : index
    %137 = vector.load %arg11[%c0_179, %c0_180] : memref<360x128xf32, #tpu.memory_space<vmem>>, vector<320x128xf32>
    tpu.vector_store %arg11[%c0_179, %c0_180], %136 {strides = array<i32>} : memref<360x128xf32, #tpu.memory_space<vmem>>, vector<320x128xf32>,
    %c0_181 = arith.constant 0 : index
    %c0_182 = arith.constant 0 : index
    %138 = vector.load %arg11[%c0_181, %c0_182] : memref<360x128xf32, #tpu.memory_space<vmem>>, vector<320x128xf32>
    %c41_183 = arith.constant 41 : index
    %c0_184 = arith.constant 0 : index
    %139 = vector.load %arg12[%c41_183, %c0_184] : memref<368x128xbf16, #tpu.memory_space<vmem>>, vector<320x128xbf16>
    %c7_185 = arith.constant 7 : index
    %c0_186 = arith.constant 0 : index
    %c0_187 = arith.constant 0 : index
    %140 = vector.load %arg5[%c7_185, %c0_186, %c0_187] : memref<9x128x128xbf16, #tpu.memory_space<vmem>>, vector<1x128x128xbf16>
    %141 = vector.shape_cast %140 : vector<1x128x128xbf16> to vector<128x128xbf16>
    %cst_188 = arith.constant dense<0.000000e+00> : vector<320x128xf32>
    %142 = tpu.matmul %139, %141, %cst_188 {dimension_numbers = #tpu.dot_dimension_numbers<[1], [0], [0], [1], [0, 0, 1, 1], [], []>} : vector<320x128xbf16>, vector<128x128xbf16>, vector<320x128xf32> -> vector<320x128xf32>
    %143 = arith.addf %138, %142 : vector<320x128xf32>
    %c0_189 = arith.constant 0 : index
    %c0_190 = arith.constant 0 : index
    %144 = vector.load %arg11[%c0_189, %c0_190] : memref<360x128xf32, #tpu.memory_space<vmem>>, vector<320x128xf32>
    tpu.vector_store %arg11[%c0_189, %c0_190], %143 {strides = array<i32>} : memref<360x128xf32, #tpu.memory_space<vmem>>, vector<320x128xf32>,
    %c0_191 = arith.constant 0 : index
    %c0_192 = arith.constant 0 : index
    %145 = vector.load %arg11[%c0_191, %c0_192] : memref<360x128xf32, #tpu.memory_space<vmem>>, vector<320x128xf32>
    %c42_193 = arith.constant 42 : index
    %c0_194 = arith.constant 0 : index
    %146 = vector.load %arg12[%c42_193, %c0_194] : memref<368x128xbf16, #tpu.memory_space<vmem>>, vector<320x128xbf16>
    %c8_195 = arith.constant 8 : index
    %c0_196 = arith.constant 0 : index
    %c0_197 = arith.constant 0 : index
    %147 = vector.load %arg5[%c8_195, %c0_196, %c0_197] : memref<9x128x128xbf16, #tpu.memory_space<vmem>>, vector<1x128x128xbf16>
    %148 = vector.shape_cast %147 : vector<1x128x128xbf16> to vector<128x128xbf16>
    %cst_198 = arith.constant dense<0.000000e+00> : vector<320x128xf32>
    %149 = tpu.matmul %146, %148, %cst_198 {dimension_numbers = #tpu.dot_dimension_numbers<[1], [0], [0], [1], [0, 0, 1, 1], [], []>} : vector<320x128xbf16>, vector<128x128xbf16>, vector<320x128xf32> -> vector<320x128xf32>
    %150 = arith.addf %145, %149 : vector<320x128xf32>
    %c0_199 = arith.constant 0 : index
    %c0_200 = arith.constant 0 : index
    %151 = vector.load %arg11[%c0_199, %c0_200] : memref<360x128xf32, #tpu.memory_space<vmem>>, vector<320x128xf32>
    tpu.vector_store %arg11[%c0_199, %c0_200], %150 {strides = array<i32>} : memref<360x128xf32, #tpu.memory_space<vmem>>, vector<320x128xf32>,
    %c0_201 = arith.constant 0 : index
    %c0_202 = arith.constant 0 : index
    %152 = vector.load %arg9[%c0_201, %c0_202] : memref<64x320xf32, #tpu.memory_space<vmem>>, vector<64x320xf32>
    %c0_203 = arith.constant 0 : index
    %c0_204 = arith.constant 0 : index
    %153 = vector.load %arg11[%c0_203, %c0_204] : memref<360x128xf32, #tpu.memory_space<vmem>>, vector<320x128xf32>
    %cst_205 = arith.constant dense<0.000000e+00> : vector<64x128xf32>
    %154 = tpu.matmul %152, %153, %cst_205 {dimension_numbers = #tpu.dot_dimension_numbers<[1], [0], [0], [1], [0, 0, 1, 1], [], []>} : vector<64x320xf32>, vector<320x128xf32>, vector<64x128xf32> -> vector<64x128xf32>
    %c0_206 = arith.constant 0 : index
    %c0_207 = arith.constant 0 : index
    %155 = vector.load %arg8[%c0_206, %c0_207] : memref<1x128xf32, #tpu.memory_space<vmem>>, vector<1x128xf32>
    %156 = vector.broadcast %155 : vector<1x128xf32> to vector<64x128xf32>
    %157 = arith.addf %154, %156 : vector<64x128xf32>
    %c0_208 = arith.constant 0 : index
    %c0_209 = arith.constant 0 : index
    %c0_210 = arith.constant 0 : index
    %c0_211 = arith.constant 0 : index
    %158 = vector.load %arg10[%c0_208, %c0_209, %c0_210, %c0_211] : memref<1x1x64x128xf32, #tpu.memory_space<vmem>>, vector<1x1x64x128xf32>
    %159 = vector.shape_cast %158 : vector<1x1x64x128xf32> to vector<64x128xf32>
    %160 = vector.shape_cast %157 : vector<64x128xf32> to vector<1x1x64x128xf32>
    tpu.vector_store %arg10[%c0_208, %c0_209, %c0_210, %c0_211], %160 {strides = array<i32>} : memref<1x1x64x128xf32, #tpu.memory_space<vmem>>, vector<1x1x64x128xf32>,
    return
  }
  func.func @transform_0(%arg0: i32, %arg1: i32) -> (i32, i32, i32, i32) {
    %c0_i32 = arith.constant 0 : i32
    %c0_i32_0 = arith.constant 0 : i32
    %c0_i32_1 = arith.constant 0 : i32
    return %arg0, %arg1, %c0_i32, %c0_i32_0 : i32, i32, i32, i32
  }
  func.func @transform_1(%arg0: i32, %arg1: i32) -> (i32, i32, i32) {
    %c0_i32 = arith.constant 0 : i32
    %c0_i32_0 = arith.constant 0 : i32
    %c0_i32_1 = arith.constant 0 : i32
    return %arg1, %c0_i32, %c0_i32_0 : i32, i32, i32
  }
  func.func @transform_2(%arg0: i32, %arg1: i32) -> (i32, i32, i32) {
    %c0_i32 = arith.constant 0 : i32
    %c0_i32_0 = arith.constant 0 : i32
    %c0_i32_1 = arith.constant 0 : i32
    %c0_i32_2 = arith.constant 0 : i32
    return %c0_i32, %c0_i32_0, %c0_i32_1 : i32, i32, i32
  }
  func.func @transform_3(%arg0: i32, %arg1: i32) -> (i32, i32, i32) {
    %c0_i32 = arith.constant 0 : i32
    %c0_i32_0 = arith.constant 0 : i32
    %c0_i32_1 = arith.constant 0 : i32
    %c0_i32_2 = arith.constant 0 : i32
    return %c0_i32, %c0_i32_0, %c0_i32_1 : i32, i32, i32
  }
  func.func @transform_4(%arg0: i32, %arg1: i32) -> (i32, i32) {
    %c0_i32 = arith.constant 0 : i32
    %c0_i32_0 = arith.constant 0 : i32
    %c0_i32_1 = arith.constant 0 : i32
    return %c0_i32, %c0_i32_0 : i32, i32
  }
  func.func @transform_5(%arg0: i32, %arg1: i32) -> (i32, i32) {
    %c0_i32 = arith.constant 0 : i32
    %c0_i32_0 = arith.constant 0 : i32
    %c0_i32_1 = arith.constant 0 : i32
    return %c0_i32, %c0_i32_0 : i32, i32
  }
  func.func @transform_6(%arg0: i32, %arg1: i32) -> (i32, i32) {
    %c0_i32 = arith.constant 0 : i32
    %c0_i32_0 = arith.constant 0 : i32
    %c0_i32_1 = arith.constant 0 : i32
    return %c0_i32, %c0_i32_0 : i32, i32
  }
  func.func @transform_7(%arg0: i32, %arg1: i32) -> (i32, i32) {
    %c0_i32 = arith.constant 0 : i32
    %c0_i32_0 = arith.constant 0 : i32
    %c0_i32_1 = arith.constant 0 : i32
    return %c0_i32, %c0_i32_0 : i32, i32
  }
  func.func @transform_8(%arg0: i32, %arg1: i32) -> (i32, i32, i32, i32) {
    %c0_i32 = arith.constant 0 : i32
    %c0_i32_0 = arith.constant 0 : i32
    %c0_i32_1 = arith.constant 0 : i32
    return %arg0, %arg1, %c0_i32, %c0_i32_0 : i32, i32, i32, i32
  }
}

</mosaic_0001>

<bundles_post_ra>
// kernel: disc_optimized_resblock.1
= control target key start
LH: loop header
LB: loop body
LE: loop exit
PB: predicated region body
PF: predicated region fallthrough
CT: control target
= control target key end

     0   :  { %s17117_s27 = smov 0   ;;  %s17119_s28 = smov 0   ;;  %s20739_s0 = inlined_call_operand.vmem [shape: bf16[2,1,408,4], index: 0, kind: input, shape index: {}]   ;;  %s20740_s1 = inlined_call_operand.vmem [shape: f32[1,360,1], index: 1, kind: input, shape index: {}]   ;;  %s20741_s2 = inlined_call_operand.vmem [shape: bf16[9,4,128], index: 2, kind: input, shape index: {}]   ;;  %s20742_s3 = inlined_call_operand.vmem [shape: bf16[9,128,128], index: 3, kind: input, shape index: {}]   ;;  %s20743_s4 = inlined_call_operand.vmem [shape: bf16[4,128], index: 4, kind: input, shape index: {}]   ;;  %s20744_s5 = inlined_call_operand.vmem [shape: f32[1,128], index: 5, kind: input, shape index: {}]   ;;  %s20745_s6 = inlined_call_operand.vmem [shape: f32[1,128], index: 6, kind: input, shape index: {}]   ;;  %s20746_s7 = inlined_call_operand.vmem [shape: f32[64,320], index: 7, kind: input, shape index: {}]   ;;  %s20747_s8 = inlined_call_operand.vmem [shape: f32[2,1,64,128], index: 8, kind: output, shape index: {}]  }
   0x1   :  { %s17121_s29 = smov 0  }
   0x2 LB: > { %s30_s30 = sadd.s32 1, %s17063_s28  ;;  %p13441_p0 = scmp.ge.s32.totalorder %s17067_s29, 1  ;;  %s17067_s29 = sphi %s17121_s29, %s18_s29   ;;  %s17063_s28 = sphi %s17119_s28, %s21164_s28   ;;  %s17059_s27 = sphi %s17117_s27, %s21163_s27  }
   0x3   : > { %p32_p1 = scmp.ge.s32.totalorder %s30_s30, 2  ;;  %p292_p2 = scmp.lt.s32.totalorder %s17067_s29, 3 }
   0x5   : > { %s21166_s30 = smov (%p32_p1, %s30_s30), 0  ;;  %p293_p3 = pnand %p13441_p0, %p292_p2 }
   0x7   : > { %296 = sbr.rel (%p293_p3) target bundleno = 1889 (0x761), region = 52 }
   0xc   : > { %v408_v0 = vld [vmem:[%s20741_s2] sm:$0x3]  ;;  %vm592_vm0 = vcmask 1041408   ;;  %p339_p4 = scmp.lt.s32.totalorder %s17059_s27, 1  ;;  %v20748_v1 = vmov 0.0   ;;  %vm17070_vm1 = vmmov 0  }
   0xd   : > { %15090 = vmatprep.subr.bf16.mxu0 %v20748_v1  ;;  %v594_v2 = vsel %vm592_vm0, %v408_v0, 0  ;;  %15092 = vmatprep.mubr.msk.bf16.mxu0 %vm17070_vm1, %v20748_v1  ;;  %v13491_v3 = vld [vmem:[%s20741_s2 + $0x2] sm:$0x3]  ;;  %v13538_v5 = vld [vmem:[%s20741_s2 + $0x4] sm:$0x3]  ;;  %vm522_vm2 = vcmask 31744  }
   0xe   : > { %15091 = vmatpush3.bf16.msra.mxu0 %v594_v2  ;;  %s21168_s27 = smov (!%p339_p4, %s17059_s27), 1  ;;  %15184 = vmatprep.subr.bf16.mxu1 %v20748_v1  ;;  %v1274_v4 = vsel %vm592_vm0, %v13491_v3, 0  ;;  %v1906_v7 = vsel %vm592_vm0, %v13538_v5, 0  ;;  %vm1020_vm3 = vsmask.f32 7424  ;;  %vm1790_vm4 = vcmask 1046528  }
   0xf   : > { %15185 = vmatpush3.bf16.msra.mxu1 %v1274_v4  ;;  %15186 = vmatprep.mubr.msk.bf16.mxu1 %vm17070_vm1, %v20748_v1  ;;  %s16527_s15 = smul.u32 204, %s21168_s27  ;;  %v13585_v0 = vld [vmem:[%s20741_s2 + $0x6] sm:$0x3]  ;;  %vm2422_vm5 = vcmask 1045504   ;;  %vm3054_vm6 = vsmask.f32 5376 }
  0x10   : > { %15278 = vmatprep.subr.bf16.mxu0 %v20748_v1  ;;  %15372 = vmatprep.subr.bf16.mxu1 %v20748_v1  ;;  %vm3847_vm7 = vcmask 1044480   ;;  %vm13085_vm8 = vcmask 523264   ;;  %s14352_s22 = sshll.u32 %s21168_s27, 6 }
  0x11   : > { %s17160_s18 = scalar_lea.vmem %s20739_s0, %s16527_s15  ;;  %s20720_s25 = scalar_lea.vmem %s20747_s8, %s14352_s22 }
  0x12   : > { %v16557_v6 = vld [vmem:[%s17160_s18] sm:$0xff]   ;;  %v16559_v9 = vld [vmem:[%s17160_s18 + $0x8] sm:$0xff]   ;;  %v16561_v13 = vld [vmem:[%s17160_s18 + $0x10] sm:$0xff]  }
  0x13   : > { %15093 = vmatmul.mubr.msk.bf16.vlgmr.msra.gmra.mxu0 %vm522_vm2, %v16557_v6  ;;  %v16558_v8 = vld [vmem:[%s17160_s18] sm:$0xff]   ;;  %v1029_v12 = vshll.u32 %v16559_v9, 16  ;;  %v16560_v16 = vld [vmem:[%s17160_s18 + $0x8] sm:$0xff]   ;;  %v1033_v18 = vshrl.u32 %v16559_v9, 16  ;;  %v1037_v19 = vshll.u32 %v16561_v13, 16  ;;  %v16563_v23 = vld [vmem:[%s17160_s18 + $0x18] sm:$0xff]  }
  0x14   : > { %15096 = vmatprep.mubr.msk.bf16.mxu0 %vm17070_vm1, %v20748_v1  ;;  %15279 = vmatpush3.bf16.msra.mxu0 %v1906_v7  ;;  %v1022_v10 = vshrl.u32 %v16558_v8, 16  ;;  %v1024_v11 = vshll.u32 %v16558_v8, 16  ;;  %v16562_v24 = vld [vmem:[%s17160_s18 + $0x10] sm:$0xff]   ;;  %v1041_v26 = vshrl.u32 %v16561_v13, 16  ;;  %v1045_v27 = vshll.u32 %v16563_v23, 16  ;;  %v16565_v28 = vld [vmem:[%s17160_s18 + $0x20] sm:$0xff]  }
  0x15   : > { %15466 = vmatprep.subr.bf16.mxu0 %v20748_v1  ;;  %v1031_v15 = vrot.slane %v1029_v12, 1  ;;  %v1039_v22 = vrot.slane %v1037_v19, 1  ;;  %v16564_v31 = vld [vmem:[%s17160_s18 + $0x18] sm:$0xff]   ;;  %v1053_v32 = vshll.u32 %v16565_v28, 16  ;;  %v1049_v34 = vshrl.u32 %v16563_v23, 16  ;;  %v16567_v36 = vld [vmem:[%s17160_s18 + $0x28] sm:$0xff]  }
  0x16   : > { %v1026_v14 = vrot.slane %v1024_v11, 1  ;;  %v1047_v30 = vrot.slane %v1045_v27, 1  ;;  %v16566_v38 = vld [vmem:[%s17160_s18 + $0x20] sm:$0xff]   ;;  %v1057_v40 = vshrl.u32 %v16565_v28, 16  ;;  %v1061_v41 = vshll.u32 %v16567_v36, 16  ;;  %v16569_v44 = vld [vmem:[%s17160_s18 + $0x30] sm:$0xff]  }
  0x17   : > { %v1035_v21 = vor.u32 %v1033_v18, %v1031_v15  ;;  %v1043_v29 = vor.u32 %v1041_v26, %v1039_v22  ;;  %v1055_v35 = vrot.slane %v1053_v32, 1  ;;  %v16568_v45 = vld [vmem:[%s17160_s18 + $0x28] sm:$0xff]   ;;  %v1065_v47 = vshrl.u32 %v16567_v36, 16  ;;  %v16571_v49 = vld [vmem:[%s17160_s18 + $0x38] sm:$0xff]   ;;  %v16570_v52 = vld [vmem:[%s17160_s18 + $0x30] sm:$0xff]  }
  0x18   : > { %v1027_v17 = vor.u32 %v1026_v14, %v1022_v10  ;;  %v1051_v37 = vor.u32 %v1049_v34, %v1047_v30  ;;  %v1063_v43 = vrot.slane %v1061_v41, 1  ;;  %v1069_v48 = vshll.u32 %v16569_v44, 16  ;;  %v16573_v56 = vld [vmem:[%s17160_s18 + $0x40] sm:$0xff]   ;;  %v16572_v59 = vld [vmem:[%s17160_s18 + $0x38] sm:$0xff]   ;;  %v16575_v62 = vld [vmem:[%s17160_s18 + $0x48] sm:$0xff]  }
  0x19   : > { %v1040_v25 = vsel %vm1020_vm3, %v1035_v21, %v1039_v22  ;;  %v1048_v33 = vsel %vm1020_vm3, %v1043_v29, %v1047_v30  ;;  %v1059_v42 = vor.u32 %v1057_v40, %v1055_v35  ;;  %v1073_v53 = vshrl.u32 %v16569_v44, 16  ;;  %v16577_v5 = vld [vmem:[%s17160_s18 + $0x50] sm:$0xff]   ;;  %v16574_v7 = vld [vmem:[%s17160_s18 + $0x40] sm:$0xff]   ;;  %v16579_v12 = vld [vmem:[%s17160_s18 + $0x58] sm:$0xff]  }
  0x1a   : > { %v1032_v20 = vsel %vm1020_vm3, %v1027_v17, %v1031_v15  ;;  %v1056_v39 = vsel %vm1020_vm3, %v1051_v37, %v1055_v35  ;;  %v1067_v50 = vor.u32 %v1065_v47, %v1063_v43  ;;  %v1071_v51 = vrot.slane %v1069_v48, 1  ;;  %v16576_v14 = vld [vmem:[%s17160_s18 + $0x48] sm:$0xff]   ;;  %v16581_v19 = vld [vmem:[%s17160_s18 + $0x60] sm:$0xff]   ;;  %v16578_v21 = vld [vmem:[%s17160_s18 + $0x50] sm:$0xff]  }
  0x1b   : > { %15097 = vmatmul.mubr.msk.bf16.gmra.mxu0 %vm522_vm2, %v16560_v16  ;;  %15187 = vmatmul.mubr.msk.bf16.vlgmr.msra.gmra.mxu1 %vm522_vm2, %v1032_v20  ;;  %v1064_v46 = vsel %vm1020_vm3, %v1059_v42, %v1063_v43  ;;  %v1077_v54 = vshll.u32 %v16571_v49, 16  ;;  %v1081_v60 = vshrl.u32 %v16571_v49, 16  ;;  %v1085_v61 = vshll.u32 %v16573_v56, 16  ;;  %v16583_v26 = vld [vmem:[%s17160_s18 + $0x68] sm:$0xff]   ;;  %v16580_v28 = vld [vmem:[%s17160_s18 + $0x58] sm:$0xff]   ;;  %v16582_v35 = vld [vmem:[%s17160_s18 + $0x60] sm:$0xff]  }
  0x1c   : > { %15100 = vmatprep.mubr.msk.bf16.mxu0 %vm17070_vm1, %v20748_v1  ;;  %15190 = vmatprep.mubr.msk.bf16.mxu1 %vm17070_vm1, %v20748_v1  ;;  %v1072_v55 = vsel %vm1020_vm3, %v1067_v50, %v1071_v51  ;;  %v1075_v57 = vor.u32 %v1073_v53, %v1071_v51  ;;  %v1093_v4 = vshll.u32 %v16575_v62, 16  ;;  %v2538_v6 = vsel %vm592_vm0, %v13585_v0, 0  ;;  %v16584_v41 = vld [vmem:[%s17160_s18 + $0x68] sm:$0xff]   ;;  %v16589_v48 = vld [vmem:[%s17160_s18 + $0x80] sm:$0xff]   ;;  %v16586_v49 = vld [vmem:[%s17160_s18 + $0x70] sm:$0xff]  }
  0x1d   : > { %v1079_v58 = vrot.slane %v1077_v54, 1  ;;  %v1087_v3 = vrot.slane %v1085_v61, 1  ;;  %15373 = vmatpush3.bf16.msra.mxu1 %v2538_v6  ;;  %v1089_v8 = vshrl.u32 %v16573_v56, 16  ;;  %v1101_v11 = vshll.u32 %v16577_v5, 16  ;;  %v16591_v54 = vld [vmem:[%s17160_s18 + $0x88] sm:$0xff]   ;;  %v16588_v56 = vld [vmem:[%s17160_s18 + $0x78] sm:$0xff]  }
  0x1e   : > { %15560 = vmatprep.subr.bf16.mxu1 %v20748_v1  ;;  %v1095_v10 = vrot.slane %v1093_v4, 1  ;;  %v1097_v16 = vshrl.u32 %v16575_v62, 16  ;;  %v1109_v18 = vshll.u32 %v16579_v12, 16  ;;  %v1105_v23 = vshrl.u32 %v16577_v5, 16  ;;  %v16593_v61 = vld [vmem:[%s17160_s18 + $0x90] sm:$0xff]   ;;  %v16595_v5 = vld [vmem:[%s17160_s18 + $0x98] sm:$0xff]  }
  0x1f   : > { %v1080_v63 = vsel %vm1020_vm3, %v1075_v57, %v1079_v58  ;;  %v1083_v2 = vor.u32 %v1081_v60, %v1079_v58  ;;  %v1091_v13 = vor.u32 %v1089_v8, %v1087_v3  ;;  %v1103_v17 = vrot.slane %v1101_v11, 1 }
  0x20   : > { %v1099_v20 = vor.u32 %v1097_v16, %v1095_v10  ;;  %v1113_v30 = vshrl.u32 %v16579_v12, 16  ;;  %v1125_v32 = vshll.u32 %v16583_v26, 16  ;;  %v1121_v37 = vshrl.u32 %v16581_v19, 16  ;;  %v16597_v12 = vld [vmem:[%s17160_s18 + $0xa0] sm:$0xff]  }
  0x21   : > { %v1088_v9 = vsel %vm1020_vm3, %v1083_v2, %v1087_v3  ;;  %v1096_v15 = vsel %vm1020_vm3, %v1091_v13, %v1095_v10  ;;  %v1107_v27 = vor.u32 %v1105_v23, %v1103_v17  ;;  %v1129_v43 = vshrl.u32 %v16583_v26, 16  ;;  %v16601_v26 = vld [vmem:[%s17160_s18 + $0xb0] sm:$0x1f]  }
  0x22   : > { %v1104_v22 = vsel %vm1020_vm3, %v1099_v20, %v1103_v17  ;;  %v1149_v53 = vshll.u32 %v16589_v48, 16  ;;  %v1157_v60 = vshll.u32 %v16591_v54, 16  ;;  %v1153_v2 = vshrl.u32 %v16589_v48, 16  ;;  %v16607_v48 = vld [vmem:[%s17160_s18 + $0x10] sm:$0xff]  }
  0x23   : > { %15101 = vmatmul.mubr.msk.bf16.gmra.mxu0 %vm522_vm2, %v16562_v24  ;;  %15191 = vmatmul.mubr.msk.bf16.gmra.mxu1 %vm522_vm2, %v1040_v25  ;;  %v1111_v24 = vrot.slane %v1109_v18, 1  ;;  %v1117_v25 = vshll.u32 %v16581_v19, 16  ;;  %v1165_v4 = vshll.u32 %v16593_v61, 16  ;;  %v1173_v11 = vshll.u32 %v16595_v5, 16  ;;  %v16599_v19 = vld [vmem:[%s17160_s18 + $0xa8] sm:$0xff]  }
  0x24   : > { %15104 = vmatprep.mubr.msk.bf16.mxu0 %vm17070_vm1, %v20748_v1  ;;  %15194 = vmatprep.mubr.msk.bf16.mxu1 %vm17070_vm1, %v20748_v1  ;;  %v1159_v3 = vrot.slane %v1157_v60, 1  ;;  %v1169_v16 = vshrl.u32 %v16593_v61, 16  ;;  %v1181_v18 = vshll.u32 %v16597_v12, 16  ;;  %v1177_v23 = vshrl.u32 %v16595_v5, 16 }
  0x25   : > { %v1112_v29 = vsel %vm1020_vm3, %v1107_v27, %v1111_v24  ;;  %v1115_v34 = vor.u32 %v1113_v30, %v1111_v24  ;;  %v1167_v10 = vrot.slane %v1165_v4, 1  ;;  %v1175_v17 = vrot.slane %v1173_v11, 1  ;;  %v16612_v11 = vld [vmem:[%s17160_s18 + $0x28] sm:$0xff]  }
  0x26   : > { %v1183_v24 = vrot.slane %v1181_v18, 1  ;;  %v1185_v30 = vshrl.u32 %v16597_v12, 16  ;;  %v16613_v12 = vld [vmem:[%s17160_s18 + $0x28] sm:$0xff]  }
  0x27   : > { %v1171_v20 = vor.u32 %v1169_v16, %v1167_v10  ;;  %v1179_v27 = vor.u32 %v1177_v23, %v1175_v17  ;;  %v2430_v23 = vrot.slane %v16612_v11, 2 }
  0x2b   : > { %15105 = vmatmul.mubr.msk.bf16.gmra.mxu0 %vm522_vm2, %v16564_v31  ;;  %15195 = vmatmul.mubr.msk.bf16.gmra.mxu1 %vm522_vm2, %v1048_v33  ;;  %v1119_v31 = vrot.slane %v1117_v25, 1  ;;  %v16585_v33 = vld [vmem:[%s17160_s18 + $0x70] sm:$0xff]   ;;  %v1189_v25 = vshll.u32 %v16599_v19, 16 }
  0x2c   : > { %15108 = vmatprep.mubr.msk.bf16.mxu0 %vm17070_vm1, %v20748_v1  ;;  %15198 = vmatprep.mubr.msk.bf16.mxu1 %vm17070_vm1, %v20748_v1  ;;  %v1137_v51 = vshrl.u32 %v16585_v33, 16 }
  0x2d   : > { %v1120_v36 = vsel %vm1020_vm3, %v1115_v34, %v1119_v31  ;;  %v1123_v40 = vor.u32 %v1121_v37, %v1119_v31  ;;  %v1191_v31 = vrot.slane %v1189_v25, 1  ;;  %v16600_v34 = vld [vmem:[%s17160_s18 + $0xa8] sm:$0xff]  }
  0x33   : > { %15109 = vmatmul.mubr.msk.bf16.gmra.mxu0 %vm522_vm2, %v16566_v38  ;;  %15199 = vmatmul.mubr.msk.bf16.gmra.mxu1 %vm522_vm2, %v1056_v39  ;;  %v1127_v38 = vrot.slane %v1125_v32, 1  ;;  %v1133_v39 = vshll.u32 %v16585_v33, 16  ;;  %v1197_v32 = vshll.u32 %v16601_v26, 16  ;;  %v1187_v33 = vor.u32 %v1185_v30, %v1183_v24 }
  0x34   : > { %15112 = vmatprep.mubr.msk.bf16.mxu0 %vm17070_vm1, %v20748_v1  ;;  %15202 = vmatprep.mubr.msk.bf16.mxu1 %vm17070_vm1, %v20748_v1 }
  0x35   : > { %v1128_v42 = vsel %vm1020_vm3, %v1123_v40, %v1127_v38  ;;  %v1135_v44 = vrot.slane %v1133_v39, 1  ;;  %v1199_v37 = vrot.slane %v1197_v32, 1  ;;  %v16604_v39 = vld [vmem:[%s17160_s18 + $0x8] sm:$0xff]  }
  0x3b   : > { %15113 = vmatmul.mubr.msk.bf16.gmra.mxu0 %vm522_vm2, %v16568_v45  ;;  %15203 = vmatmul.mubr.msk.bf16.gmra.mxu1 %vm522_vm2, %v1064_v46  ;;  %v16587_v45 = vld [vmem:[%s17160_s18 + $0x78] sm:$0xff]   ;;  %v1131_v46 = vor.u32 %v1129_v43, %v1127_v38  ;;  %v16603_v38 = vld [vmem:[%s17160_s18] sm:$0xfe]   ;;  %v1201_v43 = vshrl.u32 %v16601_v26, 16 }
  0x3c   : > { %15116 = vmatprep.mubr.msk.bf16.mxu0 %vm17070_vm1, %v20748_v1  ;;  %15206 = vmatprep.mubr.msk.bf16.mxu1 %vm17070_vm1, %v20748_v1  ;;  %v1141_v47 = vshll.u32 %v16587_v45, 16  ;;  %v1145_v58 = vshrl.u32 %v16587_v45, 16  ;;  %v1792_v45 = vrot.slane %v16604_v39, 1 }
  0x3d   : > { %v1136_v50 = vsel %vm1020_vm3, %v1131_v46, %v1135_v44  ;;  %v16605_v46 = vld [vmem:[%s17160_s18 + $0x8] sm:$0xfc]  }
  0x43   : > { %15117 = vmatmul.mubr.msk.bf16.gmra.mxu0 %vm522_vm2, %v16570_v52  ;;  %15207 = vmatmul.mubr.msk.bf16.gmra.mxu1 %vm522_vm2, %v1072_v55  ;;  %v1143_v52 = vrot.slane %v1141_v47, 1  ;;  %v1139_v55 = vor.u32 %v1137_v51, %v1135_v44  ;;  %v1791_v44 = vrot.slane %v16603_v38, 1  ;;  %v16606_v47 = vld [vmem:[%s17160_s18 + $0x10] sm:$0xff]  }
  0x44   : > { %15120 = vmatprep.mubr.msk.bf16.mxu0 %vm17070_vm1, %v20748_v1  ;;  %15210 = vmatprep.mubr.msk.bf16.mxu1 %vm17070_vm1, %v20748_v1 }
  0x45   : > { %v1144_v57 = vsel %vm1020_vm3, %v1139_v55, %v1143_v52  ;;  %v1147_v62 = vor.u32 %v1145_v58, %v1143_v52  ;;  %v1793_v51 = vsel %vm1790_vm4, %v1791_v44, %v1792_v45  ;;  %v2423_v52 = vrot.slane %v16605_v46, 2  ;;  %v16617_v44 = vld [vmem:[%s17160_s18 + $0x38] sm:$0xff]  }
  0x4b   : > { %15121 = vmatmul.mubr.msk.bf16.gmra.mxu0 %vm522_vm2, %v16572_v59  ;;  %15211 = vmatmul.mubr.msk.bf16.gmra.mxu1 %vm522_vm2, %v1080_v63  ;;  %v1151_v59 = vrot.slane %v1149_v53, 1  ;;  %v16590_v63 = vld [vmem:[%s17160_s18 + $0x80] sm:$0xff]   ;;  %v2424_v53 = vrot.slane %v16606_v47, 2 }
  0x4c   : > { %15124 = vmatprep.mubr.msk.bf16.mxu0 %vm17070_vm1, %v20748_v1  ;;  %15214 = vmatprep.mubr.msk.bf16.mxu1 %vm17070_vm1, %v20748_v1 }
  0x4d   : > { %v1152_v0 = vsel %vm1020_vm3, %v1147_v62, %v1151_v59  ;;  %v1155_v6 = vor.u32 %v1153_v2, %v1151_v59  ;;  %v2425_v59 = vsel %vm2422_vm5, %v2423_v52, %v2424_v53 }
  0x4f   : > { %v1160_v8 = vsel %vm1020_vm3, %v1155_v6, %v1159_v3 }
  0x53   : > { %15125 = vmatmul.mubr.msk.bf16.gmra.mxu0 %vm522_vm2, %v16574_v7  ;;  %15215 = vmatmul.mubr.msk.bf16.gmra.mxu1 %vm522_vm2, %v1088_v9  ;;  %v16592_v7 = vld [vmem:[%s17160_s18 + $0x88] sm:$0xff]   ;;  %v1161_v9 = vshrl.u32 %v16591_v54, 16  ;;  %v1794_v54 = vrot.slane %v16607_v48, 1 }
  0x54   : > { %15128 = vmatprep.mubr.msk.bf16.mxu0 %vm17070_vm1, %v20748_v1  ;;  %15218 = vmatprep.mubr.msk.bf16.mxu1 %vm17070_vm1, %v20748_v1 }
  0x55   : > { %v1163_v13 = vor.u32 %v1161_v9, %v1159_v3  ;;  %v1795_v58 = vsel %vm1790_vm4, %v1792_v45, %v1794_v54 }
  0x5b   : > { %15129 = vmatmul.mubr.msk.bf16.gmra.mxu0 %vm522_vm2, %v16576_v14  ;;  %15219 = vmatmul.mubr.msk.bf16.gmra.mxu1 %vm522_vm2, %v1096_v15  ;;  %v16594_v14 = vld [vmem:[%s17160_s18 + $0x90] sm:$0xff]   ;;  %v1168_v15 = vsel %vm1020_vm3, %v1163_v13, %v1167_v10 }
  0x5c   : > { %15132 = vmatprep.mubr.msk.bf16.mxu0 %vm17070_vm1, %v20748_v1  ;;  %15222 = vmatprep.mubr.msk.bf16.mxu1 %vm17070_vm1, %v20748_v1 }
  0x63   : > { %15133 = vmatmul.mubr.msk.bf16.gmra.mxu0 %vm522_vm2, %v16578_v21  ;;  %15223 = vmatmul.mubr.msk.bf16.gmra.mxu1 %vm522_vm2, %v1104_v22  ;;  %v16596_v21 = vld [vmem:[%s17160_s18 + $0x98] sm:$0xff]   ;;  %v1176_v22 = vsel %vm1020_vm3, %v1171_v20, %v1175_v17 }
  0x64   : > { %15136 = vmatprep.mubr.msk.bf16.mxu0 %vm17070_vm1, %v20748_v1  ;;  %15226 = vmatprep.mubr.msk.bf16.mxu1 %vm17070_vm1, %v20748_v1 }
  0x6b   : > { %15137 = vmatmul.mubr.msk.bf16.gmra.mxu0 %vm522_vm2, %v16580_v28  ;;  %15227 = vmatmul.mubr.msk.bf16.gmra.mxu1 %vm522_vm2, %v1112_v29  ;;  %v16598_v28 = vld [vmem:[%s17160_s18 + $0xa0] sm:$0xff]   ;;  %v1184_v29 = vsel %vm1020_vm3, %v1179_v27, %v1183_v24  ;;  %v1800_v24 = vrot.slane %v16613_v12, 1  ;;  %v16614_v27 = vld [vmem:[%s17160_s18 + $0x30] sm:$0xff]  }
  0x6c   : > { %15140 = vmatprep.mubr.msk.bf16.mxu0 %vm17070_vm1, %v20748_v1  ;;  %15230 = vmatprep.mubr.msk.bf16.mxu1 %vm17070_vm1, %v20748_v1  ;;  %v2432_v39 = vrot.slane %v16614_v27, 2 }
  0x73   : > { %15141 = vmatmul.mubr.msk.bf16.gmra.mxu0 %vm522_vm2, %v16582_v35  ;;  %15231 = vmatmul.mubr.msk.bf16.gmra.mxu1 %vm522_vm2, %v1120_v36  ;;  %v1192_v35 = vsel %vm1020_vm3, %v1187_v33, %v1191_v31  ;;  %v1193_v36 = vshrl.u32 %v16599_v19, 16 }
  0x74   : > { %15144 = vmatprep.mubr.msk.bf16.mxu0 %vm17070_vm1, %v20748_v1  ;;  %15234 = vmatprep.mubr.msk.bf16.mxu1 %vm17070_vm1, %v20748_v1 }
  0x75   : > { %v1195_v40 = vor.u32 %v1193_v36, %v1191_v31 }
  0x7b   : > { %15145 = vmatmul.mubr.msk.bf16.gmra.mxu0 %vm522_vm2, %v16584_v41  ;;  %15235 = vmatmul.mubr.msk.bf16.gmra.mxu1 %vm522_vm2, %v1128_v42  ;;  %v16602_v41 = vld [vmem:[%s17160_s18 + $0xb0] ss:$0 sps:$4 sm:$0xff]   ;;  %v1200_v42 = vsel %vm1020_vm3, %v1195_v40, %v1199_v37 }
  0x7c   : > { %15148 = vmatprep.mubr.msk.bf16.mxu0 %vm17070_vm1, %v20748_v1  ;;  %15238 = vmatprep.mubr.msk.bf16.mxu1 %vm17070_vm1, %v20748_v1 }
  0x83   : > { %15149 = vmatmul.mubr.msk.bf16.gmra.mxu0 %vm522_vm2, %v16586_v49  ;;  %15239 = vmatmul.mubr.msk.bf16.gmra.mxu1 %vm522_vm2, %v1136_v50  ;;  %v13632_v49 = vld [vmem:[%s20741_s2 + $0x8] sm:$0x3]  ;;  %v1203_v50 = vor.u32 %v1201_v43, %v1199_v37  ;;  %v16616_v43 = vld [vmem:[%s17160_s18 + $0x38] sm:$0xff]  }
  0x84   : > { %15152 = vmatprep.mubr.msk.bf16.mxu0 %vm17070_vm1, %v20748_v1  ;;  %15242 = vmatprep.mubr.msk.bf16.mxu1 %vm17070_vm1, %v20748_v1  ;;  %v3331_v55 = vsel %vm592_vm0, %v13632_v49, 0 }
  0x8b   : > { %15153 = vmatmul.mubr.msk.bf16.gmra.mxu0 %vm522_vm2, %v16588_v56  ;;  %15243 = vmatmul.mubr.msk.bf16.gmra.mxu1 %vm522_vm2, %v1144_v57  ;;  %v16608_v56 = vld [vmem:[%s17160_s18 + $0x18] sm:$0xff]  }
  0x8c   : > { %15156 = vmatprep.mubr.msk.bf16.mxu0 %vm17070_vm1, %v20748_v1  ;;  %15246 = vmatprep.mubr.msk.bf16.mxu1 %vm17070_vm1, %v20748_v1  ;;  %v16609_v57 = vld [vmem:[%s17160_s18 + $0x18] sm:$0xff]   ;;  %v2426_v60 = vrot.slane %v16608_v56, 2  ;;  %v1804_v56 = vrot.slane %v16617_v44, 1 }
  0x8d   : > { %v1796_v61 = vrot.slane %v16609_v57, 1 }
  0x8e   : > { %v2427_v6 = vsel %vm2422_vm5, %v2424_v53, %v2426_v60  ;;  %v2433_v53 = vsel %vm2422_vm5, %v2430_v23, %v2432_v39 }
  0x8f   : > { %v1797_v4 = vsel %vm1790_vm4, %v1794_v54, %v1796_v61 }
  0x93   : > { %15157 = vmatmul.mubr.msk.bf16.gmra.mxu0 %vm522_vm2, %v16590_v63  ;;  %15247 = vmatmul.mubr.msk.bf16.gmra.mxu1 %vm522_vm2, %v1152_v0  ;;  %v16610_v63 = vld [vmem:[%s17160_s18 + $0x20] sm:$0xff]  }
  0x94   : > { %15160 = vmatprep.mubr.msk.bf16.mxu0 %vm17070_vm1, %v20748_v1  ;;  %15250 = vmatprep.mubr.msk.bf16.mxu1 %vm17070_vm1, %v20748_v1  ;;  %v16611_v0 = vld [vmem:[%s17160_s18 + $0x20] sm:$0xff]  }
  0x9b   : > { %15161 = vmatmul.mubr.msk.bf16.gmra.mxu0 %vm522_vm2, %v16592_v7  ;;  %15251 = vmatmul.mubr.msk.bf16.gmra.mxu1 %vm522_vm2, %v1160_v8  ;;  %v2428_v7 = vrot.slane %v16610_v63, 2  ;;  %v1798_v8 = vrot.slane %v16611_v0, 1  ;;  %v16619_v0 = vld [vmem:[%s17160_s18 + $0x40] sm:$0xff]  }
  0x9c   : > { %15164 = vmatprep.mubr.msk.bf16.mxu0 %vm17070_vm1, %v20748_v1  ;;  %15254 = vmatprep.mubr.msk.bf16.mxu1 %vm17070_vm1, %v20748_v1  ;;  %v1806_v11 = vrot.slane %v16619_v0, 1 }
  0x9d   : > { %v1799_v18 = vsel %vm1790_vm4, %v1796_v61, %v1798_v8  ;;  %v2431_v37 = vsel %vm2422_vm5, %v2428_v7, %v2430_v23 }
  0xa3   : > { %15165 = vmatmul.mubr.msk.bf16.gmra.mxu0 %vm522_vm2, %v16594_v14  ;;  %15255 = vmatmul.mubr.msk.bf16.gmra.mxu1 %vm522_vm2, %v1168_v15 }
  0xa4   : > { %15168 = vmatprep.mubr.msk.bf16.mxu0 %vm17070_vm1, %v20748_v1  ;;  %15258 = vmatprep.mubr.msk.bf16.mxu1 %vm17070_vm1, %v20748_v1 }
  0xab   : > { %15169 = vmatmul.mubr.msk.bf16.gmra.mxu0 %vm522_vm2, %v16596_v21  ;;  %15259 = vmatmul.mubr.msk.bf16.gmra.mxu1 %vm522_vm2, %v1176_v22  ;;  %v2429_v21 = vsel %vm2422_vm5, %v2426_v60, %v2428_v7 }
  0xac   : > { %15172 = vmatprep.mubr.msk.bf16.mxu0 %vm17070_vm1, %v20748_v1  ;;  %15262 = vmatprep.mubr.msk.bf16.mxu1 %vm17070_vm1, %v20748_v1 }
  0xb3   : > { %15173 = vmatmul.mubr.msk.bf16.gmra.mxu0 %vm522_vm2, %v16598_v28  ;;  %15263 = vmatmul.mubr.msk.bf16.gmra.mxu1 %vm522_vm2, %v1184_v29  ;;  %v16615_v28 = vld [vmem:[%s17160_s18 + $0x30] sm:$0xff]  }
  0xb4   : > { %15176 = vmatprep.mubr.msk.bf16.mxu0 %vm17070_vm1, %v20748_v1  ;;  %15266 = vmatprep.mubr.msk.bf16.mxu1 %vm17070_vm1, %v20748_v1  ;;  %v1802_v40 = vrot.slane %v16615_v28, 1 }
  0xbb   : > { %15177 = vmatmul.mubr.msk.bf16.gmra.mxu0 %vm522_vm2, %v16600_v34  ;;  %15267 = vmatmul.mubr.msk.bf16.gmra.mxu1 %vm522_vm2, %v1192_v35  ;;  %v1801_v34 = vsel %vm1790_vm4, %v1798_v8, %v1800_v24 }
  0xbc   : > { %15180 = vmatprep.mubr.msk.bf16.mxu0 %vm17070_vm1, %v20748_v1  ;;  %15270 = vmatprep.mubr.msk.bf16.mxu1 %vm17070_vm1, %v20748_v1 }
  0xc3   : > { %15181 = vmatmul.mubr.msk.bf16.gmra.mxu0 %vm522_vm2, %v16602_v41  ;;  %15271 = vmatmul.mubr.msk.bf16.gmra.mxu1 %vm522_vm2, %v1200_v42 }
  0xc4   : > { %15280 = vmatprep.mubr.msk.bf16.mxu0 %vm17070_vm1, %v20748_v1  ;;  %15274 = vmatprep.mubr.msk.bf16.mxu1 %vm17070_vm1, %v20748_v1 }
  0xcb   : > { %15281 = vmatmul.mubr.msk.bf16.vlgmr.msra.gmra.mxu0 %vm522_vm2, %v1793_v51  ;;  %15275 = vmatmul.mubr.msk.bf16.gmra.mxu1 %vm522_vm2, %v1203_v50  ;;  %v1803_v50 = vsel %vm1790_vm4, %v1800_v24, %v1802_v40 }
  0xcc   : > { %15284 = vmatprep.mubr.msk.bf16.mxu0 %vm17070_vm1, %v20748_v1  ;;  %15374 = vmatprep.mubr.msk.bf16.mxu1 %vm17070_vm1, %v20748_v1 }
  0xcd   : > { %15467 = vmatpush3.bf16.msra.mxu0 %v3331_v55  ;;  %v2434_v55 = vrot.slane %v16616_v43, 2 }
  0xce   : > { %15654 = vmatprep.subr.bf16.mxu0 %v20748_v1 }
  0xd3   : > { %v630_v62 = vpop.f32.mrf.mxu0  ;;  %15285 = vmatmul.mubr.msk.bf16.gmra.mxu0 %vm522_vm2, %v1795_v58  ;;  %15375 = vmatmul.mubr.msk.bf16.vlgmr.msra.gmra.mxu1 %vm522_vm2, %v2425_v59 }
  0xd4   : > { %15288 = vmatprep.mubr.msk.bf16.mxu0 %vm17070_vm1, %v20748_v1  ;;  %15378 = vmatprep.mubr.msk.bf16.mxu1 %vm17070_vm1, %v20748_v1 }
  0xd5   : > { %v15094_v2 = vpop.f32.mrf.mxu0 }
  0xd7   : > { %v633_v3 = vpop.f32.mrf.mxu0 }
  0xd9   : > { %v15095_v5 = vpop.f32.mrf.mxu0 }
  0xdb   : > { %v638_v9 = vpop.f32.mrf.mxu0  ;;  %15289 = vmatmul.mubr.msk.bf16.gmra.mxu0 %vm522_vm2, %v1797_v4  ;;  %v1310_v10 = vpop.f32.mrf.mxu1  ;;  %15379 = vmatmul.mubr.msk.bf16.gmra.mxu1 %vm522_vm2, %v2427_v6  ;;  %v2435_v6 = vsel %vm2422_vm5, %v2432_v39, %v2434_v55  ;;  %v16622_v39 = vld [vmem:[%s17160_s18 + $0x50] sm:$0xff]  }
  0xdc   : > { %15292 = vmatprep.mubr.msk.bf16.mxu0 %vm17070_vm1, %v20748_v1  ;;  %v17409_v13 = vadd.f32 %v1310_v10, %v630_v62  ;;  %15382 = vmatprep.mubr.msk.bf16.mxu1 %vm17070_vm1, %v20748_v1  ;;  %v16618_v62 = vld [vmem:[%s17160_s18 + $0x40] sm:$0xff]  }
  0xdd   : > { %v15098_v14 = vpop.f32.mrf.mxu0  ;;  %v15188_v15 = vpop.f32.mrf.mxu1  ;;  %v2436_v10 = vrot.slane %v16618_v62, 2 }
  0xdf   : > { %v641_v16 = vpop.f32.mrf.mxu0  ;;  %v1313_v17 = vpop.f32.mrf.mxu1  ;;  %v2437_v24 = vsel %vm2422_vm5, %v2434_v55, %v2436_v10 }
  0xe0   : > { %v17414_v19 = vadd.f32 %v1313_v17, %v633_v3  ;;  %v1805_v3 = vsel %vm1790_vm4, %v1802_v40, %v1804_v56  ;;  %v16623_v40 = vld [vmem:[%s17160_s18 + $0x50] sm:$0xff]  }
  0xe1   : > { %v15099_v20 = vpop.f32.mrf.mxu0  ;;  %v15189_v22 = vpop.f32.mrf.mxu1 }
  0xe2   : > { %v16620_v20 = vld [vmem:[%s17160_s18 + $0x48] sm:$0xff]  }
  0xe3   : > { %v646_v25 = vpop.f32.mrf.mxu0  ;;  %15293 = vmatmul.mubr.msk.bf16.gmra.mxu0 %vm522_vm2, %v1799_v18  ;;  %v1318_v26 = vpop.f32.mrf.mxu1  ;;  %15383 = vmatmul.mubr.msk.bf16.gmra.mxu1 %vm522_vm2, %v2429_v21  ;;  %v1807_v18 = vsel %vm1790_vm4, %v1804_v56, %v1806_v11  ;;  %v16621_v21 = vld [vmem:[%s17160_s18 + $0x48] sm:$0xff]   ;;  %v2438_v28 = vrot.slane %v16620_v20, 2  ;;  %v16626_v20 = vld [vmem:[%s17160_s18 + $0x60] sm:$0xff]  }
  0xe4   : > { %15296 = vmatprep.mubr.msk.bf16.mxu0 %vm17070_vm1, %v20748_v1  ;;  %v17423_v29 = vadd.f32 %v1318_v26, %v638_v9  ;;  %15386 = vmatprep.mubr.msk.bf16.mxu1 %vm17070_vm1, %v20748_v1 }
  0xe5   : > { %v15102_v30 = vpop.f32.mrf.mxu0  ;;  %v15192_v31 = vpop.f32.mrf.mxu1  ;;  %v2439_v44 = vsel %vm2422_vm5, %v2436_v10, %v2438_v28 }
  0xe6   : > { %v1808_v30 = vrot.slane %v16621_v21, 1 }
  0xe7   : > { %v649_v32 = vpop.f32.mrf.mxu0  ;;  %v1321_v33 = vpop.f32.mrf.mxu1 }
  0xe8   : > { %v17428_v35 = vadd.f32 %v1321_v33, %v641_v16 }
  0xe9   : > { %v15103_v36 = vpop.f32.mrf.mxu0  ;;  %v15193_v38 = vpop.f32.mrf.mxu1 }
  0xea   : > { %v13679_v36 = vld [vmem:[%s20741_s2 + $0xa] sm:$0x3]  ;;  %v1809_v38 = vsel %vm1790_vm4, %v1806_v11, %v1808_v30 }
  0xeb   : > { %v654_v41 = vpop.f32.mrf.mxu0  ;;  %15297 = vmatmul.mubr.msk.bf16.gmra.mxu0 %vm522_vm2, %v1801_v34  ;;  %v1326_v42 = vpop.f32.mrf.mxu1  ;;  %15387 = vmatmul.mubr.msk.bf16.gmra.mxu1 %vm522_vm2, %v2431_v37 }
  0xec   : > { %15300 = vmatprep.mubr.msk.bf16.mxu0 %vm17070_vm1, %v20748_v1  ;;  %v17437_v45 = vadd.f32 %v1326_v42, %v646_v25  ;;  %15390 = vmatprep.mubr.msk.bf16.mxu1 %vm17070_vm1, %v20748_v1 }
  0xed   : > { %v15106_v46 = vpop.f32.mrf.mxu0  ;;  %v15196_v47 = vpop.f32.mrf.mxu1 }
  0xef   : > { %v657_v48 = vpop.f32.mrf.mxu0  ;;  %v1329_v49 = vpop.f32.mrf.mxu1 }
  0xf0   : > { %v17442_v51 = vadd.f32 %v1329_v49, %v649_v32  ;;  %v2440_v49 = vrot.slane %v16622_v39, 2 }
  0xf1   : > { %v15107_v52 = vpop.f32.mrf.mxu0  ;;  %v15197_v54 = vpop.f32.mrf.mxu1 }
  0xf2   : > { %v2441_v62 = vsel %vm2422_vm5, %v2438_v28, %v2440_v49  ;;  %v2444_v28 = vrot.slane %v16626_v20, 2 }
  0xf3   : > { %v662_v57 = vpop.f32.mrf.mxu0  ;;  %15301 = vmatmul.mubr.msk.bf16.gmra.mxu0 %vm522_vm2, %v1803_v50  ;;  %v1334_v58 = vpop.f32.mrf.mxu1  ;;  %15391 = vmatmul.mubr.msk.bf16.gmra.mxu1 %vm522_vm2, %v2433_v53  ;;  %v1810_v50 = vrot.slane %v16623_v40, 1  ;;  %v16628_v40 = vld [vmem:[%s17160_s18 + $0x68] sm:$0xff]  }
  0xf4   : > { %15304 = vmatprep.mubr.msk.bf16.mxu0 %vm17070_vm1, %v20748_v1  ;;  %v17449_v59 = vadd.f32 %v1334_v58, %v654_v41  ;;  %15394 = vmatprep.mubr.msk.bf16.mxu1 %vm17070_vm1, %v20748_v1  ;;  %v3963_v41 = vsel %vm592_vm0, %v13679_v36, 0  ;;  %v16625_v58 = vld [vmem:[%s17160_s18 + $0x58] sm:$0xff]   ;;  %v16629_v36 = vld [vmem:[%s17160_s18 + $0x68] sm:$0xff]  }
  0xf5   : > { %v15110_v60 = vpop.f32.mrf.mxu0  ;;  %v15200_v61 = vpop.f32.mrf.mxu1  ;;  %15561 = vmatpush3.bf16.msra.mxu1 %v3963_v41 }
  0xf6   : > { %15748 = vmatprep.subr.bf16.mxu1 %v20748_v1 }
  0xf7   : > { %v665_v63 = vpop.f32.mrf.mxu0  ;;  %v1337_v2 = vpop.f32.mrf.mxu1 }
  0xf8   : > { %v17456_v4 = vadd.f32 %v1337_v2, %v657_v48 }
  0xf9   : > { %v15111_v5 = vpop.f32.mrf.mxu0  ;;  %v15201_v7 = vpop.f32.mrf.mxu1 }
  0xfa   : > { %v1812_v5 = vrot.slane %v16625_v58, 1 }
  0xfb   : > { %v670_v8 = vpop.f32.mrf.mxu0  ;;  %15305 = vmatmul.mubr.msk.bf16.gmra.mxu0 %vm522_vm2, %v1805_v3  ;;  %v1342_v9 = vpop.f32.mrf.mxu1  ;;  %15395 = vmatmul.mubr.msk.bf16.gmra.mxu1 %vm522_vm2, %v2435_v6 }
  0xfc   : > { %15308 = vmatprep.mubr.msk.bf16.mxu0 %vm17070_vm1, %v20748_v1  ;;  %v17463_v12 = vadd.f32 %v1342_v9, %v662_v57  ;;  %15398 = vmatprep.mubr.msk.bf16.mxu1 %vm17070_vm1, %v20748_v1  ;;  %v1811_v57 = vsel %vm1790_vm4, %v1808_v30, %v1810_v50 }
  0xfd   : > { %v15114_v14 = vpop.f32.mrf.mxu0  ;;  %v15204_v15 = vpop.f32.mrf.mxu1 }
  0xfe   : > { %v1813_v14 = vsel %vm1790_vm4, %v1810_v50, %v1812_v5  ;;  %v16627_v15 = vld [vmem:[%s17160_s18 + $0x60] sm:$0xff]  }
  0xff   : > { %v673_v16 = vpop.f32.mrf.mxu0  ;;  %v1345_v17 = vpop.f32.mrf.mxu1 }
 0x100   : > { %v17470_v22 = vadd.f32 %v1345_v17, %v665_v63  ;;  %v16624_v63 = vld [vmem:[%s17160_s18 + $0x58] sm:$0xff]  }
 0x101   : > { %v15115_v23 = vpop.f32.mrf.mxu0  ;;  %v15205_v25 = vpop.f32.mrf.mxu1 }
 0x102   : > { %v1814_v25 = vrot.slane %v16627_v15, 1  ;;  %v16633_v15 = vld [vmem:[%s17160_s18 + $0x78] sm:$0xff]  }
 0x103   : > { %v678_v26 = vpop.f32.mrf.mxu0  ;;  %15309 = vmatmul.mubr.msk.bf16.gmra.mxu0 %vm522_vm2, %v1807_v18  ;;  %v1350_v27 = vpop.f32.mrf.mxu1  ;;  %15399 = vmatmul.mubr.msk.bf16.gmra.mxu1 %vm522_vm2, %v2437_v24 }
 0x104   : > { %15312 = vmatprep.mubr.msk.bf16.mxu0 %vm17070_vm1, %v20748_v1  ;;  %v17477_v31 = vadd.f32 %v1350_v27, %v670_v8  ;;  %15402 = vmatprep.mubr.msk.bf16.mxu1 %vm17070_vm1, %v20748_v1  ;;  %v2442_v8 = vrot.slane %v16624_v63, 2 }
 0x105   : > { %v15118_v32 = vpop.f32.mrf.mxu0  ;;  %v15208_v33 = vpop.f32.mrf.mxu1 }
 0x106   : > { %v2443_v18 = vsel %vm2422_vm5, %v2440_v49, %v2442_v8  ;;  %v2445_v39 = vsel %vm2422_vm5, %v2442_v8, %v2444_v28  ;;  %v2446_v49 = vrot.slane %v16628_v40, 2 }
 0x107   : > { %v681_v34 = vpop.f32.mrf.mxu0  ;;  %v1353_v37 = vpop.f32.mrf.mxu1 }
 0x108   : > { %v17488_v42 = vadd.f32 %v1353_v37, %v673_v16 }
 0x109   : > { %v15119_v43 = vpop.f32.mrf.mxu0  ;;  %v15209_v46 = vpop.f32.mrf.mxu1 }
 0x10a   : > { %v1816_v46 = vrot.slane %v16629_v36, 1 }
 0x10b   : > { %v686_v47 = vpop.f32.mrf.mxu0  ;;  %15313 = vmatmul.mubr.msk.bf16.gmra.mxu0 %vm522_vm2, %v1809_v38  ;;  %v1358_v48 = vpop.f32.mrf.mxu1  ;;  %15403 = vmatmul.mubr.msk.bf16.gmra.mxu1 %vm522_vm2, %v2439_v44 }
 0x10c   : > { %15316 = vmatprep.mubr.msk.bf16.mxu0 %vm17070_vm1, %v20748_v1  ;;  %v17496_v52 = vadd.f32 %v1358_v48, %v678_v26  ;;  %15406 = vmatprep.mubr.msk.bf16.mxu1 %vm17070_vm1, %v20748_v1 }
 0x10d   : > { %v15122_v53 = vpop.f32.mrf.mxu0  ;;  %v15212_v54 = vpop.f32.mrf.mxu1 }
 0x10f   : > { %v689_v55 = vpop.f32.mrf.mxu0  ;;  %v1361_v56 = vpop.f32.mrf.mxu1 }
 0x110   : > { %v17502_v60 = vadd.f32 %v1361_v56, %v681_v34  ;;  %v1815_v34 = vsel %vm1790_vm4, %v1812_v5, %v1814_v25  ;;  %v16631_v56 = vld [vmem:[%s17160_s18 + $0x70] sm:$0xff]  }
 0x111   : > { %v15123_v61 = vpop.f32.mrf.mxu0  ;;  %v15213_v0 = vpop.f32.mrf.mxu1 }
 0x112   : > { %v2447_v61 = vsel %vm2422_vm5, %v2444_v28, %v2446_v49 }
 0x113   : > { %v694_v2 = vpop.f32.mrf.mxu0  ;;  %15317 = vmatmul.mubr.msk.bf16.gmra.mxu0 %vm522_vm2, %v1811_v57  ;;  %v1366_v3 = vpop.f32.mrf.mxu1  ;;  %15407 = vmatmul.mubr.msk.bf16.gmra.mxu1 %vm522_vm2, %v2441_v62  ;;  %v16630_v62 = vld [vmem:[%s17160_s18 + $0x70] sm:$0xff]  }
 0x114   : > { %15320 = vmatprep.mubr.msk.bf16.mxu0 %vm17070_vm1, %v20748_v1  ;;  %v17510_v6 = vadd.f32 %v1366_v3, %v686_v47  ;;  %15410 = vmatprep.mubr.msk.bf16.mxu1 %vm17070_vm1, %v20748_v1  ;;  %v1818_v3 = vrot.slane %v16631_v56, 1  ;;  %v2448_v8 = vrot.slane %v16630_v62, 2 }
 0x115   : > { %v15126_v7 = vpop.f32.mrf.mxu0  ;;  %v15216_v9 = vpop.f32.mrf.mxu1 }
 0x116   : > { %v2449_v20 = vsel %vm2422_vm5, %v2446_v49, %v2448_v8 }
 0x117   : > { %v697_v10 = vpop.f32.mrf.mxu0  ;;  %v1369_v11 = vpop.f32.mrf.mxu1 }
 0x118   : > { %v17516_v16 = vadd.f32 %v1369_v11, %v689_v55  ;;  %v1817_v55 = vsel %vm1790_vm4, %v1814_v25, %v1816_v46 }
 0x119   : > { %v15127_v17 = vpop.f32.mrf.mxu0  ;;  %v15217_v21 = vpop.f32.mrf.mxu1 }
 0x11a   : > { %v16632_v21 = vld [vmem:[%s17160_s18 + $0x78] sm:$0xff]  }
 0x11b   : > { %v702_v23 = vpop.f32.mrf.mxu0  ;;  %15321 = vmatmul.mubr.msk.bf16.gmra.mxu0 %vm522_vm2, %v1813_v14  ;;  %v1374_v24 = vpop.f32.mrf.mxu1  ;;  %15411 = vmatmul.mubr.msk.bf16.gmra.mxu1 %vm522_vm2, %v2443_v18  ;;  %v1819_v14 = vsel %vm1790_vm4, %v1816_v46, %v1818_v3 }
 0x11c   : > { %15324 = vmatprep.mubr.msk.bf16.mxu0 %vm17070_vm1, %v20748_v1  ;;  %v17524_v26 = vadd.f32 %v1374_v24, %v694_v2  ;;  %15414 = vmatprep.mubr.msk.bf16.mxu1 %vm17070_vm1, %v20748_v1 }
 0x11d   : > { %v15130_v27 = vpop.f32.mrf.mxu0  ;;  %v15220_v30 = vpop.f32.mrf.mxu1 }
 0x11e   : > { %v1820_v27 = vrot.slane %v16633_v15, 1 }
 0x11f   : > { %v705_v32 = vpop.f32.mrf.mxu0  ;;  %v1377_v33 = vpop.f32.mrf.mxu1 }
 0x120   : > { %v17530_v37 = vadd.f32 %v1377_v33, %v697_v10 }
 0x121   : > { %v15131_v38 = vpop.f32.mrf.mxu0  ;;  %v15221_v41 = vpop.f32.mrf.mxu1 }
 0x122   : > { %v1821_v38 = vsel %vm1790_vm4, %v1818_v3, %v1820_v27 }
 0x123   : > { %v710_v43 = vpop.f32.mrf.mxu0  ;;  %15325 = vmatmul.mubr.msk.bf16.gmra.mxu0 %vm522_vm2, %v1815_v34  ;;  %v1382_v44 = vpop.f32.mrf.mxu1  ;;  %15415 = vmatmul.mubr.msk.bf16.gmra.mxu1 %vm522_vm2, %v2445_v39  ;;  %v16635_v39 = vld [vmem:[%s17160_s18 + $0x80] sm:$0xff]  }
 0x124   : > { %15328 = vmatprep.mubr.msk.bf16.mxu0 %vm17070_vm1, %v20748_v1  ;;  %v17538_v47 = vadd.f32 %v1382_v44, %v702_v23  ;;  %15418 = vmatprep.mubr.msk.bf16.mxu1 %vm17070_vm1, %v20748_v1  ;;  %v16634_v44 = vld [vmem:[%s17160_s18 + $0x80] sm:$0xff]  }
 0x125   : > { %v15134_v48 = vpop.f32.mrf.mxu0  ;;  %v15224_v50 = vpop.f32.mrf.mxu1 }
 0x126   : > { %v1822_v50 = vrot.slane %v16635_v39, 1 }
 0x127   : > { %v713_v53 = vpop.f32.mrf.mxu0  ;;  %v1385_v54 = vpop.f32.mrf.mxu1 }
 0x128   : > { %v17544_v57 = vadd.f32 %v1385_v54, %v705_v32  ;;  %v2450_v32 = vrot.slane %v16632_v21, 2  ;;  %v1823_v62 = vsel %vm1790_vm4, %v1820_v27, %v1822_v50 }
 0x129   : > { %v15135_v58 = vpop.f32.mrf.mxu0  ;;  %v15225_v63 = vpop.f32.mrf.mxu1 }
 0x12a   : > { %v16637_v63 = vld [vmem:[%s17160_s18 + $0x88] sm:$0xff]  }
 0x12b   : > { %v718_v0 = vpop.f32.mrf.mxu0  ;;  %15329 = vmatmul.mubr.msk.bf16.gmra.mxu0 %vm522_vm2, %v1817_v55  ;;  %v1390_v2 = vpop.f32.mrf.mxu1  ;;  %15419 = vmatmul.mubr.msk.bf16.gmra.mxu1 %vm522_vm2, %v2447_v61  ;;  %v2452_v55 = vrot.slane %v16634_v44, 2 }
 0x12c   : > { %15332 = vmatprep.mubr.msk.bf16.mxu0 %vm17070_vm1, %v20748_v1  ;;  %v17552_v5 = vadd.f32 %v1390_v2, %v710_v43  ;;  %15422 = vmatprep.mubr.msk.bf16.mxu1 %vm17070_vm1, %v20748_v1  ;;  %v2451_v43 = vsel %vm2422_vm5, %v2448_v8, %v2450_v32 }
 0x12d   : > { %v15138_v7 = vpop.f32.mrf.mxu0  ;;  %v15228_v9 = vpop.f32.mrf.mxu1  ;;  %v2453_v3 = vsel %vm2422_vm5, %v2450_v32, %v2452_v55 }
 0x12e   : > { %v16636_v7 = vld [vmem:[%s17160_s18 + $0x88] sm:$0xff]  }
 0x12f   : > { %v721_v10 = vpop.f32.mrf.mxu0  ;;  %v1393_v11 = vpop.f32.mrf.mxu1 }
 0x130   : > { %v17558_v17 = vadd.f32 %v1393_v11, %v713_v53  ;;  %v1824_v11 = vrot.slane %v16637_v63, 1 }
 0x131   : > { %v15139_v18 = vpop.f32.mrf.mxu0  ;;  %v15229_v23 = vpop.f32.mrf.mxu1 }
 0x132   : > { %v2454_v18 = vrot.slane %v16636_v7, 2 }
 0x133   : > { %v726_v24 = vpop.f32.mrf.mxu0  ;;  %15333 = vmatmul.mubr.msk.bf16.gmra.mxu0 %vm522_vm2, %v1819_v14  ;;  %v1398_v25 = vpop.f32.mrf.mxu1  ;;  %15423 = vmatmul.mubr.msk.bf16.gmra.mxu1 %vm522_vm2, %v2449_v20 }
 0x134   : > { %15336 = vmatprep.mubr.msk.bf16.mxu0 %vm17070_vm1, %v20748_v1  ;;  %v17566_v28 = vadd.f32 %v1398_v25, %v718_v0  ;;  %15426 = vmatprep.mubr.msk.bf16.mxu1 %vm17070_vm1, %v20748_v1  ;;  %v16639_v25 = vld [vmem:[%s17160_s18 + $0x90] sm:$0xff]   ;;  %v2455_v32 = vsel %vm2422_vm5, %v2452_v55, %v2454_v18 }
 0x135   : > { %v15142_v30 = vpop.f32.mrf.mxu0  ;;  %v15232_v33 = vpop.f32.mrf.mxu1  ;;  %v1826_v39 = vrot.slane %v16639_v25, 1  ;;  %v16642_v25 = vld [vmem:[%s17160_s18 + $0xa0] sm:$0xff]  }
 0x136   : > { %v16638_v33 = vld [vmem:[%s17160_s18 + $0x90] sm:$0xff]  }
 0x137   : > { %v729_v34 = vpop.f32.mrf.mxu0  ;;  %v1401_v36 = vpop.f32.mrf.mxu1  ;;  %v2456_v44 = vrot.slane %v16638_v33, 2 }
 0x138   : > { %v17572_v40 = vadd.f32 %v1401_v36, %v721_v10 }
 0x139   : > { %v15143_v41 = vpop.f32.mrf.mxu0  ;;  %v15233_v46 = vpop.f32.mrf.mxu1 }
 0x13b   : > { %v734_v48 = vpop.f32.mrf.mxu0  ;;  %15337 = vmatmul.mubr.msk.bf16.gmra.mxu0 %vm522_vm2, %v1821_v38  ;;  %v1406_v49 = vpop.f32.mrf.mxu1  ;;  %15427 = vmatmul.mubr.msk.bf16.gmra.mxu1 %vm522_vm2, %v2451_v43 }
 0x13c   : > { %15340 = vmatprep.mubr.msk.bf16.mxu0 %vm17070_vm1, %v20748_v1  ;;  %v17580_v53 = vadd.f32 %v1406_v49, %v726_v24  ;;  %15430 = vmatprep.mubr.msk.bf16.mxu1 %vm17070_vm1, %v20748_v1  ;;  %v1825_v24 = vsel %vm1790_vm4, %v1822_v50, %v1824_v11  ;;  %v1827_v50 = vsel %vm1790_vm4, %v1824_v11, %v1826_v39 }
 0x13d   : > { %v15146_v54 = vpop.f32.mrf.mxu0  ;;  %v15236_v56 = vpop.f32.mrf.mxu1 }
 0x13e   : > { %v16641_v54 = vld [vmem:[%s17160_s18 + $0x98] sm:$0xff]  }
 0x13f   : > { %v737_v58 = vpop.f32.mrf.mxu0  ;;  %v1409_v61 = vpop.f32.mrf.mxu1 }
 0x140   : > { %v17586_v0 = vadd.f32 %v1409_v61, %v729_v34  ;;  %v16640_v61 = vld [vmem:[%s17160_s18 + $0x98] sm:$0xff]  }
 0x141   : > { %v15147_v2 = vpop.f32.mrf.mxu0  ;;  %v15237_v8 = vpop.f32.mrf.mxu1 }
 0x143   : > { %v742_v9 = vpop.f32.mrf.mxu0  ;;  %15341 = vmatmul.mubr.msk.bf16.gmra.mxu0 %vm522_vm2, %v1823_v62  ;;  %v1414_v10 = vpop.f32.mrf.mxu1  ;;  %15431 = vmatmul.mubr.msk.bf16.gmra.mxu1 %vm522_vm2, %v2453_v3  ;;  %v1828_v3 = vrot.slane %v16641_v54, 1 }
 0x144   : > { %15344 = vmatprep.mubr.msk.bf16.mxu0 %vm17070_vm1, %v20748_v1  ;;  %v17594_v14 = vadd.f32 %v1414_v10, %v734_v48  ;;  %15434 = vmatprep.mubr.msk.bf16.mxu1 %vm17070_vm1, %v20748_v1 }
 0x145   : > { %v15150_v15 = vpop.f32.mrf.mxu0  ;;  %v15240_v20 = vpop.f32.mrf.mxu1 }
 0x146   : > { %v16643_v20 = vld [vmem:[%s17160_s18 + $0xa0] sm:$0xff]  }
 0x147   : > { %v745_v21 = vpop.f32.mrf.mxu0  ;;  %v1417_v23 = vpop.f32.mrf.mxu1 }
 0x148   : > { %v17600_v27 = vadd.f32 %v1417_v23, %v737_v58  ;;  %v2457_v58 = vsel %vm2422_vm5, %v2454_v18, %v2456_v44  ;;  %v1829_v18 = vsel %vm1790_vm4, %v1826_v39, %v1828_v3  ;;  %v2460_v39 = vrot.slane %v16642_v25, 2 }
 0x149   : > { %v15151_v30 = vpop.f32.mrf.mxu0  ;;  %v15241_v34 = vpop.f32.mrf.mxu1 }
 0x14a   : > { %v1830_v34 = vrot.slane %v16643_v20, 1  ;;  %v16647_v20 = vld [vmem:[%s17160_s18 + $0xb0] sm:$0x1f]  }
 0x14b   : > { %v750_v36 = vpop.f32.mrf.mxu0  ;;  %15345 = vmatmul.mubr.msk.bf16.gmra.mxu0 %vm522_vm2, %v1825_v24  ;;  %v1422_v38 = vpop.f32.mrf.mxu1  ;;  %15435 = vmatmul.mubr.msk.bf16.gmra.mxu1 %vm522_vm2, %v2455_v32 }
 0x14c   : > { %15348 = vmatprep.mubr.msk.bf16.mxu0 %vm17070_vm1, %v20748_v1  ;;  %v17608_v41 = vadd.f32 %v1422_v38, %v742_v9  ;;  %15438 = vmatprep.mubr.msk.bf16.mxu1 %vm17070_vm1, %v20748_v1  ;;  %v2458_v9 = vrot.slane %v16640_v61, 2 }
 0x14d   : > { %v15154_v43 = vpop.f32.mrf.mxu0  ;;  %v15244_v46 = vpop.f32.mrf.mxu1 }
 0x14e   : > { %v2459_v24 = vsel %vm2422_vm5, %v2456_v44, %v2458_v9 }
 0x14f   : > { %v753_v48 = vpop.f32.mrf.mxu0  ;;  %v1425_v49 = vpop.f32.mrf.mxu1 }
 0x150   : > { %v17614_v55 = vadd.f32 %v1425_v49, %v745_v21  ;;  %v16645_v49 = vld [vmem:[%s17160_s18 + $0xa8] sm:$0xff]  }
 0x151   : > { %v15155_v56 = vpop.f32.mrf.mxu0  ;;  %v15245_v62 = vpop.f32.mrf.mxu1 }
 0x152   : > { %v2461_v56 = vsel %vm2422_vm5, %v2458_v9, %v2460_v39 }
 0x153   : > { %v758_v63 = vpop.f32.mrf.mxu0  ;;  %15349 = vmatmul.mubr.msk.bf16.gmra.mxu0 %vm522_vm2, %v1827_v50  ;;  %v1430_v2 = vpop.f32.mrf.mxu1  ;;  %15439 = vmatmul.mubr.msk.bf16.gmra.mxu1 %vm522_vm2, %v2457_v58  ;;  %v16644_v58 = vld [vmem:[%s17160_s18 + $0xa8] sm:$0xff]  }
 0x154   : > { %15352 = vmatprep.mubr.msk.bf16.mxu0 %vm17070_vm1, %v20748_v1  ;;  %v17622_v7 = vadd.f32 %v1430_v2, %v750_v36  ;;  %15442 = vmatprep.mubr.msk.bf16.mxu1 %vm17070_vm1, %v20748_v1  ;;  %v1832_v2 = vrot.slane %v16645_v49, 1  ;;  %v2462_v9 = vrot.slane %v16644_v58, 2  ;;  %v16650_v58 = vld [vmem:[%s17160_s18 + $0x10] sm:$0xff]  }
 0x155   : > { %v15158_v8 = vpop.f32.mrf.mxu0  ;;  %v15248_v10 = vpop.f32.mrf.mxu1 }
 0x156   : > { %v2463_v25 = vsel %vm2422_vm5, %v2460_v39, %v2462_v9 }
 0x157   : > { %v761_v11 = vpop.f32.mrf.mxu0  ;;  %v1433_v15 = vpop.f32.mrf.mxu1 }
 0x158   : > { %v17628_v21 = vadd.f32 %v1433_v15, %v753_v48  ;;  %v1831_v48 = vsel %vm1790_vm4, %v1828_v3, %v1830_v34 }
 0x159   : > { %v15159_v23 = vpop.f32.mrf.mxu0  ;;  %v15249_v30 = vpop.f32.mrf.mxu1 }
 0x15a   : > { %v16646_v30 = vld [vmem:[%s17160_s18 + $0xb0] sm:$0xff]  }
 0x15b   : > { %v766_v32 = vpop.f32.mrf.mxu0  ;;  %15353 = vmatmul.mubr.msk.bf16.gmra.mxu0 %vm522_vm2, %v1829_v18  ;;  %v1438_v33 = vpop.f32.mrf.mxu1  ;;  %15443 = vmatmul.mubr.msk.bf16.gmra.mxu1 %vm522_vm2, %v2459_v24  ;;  %v1833_v18 = vsel %vm1790_vm4, %v1830_v34, %v1832_v2  ;;  %v1834_v34 = vrot.slane %v16647_v20, 1  ;;  %v2464_v39 = vrot.slane %v16646_v30, 2 }
 0x15c   : > { %15356 = vmatprep.mubr.msk.bf16.mxu0 %vm17070_vm1, %v20748_v1  ;;  %v17636_v36 = vadd.f32 %v1438_v33, %v758_v63  ;;  %15446 = vmatprep.mubr.msk.bf16.mxu1 %vm17070_vm1, %v20748_v1 }
 0x15d   : > { %v15162_v38 = vpop.f32.mrf.mxu0  ;;  %v15252_v43 = vpop.f32.mrf.mxu1 }
 0x15f   : > { %v769_v44 = vpop.f32.mrf.mxu0  ;;  %v1441_v46 = vpop.f32.mrf.mxu1 }
 0x160   : > { %v17642_v50 = vadd.f32 %v1441_v46, %v761_v11 }
 0x161   : > { %v15163_v54 = vpop.f32.mrf.mxu0  ;;  %v15253_v61 = vpop.f32.mrf.mxu1 }
 0x162   : > { %v1835_v54 = vsel %vm1790_vm4, %v1832_v2, %v1834_v34 }
 0x163   : > { %v774_v62 = vpop.f32.mrf.mxu0  ;;  %15357 = vmatmul.mubr.msk.bf16.gmra.mxu0 %vm522_vm2, %v1831_v48  ;;  %v1446_v63 = vpop.f32.mrf.mxu1  ;;  %15447 = vmatmul.mubr.msk.bf16.gmra.mxu1 %vm522_vm2, %v2461_v56  ;;  %v16649_v56 = vld [vmem:[%s17160_s18 + $0x8] sm:$0xfc]  }
 0x164   : > { %15360 = vmatprep.mubr.msk.bf16.mxu0 %vm17070_vm1, %v20748_v1  ;;  %v17650_v3 = vadd.f32 %v1446_v63, %v766_v32  ;;  %15450 = vmatprep.mubr.msk.bf16.mxu1 %vm17070_vm1, %v20748_v1  ;;  %v3056_v2 = vshrl.u32 %v16649_v56, 16  ;;  %v3059_v20 = vshll.u32 %v16649_v56, 16 }
 0x165   : > { %v15166_v8 = vpop.f32.mrf.mxu0  ;;  %v15256_v10 = vpop.f32.mrf.mxu1 }
 0x166   : > { %v2465_v8 = vsel %vm2422_vm5, %v2462_v9, %v2464_v39  ;;  %v16648_v10 = vld [vmem:[%s17160_s18 + $0xb8] sm:$0x3f]  }
 0x167   : > { %v777_v11 = vpop.f32.mrf.mxu0  ;;  %v1449_v15 = vpop.f32.mrf.mxu1  ;;  %v2466_v9 = vrot.slane %v16648_v10, 2 }
 0x168   : > { %v17656_v23 = vadd.f32 %v1449_v15, %v769_v44 }
 0x169   : > { %v15167_v24 = vpop.f32.mrf.mxu0  ;;  %v15257_v32 = vpop.f32.mrf.mxu1 }
 0x16a   : > { %v3064_v24 = vshrl.u32 %v16650_v58, 16 }
 0x16b   : > { %v782_v33 = vpop.f32.mrf.mxu0  ;;  %15361 = vmatmul.mubr.msk.bf16.gmra.mxu0 %vm522_vm2, %v1833_v18  ;;  %v1454_v38 = vpop.f32.mrf.mxu1  ;;  %15451 = vmatmul.mubr.msk.bf16.gmra.mxu1 %vm522_vm2, %v2463_v25 }
 0x16c   : > { %15364 = vmatprep.mubr.msk.bf16.mxu0 %vm17070_vm1, %v20748_v1  ;;  %v17664_v43 = vadd.f32 %v1454_v38, %v774_v62  ;;  %15454 = vmatprep.mubr.msk.bf16.mxu1 %vm17070_vm1, %v20748_v1 }
 0x16d   : > { %v15170_v44 = vpop.f32.mrf.mxu0  ;;  %v15260_v46 = vpop.f32.mrf.mxu1 }
 0x16e   : > { %v3058_v46 = vrot.slane %v3056_v2, 2 }
 0x16f   : > { %v785_v48 = vpop.f32.mrf.mxu0  ;;  %v1457_v49 = vpop.f32.mrf.mxu1 }
 0x170   : > { %v17671_v61 = vadd.f32 %v1457_v49, %v777_v11  ;;  %v3067_v11 = vshll.u32 %v16650_v58, 16  ;;  %v3061_v49 = vrot.slane %v3059_v20, 3  ;;  %v2467_v58 = vsel %vm2422_vm5, %v2464_v39, %v2466_v9 }
 0x171   : > { %v15171_v63 = vpop.f32.mrf.mxu0  ;;  %v15261_v62 = vpop.f32.mrf.mxu1 }
 0x172   : > { %v3069_v63 = vrot.slane %v3067_v11, 3  ;;  %v3062_v10 = vor.u32 %v3061_v49, %v3058_v46 }
 0x173   : > { %v790_v15 = vpop.f32.mrf.mxu0  ;;  %15365 = vmatmul.mubr.msk.bf16.gmra.mxu0 %vm522_vm2, %v1835_v54  ;;  %v1462_v18 = vpop.f32.mrf.mxu1  ;;  %15455 = vmatmul.mubr.msk.bf16.gmra.mxu1 %vm522_vm2, %v2465_v8  ;;  %v3066_v54 = vrot.slane %v3064_v24, 2  ;;  %v16653_v8 = vld [vmem:[%s17160_s18 + $0x18] sm:$0xff]  }
 0x174   : > { %15368 = vmatprep.mubr.msk.bf16.mxu0 %vm17070_vm1, %v20748_v1  ;;  %v17679_v25 = vadd.f32 %v1462_v18, %v782_v33  ;;  %15458 = vmatprep.mubr.msk.bf16.mxu1 %vm17070_vm1, %v20748_v1  ;;  %v3073_v20 = vshrl.u32 %v16653_v8, 16 }
 0x175   : > { %v15174_v30 = vpop.f32.mrf.mxu0  ;;  %v15264_v32 = vpop.f32.mrf.mxu1  ;;  %v3070_v2 = vor.u32 %v3069_v63, %v3066_v54  ;;  %v16655_v63 = vld [vmem:[%s17160_s18 + $0x20] sm:$0xff]  }
 0x176   : > { %v13726_v32 = vld [vmem:[%s20741_s2 + $0xc] sm:$0x3]  ;;  %v3075_v49 = vrot.slane %v3073_v20, 2  ;;  %v3082_v20 = vshrl.u32 %v16655_v63, 16 }
 0x177   : > { %v793_v38 = vpop.f32.mrf.mxu0  ;;  %v1465_v44 = vpop.f32.mrf.mxu1  ;;  %v3071_v46 = vsel %vm3054_vm6, %v3062_v10, %v3070_v2 }
 0x178   : > { %v17684_v62 = vadd.f32 %v1465_v44, %v785_v48  ;;  %v3076_v48 = vshll.u32 %v16653_v8, 16 }
 0x179   : > { %v15175_v56 = vpop.f32.mrf.mxu0  ;;  %v15265_v33 = vpop.f32.mrf.mxu1 }
 0x17a   : > { %v3078_v54 = vrot.slane %v3076_v48, 3  ;;  %v16651_v56 = vld [vmem:[%s17160_s18 + $0x8] sm:$0xf8]  }
 0x17b   : > { %v798_v18 = vpop.f32.mrf.mxu0  ;;  %15369 = vmatmul.mubr.msk.bf16.gmra.mxu0 %vm522_vm2, %v1834_v34  ;;  %v1470_v30 = vpop.f32.mrf.mxu1  ;;  %15459 = vmatmul.mubr.msk.bf16.gmra.mxu1 %vm522_vm2, %v2467_v58  ;;  %v16652_v58 = vld [vmem:[%s17160_s18 + $0x10] sm:$0xff]  }
 0x17c   : > { %15468 = vmatprep.mubr.msk.bf16.mxu0 %vm17070_vm1, %v20748_v1  ;;  %v17691_v24 = vadd.f32 %v1470_v30, %v790_v15  ;;  %15462 = vmatprep.mubr.msk.bf16.mxu1 %vm17070_vm1, %v20748_v1  ;;  %v4546_v30 = vsel %vm592_vm0, %v13726_v32, 0  ;;  %v3079_v10 = vor.u32 %v3078_v54, %v3075_v49  ;;  %v3848_v32 = vrot.slane %v16651_v56, 3 }
 0x17d   : > { %v15178_v39 = vpop.f32.mrf.mxu0  ;;  %v15268_v34 = vpop.f32.mrf.mxu1  ;;  %v3084_v54 = vrot.slane %v3082_v20, 2 }
 0x17e   : > { %v3080_v49 = vsel %vm3054_vm6, %v3070_v2, %v3079_v10 }
 0x17f   : > { %v801_v11 = vpop.f32.mrf.mxu0  ;;  %v1473_v44 = vpop.f32.mrf.mxu1 }
 0x180   : > { %v17700_v8 = vadd.f32 %v1473_v44, %v793_v38  ;;  %v3085_v38 = vshll.u32 %v16655_v63, 16 }
 0x181   : > { %v15179_v15 = vpop.f32.mrf.mxu0  ;;  %v15269_v33 = vpop.f32.mrf.mxu1 }
 0x182   : > { %20750 = vst [vmem:[#allocation4_spill] sm:$0xff] %v17700_v8  ;;  %v3849_v15 = vrot.slane %v16652_v58, 3  ;;  %v3087_v63 = vrot.slane %v3085_v38, 3  ;;  %v16654_v8 = vld [vmem:[%s17160_s18 + $0x18] sm:$0xff]  }
 0x183   : > { %v806_v39 = vpop.f32.mrf.mxu0  ;;  %15469 = vmatmul.mubr.msk.bf16.vlgmr.msra.gmra.mxu0 %vm522_vm2, %v3071_v46  ;;  %v1478_v34 = vpop.f32.mrf.mxu1  ;;  %15463 = vmatmul.mubr.msk.bf16.gmra.mxu1 %vm522_vm2, %v2466_v9 }
 0x184   : > { %15472 = vmatprep.mubr.msk.bf16.mxu0 %vm17070_vm1, %v20748_v1  ;;  %v17709_v48 = vadd.f32 %v1478_v34, %v798_v18  ;;  %15562 = vmatprep.mubr.msk.bf16.mxu1 %vm17070_vm1, %v20748_v1  ;;  %v16657_v18 = vld [vmem:[%s17160_s18 + $0x28] sm:$0xff]   ;;  %v3088_v2 = vor.u32 %v3087_v63, %v3084_v54  ;;  %v16659_v54 = vld [vmem:[%s17160_s18 + $0x30] sm:$0xff]  }
 0x185   : > { %v15182_v44 = vpop.f32.mrf.mxu0  ;;  %15655 = vmatpush3.bf16.msra.mxu0 %v4546_v30  ;;  %v15272_v46 = vpop.f32.mrf.mxu1  ;;  %v3094_v20 = vshll.u32 %v16657_v18, 16 }
 0x186   : > { %20751 = vst [vmem:[#allocation5_spill] sm:$0xff] %v17709_v48  ;;  %15842 = vmatprep.subr.bf16.mxu0 %v20748_v1  ;;  %v3850_v48 = vsel %vm3847_vm7, %v3848_v32, %v3849_v15 }
 0x187   : > { %v809_v9 = vpop.f32.mrf.mxu0  ;;  %v1481_v33 = vpop.f32.mrf.mxu1 }
 0x188   : > { %v17716_v34 = vadd.f32 %v1481_v33, %v801_v11  ;;  %v3091_v11 = vshrl.u32 %v16657_v18, 16  ;;  %v3851_v9 = vrot.slane %v16654_v8, 3 }
 0x189   : > { %v15183_v44 = vpop.f32.mrf.mxu0  ;;  %v15273_v56 = vpop.f32.mrf.mxu1 }
 0x18a   : > { %v3089_v44 = vsel %vm3054_vm6, %v3079_v10, %v3088_v2  ;;  %v3093_v56 = vrot.slane %v3091_v11, 2  ;;  %v3852_v18 = vsel %vm3847_vm7, %v3849_v15, %v3851_v9  ;;  %v3100_v10 = vshrl.u32 %v16659_v54, 16 }
 0x18b   : > { %v1942_v58 = vpop.f32.mrf.mxu0  ;;  %15473 = vmatmul.mubr.msk.bf16.gmra.mxu0 %vm522_vm2, %v3080_v49  ;;  %v1486_v30 = vpop.f32.mrf.mxu1  ;;  %15563 = vmatmul.mubr.msk.bf16.vlgmr.msra.gmra.mxu1 %vm522_vm2, %v3850_v48  ;;  %v3103_v11 = vshll.u32 %v16659_v54, 16 }
 0x18c   : > { %v2169_v46 = vadd.f32 %v1942_v58, %v17409_v13  ;;  %15476 = vmatprep.mubr.msk.bf16.mxu0 %vm17070_vm1, %v20748_v1  ;;  %v17725_v38 = vadd.f32 %v1486_v30, %v806_v39  ;;  %15566 = vmatprep.mubr.msk.bf16.mxu1 %vm17070_vm1, %v20748_v1  ;;  %v3096_v58 = vrot.slane %v3094_v20, 3  ;;  %v16656_v39 = vld [vmem:[%s17160_s18 + $0x20] sm:$0xff]  }
 0x18d   : > { %v15282_v32 = vpop.f32.mrf.mxu0  ;;  %v15276_v33 = vpop.f32.mrf.mxu1 }
 0x18e   : > { %v20752_v33 = vmov 0.0  }
 0x18f   : > { %v1945_v49 = vpop.f32.mrf.mxu0  ;;  %v1489_v48 = vpop.f32.mrf.mxu1 }
 0x190   : > { %v2170_v13 = vadd.f32 %v1945_v49, %v17414_v19  ;;  %v3097_v19 = vor.u32 %v3096_v58, %v3093_v56  ;;  %v3853_v49 = vrot.slane %v16656_v39, 3  ;;  %v16661_v56 = vld [vmem:[%s17160_s18 + $0x38] sm:$0xff]  }
 0x191   : > { %v15283_v63 = vpop.f32.mrf.mxu0  ;;  %v15277_v30 = vpop.f32.mrf.mxu1 }
 0x192   : > { %v3102_v30 = vrot.slane %v3100_v10, 2  ;;  %v3112_v10 = vshll.u32 %v16661_v56, 16 }
 0x193   : > { %v1950_v32 = vpop.f32.mrf.mxu0  ;;  %15477 = vmatmul.mubr.msk.bf16.gmra.mxu0 %vm522_vm2, %v3089_v44  ;;  %v2574_v1 = vpop.f32.mrf.mxu1  ;;  %15567 = vmatmul.mubr.msk.bf16.gmra.mxu1 %vm522_vm2, %v3852_v18  ;;  %v3098_v18 = vsel %vm3054_vm6, %v3088_v2, %v3097_v19 }
 0x194   : > { %v2171_v8 = vadd.f32 %v1950_v32, %v17423_v29  ;;  %15480 = vmatprep.mubr.msk.bf16.mxu0 %vm17070_vm1, %v20752_v33  ;;  %v17739_v20 = vadd.f32 %v2574_v1, %v2169_v46  ;;  %15570 = vmatprep.mubr.msk.bf16.mxu1 %vm17070_vm1, %v20752_v33  ;;  %v3105_v32 = vrot.slane %v3103_v11, 3  ;;  %v3854_v1 = vsel %vm3847_vm7, %v3851_v9, %v3853_v49  ;;  %v16658_v46 = vld [vmem:[%s17160_s18 + $0x28] sm:$0xff]  }
 0x195   : > { %v15286_v15 = vpop.f32.mrf.mxu0  ;;  %v15376_v48 = vpop.f32.mrf.mxu1 }
 0x196   : > { %20753 = vst [vmem:[#allocation6_spill] sm:$0xff] %v17739_v20  ;;  %v3106_v2 = vor.u32 %v3105_v32, %v3102_v30  ;;  %v3855_v48 = vrot.slane %v16658_v46, 3  ;;  %v16663_v30 = vld [vmem:[%s17160_s18 + $0x40] sm:$0xff]  }
 0x197   : > { %v1953_v44 = vpop.f32.mrf.mxu0  ;;  %v2577_v63 = vpop.f32.mrf.mxu1 }
 0x198   : > { %v2172_v29 = vadd.f32 %v1953_v44, %v17428_v35  ;;  %v17746_v58 = vadd.f32 %v2577_v63, %v2170_v13  ;;  %v3109_v13 = vshrl.u32 %v16661_v56, 16 }
 0x199   : > { %v15287_v54 = vpop.f32.mrf.mxu0  ;;  %v15377_v15 = vpop.f32.mrf.mxu1 }
 0x19a   : > { %v3111_v54 = vrot.slane %v3109_v13, 2  ;;  %v16660_v15 = vld [vmem:[%s17160_s18 + $0x30] sm:$0xff]   ;;  %v3121_v13 = vshll.u32 %v16663_v30, 16 }
 0x19b   : > { %v1958_v20 = vpop.f32.mrf.mxu0  ;;  %15481 = vmatmul.mubr.msk.bf16.gmra.mxu0 %vm522_vm2, %v3098_v18  ;;  %v2582_v39 = vpop.f32.mrf.mxu1  ;;  %15571 = vmatmul.mubr.msk.bf16.gmra.mxu1 %vm522_vm2, %v3854_v1  ;;  %v3114_v1 = vrot.slane %v3112_v10, 3 }
 0x19c   : > { %v2173_v35 = vadd.f32 %v1958_v20, %v17437_v45  ;;  %15484 = vmatprep.mubr.msk.bf16.mxu0 %vm17070_vm1, %v20752_v33  ;;  %v17755_v11 = vadd.f32 %v2582_v39, %v2171_v8  ;;  %15574 = vmatprep.mubr.msk.bf16.mxu1 %vm17070_vm1, %v20752_v33  ;;  %v3107_v20 = vsel %vm3054_vm6, %v3097_v19, %v3106_v2 }
 0x19d   : > { %v15290_v9 = vpop.f32.mrf.mxu0  ;;  %v15380_v44 = vpop.f32.mrf.mxu1  ;;  %v3856_v8 = vsel %vm3847_vm7, %v3853_v49, %v3855_v48  ;;  %v3115_v19 = vor.u32 %v3114_v1, %v3111_v54  ;;  %v16665_v54 = vld [vmem:[%s17160_s18 + $0x48] sm:$0xff]  }
 0x19e   : > { %v3857_v44 = vrot.slane %v16660_v15, 3 }
 0x19f   : > { %v1961_v63 = vpop.f32.mrf.mxu0  ;;  %v2585_v18 = vpop.f32.mrf.mxu1 }
 0x1a0   : > { %v2174_v45 = vadd.f32 %v1961_v63, %v17442_v51  ;;  %v17762_v32 = vadd.f32 %v2585_v18, %v2172_v29  ;;  %v3118_v29 = vshrl.u32 %v16663_v30, 16 }
 0x1a1   : > { %v15291_v56 = vpop.f32.mrf.mxu0  ;;  %v15381_v39 = vpop.f32.mrf.mxu1 }
 0x1a2   : > { %v3116_v56 = vsel %vm3054_vm6, %v3106_v2, %v3115_v19  ;;  %v3123_v39 = vrot.slane %v3121_v13, 3 }
 0x1a3   : > { %v1966_v9 = vpop.f32.mrf.mxu0  ;;  %15485 = vmatmul.mubr.msk.bf16.gmra.mxu0 %vm522_vm2, %v3107_v20  ;;  %v2590_v46 = vpop.f32.mrf.mxu1  ;;  %15575 = vmatmul.mubr.msk.bf16.gmra.mxu1 %vm522_vm2, %v3856_v8  ;;  %v3120_v8 = vrot.slane %v3118_v29, 2  ;;  %v3130_v29 = vshll.u32 %v16665_v54, 16 }
 0x1a4   : > { %v2175_v51 = vadd.f32 %v1966_v9, %v17449_v59  ;;  %15488 = vmatprep.mubr.msk.bf16.mxu0 %vm17070_vm1, %v20752_v33  ;;  %v17771_v10 = vadd.f32 %v2590_v46, %v2173_v35  ;;  %15578 = vmatprep.mubr.msk.bf16.mxu1 %vm17070_vm1, %v20752_v33  ;;  %v3858_v35 = vsel %vm3847_vm7, %v3855_v48, %v3857_v44  ;;  %v16662_v9 = vld [vmem:[%s17160_s18 + $0x38] sm:$0xff]  }
 0x1a5   : > { %v15294_v49 = vpop.f32.mrf.mxu0  ;;  %v15384_v63 = vpop.f32.mrf.mxu1  ;;  %v3124_v2 = vor.u32 %v3123_v39, %v3120_v8  ;;  %v3132_v8 = vrot.slane %v3130_v29, 3 }
 0x1a6   : > { %v3859_v63 = vrot.slane %v16662_v9, 3 }
 0x1a7   : > { %v1969_v18 = vpop.f32.mrf.mxu0  ;;  %v2593_v20 = vpop.f32.mrf.mxu1 }
 0x1a8   : > { %v2176_v59 = vadd.f32 %v1969_v18, %v17456_v4  ;;  %v17778_v1 = vadd.f32 %v2593_v20, %v2174_v45  ;;  %v3127_v45 = vshrl.u32 %v16665_v54, 16 }
 0x1a9   : > { %v15295_v30 = vpop.f32.mrf.mxu0  ;;  %v15385_v46 = vpop.f32.mrf.mxu1 }
 0x1aa   : > { %v3129_v46 = vrot.slane %v3127_v45, 2 }
 0x1ab   : > { %v1974_v49 = vpop.f32.mrf.mxu0  ;;  %15489 = vmatmul.mubr.msk.bf16.gmra.mxu0 %vm522_vm2, %v3116_v56  ;;  %v2598_v15 = vpop.f32.mrf.mxu1  ;;  %15579 = vmatmul.mubr.msk.bf16.gmra.mxu1 %vm522_vm2, %v3858_v35  ;;  %v16667_v56 = vld [vmem:[%s17160_s18 + $0x50] sm:$0xff]   ;;  %v3125_v35 = vsel %vm3054_vm6, %v3115_v19, %v3124_v2 }
 0x1ac   : > { %v2177_v4 = vadd.f32 %v1974_v49, %v17463_v12  ;;  %15492 = vmatprep.mubr.msk.bf16.mxu0 %vm17070_vm1, %v20752_v33  ;;  %v17787_v13 = vadd.f32 %v2598_v15, %v2175_v51  ;;  %15582 = vmatprep.mubr.msk.bf16.mxu1 %vm17070_vm1, %v20752_v33  ;;  %v3860_v51 = vsel %vm3847_vm7, %v3857_v44, %v3859_v63  ;;  %v16664_v49 = vld [vmem:[%s17160_s18 + $0x40] sm:$0xff]   ;;  %v3136_v9 = vshrl.u32 %v16667_v56, 16 }
 0x1ad   : > { %v15298_v48 = vpop.f32.mrf.mxu0  ;;  %v15388_v18 = vpop.f32.mrf.mxu1  ;;  %v3133_v19 = vor.u32 %v3132_v8, %v3129_v46  ;;  %v3861_v45 = vrot.slane %v16664_v49, 3 }
 0x1ae   : > { %20754 = vst [vmem:[#allocation7_spill] sm:$0xff] %v17787_v13  ;;  %v3139_v18 = vshll.u32 %v16667_v56, 16  ;;  %v3138_v56 = vrot.slane %v3136_v9, 2 }
 0x1af   : > { %v1977_v20 = vpop.f32.mrf.mxu0  ;;  %v2601_v30 = vpop.f32.mrf.mxu1 }
 0x1b0   : > { %v2178_v12 = vadd.f32 %v1977_v20, %v17470_v22  ;;  %v17794_v39 = vadd.f32 %v2601_v30, %v2176_v59  ;;  %v3141_v30 = vrot.slane %v3139_v18, 3 }
 0x1b1   : > { %v15299_v54 = vpop.f32.mrf.mxu0  ;;  %v15389_v15 = vpop.f32.mrf.mxu1 }
 0x1b2   : > { %v3142_v49 = vor.u32 %v3141_v30, %v3138_v56 }
 0x1b3   : > { %v1982_v48 = vpop.f32.mrf.mxu0  ;;  %15493 = vmatmul.mubr.msk.bf16.gmra.mxu0 %vm522_vm2, %v3125_v35  ;;  %v2606_v13 = vpop.f32.mrf.mxu1  ;;  %15583 = vmatmul.mubr.msk.bf16.gmra.mxu1 %vm522_vm2, %v3860_v51  ;;  %v16669_v51 = vld [vmem:[%s17160_s18 + $0x58] sm:$0xff]  }
 0x1b4   : > { %v2179_v22 = vadd.f32 %v1982_v48, %v17477_v31  ;;  %15496 = vmatprep.mubr.msk.bf16.mxu0 %vm17070_vm1, %v20752_v33  ;;  %v17803_v59 = vadd.f32 %v2606_v13, %v2177_v4  ;;  %15586 = vmatprep.mubr.msk.bf16.mxu1 %vm17070_vm1, %v20752_v33  ;;  %v3134_v31 = vsel %vm3054_vm6, %v3124_v2, %v3133_v19  ;;  %v16666_v13 = vld [vmem:[%s17160_s18 + $0x48] sm:$0xff]   ;;  %v3148_v2 = vshll.u32 %v16669_v51, 16 }
 0x1b5   : > { %v15302_v44 = vpop.f32.mrf.mxu0  ;;  %v15392_v29 = vpop.f32.mrf.mxu1  ;;  %v3862_v4 = vsel %vm3847_vm7, %v3859_v63, %v3861_v45  ;;  %v3863_v18 = vrot.slane %v16666_v13, 3  ;;  %v3143_v56 = vsel %vm3054_vm6, %v3133_v19, %v3142_v49 }
 0x1b7   : > { %v1985_v20 = vpop.f32.mrf.mxu0  ;;  %v2609_v35 = vpop.f32.mrf.mxu1  ;;  %v3864_v13 = vsel %vm3847_vm7, %v3861_v45, %v3863_v18 }
 0x1b8   : > { %v2180_v54 = vadd.f32 %v1985_v20, %v17488_v42  ;;  %v17810_v15 = vadd.f32 %v2609_v35, %v2178_v12  ;;  %v3145_v42 = vshrl.u32 %v16669_v51, 16  ;;  %v16671_v51 = vld [vmem:[%s17160_s18 + $0x60] sm:$0xff]  }
 0x1b9   : > { %v15303_v46 = vpop.f32.mrf.mxu0  ;;  %v15393_v8 = vpop.f32.mrf.mxu1 }
 0x1bb   : > { %v1990_v48 = vpop.f32.mrf.mxu0  ;;  %15497 = vmatmul.mubr.msk.bf16.gmra.mxu0 %vm522_vm2, %v3134_v31  ;;  %v2614_v44 = vpop.f32.mrf.mxu1  ;;  %15587 = vmatmul.mubr.msk.bf16.gmra.mxu1 %vm522_vm2, %v3862_v4  ;;  %v3147_v31 = vrot.slane %v3145_v42, 2  ;;  %v3154_v42 = vshrl.u32 %v16671_v51, 16 }
 0x1bc   : > { %v2181_v9 = vadd.f32 %v1990_v48, %v17496_v52  ;;  %15500 = vmatprep.mubr.msk.bf16.mxu0 %vm17070_vm1, %v20752_v33  ;;  %v17819_v12 = vadd.f32 %v2614_v44, %v2179_v22  ;;  %15590 = vmatprep.mubr.msk.bf16.mxu1 %vm17070_vm1, %v20752_v33  ;;  %v13773_v52 = vld [vmem:[%s20741_s2 + $0xe] sm:$0x3]  ;;  %v3150_v22 = vrot.slane %v3148_v2, 3  ;;  %v16668_v48 = vld [vmem:[%s17160_s18 + $0x50] sm:$0xff]   ;;  %v3157_v2 = vshll.u32 %v16671_v51, 16 }
 0x1bd   : > { %v15306_v63 = vpop.f32.mrf.mxu0  ;;  %v15396_v29 = vpop.f32.mrf.mxu1  ;;  %v5315_v46 = vsel %vm592_vm0, %v13773_v52, 0 }
 0x1be   : > { %15749 = vmatpush3.bf16.msra.mxu1 %v5315_v46 }
 0x1bf   : > { %v1993_v20 = vpop.f32.mrf.mxu0  ;;  %v2617_v30 = vpop.f32.mrf.mxu1 }
 0x1c0   : > { %v2182_v35 = vadd.f32 %v1993_v20, %v17502_v60  ;;  %v17830_v4 = vadd.f32 %v2617_v30, %v2180_v54  ;;  %v3151_v54 = vor.u32 %v3150_v22, %v3147_v31  ;;  %v3865_v20 = vrot.slane %v16668_v48, 3  ;;  %v16673_v31 = vld [vmem:[%s17160_s18 + $0x68] sm:$0xff]  }
 0x1c1   : > { %v15307_v8 = vpop.f32.mrf.mxu0  ;;  %v15397_v19 = vpop.f32.mrf.mxu1 }
 0x1c2   : > { %v3152_v46 = vsel %vm3054_vm6, %v3142_v49, %v3151_v54  ;;  %v3156_v8 = vrot.slane %v3154_v42, 2  ;;  %v16670_v19 = vld [vmem:[%s17160_s18 + $0x58] sm:$0xff]   ;;  %v3166_v42 = vshll.u32 %v16673_v31, 16 }
 0x1c3   : > { %v1998_v44 = vpop.f32.mrf.mxu0  ;;  %15501 = vmatmul.mubr.msk.bf16.gmra.mxu0 %vm522_vm2, %v3143_v56  ;;  %v2622_v63 = vpop.f32.mrf.mxu1  ;;  %15591 = vmatmul.mubr.msk.bf16.gmra.mxu1 %vm522_vm2, %v3864_v13  ;;  %v3159_v13 = vrot.slane %v3157_v2, 3 }
 0x1c4   : > { %v2183_v60 = vadd.f32 %v1998_v44, %v17510_v6  ;;  %15504 = vmatprep.mubr.msk.bf16.mxu0 %vm17070_vm1, %v20752_v33  ;;  %v17839_v45 = vadd.f32 %v2622_v63, %v2181_v9  ;;  %15594 = vmatprep.mubr.msk.bf16.mxu1 %vm17070_vm1, %v20752_v33  ;;  %v3866_v9 = vsel %vm3847_vm7, %v3863_v18, %v3865_v20 }
 0x1c5   : > { %v15310_v29 = vpop.f32.mrf.mxu0  ;;  %v15400_v56 = vpop.f32.mrf.mxu1  ;;  %v3160_v49 = vor.u32 %v3159_v13, %v3156_v8  ;;  %v16675_v8 = vld [vmem:[%s17160_s18 + $0x70] sm:$0xff]  }
 0x1c6   : > { %v3867_v29 = vrot.slane %v16670_v19, 3 }
 0x1c7   : > { %v2001_v52 = vpop.f32.mrf.mxu0  ;;  %v2625_v30 = vpop.f32.mrf.mxu1 }
 0x1c8   : > { %v2184_v6 = vadd.f32 %v2001_v52, %v17516_v16  ;;  %v17846_v22 = vadd.f32 %v2625_v30, %v2182_v35  ;;  %v3163_v35 = vshrl.u32 %v16673_v31, 16 }
 0x1c9   : > { %v15311_v51 = vpop.f32.mrf.mxu0  ;;  %v15401_v44 = vpop.f32.mrf.mxu1 }
 0x1ca   : > { %v3165_v51 = vrot.slane %v3163_v35, 2  ;;  %v16672_v44 = vld [vmem:[%s17160_s18 + $0x60] sm:$0xff]   ;;  %v3175_v35 = vshll.u32 %v16675_v8, 16 }
 0x1cb   : > { %v2006_v63 = vpop.f32.mrf.mxu0  ;;  %15505 = vmatmul.mubr.msk.bf16.gmra.mxu0 %vm522_vm2, %v3152_v46  ;;  %v2630_v48 = vpop.f32.mrf.mxu1  ;;  %15595 = vmatmul.mubr.msk.bf16.gmra.mxu1 %vm522_vm2, %v3866_v9  ;;  %v3161_v46 = vsel %vm3054_vm6, %v3151_v54, %v3160_v49  ;;  %v3168_v9 = vrot.slane %v3166_v42, 3 }
 0x1cc   : > { %v2185_v16 = vadd.f32 %v2006_v63, %v17524_v26  ;;  %15508 = vmatprep.mubr.msk.bf16.mxu0 %vm17070_vm1, %v20752_v33  ;;  %v17855_v2 = vadd.f32 %v2630_v48, %v2183_v60  ;;  %15598 = vmatprep.mubr.msk.bf16.mxu1 %vm17070_vm1, %v20752_v33  ;;  %v3868_v60 = vsel %vm3847_vm7, %v3865_v20, %v3867_v29 }
 0x1cd   : > { %v15314_v18 = vpop.f32.mrf.mxu0  ;;  %v15404_v56 = vpop.f32.mrf.mxu1  ;;  %v3169_v54 = vor.u32 %v3168_v9, %v3165_v51  ;;  %v16677_v51 = vld [vmem:[%s17160_s18 + $0x78] sm:$0xff]  }
 0x1ce   : > { %v3869_v18 = vrot.slane %v16672_v44, 3 }
 0x1cf   : > { %v2009_v52 = vpop.f32.mrf.mxu0  ;;  %v2633_v30 = vpop.f32.mrf.mxu1 }
 0x1d0   : > { %v2186_v26 = vadd.f32 %v2009_v52, %v17530_v37  ;;  %v17862_v13 = vadd.f32 %v2633_v30, %v2184_v6  ;;  %v3172_v6 = vshrl.u32 %v16675_v8, 16 }
 0x1d1   : > { %v15315_v31 = vpop.f32.mrf.mxu0  ;;  %v15405_v63 = vpop.f32.mrf.mxu1 }
 0x1d2   : > { %v3174_v31 = vrot.slane %v3172_v6, 2  ;;  %v16674_v63 = vld [vmem:[%s17160_s18 + $0x68] sm:$0xff]   ;;  %v3184_v6 = vshll.u32 %v16677_v51, 16 }
 0x1d3   : > { %v2014_v48 = vpop.f32.mrf.mxu0  ;;  %15509 = vmatmul.mubr.msk.bf16.gmra.mxu0 %vm522_vm2, %v3161_v46  ;;  %v2638_v19 = vpop.f32.mrf.mxu1  ;;  %15599 = vmatmul.mubr.msk.bf16.gmra.mxu1 %vm522_vm2, %v3868_v60  ;;  %v3170_v46 = vsel %vm3054_vm6, %v3160_v49, %v3169_v54  ;;  %v3177_v60 = vrot.slane %v3175_v35, 3 }
 0x1d4   : > { %v2187_v37 = vadd.f32 %v2014_v48, %v17538_v47  ;;  %15512 = vmatprep.mubr.msk.bf16.mxu0 %vm17070_vm1, %v20752_v33  ;;  %v17871_v42 = vadd.f32 %v2638_v19, %v2185_v16  ;;  %15602 = vmatprep.mubr.msk.bf16.mxu1 %vm17070_vm1, %v20752_v33  ;;  %v3870_v16 = vsel %vm3847_vm7, %v3867_v29, %v3869_v18 }
 0x1d5   : > { %v15318_v20 = vpop.f32.mrf.mxu0  ;;  %v15408_v56 = vpop.f32.mrf.mxu1  ;;  %v3178_v49 = vor.u32 %v3177_v60, %v3174_v31  ;;  %v16679_v31 = vld [vmem:[%s17160_s18 + $0x80] sm:$0xff]  }
 0x1d6   : > { %v3871_v20 = vrot.slane %v16674_v63, 3 }
 0x1d7   : > { %v2017_v52 = vpop.f32.mrf.mxu0  ;;  %v2641_v30 = vpop.f32.mrf.mxu1 }
 0x1d8   : > { %v2188_v47 = vadd.f32 %v2017_v52, %v17544_v57  ;;  %v17878_v9 = vadd.f32 %v2641_v30, %v2186_v26  ;;  %v3181_v26 = vshrl.u32 %v16677_v51, 16 }
 0x1d9   : > { %v15319_v8 = vpop.f32.mrf.mxu0  ;;  %v15409_v48 = vpop.f32.mrf.mxu1 }
 0x1da   : > { %v3183_v8 = vrot.slane %v3181_v26, 2  ;;  %v16676_v48 = vld [vmem:[%s17160_s18 + $0x70] sm:$0xff]   ;;  %v3193_v26 = vshll.u32 %v16679_v31, 16 }
 0x1db   : > { %v2022_v19 = vpop.f32.mrf.mxu0  ;;  %15513 = vmatmul.mubr.msk.bf16.gmra.mxu0 %vm522_vm2, %v3170_v46  ;;  %v2646_v44 = vpop.f32.mrf.mxu1  ;;  %15603 = vmatmul.mubr.msk.bf16.gmra.mxu1 %vm522_vm2, %v3870_v16  ;;  %v3179_v46 = vsel %vm3054_vm6, %v3169_v54, %v3178_v49  ;;  %v3186_v16 = vrot.slane %v3184_v6, 3 }
 0x1dc   : > { %v2189_v57 = vadd.f32 %v2022_v19, %v17552_v5  ;;  %15516 = vmatprep.mubr.msk.bf16.mxu0 %vm17070_vm1, %v20752_v33  ;;  %v17887_v35 = vadd.f32 %v2646_v44, %v2187_v37  ;;  %15606 = vmatprep.mubr.msk.bf16.mxu1 %vm17070_vm1, %v20752_v33  ;;  %v3872_v37 = vsel %vm3847_vm7, %v3869_v18, %v3871_v20 }
 0x1dd   : > { %v15322_v29 = vpop.f32.mrf.mxu0  ;;  %v15412_v56 = vpop.f32.mrf.mxu1  ;;  %v3187_v54 = vor.u32 %v3186_v16, %v3183_v8  ;;  %v16681_v8 = vld [vmem:[%s17160_s18 + $0x88] sm:$0xff]  }
 0x1de   : > { %v3873_v29 = vrot.slane %v16676_v48, 3 }
 0x1df   : > { %v2025_v52 = vpop.f32.mrf.mxu0  ;;  %v2649_v30 = vpop.f32.mrf.mxu1 }
 0x1e0   : > { %v2190_v5 = vadd.f32 %v2025_v52, %v17558_v17  ;;  %v17894_v60 = vadd.f32 %v2649_v30, %v2188_v47  ;;  %v3190_v47 = vshrl.u32 %v16679_v31, 16 }
 0x1e1   : > { %v15323_v51 = vpop.f32.mrf.mxu0  ;;  %v15413_v19 = vpop.f32.mrf.mxu1 }
 0x1e2   : > { %v3192_v51 = vrot.slane %v3190_v47, 2  ;;  %v16678_v19 = vld [vmem:[%s17160_s18 + $0x78] sm:$0xff]   ;;  %v3202_v47 = vshll.u32 %v16681_v8, 16 }
 0x1e3   : > { %v2030_v44 = vpop.f32.mrf.mxu0  ;;  %15517 = vmatmul.mubr.msk.bf16.gmra.mxu0 %vm522_vm2, %v3179_v46  ;;  %v2654_v63 = vpop.f32.mrf.mxu1  ;;  %15607 = vmatmul.mubr.msk.bf16.gmra.mxu1 %vm522_vm2, %v3872_v37  ;;  %v3188_v46 = vsel %vm3054_vm6, %v3178_v49, %v3187_v54  ;;  %v3195_v37 = vrot.slane %v3193_v26, 3 }
 0x1e4   : > { %v2191_v17 = vadd.f32 %v2030_v44, %v17566_v28  ;;  %15520 = vmatprep.mubr.msk.bf16.mxu0 %vm17070_vm1, %v20752_v33  ;;  %v17903_v6 = vadd.f32 %v2654_v63, %v2189_v57  ;;  %15610 = vmatprep.mubr.msk.bf16.mxu1 %vm17070_vm1, %v20752_v33  ;;  %v3874_v57 = vsel %vm3847_vm7, %v3871_v20, %v3873_v29 }
 0x1e5   : > { %v15326_v18 = vpop.f32.mrf.mxu0  ;;  %v15416_v56 = vpop.f32.mrf.mxu1  ;;  %v3196_v49 = vor.u32 %v3195_v37, %v3192_v51  ;;  %v16683_v51 = vld [vmem:[%s17160_s18 + $0x90] sm:$0xff]  }
 0x1e6   : > { %v3875_v18 = vrot.slane %v16678_v19, 3 }
 0x1e7   : > { %v2033_v52 = vpop.f32.mrf.mxu0  ;;  %v2657_v30 = vpop.f32.mrf.mxu1 }
 0x1e8   : > { %v2192_v28 = vadd.f32 %v2033_v52, %v17572_v40  ;;  %v17910_v16 = vadd.f32 %v2657_v30, %v2190_v5  ;;  %v3199_v5 = vshrl.u32 %v16681_v8, 16 }
 0x1e9   : > { %v15327_v31 = vpop.f32.mrf.mxu0  ;;  %v15417_v44 = vpop.f32.mrf.mxu1 }
 0x1ea   : > { %v3201_v31 = vrot.slane %v3199_v5, 2  ;;  %v16680_v44 = vld [vmem:[%s17160_s18 + $0x80] sm:$0xff]   ;;  %v3211_v5 = vshll.u32 %v16683_v51, 16 }
 0x1eb   : > { %v2038_v63 = vpop.f32.mrf.mxu0  ;;  %15521 = vmatmul.mubr.msk.bf16.gmra.mxu0 %vm522_vm2, %v3188_v46  ;;  %v2662_v48 = vpop.f32.mrf.mxu1  ;;  %15611 = vmatmul.mubr.msk.bf16.gmra.mxu1 %vm522_vm2, %v3874_v57  ;;  %v3197_v46 = vsel %vm3054_vm6, %v3187_v54, %v3196_v49  ;;  %v3204_v57 = vrot.slane %v3202_v47, 3 }
 0x1ec   : > { %v2193_v40 = vadd.f32 %v2038_v63, %v17580_v53  ;;  %15524 = vmatprep.mubr.msk.bf16.mxu0 %vm17070_vm1, %v20752_v33  ;;  %v17919_v26 = vadd.f32 %v2662_v48, %v2191_v17  ;;  %15614 = vmatprep.mubr.msk.bf16.mxu1 %vm17070_vm1, %v20752_v33  ;;  %v3876_v17 = vsel %vm3847_vm7, %v3873_v29, %v3875_v18 }
 0x1ed   : > { %v15330_v20 = vpop.f32.mrf.mxu0  ;;  %v15420_v56 = vpop.f32.mrf.mxu1  ;;  %v3205_v54 = vor.u32 %v3204_v57, %v3201_v31  ;;  %v16685_v31 = vld [vmem:[%s17160_s18 + $0x98] sm:$0xff]  }
 0x1ee   : > { %v3877_v20 = vrot.slane %v16680_v44, 3 }
 0x1ef   : > { %v2041_v52 = vpop.f32.mrf.mxu0  ;;  %v2665_v30 = vpop.f32.mrf.mxu1 }
 0x1f0   : > { %v2194_v53 = vadd.f32 %v2041_v52, %v17586_v0  ;;  %v17926_v37 = vadd.f32 %v2665_v30, %v2192_v28  ;;  %v3208_v28 = vshrl.u32 %v16683_v51, 16 }
 0x1f1   : > { %v15331_v8 = vpop.f32.mrf.mxu0  ;;  %v15421_v63 = vpop.f32.mrf.mxu1 }
 0x1f2   : > { %v3210_v8 = vrot.slane %v3208_v28, 2  ;;  %v16682_v63 = vld [vmem:[%s17160_s18 + $0x88] sm:$0xff]   ;;  %v3220_v28 = vshll.u32 %v16685_v31, 16 }
 0x1f3   : > { %v2046_v48 = vpop.f32.mrf.mxu0  ;;  %15525 = vmatmul.mubr.msk.bf16.gmra.mxu0 %vm522_vm2, %v3197_v46  ;;  %v2670_v19 = vpop.f32.mrf.mxu1  ;;  %15615 = vmatmul.mubr.msk.bf16.gmra.mxu1 %vm522_vm2, %v3876_v17  ;;  %v3206_v46 = vsel %vm3054_vm6, %v3196_v49, %v3205_v54  ;;  %v3213_v17 = vrot.slane %v3211_v5, 3 }
 0x1f4   : > { %v2195_v0 = vadd.f32 %v2046_v48, %v17594_v14  ;;  %15528 = vmatprep.mubr.msk.bf16.mxu0 %vm17070_vm1, %v20752_v33  ;;  %v17935_v47 = vadd.f32 %v2670_v19, %v2193_v40  ;;  %15618 = vmatprep.mubr.msk.bf16.mxu1 %vm17070_vm1, %v20752_v33  ;;  %v3878_v40 = vsel %vm3847_vm7, %v3875_v18, %v3877_v20 }
 0x1f5   : > { %v15334_v29 = vpop.f32.mrf.mxu0  ;;  %v15424_v56 = vpop.f32.mrf.mxu1  ;;  %v3214_v49 = vor.u32 %v3213_v17, %v3210_v8  ;;  %v16687_v8 = vld [vmem:[%s17160_s18 + $0xa0] sm:$0xff]  }
 0x1f6   : > { %v3879_v29 = vrot.slane %v16682_v63, 3 }
 0x1f7   : > { %v2049_v52 = vpop.f32.mrf.mxu0  ;;  %v2673_v30 = vpop.f32.mrf.mxu1 }
 0x1f8   : > { %v2196_v14 = vadd.f32 %v2049_v52, %v17600_v27  ;;  %v17942_v57 = vadd.f32 %v2673_v30, %v2194_v53  ;;  %v3217_v53 = vshrl.u32 %v16685_v31, 16 }
 0x1f9   : > { %v15335_v51 = vpop.f32.mrf.mxu0  ;;  %v15425_v48 = vpop.f32.mrf.mxu1 }
 0x1fa   : > { %v3219_v51 = vrot.slane %v3217_v53, 2  ;;  %v16684_v48 = vld [vmem:[%s17160_s18 + $0x90] sm:$0xff]   ;;  %v3229_v53 = vshll.u32 %v16687_v8, 16 }
 0x1fb   : > { %v2054_v19 = vpop.f32.mrf.mxu0  ;;  %15529 = vmatmul.mubr.msk.bf16.gmra.mxu0 %vm522_vm2, %v3206_v46  ;;  %v2678_v44 = vpop.f32.mrf.mxu1  ;;  %15619 = vmatmul.mubr.msk.bf16.gmra.mxu1 %vm522_vm2, %v3878_v40  ;;  %v3215_v46 = vsel %vm3054_vm6, %v3205_v54, %v3214_v49  ;;  %v3222_v40 = vrot.slane %v3220_v28, 3 }
 0x1fc   : > { %v2197_v27 = vadd.f32 %v2054_v19, %v17608_v41  ;;  %15532 = vmatprep.mubr.msk.bf16.mxu0 %vm17070_vm1, %v20752_v33  ;;  %v17951_v5 = vadd.f32 %v2678_v44, %v2195_v0  ;;  %15622 = vmatprep.mubr.msk.bf16.mxu1 %vm17070_vm1, %v20752_v33  ;;  %v3880_v0 = vsel %vm3847_vm7, %v3877_v20, %v3879_v29 }
 0x1fd   : > { %v15338_v18 = vpop.f32.mrf.mxu0  ;;  %v15428_v56 = vpop.f32.mrf.mxu1  ;;  %v3223_v54 = vor.u32 %v3222_v40, %v3219_v51  ;;  %v16689_v51 = vld [vmem:[%s17160_s18 + $0xa8] sm:$0xff]  }
 0x1fe   : > { %v3881_v18 = vrot.slane %v16684_v48, 3 }
 0x1ff   : > { %v2057_v52 = vpop.f32.mrf.mxu0  ;;  %v2681_v30 = vpop.f32.mrf.mxu1 }
 0x200   : > { %v2198_v41 = vadd.f32 %v2057_v52, %v17614_v55  ;;  %v17958_v17 = vadd.f32 %v2681_v30, %v2196_v14  ;;  %v3226_v14 = vshrl.u32 %v16687_v8, 16 }
 0x201   : > { %v15339_v31 = vpop.f32.mrf.mxu0  ;;  %v15429_v19 = vpop.f32.mrf.mxu1 }
 0x202   : > { %v3228_v31 = vrot.slane %v3226_v14, 2  ;;  %v16686_v19 = vld [vmem:[%s17160_s18 + $0x98] sm:$0xff]   ;;  %v3238_v14 = vshll.u32 %v16689_v51, 16 }
 0x203   : > { %v2062_v44 = vpop.f32.mrf.mxu0  ;;  %15533 = vmatmul.mubr.msk.bf16.gmra.mxu0 %vm522_vm2, %v3215_v46  ;;  %v2686_v63 = vpop.f32.mrf.mxu1  ;;  %15623 = vmatmul.mubr.msk.bf16.gmra.mxu1 %vm522_vm2, %v3880_v0  ;;  %v3224_v46 = vsel %vm3054_vm6, %v3214_v49, %v3223_v54  ;;  %v3231_v0 = vrot.slane %v3229_v53, 3 }
 0x204   : > { %v2199_v55 = vadd.f32 %v2062_v44, %v17622_v7  ;;  %15536 = vmatprep.mubr.msk.bf16.mxu0 %vm17070_vm1, %v20752_v33  ;;  %v17967_v28 = vadd.f32 %v2686_v63, %v2197_v27  ;;  %15626 = vmatprep.mubr.msk.bf16.mxu1 %vm17070_vm1, %v20752_v33  ;;  %v3882_v27 = vsel %vm3847_vm7, %v3879_v29, %v3881_v18 }
 0x205   : > { %v15342_v20 = vpop.f32.mrf.mxu0  ;;  %v15432_v56 = vpop.f32.mrf.mxu1  ;;  %v3232_v49 = vor.u32 %v3231_v0, %v3228_v31  ;;  %v16691_v31 = vld [vmem:[%s17160_s18 + $0xb0] sm:$0xff]  }
 0x206   : > { %v3883_v20 = vrot.slane %v16686_v19, 3 }
 0x207   : > { %v2065_v52 = vpop.f32.mrf.mxu0  ;;  %v2689_v30 = vpop.f32.mrf.mxu1 }
 0x208   : > { %v2200_v7 = vadd.f32 %v2065_v52, %v17628_v21  ;;  %v17974_v40 = vadd.f32 %v2689_v30, %v2198_v41  ;;  %v3235_v41 = vshrl.u32 %v16689_v51, 16 }
 0x209   : > { %v15343_v8 = vpop.f32.mrf.mxu0  ;;  %v15433_v44 = vpop.f32.mrf.mxu1 }
 0x20a   : > { %v3237_v8 = vrot.slane %v3235_v41, 2  ;;  %v16688_v44 = vld [vmem:[%s17160_s18 + $0xa0] sm:$0xff]   ;;  %v3247_v41 = vshll.u32 %v16691_v31, 16 }
 0x20b   : > { %v2070_v63 = vpop.f32.mrf.mxu0  ;;  %15537 = vmatmul.mubr.msk.bf16.gmra.mxu0 %vm522_vm2, %v3224_v46  ;;  %v2694_v48 = vpop.f32.mrf.mxu1  ;;  %15627 = vmatmul.mubr.msk.bf16.gmra.mxu1 %vm522_vm2, %v3882_v27  ;;  %v3233_v46 = vsel %vm3054_vm6, %v3223_v54, %v3232_v49  ;;  %v3240_v27 = vrot.slane %v3238_v14, 3 }
 0x20c   : > { %v2201_v21 = vadd.f32 %v2070_v63, %v17636_v36  ;;  %15540 = vmatprep.mubr.msk.bf16.mxu0 %vm17070_vm1, %v20752_v33  ;;  %v17983_v53 = vadd.f32 %v2694_v48, %v2199_v55  ;;  %15630 = vmatprep.mubr.msk.bf16.mxu1 %vm17070_vm1, %v20752_v33  ;;  %v3884_v55 = vsel %vm3847_vm7, %v3881_v18, %v3883_v20 }
 0x20d   : > { %v15346_v29 = vpop.f32.mrf.mxu0  ;;  %v15436_v56 = vpop.f32.mrf.mxu1  ;;  %v3241_v54 = vor.u32 %v3240_v27, %v3237_v8  ;;  %v16693_v8 = vld [vmem:[%s17160_s18 + $0xb8] sm:$0x7f]  }
 0x20e   : > { %v3885_v29 = vrot.slane %v16688_v44, 3 }
 0x20f   : > { %v2073_v52 = vpop.f32.mrf.mxu0  ;;  %v2697_v30 = vpop.f32.mrf.mxu1 }
 0x210   : > { %v2202_v36 = vadd.f32 %v2073_v52, %v17642_v50  ;;  %v17990_v0 = vadd.f32 %v2697_v30, %v2200_v7  ;;  %v3244_v7 = vshrl.u32 %v16691_v31, 16 }
 0x211   : > { %v15347_v51 = vpop.f32.mrf.mxu0  ;;  %v15437_v63 = vpop.f32.mrf.mxu1 }
 0x212   : > { %v3246_v51 = vrot.slane %v3244_v7, 2  ;;  %v16690_v63 = vld [vmem:[%s17160_s18 + $0xa8] sm:$0xff]   ;;  %v3253_v7 = vshrl.u32 %v16693_v8, 16 }
 0x213   : > { %v2078_v48 = vpop.f32.mrf.mxu0  ;;  %15541 = vmatmul.mubr.msk.bf16.gmra.mxu0 %vm522_vm2, %v3233_v46  ;;  %v2702_v19 = vpop.f32.mrf.mxu1  ;;  %15631 = vmatmul.mubr.msk.bf16.gmra.mxu1 %vm522_vm2, %v3884_v55  ;;  %v3242_v46 = vsel %vm3054_vm6, %v3232_v49, %v3241_v54  ;;  %v3249_v55 = vrot.slane %v3247_v41, 3 }
 0x214   : > { %v2203_v50 = vadd.f32 %v2078_v48, %v17650_v3  ;;  %15544 = vmatprep.mubr.msk.bf16.mxu0 %vm17070_vm1, %v20752_v33  ;;  %v17999_v14 = vadd.f32 %v2702_v19, %v2201_v21  ;;  %15634 = vmatprep.mubr.msk.bf16.mxu1 %vm17070_vm1, %v20752_v33  ;;  %v3886_v21 = vsel %vm3847_vm7, %v3883_v20, %v3885_v29 }
 0x215   : > { %v15350_v18 = vpop.f32.mrf.mxu0  ;;  %v15440_v56 = vpop.f32.mrf.mxu1  ;;  %v3250_v49 = vor.u32 %v3249_v55, %v3246_v51 }
 0x216   : > { %v3887_v18 = vrot.slane %v16690_v63, 3 }
 0x217   : > { %v2081_v52 = vpop.f32.mrf.mxu0  ;;  %v2705_v30 = vpop.f32.mrf.mxu1 }
 0x218   : > { %v2204_v3 = vadd.f32 %v2081_v52, %v17656_v23  ;;  %v18006_v27 = vadd.f32 %v2705_v30, %v2202_v36  ;;  %v3256_v36 = vshll.u32 %v16693_v8, 16  ;;  %v16692_v8 = vld [vmem:[%s17160_s18 + $0xb0] sm:$0xff]  }
 0x219   : > { %v15351_v31 = vpop.f32.mrf.mxu0  ;;  %v15441_v48 = vpop.f32.mrf.mxu1 }
 0x21a   : > { %v3255_v31 = vrot.slane %v3253_v7, 2 }
 0x21b   : > { %v2086_v19 = vpop.f32.mrf.mxu0  ;;  %15545 = vmatmul.mubr.msk.bf16.gmra.mxu0 %vm522_vm2, %v3242_v46  ;;  %v2710_v44 = vpop.f32.mrf.mxu1  ;;  %15635 = vmatmul.mubr.msk.bf16.gmra.mxu1 %vm522_vm2, %v3886_v21  ;;  %v3258_v21 = vrot.slane %v3256_v36, 3 }
 0x21c   : > { %v2205_v23 = vadd.f32 %v2086_v19, %v17664_v43  ;;  %15548 = vmatprep.mubr.msk.bf16.mxu0 %vm17070_vm1, %v20752_v33  ;;  %v18015_v41 = vadd.f32 %v2710_v44, %v2203_v50  ;;  %15638 = vmatprep.mubr.msk.bf16.mxu1 %vm17070_vm1, %v20752_v33  ;;  %v3251_v43 = vsel %vm3054_vm6, %v3241_v54, %v3250_v49 }
 0x21d   : > { %v15354_v20 = vpop.f32.mrf.mxu0  ;;  %v15444_v56 = vpop.f32.mrf.mxu1  ;;  %v3888_v50 = vsel %vm3847_vm7, %v3885_v29, %v3887_v18  ;;  %v3259_v54 = vor.u32 %v3258_v21, %v3255_v31  ;;  %v3889_v29 = vrot.slane %v16692_v8, 3  ;;  %v16694_v31 = vld [vmem:[%s17160_s18 + $0xb8] sm:$0x7f]  }
 0x21f   : > { %v2089_v52 = vpop.f32.mrf.mxu0  ;;  %v2713_v30 = vpop.f32.mrf.mxu1 }
 0x220   : > { %v2206_v46 = vadd.f32 %v2089_v52, %v17671_v61  ;;  %v18021_v51 = vadd.f32 %v2713_v30, %v2204_v3  ;;  %v3260_v52 = vsel %vm3054_vm6, %v3250_v49, %v3259_v54 }
 0x221   : > { %v15355_v55 = vpop.f32.mrf.mxu0  ;;  %v15445_v48 = vpop.f32.mrf.mxu1 }
 0x223   : > { %v2094_v19 = vpop.f32.mrf.mxu0  ;;  %15549 = vmatmul.mubr.msk.bf16.gmra.mxu0 %vm522_vm2, %v3251_v43  ;;  %v2718_v63 = vpop.f32.mrf.mxu1  ;;  %15639 = vmatmul.mubr.msk.bf16.gmra.mxu1 %vm522_vm2, %v3888_v50  ;;  %v3890_v43 = vsel %vm3847_vm7, %v3887_v18, %v3889_v29  ;;  %v3891_v18 = vrot.slane %v16694_v31, 3 }
 0x224   : > { %v2207_v61 = vadd.f32 %v2094_v19, %v17679_v25  ;;  %15552 = vmatprep.mubr.msk.bf16.mxu0 %vm17070_vm1, %v20752_v33  ;;  %v18030_v3 = vadd.f32 %v2718_v63, %v2205_v23  ;;  %15642 = vmatprep.mubr.msk.bf16.mxu1 %vm17070_vm1, %v20752_v33  ;;  %v20755_v19 = vld [vmem:[#allocation4_spill] sm:$0xff] }
 0x225   : > { %v15358_v44 = vpop.f32.mrf.mxu0  ;;  %v15448_v7 = vpop.f32.mrf.mxu1 }
 0x227   : > { %v2097_v36 = vpop.f32.mrf.mxu0  ;;  %v2721_v20 = vpop.f32.mrf.mxu1 }
 0x228   : > { %v2208_v56 = vadd.f32 %v2097_v36, %v17684_v62  ;;  %v18036_v30 = vadd.f32 %v2721_v20, %v2206_v46  ;;  %v16696_v36 = vld [vmem:[%s17160_s18 + $0x14] sm:$0xff]  }
 0x229   : > { %v15359_v25 = vpop.f32.mrf.mxu0  ;;  %v15449_v23 = vpop.f32.mrf.mxu1 }
 0x22a   : > { %v20756_v25 = vld [vmem:[#allocation5_spill] sm:$0xff]  ;;  %v5065_v23 = vshll.u32 %v16696_v36, 16 }
 0x22b   : > { %v2102_v21 = vpop.f32.mrf.mxu0  ;;  %15553 = vmatmul.mubr.msk.bf16.gmra.mxu0 %vm522_vm2, %v3260_v52  ;;  %v2726_v55 = vpop.f32.mrf.mxu1  ;;  %15643 = vmatmul.mubr.msk.bf16.gmra.mxu1 %vm522_vm2, %v3890_v43 }
 0x22c   : > { %v2209_v50 = vadd.f32 %v2102_v21, %v17691_v24  ;;  %15556 = vmatprep.mubr.msk.bf16.mxu0 %vm17070_vm1, %v20752_v33  ;;  %v18045_v62 = vadd.f32 %v2726_v55, %v2207_v61  ;;  %15646 = vmatprep.mubr.msk.bf16.mxu1 %vm17070_vm1, %v20752_v33  ;;  %v3892_v24 = vsel %vm3847_vm7, %v3889_v29, %v3891_v18  ;;  %v16697_v29 = vld [vmem:[%s17160_s18 + $0x1c] sm:$0xff]  }
 0x22d   : > { %v15362_v49 = vpop.f32.mrf.mxu0  ;;  %v15452_v46 = vpop.f32.mrf.mxu1 }
 0x22e   : > { %v16695_v49 = vld [vmem:[%s17160_s18 + $0x14] sm:$0xff]  }
 0x22f   : > { %v2105_v8 = vpop.f32.mrf.mxu0  ;;  %v2729_v48 = vpop.f32.mrf.mxu1 }
 0x230   : > { %v2210_v63 = vadd.f32 %v2105_v8, %v20755_v19  ;;  %v18050_v44 = vadd.f32 %v2729_v48, %v2208_v56  ;;  %v5063_v19 = vshrl.u32 %v16696_v36, 16 }
 0x231   : > { %v15363_v7 = vpop.f32.mrf.mxu0  ;;  %v15453_v61 = vpop.f32.mrf.mxu1 }
 0x232   : > { %v5067_v7 = vrot.slane %v5065_v23, 1 }
 0x233   : > { %v2110_v20 = vpop.f32.mrf.mxu0  ;;  %15557 = vmatmul.mubr.msk.bf16.gmra.mxu0 %vm522_vm2, %v3259_v54  ;;  %v2734_v52 = vpop.f32.mrf.mxu1  ;;  %15647 = vmatmul.mubr.msk.bf16.gmra.mxu1 %vm522_vm2, %v3892_v24  ;;  %v13820_v54 = vld [vmem:[%s20741_s2 + $0x10] sm:$0x3]  ;;  %v5070_v24 = vshll.u32 %v16697_v29, 16 }
 0x234   : > { %v2211_v43 = vadd.f32 %v2110_v20, %v20756_v25  ;;  %15656 = vmatprep.mubr.msk.bf16.mxu0 %vm17070_vm1, %v20752_v33  ;;  %v18059_v31 = vadd.f32 %v2734_v52, %v2209_v50  ;;  %15650 = vmatprep.mubr.msk.bf16.mxu1 %vm17070_vm1, %v20752_v33  ;;  %v5946_v20 = vsel %vm592_vm0, %v13820_v54, 0  ;;  %v5068_v36 = vor.u32 %v5067_v7, %v5063_v19  ;;  %v16698_v54 = vld [vmem:[%s17160_s18 + $0x1c] sm:$0xff]   ;;  %v20757_v7 = vld [vmem:[#allocation6_spill] sm:$0xff] }
 0x235   : > { %v15366_v56 = vpop.f32.mrf.mxu0  ;;  %v15456_v21 = vpop.f32.mrf.mxu1  ;;  %v5072_v23 = vrot.slane %v5070_v24, 1 }
 0x236   : > { %v16699_v21 = vld [vmem:[%s17160_s18 + $0x24] sm:$0xff]  }
 0x237   : > { %v2113_v55 = vpop.f32.mrf.mxu0  ;;  %v2737_v46 = vpop.f32.mrf.mxu1 }
 0x238   : > { %v2212_v8 = vadd.f32 %v2113_v55, %v17716_v34  ;;  %v18069_v48 = vadd.f32 %v2737_v46, %v2210_v63 }
 0x239   : > { %v15367_v50 = vpop.f32.mrf.mxu0  ;;  %v15457_v61 = vpop.f32.mrf.mxu1 }
 0x23a   : > { %v5073_v50 = vsel %vm1020_vm3, %v5068_v36, %v5072_v23  ;;  %v5078_v61 = vshll.u32 %v16699_v21, 16  ;;  %v16701_v36 = vld [vmem:[%s17160_s18 + $0x2c] sm:$0xff]  }
 0x23b   : > { %v2118_v52 = vpop.f32.mrf.mxu0  ;;  %15657 = vmatmul.mubr.msk.bf16.vlgmr.msra.gmra.mxu0 %vm522_vm2, %v16695_v49  ;;  %v2742_v25 = vpop.f32.mrf.mxu1  ;;  %15651 = vmatmul.mubr.msk.bf16.gmra.mxu1 %vm522_vm2, %v3891_v18 }
 0x23c   : > { %v2213_v56 = vadd.f32 %v2118_v52, %v17725_v38  ;;  %15660 = vmatprep.mubr.msk.bf16.mxu0 %vm17070_vm1, %v20752_v33  ;;  %v18077_v34 = vadd.f32 %v2742_v25, %v2211_v43  ;;  %15750 = vmatprep.mubr.msk.bf16.mxu1 %vm17070_vm1, %v20752_v33  ;;  %v5074_v43 = vshrl.u32 %v16697_v29, 16 }
 0x23d   : > { %v15370_v63 = vpop.f32.mrf.mxu0  ;;  %15843 = vmatpush3.bf16.msra.mxu0 %v5946_v20  ;;  %v15460_v55 = vpop.f32.mrf.mxu1 }
 0x23e   : > { %v5076_v29 = vor.u32 %v5074_v43, %v5072_v23  ;;  %v5080_v63 = vrot.slane %v5078_v61, 1 }
 0x23f   : > { %v2121_v49 = vpop.f32.mrf.mxu0  ;;  %v2745_v46 = vpop.f32.mrf.mxu1 }
 0x240   : > { %v18083_v18 = vadd.f32 %v2745_v46, %v2212_v8 }
 0x241   : > { %v15371_v38 = vpop.f32.mrf.mxu0  ;;  %v15461_v52 = vpop.f32.mrf.mxu1 }
 0x242   : > { %v5081_v52 = vsel %vm1020_vm3, %v5076_v29, %v5080_v63  ;;  %v16703_v29 = vld [vmem:[%s17160_s18 + $0x34] sm:$0xff]  }
 0x243   : > { %v3367_v25 = vpop.f32.mrf.mxu0  ;;  %15661 = vmatmul.mubr.msk.bf16.gmra.mxu0 %vm522_vm2, %v16698_v54  ;;  %v2750_v19 = vpop.f32.mrf.mxu1  ;;  %15751 = vmatmul.mubr.msk.bf16.vlgmr.msra.gmra.mxu1 %vm522_vm2, %v5073_v50  ;;  %v16700_v54 = vld [vmem:[%s17160_s18 + $0x24] sm:$0xff]  }
 0x244   : > { %v3594_v24 = vadd.f32 %v3367_v25, %v20757_v7  ;;  %15664 = vmatprep.mubr.msk.bf16.mxu0 %vm17070_vm1, %v20752_v33  ;;  %v18091_v8 = vadd.f32 %v2750_v19, %v2213_v56  ;;  %15754 = vmatprep.mubr.msk.bf16.mxu1 %vm17070_vm1, %v20752_v33  ;;  %v5082_v25 = vshrl.u32 %v16699_v21, 16  ;;  %v5086_v56 = vshll.u32 %v16701_v36, 16 }
 0x245   : > { %v15470_v20 = vpop.f32.mrf.mxu0  ;;  %v15464_v55 = vpop.f32.mrf.mxu1 }
 0x246   : > { %v5084_v21 = vor.u32 %v5082_v25, %v5080_v63  ;;  %v5088_v20 = vrot.slane %v5086_v56, 1 }
 0x247   : > { %v3370_v49 = vpop.f32.mrf.mxu0  ;;  %v2753_v46 = vpop.f32.mrf.mxu1 }
 0x248   : > { %v3595_v38 = vadd.f32 %v3370_v49, %v17746_v58 }
 0x249   : > { %v15471_v50 = vpop.f32.mrf.mxu0  ;;  %v15465_v19 = vpop.f32.mrf.mxu1 }
 0x24a   : > { %v5090_v19 = vshrl.u32 %v16701_v36, 16 }
 0x24b   : > { %v3375_v7 = vpop.f32.mrf.mxu0  ;;  %15665 = vmatmul.mubr.msk.bf16.gmra.mxu0 %vm522_vm2, %v16700_v54  ;;  %v3999_v23 = vpop.f32.mrf.mxu1  ;;  %15755 = vmatmul.mubr.msk.bf16.gmra.mxu1 %vm522_vm2, %v5081_v52  ;;  %v16702_v54 = vld [vmem:[%s17160_s18 + $0x2c] sm:$0xff]  }
 0x24c   : > { %v3596_v43 = vadd.f32 %v3375_v7, %v17755_v11  ;;  %15668 = vmatprep.mubr.msk.bf16.mxu0 %vm17070_vm1, %v20752_v33  ;;  %v18104_v58 = vadd.f32 %v3999_v23, %v3594_v24  ;;  %15758 = vmatprep.mubr.msk.bf16.mxu1 %vm17070_vm1, %v20752_v33  ;;  %v5089_v24 = vsel %vm1020_vm3, %v5084_v21, %v5088_v20  ;;  %v5094_v7 = vshll.u32 %v16703_v29, 16  ;;  %v16705_v21 = vld [vmem:[%s17160_s18 + $0x3c] sm:$0xff]  }
 0x24d   : > { %v15474_v61 = vpop.f32.mrf.mxu0  ;;  %v15564_v55 = vpop.f32.mrf.mxu1  ;;  %v5092_v36 = vor.u32 %v5090_v19, %v5088_v20  ;;  %v20758_v19 = vld [vmem:[#allocation7_spill] sm:$0xff] }
 0x24e   : > { %v5096_v56 = vrot.slane %v5094_v7, 1 }
 0x24f   : > { %v3378_v49 = vpop.f32.mrf.mxu0  ;;  %v4002_v46 = vpop.f32.mrf.mxu1 }
 0x250   : > { %v3597_v50 = vadd.f32 %v3378_v49, %v17762_v32  ;;  %v18111_v52 = vadd.f32 %v4002_v46, %v3595_v38 }
 0x251   : > { %v15475_v11 = vpop.f32.mrf.mxu0  ;;  %v15565_v23 = vpop.f32.mrf.mxu1 }
 0x252   : > { %v5098_v23 = vshrl.u32 %v16703_v29, 16 }
 0x253   : > { %v3383_v61 = vpop.f32.mrf.mxu0  ;;  %15669 = vmatmul.mubr.msk.bf16.gmra.mxu0 %vm522_vm2, %v16702_v54  ;;  %v4007_v63 = vpop.f32.mrf.mxu1  ;;  %15759 = vmatmul.mubr.msk.bf16.gmra.mxu1 %vm522_vm2, %v5089_v24  ;;  %v16704_v54 = vld [vmem:[%s17160_s18 + $0x34] sm:$0xff]  }
 0x254   : > { %v3598_v25 = vadd.f32 %v3383_v61, %v17771_v10  ;;  %15672 = vmatprep.mubr.msk.bf16.mxu0 %vm17070_vm1, %v20752_v33  ;;  %v18119_v32 = vadd.f32 %v4007_v63, %v3596_v43  ;;  %15762 = vmatprep.mubr.msk.bf16.mxu1 %vm17070_vm1, %v20752_v33  ;;  %v5097_v43 = vsel %vm1020_vm3, %v5092_v36, %v5096_v56  ;;  %v5102_v61 = vshll.u32 %v16705_v21, 16 }
 0x255   : > { %v15478_v38 = vpop.f32.mrf.mxu0  ;;  %v15568_v55 = vpop.f32.mrf.mxu1  ;;  %v5100_v29 = vor.u32 %v5098_v23, %v5096_v56 }
 0x256   : > { %v5104_v36 = vrot.slane %v5102_v61, 1  ;;  %v16707_v55 = vld [vmem:[%s17160_s18 + $0x44] sm:$0xff]  }
 0x257   : > { %v3386_v49 = vpop.f32.mrf.mxu0  ;;  %v4010_v46 = vpop.f32.mrf.mxu1 }
 0x258   : > { %v3599_v11 = vadd.f32 %v3386_v49, %v17778_v1  ;;  %v18126_v24 = vadd.f32 %v4010_v46, %v3597_v50 }
 0x259   : > { %v15479_v10 = vpop.f32.mrf.mxu0  ;;  %v15569_v63 = vpop.f32.mrf.mxu1 }
 0x25b   : > { %v3391_v38 = vpop.f32.mrf.mxu0  ;;  %15673 = vmatmul.mubr.msk.bf16.gmra.mxu0 %vm522_vm2, %v16704_v54  ;;  %v4015_v20 = vpop.f32.mrf.mxu1  ;;  %15763 = vmatmul.mubr.msk.bf16.gmra.mxu1 %vm522_vm2, %v5097_v43  ;;  %v16706_v54 = vld [vmem:[%s17160_s18 + $0x3c] sm:$0xff]  }
 0x25c   : > { %v3600_v7 = vadd.f32 %v3391_v38, %v20758_v19  ;;  %15676 = vmatprep.mubr.msk.bf16.mxu0 %vm17070_vm1, %v20752_v33  ;;  %v18134_v1 = vadd.f32 %v4015_v20, %v3598_v25  ;;  %15766 = vmatprep.mubr.msk.bf16.mxu1 %vm17070_vm1, %v20752_v33  ;;  %v5105_v25 = vsel %vm1020_vm3, %v5100_v29, %v5104_v36  ;;  %v5106_v20 = vshrl.u32 %v16705_v21, 16  ;;  %v16709_v29 = vld [vmem:[%s17160_s18 + $0x4c] sm:$0xff]  }
 0x25d   : > { %v15482_v50 = vpop.f32.mrf.mxu0  ;;  %v15572_v49 = vpop.f32.mrf.mxu1  ;;  %v5110_v19 = vshll.u32 %v16707_v55, 16 }
 0x25e   : > { %20759 = vst [vmem:[#allocation4_spill] sm:$0xff] %v18134_v1  ;;  %v5108_v21 = vor.u32 %v5106_v20, %v5104_v36 }
 0x25f   : > { %v3394_v46 = vpop.f32.mrf.mxu0  ;;  %v4018_v10 = vpop.f32.mrf.mxu1  ;;  %v5112_v61 = vrot.slane %v5110_v19, 1 }
 0x260   : > { %v3601_v43 = vadd.f32 %v3394_v46, %v17794_v39  ;;  %v18141_v63 = vadd.f32 %v4018_v10, %v3599_v11 }
 0x261   : > { %v15483_v38 = vpop.f32.mrf.mxu0  ;;  %v15573_v50 = vpop.f32.mrf.mxu1 }
 0x262   : > { %v5118_v50 = vshll.u32 %v16709_v29, 16 }
 0x263   : > { %v3399_v1 = vpop.f32.mrf.mxu0  ;;  %15677 = vmatmul.mubr.msk.bf16.gmra.mxu0 %vm522_vm2, %v16706_v54  ;;  %v4023_v56 = vpop.f32.mrf.mxu1  ;;  %15767 = vmatmul.mubr.msk.bf16.gmra.mxu1 %vm522_vm2, %v5105_v25  ;;  %v16708_v54 = vld [vmem:[%s17160_s18 + $0x44] sm:$0xff]  }
 0x264   : > { %v3602_v23 = vadd.f32 %v3399_v1, %v17803_v59  ;;  %15680 = vmatprep.mubr.msk.bf16.mxu0 %vm17070_vm1, %v20752_v33  ;;  %v18149_v39 = vadd.f32 %v4023_v56, %v3600_v7  ;;  %15770 = vmatprep.mubr.msk.bf16.mxu1 %vm17070_vm1, %v20752_v33  ;;  %v5113_v7 = vsel %vm1020_vm3, %v5108_v21, %v5112_v61  ;;  %v5114_v1 = vshrl.u32 %v16707_v55, 16  ;;  %v16711_v21 = vld [vmem:[%s17160_s18 + $0x54] sm:$0xff]  }
 0x265   : > { %v15486_v11 = vpop.f32.mrf.mxu0  ;;  %v15576_v49 = vpop.f32.mrf.mxu1  ;;  %v5120_v19 = vrot.slane %v5118_v50, 1 }
 0x266   : > { %v5116_v55 = vor.u32 %v5114_v1, %v5112_v61 }
 0x267   : > { %v3402_v46 = vpop.f32.mrf.mxu0  ;;  %v4026_v10 = vpop.f32.mrf.mxu1 }
 0x268   : > { %v3603_v38 = vadd.f32 %v3402_v46, %v17810_v15  ;;  %v18156_v25 = vadd.f32 %v4026_v10, %v3601_v43 }
 0x269   : > { %v15487_v59 = vpop.f32.mrf.mxu0  ;;  %v15577_v56 = vpop.f32.mrf.mxu1 }
 0x26a   : > { %v5122_v56 = vshrl.u32 %v16709_v29, 16 }
 0x26b   : > { %v3407_v11 = vpop.f32.mrf.mxu0  ;;  %15681 = vmatmul.mubr.msk.bf16.gmra.mxu0 %vm522_vm2, %v16708_v54  ;;  %v4031_v36 = vpop.f32.mrf.mxu1  ;;  %15771 = vmatmul.mubr.msk.bf16.gmra.mxu1 %vm522_vm2, %v5113_v7  ;;  %v16710_v54 = vld [vmem:[%s17160_s18 + $0x4c] sm:$0xff]  }
 0x26c   : > { %v3604_v20 = vadd.f32 %v3407_v11, %v17819_v12  ;;  %15684 = vmatprep.mubr.msk.bf16.mxu0 %vm17070_vm1, %v20752_v33  ;;  %v18164_v15 = vadd.f32 %v4031_v36, %v3602_v23  ;;  %15774 = vmatprep.mubr.msk.bf16.mxu1 %vm17070_vm1, %v20752_v33  ;;  %v5121_v23 = vsel %vm1020_vm3, %v5116_v55, %v5120_v19  ;;  %v5126_v11 = vshll.u32 %v16711_v21, 16  ;;  %v16713_v55 = vld [vmem:[%s17160_s18 + $0x5c] sm:$0xff]  }
 0x26d   : > { %v15490_v43 = vpop.f32.mrf.mxu0  ;;  %v15580_v49 = vpop.f32.mrf.mxu1  ;;  %v5124_v29 = vor.u32 %v5122_v56, %v5120_v19 }
 0x26e   : > { %v5128_v50 = vrot.slane %v5126_v11, 1 }
 0x26f   : > { %v3410_v46 = vpop.f32.mrf.mxu0  ;;  %v4034_v10 = vpop.f32.mrf.mxu1 }
 0x270   : > { %v3605_v59 = vadd.f32 %v3410_v46, %v17830_v4  ;;  %v18171_v7 = vadd.f32 %v4034_v10, %v3603_v38 }
 0x271   : > { %v15491_v12 = vpop.f32.mrf.mxu0  ;;  %v15581_v36 = vpop.f32.mrf.mxu1 }
 0x272   : > { %v5130_v36 = vshrl.u32 %v16711_v21, 16 }
 0x273   : > { %v3415_v43 = vpop.f32.mrf.mxu0  ;;  %15685 = vmatmul.mubr.msk.bf16.gmra.mxu0 %vm522_vm2, %v16710_v54  ;;  %v4039_v61 = vpop.f32.mrf.mxu1  ;;  %15775 = vmatmul.mubr.msk.bf16.gmra.mxu1 %vm522_vm2, %v5121_v23  ;;  %v16712_v54 = vld [vmem:[%s17160_s18 + $0x54] sm:$0xff]  }
 0x274   : > { %v3606_v1 = vadd.f32 %v3415_v43, %v17839_v45  ;;  %15688 = vmatprep.mubr.msk.bf16.mxu0 %vm17070_vm1, %v20752_v33  ;;  %v18179_v4 = vadd.f32 %v4039_v61, %v3604_v20  ;;  %15778 = vmatprep.mubr.msk.bf16.mxu1 %vm17070_vm1, %v20752_v33  ;;  %v5129_v20 = vsel %vm1020_vm3, %v5124_v29, %v5128_v50  ;;  %v5134_v43 = vshll.u32 %v16713_v55, 16  ;;  %v16715_v29 = vld [vmem:[%s17160_s18 + $0x64] sm:$0xff]  }
 0x275   : > { %v15494_v38 = vpop.f32.mrf.mxu0  ;;  %v15584_v49 = vpop.f32.mrf.mxu1  ;;  %v5132_v21 = vor.u32 %v5130_v36, %v5128_v50 }
 0x276   : > { %v5136_v11 = vrot.slane %v5134_v43, 1 }
 0x277   : > { %v3418_v46 = vpop.f32.mrf.mxu0  ;;  %v4042_v10 = vpop.f32.mrf.mxu1 }
 0x278   : > { %v3607_v12 = vadd.f32 %v3418_v46, %v17846_v22  ;;  %v18186_v23 = vadd.f32 %v4042_v10, %v3605_v59 }
 0x279   : > { %v15495_v45 = vpop.f32.mrf.mxu0  ;;  %v15585_v61 = vpop.f32.mrf.mxu1 }
 0x27a   : > { %v5138_v61 = vshrl.u32 %v16713_v55, 16 }
 0x27b   : > { %v3423_v38 = vpop.f32.mrf.mxu0  ;;  %15689 = vmatmul.mubr.msk.bf16.gmra.mxu0 %vm522_vm2, %v16712_v54  ;;  %v4047_v19 = vpop.f32.mrf.mxu1  ;;  %15779 = vmatmul.mubr.msk.bf16.gmra.mxu1 %vm522_vm2, %v5129_v20  ;;  %v16714_v54 = vld [vmem:[%s17160_s18 + $0x5c] sm:$0xff]  }
 0x27c   : > { %v3608_v56 = vadd.f32 %v3423_v38, %v17855_v2  ;;  %15692 = vmatprep.mubr.msk.bf16.mxu0 %vm17070_vm1, %v20752_v33  ;;  %v18194_v22 = vadd.f32 %v4047_v19, %v3606_v1  ;;  %15782 = vmatprep.mubr.msk.bf16.mxu1 %vm17070_vm1, %v20752_v33  ;;  %v5137_v1 = vsel %vm1020_vm3, %v5132_v21, %v5136_v11  ;;  %v5142_v38 = vshll.u32 %v16715_v29, 16  ;;  %v16717_v21 = vld [vmem:[%s17160_s18 + $0x6c] sm:$0xff]  }
 0x27d   : > { %v15498_v59 = vpop.f32.mrf.mxu0  ;;  %v15588_v49 = vpop.f32.mrf.mxu1  ;;  %v5140_v55 = vor.u32 %v5138_v61, %v5136_v11 }
 0x27e   : > { %v5144_v43 = vrot.slane %v5142_v38, 1 }
 0x27f   : > { %v3426_v46 = vpop.f32.mrf.mxu0  ;;  %v4050_v10 = vpop.f32.mrf.mxu1 }
 0x280   : > { %v3609_v45 = vadd.f32 %v3426_v46, %v17862_v13  ;;  %v18201_v20 = vadd.f32 %v4050_v10, %v3607_v12 }
 0x281   : > { %v15499_v2 = vpop.f32.mrf.mxu0  ;;  %v15589_v19 = vpop.f32.mrf.mxu1 }
 0x282   : > { %v5146_v19 = vshrl.u32 %v16715_v29, 16 }
 0x283   : > { %v3431_v59 = vpop.f32.mrf.mxu0  ;;  %15693 = vmatmul.mubr.msk.bf16.gmra.mxu0 %vm522_vm2, %v16714_v54  ;;  %v4055_v50 = vpop.f32.mrf.mxu1  ;;  %15783 = vmatmul.mubr.msk.bf16.gmra.mxu1 %vm522_vm2, %v5137_v1  ;;  %v16716_v54 = vld [vmem:[%s17160_s18 + $0x64] sm:$0xff]  }
 0x284   : > { %v3610_v36 = vadd.f32 %v3431_v59, %v17871_v42  ;;  %15696 = vmatprep.mubr.msk.bf16.mxu0 %vm17070_vm1, %v20752_v33  ;;  %v18209_v13 = vadd.f32 %v4055_v50, %v3608_v56  ;;  %15786 = vmatprep.mubr.msk.bf16.mxu1 %vm17070_vm1, %v20752_v33  ;;  %v5145_v56 = vsel %vm1020_vm3, %v5140_v55, %v5144_v43  ;;  %v5150_v59 = vshll.u32 %v16717_v21, 16  ;;  %v16719_v55 = vld [vmem:[%s17160_s18 + $0x74] sm:$0xff]  }
 0x285   : > { %v15502_v12 = vpop.f32.mrf.mxu0  ;;  %v15592_v49 = vpop.f32.mrf.mxu1  ;;  %v5148_v29 = vor.u32 %v5146_v19, %v5144_v43 }
 0x286   : > { %v5152_v38 = vrot.slane %v5150_v59, 1 }
 0x287   : > { %v3434_v46 = vpop.f32.mrf.mxu0  ;;  %v4058_v10 = vpop.f32.mrf.mxu1 }
 0x288   : > { %v3611_v2 = vadd.f32 %v3434_v46, %v17878_v9  ;;  %v18216_v1 = vadd.f32 %v4058_v10, %v3609_v45 }
 0x289   : > { %v15503_v42 = vpop.f32.mrf.mxu0  ;;  %v15593_v50 = vpop.f32.mrf.mxu1 }
 0x28a   : > { %v5154_v50 = vshrl.u32 %v16717_v21, 16 }
 0x28b   : > { %v3439_v12 = vpop.f32.mrf.mxu0  ;;  %15697 = vmatmul.mubr.msk.bf16.gmra.mxu0 %vm522_vm2, %v16716_v54  ;;  %v4063_v11 = vpop.f32.mrf.mxu1  ;;  %15787 = vmatmul.mubr.msk.bf16.gmra.mxu1 %vm522_vm2, %v5145_v56  ;;  %v16718_v54 = vld [vmem:[%s17160_s18 + $0x6c] sm:$0xff]  }
 0x28c   : > { %v3612_v61 = vadd.f32 %v3439_v12, %v17887_v35  ;;  %15700 = vmatprep.mubr.msk.bf16.mxu0 %vm17070_vm1, %v20752_v33  ;;  %v18224_v9 = vadd.f32 %v4063_v11, %v3610_v36  ;;  %15790 = vmatprep.mubr.msk.bf16.mxu1 %vm17070_vm1, %v20752_v33  ;;  %v5153_v36 = vsel %vm1020_vm3, %v5148_v29, %v5152_v38  ;;  %v5158_v12 = vshll.u32 %v16719_v55, 16  ;;  %v16721_v29 = vld [vmem:[%s17160_s18 + $0x7c] sm:$0xff]  }
 0x28d   : > { %v15506_v45 = vpop.f32.mrf.mxu0  ;;  %v15596_v49 = vpop.f32.mrf.mxu1  ;;  %v5156_v21 = vor.u32 %v5154_v50, %v5152_v38 }
 0x28e   : > { %v5160_v59 = vrot.slane %v5158_v12, 1 }
 0x28f   : > { %v3442_v46 = vpop.f32.mrf.mxu0  ;;  %v4066_v10 = vpop.f32.mrf.mxu1 }
 0x290   : > { %v3613_v42 = vadd.f32 %v3442_v46, %v17894_v60  ;;  %v18231_v56 = vadd.f32 %v4066_v10, %v3611_v2 }
 0x291   : > { %v15507_v35 = vpop.f32.mrf.mxu0  ;;  %v15597_v11 = vpop.f32.mrf.mxu1 }
 0x292   : > { %v5162_v11 = vshrl.u32 %v16719_v55, 16 }
 0x293   : > { %v3447_v45 = vpop.f32.mrf.mxu0  ;;  %15701 = vmatmul.mubr.msk.bf16.gmra.mxu0 %vm522_vm2, %v16718_v54  ;;  %v4071_v43 = vpop.f32.mrf.mxu1  ;;  %15791 = vmatmul.mubr.msk.bf16.gmra.mxu1 %vm522_vm2, %v5153_v36  ;;  %v16720_v54 = vld [vmem:[%s17160_s18 + $0x74] sm:$0xff]  }
 0x294   : > { %v3614_v19 = vadd.f32 %v3447_v45, %v17903_v6  ;;  %15704 = vmatprep.mubr.msk.bf16.mxu0 %vm17070_vm1, %v20752_v33  ;;  %v18239_v60 = vadd.f32 %v4071_v43, %v3612_v61  ;;  %15794 = vmatprep.mubr.msk.bf16.mxu1 %vm17070_vm1, %v20752_v33  ;;  %v5161_v61 = vsel %vm1020_vm3, %v5156_v21, %v5160_v59  ;;  %v5166_v45 = vshll.u32 %v16721_v29, 16  ;;  %v16723_v21 = vld [vmem:[%s17160_s18 + $0x84] sm:$0xff]  }
 0x295   : > { %v15510_v2 = vpop.f32.mrf.mxu0  ;;  %v15600_v49 = vpop.f32.mrf.mxu1  ;;  %v5164_v55 = vor.u32 %v5162_v11, %v5160_v59 }
 0x296   : > { %v5168_v12 = vrot.slane %v5166_v45, 1 }
 0x297   : > { %v3450_v46 = vpop.f32.mrf.mxu0  ;;  %v4074_v10 = vpop.f32.mrf.mxu1 }
 0x298   : > { %v3615_v35 = vadd.f32 %v3450_v46, %v17910_v16  ;;  %v18246_v36 = vadd.f32 %v4074_v10, %v3613_v42 }
 0x299   : > { %v15511_v6 = vpop.f32.mrf.mxu0  ;;  %v15601_v43 = vpop.f32.mrf.mxu1 }
 0x29a   : > { %v5170_v43 = vshrl.u32 %v16721_v29, 16 }
 0x29b   : > { %v3455_v2 = vpop.f32.mrf.mxu0  ;;  %15705 = vmatmul.mubr.msk.bf16.gmra.mxu0 %vm522_vm2, %v16720_v54  ;;  %v4079_v38 = vpop.f32.mrf.mxu1  ;;  %15795 = vmatmul.mubr.msk.bf16.gmra.mxu1 %vm522_vm2, %v5161_v61  ;;  %v16722_v54 = vld [vmem:[%s17160_s18 + $0x7c] sm:$0xff]  }
 0x29c   : > { %v3616_v50 = vadd.f32 %v3455_v2, %v17919_v26  ;;  %15708 = vmatprep.mubr.msk.bf16.mxu0 %vm17070_vm1, %v20752_v33  ;;  %v18254_v16 = vadd.f32 %v4079_v38, %v3614_v19  ;;  %15798 = vmatprep.mubr.msk.bf16.mxu1 %vm17070_vm1, %v20752_v33  ;;  %v5169_v19 = vsel %vm1020_vm3, %v5164_v55, %v5168_v12  ;;  %v5174_v2 = vshll.u32 %v16723_v21, 16  ;;  %v16725_v55 = vld [vmem:[%s17160_s18 + $0x8c] sm:$0xff]  }
 0x29d   : > { %v15514_v42 = vpop.f32.mrf.mxu0  ;;  %v15604_v49 = vpop.f32.mrf.mxu1  ;;  %v5172_v29 = vor.u32 %v5170_v43, %v5168_v12 }
 0x29e   : > { %v5176_v45 = vrot.slane %v5174_v2, 1 }
 0x29f   : > { %v3458_v46 = vpop.f32.mrf.mxu0  ;;  %v4082_v10 = vpop.f32.mrf.mxu1 }
 0x2a0   : > { %v3617_v6 = vadd.f32 %v3458_v46, %v17926_v37  ;;  %v18261_v61 = vadd.f32 %v4082_v10, %v3615_v35 }
 0x2a1   : > { %v15515_v26 = vpop.f32.mrf.mxu0  ;;  %v15605_v38 = vpop.f32.mrf.mxu1 }
 0x2a2   : > { %v5178_v38 = vshrl.u32 %v16723_v21, 16 }
 0x2a3   : > { %v3463_v42 = vpop.f32.mrf.mxu0  ;;  %15709 = vmatmul.mubr.msk.bf16.gmra.mxu0 %vm522_vm2, %v16722_v54  ;;  %v4087_v59 = vpop.f32.mrf.mxu1  ;;  %15799 = vmatmul.mubr.msk.bf16.gmra.mxu1 %vm522_vm2, %v5169_v19  ;;  %v16724_v54 = vld [vmem:[%s17160_s18 + $0x84] sm:$0xff]  }
 0x2a4   : > { %v3618_v11 = vadd.f32 %v3463_v42, %v17935_v47  ;;  %15712 = vmatprep.mubr.msk.bf16.mxu0 %vm17070_vm1, %v20752_v33  ;;  %v18269_v37 = vadd.f32 %v4087_v59, %v3616_v50  ;;  %15802 = vmatprep.mubr.msk.bf16.mxu1 %vm17070_vm1, %v20752_v33  ;;  %v5177_v50 = vsel %vm1020_vm3, %v5172_v29, %v5176_v45  ;;  %v5182_v42 = vshll.u32 %v16725_v55, 16  ;;  %v16727_v29 = vld [vmem:[%s17160_s18 + $0x94] sm:$0xff]  }
 0x2a5   : > { %v15518_v35 = vpop.f32.mrf.mxu0  ;;  %v15608_v49 = vpop.f32.mrf.mxu1  ;;  %v5180_v21 = vor.u32 %v5178_v38, %v5176_v45 }
 0x2a6   : > { %v5184_v2 = vrot.slane %v5182_v42, 1 }
 0x2a7   : > { %v3466_v46 = vpop.f32.mrf.mxu0  ;;  %v4090_v10 = vpop.f32.mrf.mxu1 }
 0x2a8   : > { %v3619_v26 = vadd.f32 %v3466_v46, %v17942_v57  ;;  %v18276_v19 = vadd.f32 %v4090_v10, %v3617_v6 }
 0x2a9   : > { %v15519_v47 = vpop.f32.mrf.mxu0  ;;  %v15609_v59 = vpop.f32.mrf.mxu1 }
 0x2aa   : > { %v5186_v59 = vshrl.u32 %v16725_v55, 16 }
 0x2ab   : > { %v3471_v35 = vpop.f32.mrf.mxu0  ;;  %15713 = vmatmul.mubr.msk.bf16.gmra.mxu0 %vm522_vm2, %v16724_v54  ;;  %v4095_v12 = vpop.f32.mrf.mxu1  ;;  %15803 = vmatmul.mubr.msk.bf16.gmra.mxu1 %vm522_vm2, %v5177_v50  ;;  %v16726_v54 = vld [vmem:[%s17160_s18 + $0x8c] sm:$0xff]  }
 0x2ac   : > { %v3620_v43 = vadd.f32 %v3471_v35, %v17951_v5  ;;  %15716 = vmatprep.mubr.msk.bf16.mxu0 %vm17070_vm1, %v20752_v33  ;;  %v18284_v57 = vadd.f32 %v4095_v12, %v3618_v11  ;;  %15806 = vmatprep.mubr.msk.bf16.mxu1 %vm17070_vm1, %v20752_v33  ;;  %v5185_v11 = vsel %vm1020_vm3, %v5180_v21, %v5184_v2  ;;  %v5190_v35 = vshll.u32 %v16727_v29, 16  ;;  %v16729_v21 = vld [vmem:[%s17160_s18 + $0x9c] sm:$0xff]  }
 0x2ad   : > { %v15522_v6 = vpop.f32.mrf.mxu0  ;;  %v15612_v49 = vpop.f32.mrf.mxu1  ;;  %v5188_v55 = vor.u32 %v5186_v59, %v5184_v2 }
 0x2ae   : > { %v5192_v42 = vrot.slane %v5190_v35, 1  ;;  %v5194_v35 = vshrl.u32 %v16727_v29, 16 }
 0x2af   : > { %v3474_v46 = vpop.f32.mrf.mxu0  ;;  %v4098_v10 = vpop.f32.mrf.mxu1 }
 0x2b0   : > { %v3621_v47 = vadd.f32 %v3474_v46, %v17958_v17  ;;  %v18291_v50 = vadd.f32 %v4098_v10, %v3619_v26  ;;  %v17071_v46 = vmov 0   ;;  %v16728_v10 = vld [vmem:[%s17160_s18 + $0x94] sm:$0xff]   ;;  %v5193_v59 = vsel %vm1020_vm3, %v5188_v55, %v5192_v42 }
 0x2b1   : > { %v15523_v5 = vpop.f32.mrf.mxu0  ;;  %v15613_v12 = vpop.f32.mrf.mxu1  ;;  %16555 = vset.pattern.permute.xlu0 %v17071_v46  ;;  %6982 = vst [vmem:[#allocation3 + $0xb4] sm:$0xf] %v17071_v46  ;;  %16556 = vset.pattern.permute.xlu1 %v17071_v46  ;;  %v5196_v46 = vor.u32 %v5194_v35, %v5192_v42 }
 0x2b2   : > { %v5198_v12 = vshll.u32 %v16729_v21, 16 }
 0x2b3   : > { %v3479_v6 = vpop.f32.mrf.mxu0  ;;  %15717 = vmatmul.mubr.msk.bf16.gmra.mxu0 %vm522_vm2, %v16726_v54  ;;  %v4103_v45 = vpop.f32.mrf.mxu1  ;;  %15807 = vmatmul.mubr.msk.bf16.gmra.mxu1 %vm522_vm2, %v5185_v11 }
 0x2b4   : > { %v3622_v38 = vadd.f32 %v3479_v6, %v17967_v28  ;;  %15720 = vmatprep.mubr.msk.bf16.mxu0 %vm17070_vm1, %v20752_v33  ;;  %v18299_v17 = vadd.f32 %v4103_v45, %v3620_v43  ;;  %15810 = vmatprep.mubr.msk.bf16.mxu1 %vm17070_vm1, %v20752_v33  ;;  %v6441_v28 = vld [vmem:[%s20740_s1] sm:$0xff]  ;;  %v6442_v45 = vld [vmem:[%s20740_s1 + $0x8] sm:$0xff] }
 0x2b5   : > { %v15526_v26 = vpop.f32.mrf.mxu0  ;;  %v15616_v49 = vpop.f32.mrf.mxu1  ;;  %6488 = vperm.xlu0 %16555, %v6441_v28   ;;  %v5200_v28 = vrot.slane %v5198_v12, 1 }
 0x2b6   : > { %v6443_v26 = vld [vmem:[%s20740_s1 + $0x10] sm:$0xff] }
 0x2b7   : > { %v3482_v54 = vpop.f32.mrf.mxu0  ;;  %v4106_v43 = vpop.f32.mrf.mxu1  ;;  %6498 = vperm.xlu1 %16556, %v6443_v26   ;;  %v5201_v12 = vsel %vm1020_vm3, %v5196_v46, %v5200_v28 }
 0x2b8   : > { %v3623_v5 = vadd.f32 %v3482_v54, %v17974_v40  ;;  %v18309_v11 = vadd.f32 %v4106_v43, %v3621_v47  ;;  %v18328_v54 = vld [vmem:[%s17160_s18 + $0xa4] sm:$0xff]  }
 0x2b9   : > { %v15527_v2 = vpop.f32.mrf.mxu0  ;;  %v15617_v6 = vpop.f32.mrf.mxu1  ;;  %6493 = vperm.xlu0 %16555, %v6442_v45   ;;  %v6445_v43 = vld [vmem:[%s20740_s1 + $0x20] sm:$0xff]  ;;  %v5202_v45 = vshrl.u32 %v16729_v21, 16  ;;  %v5206_v26 = vshll.u32 %v18328_v54, 16 }
 0x2ba   : > { %v16730_v2 = vld [vmem:[%s17160_s18 + $0x9c] sm:$0xff]  }
 0x2bb   : > { %v3487_v49 = vpop.f32.mrf.mxu0  ;;  %15721 = vmatmul.mubr.msk.bf16.gmra.mxu0 %vm522_vm2, %v16728_v10  ;;  %v4111_v40 = vpop.f32.mrf.mxu1  ;;  %15811 = vmatmul.mubr.msk.bf16.gmra.mxu1 %vm522_vm2, %v5193_v59 }
 0x2bc   : > { %v3624_v29 = vadd.f32 %v3487_v49, %v17983_v53  ;;  %15724 = vmatprep.mubr.msk.bf16.mxu0 %vm17070_vm1, %v20752_v33  ;;  %v18323_v47 = vadd.f32 %v4111_v40, %v3622_v38  ;;  %15814 = vmatprep.mubr.msk.bf16.mxu1 %vm17070_vm1, %v20752_v33  ;;  %v6444_v53 = vld [vmem:[%s20740_s1 + $0x18] sm:$0xff]  ;;  %v6447_v40 = vld [vmem:[%s20740_s1 + $0x30] sm:$0xff] }
 0x2bd   : > { %v15530_v55 = vpop.f32.mrf.mxu0  ;;  %v15620_v10 = vpop.f32.mrf.mxu1  ;;  %6508 = vperm.xlu0 %16555, %v6445_v43   ;;  %6503 = vperm.xlu1 %16556, %v6444_v53   ;;  %v5204_v43 = vor.u32 %v5202_v45, %v5200_v28  ;;  %v5208_v53 = vrot.slane %v5206_v26, 1 }
 0x2be   : > { %v6446_v55 = vld [vmem:[%s20740_s1 + $0x28] sm:$0xff] }
 0x2bf   : > { %v3490_v38 = vpop.f32.mrf.mxu0  ;;  %v4114_v59 = vpop.f32.mrf.mxu1 }
 0x2c0   : > { %v3625_v6 = vadd.f32 %v3490_v38, %v17990_v0  ;;  %v18338_v42 = vadd.f32 %v4114_v59, %v3623_v5  ;;  %v18358_v38 = vld [vmem:[%s17160_s18 + $0xac] sm:$0xff]   ;;  %v7024_v59 = vld [vmem:[%s20743_s4] sm:$0x3] }
 0x2c1   : > { %v15531_v35 = vpop.f32.mrf.mxu0  ;;  %v15621_v49 = vpop.f32.mrf.mxu1  ;;  %6518 = vperm.xlu0 %16555, %v6447_v40   ;;  %6513 = vperm.xlu1 %16556, %v6446_v55   ;;  %v7230_v28 = vsel %vm592_vm0, %v7024_v59, 0  ;;  %v5209_v55 = vsel %vm1020_vm3, %v5204_v43, %v5208_v53 }
 0x2c2   : > { %16526 = vmatprep.subr.msk.bf16.mxu1 %vm592_vm0, %v7024_v59 }
 0x2c3   : > { %v3495_v0 = vpop.f32.mrf.mxu0  ;;  %15725 = vmatmul.mubr.msk.bf16.gmra.mxu0 %vm522_vm2, %v16730_v2  ;;  %v4119_v5 = vpop.f32.mrf.mxu1  ;;  %15815 = vmatmul.mubr.msk.bf16.gmra.mxu1 %vm522_vm2, %v5201_v12  ;;  %v16732_v12 = vld [vmem:[%s17160_s18 + $0xa4] sm:$0xff]  }
 0x2c4   : > { %v3626_v21 = vadd.f32 %v3495_v0, %v17999_v14  ;;  %15728 = vmatprep.mubr.msk.bf16.mxu0 %vm17070_vm1, %v20752_v33  ;;  %v18353_v46 = vadd.f32 %v4119_v5, %v3624_v29  ;;  %15818 = vmatprep.mubr.msk.bf16.mxu1 %vm17070_vm1, %v20752_v33  ;;  %v6449_v14 = vld [vmem:[%s20740_s1 + $0x40] sm:$0xff]  ;;  %v6448_v29 = vld [vmem:[%s20740_s1 + $0x38] sm:$0xff]  ;;  %v5210_v0 = vshrl.u32 %v18328_v54, 16  ;;  %v5214_v5 = vshll.u32 %v18358_v38, 16 }
 0x2c5   : > { %v15534_v10 = vpop.f32.mrf.mxu0  ;;  %v15624_v2 = vpop.f32.mrf.mxu1  ;;  %6528 = vperm.xlu0 %16555, %v6449_v14   ;;  %15937 = vmatpush3.bf16.msra.mxu1 %v7230_v28  ;;  %v16735_v28 = vld [vmem:[%s17160_s18 + $0xb4] sm:$0xff]  }
 0x2c6   : > { %6523 = vperm.xlu1 %16556, %v6448_v29   ;;  %v6451_v2 = vld [vmem:[%s20740_s1 + $0x50] sm:$0xff]  ;;  %v5212_v29 = vor.u32 %v5210_v0, %v5208_v53 }
 0x2c7   : > { %v3498_v35 = vpop.f32.mrf.mxu0  ;;  %v4122_v45 = vpop.f32.mrf.mxu1 }
 0x2c8   : > { %v3627_v26 = vadd.f32 %v3498_v35, %v18006_v27  ;;  %v18373_v49 = vadd.f32 %v4122_v45, %v3625_v6  ;;  %v6450_v27 = vld [vmem:[%s20740_s1 + $0x48] sm:$0xff]  ;;  %v5216_v35 = vrot.slane %v5214_v5, 1  ;;  %v6453_v45 = vld [vmem:[%s20740_s1 + $0x60] sm:$0xff]  ;;  %v5218_v5 = vshrl.u32 %v18358_v38, 16 }
 0x2c9   : > { %v15535_v40 = vpop.f32.mrf.mxu0  ;;  %v15625_v10 = vpop.f32.mrf.mxu1  ;;  %6538 = vperm.xlu0 %16555, %v6451_v2  }
 0x2ca   : > { %6533 = vperm.xlu1 %16556, %v6450_v27   ;;  %v5217_v0 = vsel %vm1020_vm3, %v5212_v29, %v5216_v35  ;;  %v5222_v27 = vshll.u32 %v16735_v28, 16 }
 0x2cb   : > { %v3503_v6 = vpop.f32.mrf.mxu0  ;;  %15729 = vmatmul.mubr.msk.bf16.gmra.mxu0 %vm522_vm2, %v16732_v12  ;;  %v4127_v43 = vpop.f32.mrf.mxu1  ;;  %15819 = vmatmul.mubr.msk.bf16.gmra.mxu1 %vm522_vm2, %v5209_v55 }
 0x2cc   : > { %v3628_v54 = vadd.f32 %v3503_v6, %v18015_v41  ;;  %15732 = vmatprep.mubr.msk.bf16.mxu0 %vm17070_vm1, %v20752_v33  ;;  %v18389_v59 = vadd.f32 %v4127_v43, %v3626_v21  ;;  %15822 = vmatprep.mubr.msk.bf16.mxu1 %vm17070_vm1, %v20752_v33  ;;  %v6452_v41 = vld [vmem:[%s20740_s1 + $0x58] sm:$0xff]  ;;  %v16734_v21 = vld [vmem:[%s17160_s18 + $0xac] sm:$0xff]  }
 0x2cd   : > { %v15538_v14 = vpop.f32.mrf.mxu0  ;;  %v15628_v12 = vpop.f32.mrf.mxu1  ;;  %6548 = vperm.xlu0 %16555, %v6453_v45   ;;  %v6455_v43 = vld [vmem:[%s20740_s1 + $0x70] sm:$0xff]  ;;  %v5220_v45 = vor.u32 %v5218_v5, %v5216_v35 }
 0x2ce   : > { %6543 = vperm.xlu1 %16556, %v6452_v41   ;;  %v6454_v14 = vld [vmem:[%s20740_s1 + $0x68] sm:$0xff]  ;;  %v5224_v41 = vrot.slane %v5222_v27, 1  ;;  %v5226_v27 = vshrl.u32 %v16735_v28, 16 }
 0x2cf   : > { %v3506_v40 = vpop.f32.mrf.mxu0  ;;  %v4130_v55 = vpop.f32.mrf.mxu1 }
 0x2d0   : > { %v3629_v10 = vadd.f32 %v3506_v40, %v18021_v51  ;;  %v18402_v2 = vadd.f32 %v4130_v55, %v3627_v26  ;;  %v16737_v40 = vld [vmem:[%s17160_s18 + $0xbc] sm:$0xff]   ;;  %v5225_v5 = vsel %vm1020_vm3, %v5220_v45, %v5224_v41 }
 0x2d1   : > { %v15539_v53 = vpop.f32.mrf.mxu0  ;;  %v15629_v6 = vpop.f32.mrf.mxu1  ;;  %6558 = vperm.xlu0 %16555, %v6455_v43   ;;  %v6457_v55 = vld [vmem:[%s20740_s1 + $0x80] sm:$0xff] }
 0x2d2   : > { %6553 = vperm.xlu1 %16556, %v6454_v14   ;;  %v5230_v14 = vshll.u32 %v16737_v40, 16 }
 0x2d3   : > { %v3511_v51 = vpop.f32.mrf.mxu0  ;;  %15733 = vmatmul.mubr.msk.bf16.gmra.mxu0 %vm522_vm2, %v16734_v21  ;;  %v4135_v26 = vpop.f32.mrf.mxu1  ;;  %15823 = vmatmul.mubr.msk.bf16.gmra.mxu1 %vm522_vm2, %v5217_v0 }
 0x2d4   : > { %v3630_v38 = vadd.f32 %v3511_v51, %v18030_v3  ;;  %15736 = vmatprep.mubr.msk.bf16.mxu0 %vm17070_vm1, %v20752_v33  ;;  %v18417_v29 = vadd.f32 %v4135_v26, %v3628_v54  ;;  %15826 = vmatprep.mubr.msk.bf16.mxu1 %vm17070_vm1, %v20752_v33  ;;  %v6456_v3 = vld [vmem:[%s20740_s1 + $0x78] sm:$0xff]  ;;  %v6459_v26 = vld [vmem:[%s20740_s1 + $0x90] sm:$0xff] }
 0x2d5   : > { %v15542_v12 = vpop.f32.mrf.mxu0  ;;  %v15632_v21 = vpop.f32.mrf.mxu1  ;;  %v16736_v54 = vld [vmem:[%s17160_s18 + $0xb4] sm:$0xff]   ;;  %6568 = vperm.xlu0 %16555, %v6457_v55   ;;  %v5228_v55 = vor.u32 %v5226_v27, %v5224_v41 }
 0x2d6   : > { %6563 = vperm.xlu1 %16556, %v6456_v3   ;;  %v6458_v12 = vld [vmem:[%s20740_s1 + $0x88] sm:$0xff]  ;;  %v5232_v3 = vrot.slane %v5230_v14, 1 }
 0x2d7   : > { %v3514_v53 = vpop.f32.mrf.mxu0  ;;  %v4138_v0 = vpop.f32.mrf.mxu1 }
 0x2d8   : > { %v3631_v6 = vadd.f32 %v3514_v53, %v18036_v30  ;;  %v18430_v43 = vadd.f32 %v4138_v0, %v3629_v10  ;;  %v18449_v53 = vld [vmem:[%s17160_s18 + $0xc4] sm:$0x1f]   ;;  %v5233_v14 = vsel %vm1020_vm3, %v5228_v55, %v5232_v3 }
 0x2d9   : > { %v15543_v35 = vpop.f32.mrf.mxu0  ;;  %v15633_v51 = vpop.f32.mrf.mxu1  ;;  %6578 = vperm.xlu0 %16555, %v6459_v26   ;;  %v6461_v0 = vld [vmem:[%s20740_s1 + $0xa0] sm:$0xff]  ;;  %v5234_v26 = vshrl.u32 %v16737_v40, 16 }
 0x2da   : > { %6573 = vperm.xlu1 %16556, %v6458_v12   ;;  %v16738_v35 = vld [vmem:[%s17160_s18 + $0xbc] sm:$0xff]   ;;  %v5238_v12 = vshll.u32 %v18449_v53, 16 }
 0x2db   : > { %v3519_v21 = vpop.f32.mrf.mxu0  ;;  %15737 = vmatmul.mubr.msk.bf16.gmra.mxu0 %vm522_vm2, %v16736_v54  ;;  %v4143_v30 = vpop.f32.mrf.mxu1  ;;  %15827 = vmatmul.mubr.msk.bf16.gmra.mxu1 %vm522_vm2, %v5225_v5 }
 0x2dc   : > { %v3632_v28 = vadd.f32 %v3519_v21, %v18045_v62  ;;  %15740 = vmatprep.mubr.msk.bf16.mxu0 %vm17070_vm1, %v20752_v33  ;;  %v18444_v10 = vadd.f32 %v4143_v30, %v3630_v38  ;;  %15830 = vmatprep.mubr.msk.bf16.mxu1 %vm17070_vm1, %v20752_v33  ;;  %v6460_v62 = vld [vmem:[%s20740_s1 + $0x98] sm:$0xff]  ;;  %v6463_v30 = vld [vmem:[%s20740_s1 + $0xb0] sm:$0xff] }
 0x2dd   : > { %v15546_v45 = vpop.f32.mrf.mxu0  ;;  %v15636_v54 = vpop.f32.mrf.mxu1  ;;  %6588 = vperm.xlu0 %16555, %v6461_v0   ;;  %v5236_v0 = vor.u32 %v5234_v26, %v5232_v3 }
 0x2de   : > { %6583 = vperm.xlu1 %16556, %v6460_v62   ;;  %v6462_v45 = vld [vmem:[%s20740_s1 + $0xa8] sm:$0xff]  ;;  %v5240_v62 = vrot.slane %v5238_v12, 1 }
 0x2df   : > { %v3522_v38 = vpop.f32.mrf.mxu0  ;;  %v4146_v5 = vpop.f32.mrf.mxu1 }
 0x2e0   : > { %v3633_v51 = vadd.f32 %v3522_v38, %v18050_v44  ;;  %v18459_v41 = vadd.f32 %v4146_v5, %v3631_v6  ;;  %v5241_v12 = vsel %vm1020_vm3, %v5236_v0, %v5240_v62  ;;  %v5242_v0 = vshrl.u32 %v18449_v53, 16  ;;  %v6468_v53 = vld [vmem:[%s20740_s1 + $0xd8] sm:$0xff] }
 0x2e1   : > { %v15547_v27 = vpop.f32.mrf.mxu0  ;;  %v15637_v21 = vpop.f32.mrf.mxu1  ;;  %6598 = vperm.xlu0 %16555, %v6463_v30   ;;  %v16742_v30 = vld [vmem:[%s17160_s18 + $0x1c] sm:$0xff]  }
 0x2e2   : > { %6593 = vperm.xlu1 %16556, %v6462_v45   ;;  %v16740_v27 = vld [vmem:[%s17160_s18 + $0xc4] ss:$0 sps:$4 sm:$0xff]   ;;  %v16741_v21 = vld [vmem:[%s17160_s18 + $0x14] sm:$0xfe]  }
 0x2e3   : > { %v3527_v54 = vpop.f32.mrf.mxu0  ;;  %15741 = vmatmul.mubr.msk.bf16.gmra.mxu0 %vm522_vm2, %v16738_v35  ;;  %v4151_v44 = vpop.f32.mrf.mxu1  ;;  %15831 = vmatmul.mubr.msk.bf16.gmra.mxu1 %vm522_vm2, %v5233_v14  ;;  %v6465_v35 = vld [vmem:[%s20740_s1 + $0xc0] sm:$0xff] }
 0x2e4   : > { %v3634_v40 = vadd.f32 %v3527_v54, %v18059_v31  ;;  %15744 = vmatprep.mubr.msk.bf16.mxu0 %vm17070_vm1, %v20752_v33  ;;  %v18474_v6 = vadd.f32 %v4151_v44, %v3632_v28  ;;  %15834 = vmatprep.mubr.msk.bf16.mxu1 %vm17070_vm1, %v20752_v33  ;;  %v6464_v31 = vld [vmem:[%s20740_s1 + $0xb8] sm:$0xff]  ;;  %v6467_v54 = vld [vmem:[%s20740_s1 + $0xd0] sm:$0xff]  ;;  %v6466_v44 = vld [vmem:[%s20740_s1 + $0xc8] sm:$0xff] }
 0x2e5   : > { %v15550_v55 = vpop.f32.mrf.mxu0  ;;  %v15640_v38 = vpop.f32.mrf.mxu1  ;;  %6608 = vperm.xlu0 %16555, %v6465_v35   ;;  %v5832_v35 = vrot.slane %v16742_v30, 1  ;;  %v5244_v30 = vor.u32 %v5242_v0, %v5240_v62 }
 0x2e6   : > { %6603 = vperm.xlu1 %16556, %v6464_v31   ;;  %v5831_v38 = vrot.slane %v16741_v21, 1 }
 0x2e7   : > { %v3530_v5 = vpop.f32.mrf.mxu0  ;;  %v4154_v28 = vpop.f32.mrf.mxu1 }
 0x2e8   : > { %v3635_v14 = vadd.f32 %v3530_v5, %v18069_v48  ;;  %v18488_v3 = vadd.f32 %v4154_v28, %v3633_v51 }
 0x2e9   : > { %v15551_v26 = vpop.f32.mrf.mxu0  ;;  %v15641_v45 = vpop.f32.mrf.mxu1  ;;  %6618 = vperm.xlu0 %16555, %v6467_v54  }
 0x2ea   : > { %6613 = vperm.xlu1 %16556, %v6466_v44   ;;  %v5833_v26 = vsel %vm1790_vm4, %v5831_v38, %v5832_v35 }
 0x2eb   : > { %v3535_v55 = vpop.f32.mrf.mxu0  ;;  %15745 = vmatmul.mubr.msk.bf16.gmra.mxu0 %vm522_vm2, %v16740_v27  ;;  %v4159_v48 = vpop.f32.mrf.mxu1  ;;  %15835 = vmatmul.mubr.msk.bf16.gmra.mxu1 %vm522_vm2, %v5241_v12  ;;  %v16743_v12 = vld [vmem:[%s17160_s18 + $0x24] sm:$0xff]  }
 0x2ec   : > { %v3636_v51 = vadd.f32 %v3535_v55, %v18077_v34  ;;  %15844 = vmatprep.mubr.msk.bf16.mxu0 %vm17070_vm1, %v20752_v33  ;;  %v18503_v31 = vadd.f32 %v4159_v48, %v3634_v40  ;;  %15838 = vmatprep.mubr.msk.bf16.mxu1 %vm17070_vm1, %v20752_v33  ;;  %v6469_v34 = vld [vmem:[%s20740_s1 + $0xe0] sm:$0xff]  ;;  %v6471_v55 = vld [vmem:[%s20740_s1 + $0xf0] sm:$0xff]  ;;  %v6470_v48 = vld [vmem:[%s20740_s1 + $0xe8] sm:$0xff] }
 0x2ed   : > { %v15554_v5 = vpop.f32.mrf.mxu0  ;;  %v15644_v27 = vpop.f32.mrf.mxu1  ;;  %6628 = vperm.xlu0 %16555, %v6469_v34   ;;  %v6473_v34 = vld [vmem:[%s20740_s1 + $0x100] sm:$0xff] }
 0x2ee   : > { %6623 = vperm.xlu1 %16556, %v6468_v53   ;;  %v6472_v53 = vld [vmem:[%s20740_s1 + $0xf8] sm:$0xff] }
 0x2ef   : > { %v3538_v28 = vpop.f32.mrf.mxu0  ;;  %v4162_v21 = vpop.f32.mrf.mxu1 }
 0x2f0   : > { %v3637_v40 = vadd.f32 %v3538_v28, %v18083_v18  ;;  %v18516_v45 = vadd.f32 %v4162_v21, %v3635_v14  ;;  %v5834_v14 = vrot.slane %v16743_v12, 1 }
 0x2f1   : > { %v15555_v54 = vpop.f32.mrf.mxu0  ;;  %v15645_v44 = vpop.f32.mrf.mxu1  ;;  %6638 = vperm.xlu0 %16555, %v6471_v55  }
 0x2f2   : > { %6633 = vperm.xlu1 %16556, %v6470_v48   ;;  %v5835_v21 = vsel %vm1790_vm4, %v5832_v35, %v5834_v14  ;;  %v6475_v54 = vld [vmem:[%s20740_s1 + $0x110] sm:$0xff]  ;;  %v6474_v44 = vld [vmem:[%s20740_s1 + $0x108] sm:$0xff] }
 0x2f3   : > { %v3543_v5 = vpop.f32.mrf.mxu0  ;;  %15845 = vmatmul.mubr.msk.bf16.vlgmr.msra.gmra.mxu0 %vm522_vm2, %v5833_v26  ;;  %v4167_v18 = vpop.f32.mrf.mxu1  ;;  %15839 = vmatmul.mubr.msk.bf16.gmra.mxu1 %vm522_vm2, %v5244_v30  ;;  %v16744_v30 = vld [vmem:[%s17160_s18 + $0x2c] sm:$0xff]  }
 0x2f4   : > { %v3638_v62 = vadd.f32 %v3543_v5, %v18091_v8  ;;  %15848 = vmatprep.mubr.msk.bf16.mxu0 %vm17070_vm1, %v20752_v33  ;;  %v18529_v0 = vadd.f32 %v4167_v18, %v3636_v51  ;;  %v5836_v48 = vrot.slane %v16744_v30, 1 }
 0x2f5   : > { %v15558_v38 = vpop.f32.mrf.mxu0  ;;  %v15648_v27 = vpop.f32.mrf.mxu1  ;;  %6648 = vperm.xlu0 %16555, %v6473_v34   ;;  %v6476_v34 = vld [vmem:[%s20740_s1 + $0x118] sm:$0xff] }
 0x2f6   : > { %6643 = vperm.xlu1 %16556, %v6472_v53   ;;  %v6477_v27 = vld [vmem:[%s20740_s1 + $0x120] sm:$0xff]  ;;  %v16760_v53 = vld [vmem:[%s17160_s18 + $0x14] sm:$0xfe]   ;;  %v5837_v30 = vsel %vm1790_vm4, %v5834_v14, %v5836_v48 }
 0x2f7   : > { %v3546_v28 = vpop.f32.mrf.mxu0  ;;  %v4170_v8 = vpop.f32.mrf.mxu1 }
 0x2f8   : > { %v18539_v26 = vadd.f32 %v4170_v8, %v3637_v40  ;;  %v16761_v28 = vld [vmem:[%s17160_s18 + $0x1c] sm:$0xff]   ;;  %v16763_v8 = vld [vmem:[%s17160_s18 + $0x24] sm:$0xff]  }
 0x2f9   : > { %v15559_v51 = vpop.f32.mrf.mxu0  ;;  %v15649_v12 = vpop.f32.mrf.mxu1  ;;  %6658 = vperm.xlu0 %16555, %v6475_v54  }
 0x2fa   : > { %6653 = vperm.xlu1 %16556, %v6474_v44   ;;  %v18565_v51 = vld [vmem:[%s17160_s18 + $0x34] sm:$0xff]   ;;  %v7128_v12 = vrot.slane %v16760_v53, 1  ;;  %v7129_v44 = vrot.slane %v16761_v28, 1 }
 0x2fb   : > { %v4582_v55 = vpop.f32.mrf.mxu0  ;;  %15849 = vmatmul.mubr.msk.bf16.gmra.mxu0 %vm522_vm2, %v5835_v21  ;;  %v4175_v35 = vpop.f32.mrf.mxu1 }
 0x2fc   : > { %v4809_v40 = vadd.f32 %v4582_v55, %v18104_v58  ;;  %15852 = vmatprep.mubr.msk.bf16.mxu0 %vm17070_vm1, %v20752_v33  ;;  %v18551_v5 = vadd.f32 %v4175_v35, %v3638_v62  ;;  %v7131_v55 = vrot.slane %v16763_v8, 1 }
 0x2fd   : > { %v15658_v18 = vpop.f32.mrf.mxu0  ;;  %v15652_v38 = vpop.f32.mrf.mxu1  ;;  %6668 = vperm.xlu0 %16555, %v6477_v27  }
 0x2fe   : > { %6663 = vperm.xlu1 %16556, %v6476_v34   ;;  %v6479_v18 = vld [vmem:[%s20740_s1 + $0x130] sm:$0xff]  ;;  %v6478_v38 = vld [vmem:[%s20740_s1 + $0x128] sm:$0xff]  ;;  %v7132_v14 = vsel %vm1790_vm4, %v7129_v44, %v7131_v55 }
 0x2ff   : > { %v4585_v58 = vpop.f32.mrf.mxu0  ;;  %v4178_v21 = vpop.f32.mrf.mxu1 }
 0x300   : > { %v4810_v62 = vadd.f32 %v4585_v58, %v18111_v52  ;;  %v7130_v52 = vsel %vm1790_vm4, %v7128_v12, %v7129_v44  ;;  %v5838_v58 = vrot.slane %v18565_v51, 1  ;;  %v16764_v12 = vld [vmem:[%s17160_s18 + $0x2c] sm:$0xff]  }
 0x301   : > { %v15659_v54 = vpop.f32.mrf.mxu0  ;;  %v15653_v35 = vpop.f32.mrf.mxu1  ;;  %6678 = vperm.xlu0 %16555, %v6479_v18   ;;  %15938 = vmatprep.mubr.msk.bf16.mxu1 %vm522_vm2, %v7130_v52  ;;  %v16746_v18 = vld [vmem:[%s17160_s18 + $0x3c] sm:$0xff]  }
 0x302   : > { %6673 = vperm.xlu1 %16556, %v6478_v38   ;;  %15939 = vmatmul.mubr.msk.bf16.vlgmr.msra.gmra.mxu1 %vm522_vm2, %v7132_v14  ;;  %v16766_v54 = vld [vmem:[%s17160_s18 + $0x34] sm:$0xff]   ;;  %v5839_v35 = vsel %vm1790_vm4, %v5836_v48, %v5838_v58  ;;  %v7133_v38 = vrot.slane %v16764_v12, 1 }
 0x303   : > { %v4590_v27 = vpop.f32.mrf.mxu0  ;;  %15853 = vmatmul.mubr.msk.bf16.gmra.mxu0 %vm522_vm2, %v5837_v30  ;;  %v5351_v34 = vpop.f32.mrf.mxu1  ;;  %v6481_v30 = vld [vmem:[%s20740_s1 + $0x140] sm:$0xff]  ;;  %v7135_v14 = vrot.slane %v16766_v54, 1 }
 0x304   : > { %v4811_v53 = vadd.f32 %v4590_v27, %v18119_v32  ;;  %15856 = vmatprep.mubr.msk.bf16.mxu0 %vm17070_vm1, %v20752_v33  ;;  %v18581_v28 = vadd.f32 %v5351_v34, %v4809_v40  ;;  %v6480_v32 = vld [vmem:[%s20740_s1 + $0x138] sm:$0xff] }
 0x305   : > { %v15662_v8 = vpop.f32.mrf.mxu0  ;;  %v15752_v21 = vpop.f32.mrf.mxu1  ;;  %6688 = vperm.xlu0 %16555, %v6481_v30   ;;  %v7136_v48 = vsel %vm1790_vm4, %v7133_v38, %v7135_v14 }
 0x306   : > { %6683 = vperm.xlu1 %16556, %v6480_v32   ;;  %v6483_v8 = vld [vmem:[%s20740_s1 + $0x150] sm:$0xff]  ;;  %v6482_v21 = vld [vmem:[%s20740_s1 + $0x148] sm:$0xff]  ;;  %v20760_v32 = vld [vmem:[#allocation4_spill] sm:$0xff] }
 0x307   : > { %v4593_v51 = vpop.f32.mrf.mxu0  ;;  %v5354_v44 = vpop.f32.mrf.mxu1 }
 0x308   : > { %v4812_v40 = vadd.f32 %v4593_v51, %v18126_v24  ;;  %v18595_v27 = vadd.f32 %v5354_v44, %v4810_v62  ;;  %v7134_v24 = vsel %vm1790_vm4, %v7131_v55, %v7133_v38  ;;  %v5840_v51 = vrot.slane %v16746_v18, 1  ;;  %v6484_v38 = vld [vmem:[%s20740_s1 + $0x158] sm:$0xff] }
 0x309   : > { %v15663_v52 = vpop.f32.mrf.mxu0  ;;  %v15753_v34 = vpop.f32.mrf.mxu1  ;;  %6698 = vperm.xlu0 %16555, %v6483_v8   ;;  %15942 = vmatprep.mubr.msk.bf16.mxu1 %vm522_vm2, %v7134_v24  ;;  %v16747_v24 = vld [vmem:[%s17160_s18 + $0x44] sm:$0xff]  }
 0x30a   : > { %6693 = vperm.xlu1 %16556, %v6482_v21   ;;  %15943 = vmatmul.mubr.msk.bf16.gmra.mxu1 %vm522_vm2, %v7136_v48  ;;  %v16767_v52 = vld [vmem:[%s17160_s18 + $0x3c] sm:$0xff]   ;;  %v16769_v34 = vld [vmem:[%s17160_s18 + $0x44] sm:$0xff]   ;;  %v5841_v21 = vsel %vm1790_vm4, %v5838_v58, %v5840_v51 }
 0x30b   : > { %v4598_v30 = vpop.f32.mrf.mxu0  ;;  %15857 = vmatmul.mubr.msk.bf16.gmra.mxu0 %vm522_vm2, %v5839_v35  ;;  %v5359_v62 = vpop.f32.mrf.mxu1  ;;  %v6485_v35 = vld [vmem:[%s20740_s1 + $0x160] sm:$0xff] }
 0x30c   : > { %v4813_v12 = vadd.f32 %v4598_v30, %v20760_v32  ;;  %15860 = vmatprep.mubr.msk.bf16.mxu0 %vm17070_vm1, %v20752_v33  ;;  %v18610_v54 = vadd.f32 %v5359_v62, %v4811_v53  ;;  %v7137_v30 = vrot.slane %v16767_v52, 1  ;;  %v7139_v32 = vrot.slane %v16769_v34, 1 }
 0x30d   : > { %v15666_v55 = vpop.f32.mrf.mxu0  ;;  %v15756_v44 = vpop.f32.mrf.mxu1  ;;  %6708 = vperm.xlu0 %16555, %v6485_v35   ;;  %v5842_v35 = vrot.slane %v16747_v24, 1 }
 0x30e   : > { %20761 = vst [vmem:[#allocation5_spill] sm:$0xff] %v18610_v54  ;;  %6703 = vperm.xlu1 %16556, %v6484_v38   ;;  %v7138_v44 = vsel %vm1790_vm4, %v7135_v14, %v7137_v30 }
 0x30f   : > { %v4601_v18 = vpop.f32.mrf.mxu0  ;;  %v5362_v8 = vpop.f32.mrf.mxu1  ;;  %15946 = vmatprep.mubr.msk.bf16.mxu1 %vm522_vm2, %v7138_v44 }
 0x310   : > { %v4814_v53 = vadd.f32 %v4601_v18, %v18141_v63  ;;  %v18624_v48 = vadd.f32 %v5362_v8, %v4812_v40  ;;  %v7140_v63 = vsel %vm1790_vm4, %v7137_v30, %v7139_v32  ;;  %v16770_v18 = vld [vmem:[%s17160_s18 + $0x4c] sm:$0xff]   ;;  %v16772_v8 = vld [vmem:[%s17160_s18 + $0x54] sm:$0xff]   ;;  %v5843_v30 = vsel %vm1790_vm4, %v5840_v51, %v5842_v35 }
 0x311   : > { %v15667_v62 = vpop.f32.mrf.mxu0  ;;  %v15757_v55 = vpop.f32.mrf.mxu1 }
 0x312   : > { %15947 = vmatmul.mubr.msk.bf16.gmra.mxu1 %vm522_vm2, %v7140_v63  ;;  %v16748_v55 = vld [vmem:[%s17160_s18 + $0x4c] sm:$0xff]  }
 0x313   : > { %v4606_v54 = vpop.f32.mrf.mxu0  ;;  %15861 = vmatmul.mubr.msk.bf16.gmra.mxu0 %vm522_vm2, %v5841_v21  ;;  %v5367_v58 = vpop.f32.mrf.mxu1 }
 0x314   : > { %v4815_v40 = vadd.f32 %v4606_v54, %v18149_v39  ;;  %15864 = vmatprep.mubr.msk.bf16.mxu0 %vm17070_vm1, %v20752_v33  ;;  %v18633_v38 = vadd.f32 %v5367_v58, %v4813_v12  ;;  %v7141_v39 = vrot.slane %v16770_v18, 1  ;;  %v7143_v12 = vrot.slane %v16772_v8, 1 }
 0x315   : > { %v15670_v52 = vpop.f32.mrf.mxu0  ;;  %v15760_v14 = vpop.f32.mrf.mxu1 }
 0x316   : > { %v7142_v63 = vsel %vm1790_vm4, %v7139_v32, %v7141_v39 }
 0x317   : > { %v4609_v34 = vpop.f32.mrf.mxu0  ;;  %v5370_v21 = vpop.f32.mrf.mxu1  ;;  %15950 = vmatprep.mubr.msk.bf16.mxu1 %vm522_vm2, %v7142_v63 }
 0x318   : > { %v4816_v62 = vadd.f32 %v4609_v34, %v18156_v25  ;;  %v18641_v54 = vadd.f32 %v5370_v21, %v4814_v53  ;;  %v7144_v25 = vsel %vm1790_vm4, %v7141_v39, %v7143_v12  ;;  %v5844_v53 = vrot.slane %v16748_v55, 1  ;;  %v16773_v34 = vld [vmem:[%s17160_s18 + $0x5c] sm:$0xff]   ;;  %v16774_v21 = vld [vmem:[%s17160_s18 + $0x64] sm:$0xff]  }
 0x319   : > { %v15671_v44 = vpop.f32.mrf.mxu0  ;;  %v15761_v24 = vpop.f32.mrf.mxu1 }
 0x31a   : > { %15951 = vmatmul.mubr.msk.bf16.gmra.mxu1 %vm522_vm2, %v7144_v25  ;;  %v5845_v39 = vsel %vm1790_vm4, %v5842_v35, %v5844_v53  ;;  %v16749_v24 = vld [vmem:[%s17160_s18 + $0x54] sm:$0xff]  }
 0x31b   : > { %v4614_v58 = vpop.f32.mrf.mxu0  ;;  %15865 = vmatmul.mubr.msk.bf16.gmra.mxu0 %vm522_vm2, %v5843_v30  ;;  %v5375_v51 = vpop.f32.mrf.mxu1 }
 0x31c   : > { %v4817_v52 = vadd.f32 %v4614_v58, %v18164_v15  ;;  %15868 = vmatprep.mubr.msk.bf16.mxu0 %vm17070_vm1, %v20752_v33  ;;  %v18650_v14 = vadd.f32 %v5375_v51, %v4815_v40  ;;  %v7145_v15 = vrot.slane %v16773_v34, 1  ;;  %v7147_v40 = vrot.slane %v16774_v21, 1 }
 0x31d   : > { %v15674_v18 = vpop.f32.mrf.mxu0  ;;  %v15764_v32 = vpop.f32.mrf.mxu1 }
 0x31e   : > { %v7146_v25 = vsel %vm1790_vm4, %v7143_v12, %v7145_v15 }
 0x31f   : > { %v4617_v8 = vpop.f32.mrf.mxu0  ;;  %v5378_v30 = vpop.f32.mrf.mxu1  ;;  %15954 = vmatprep.mubr.msk.bf16.mxu1 %vm522_vm2, %v7146_v25 }
 0x320   : > { %v4818_v44 = vadd.f32 %v4617_v8, %v18171_v7  ;;  %v18658_v63 = vadd.f32 %v5378_v30, %v4816_v62  ;;  %v7148_v7 = vsel %vm1790_vm4, %v7145_v15, %v7147_v40  ;;  %v5846_v62 = vrot.slane %v16749_v24, 1  ;;  %v16775_v8 = vld [vmem:[%s17160_s18 + $0x6c] sm:$0xff]   ;;  %v16776_v30 = vld [vmem:[%s17160_s18 + $0x74] sm:$0xff]  }
 0x321   : > { %v15675_v58 = vpop.f32.mrf.mxu0  ;;  %v15765_v55 = vpop.f32.mrf.mxu1 }
 0x322   : > { %15955 = vmatmul.mubr.msk.bf16.gmra.mxu1 %vm522_vm2, %v7148_v7  ;;  %v5847_v15 = vsel %vm1790_vm4, %v5844_v53, %v5846_v62  ;;  %v16750_v55 = vld [vmem:[%s17160_s18 + $0x5c] sm:$0xff]  }
 0x323   : > { %v4622_v51 = vpop.f32.mrf.mxu0  ;;  %15869 = vmatmul.mubr.msk.bf16.gmra.mxu0 %vm522_vm2, %v5845_v39  ;;  %v5383_v35 = vpop.f32.mrf.mxu1 }
 0x324   : > { %v4819_v18 = vadd.f32 %v4622_v51, %v18179_v4  ;;  %15872 = vmatprep.mubr.msk.bf16.mxu0 %vm17070_vm1, %v20752_v33  ;;  %v18667_v32 = vadd.f32 %v5383_v35, %v4817_v52  ;;  %v7149_v4 = vrot.slane %v16775_v8, 1  ;;  %v7151_v52 = vrot.slane %v16776_v30, 1 }
 0x325   : > { %v15678_v34 = vpop.f32.mrf.mxu0  ;;  %v15768_v12 = vpop.f32.mrf.mxu1 }
 0x326   : > { %v7150_v7 = vsel %vm1790_vm4, %v7147_v40, %v7149_v4 }
 0x327   : > { %v4625_v21 = vpop.f32.mrf.mxu0  ;;  %v5386_v39 = vpop.f32.mrf.mxu1  ;;  %15958 = vmatprep.mubr.msk.bf16.mxu1 %vm522_vm2, %v7150_v7 }
 0x328   : > { %v4820_v58 = vadd.f32 %v4625_v21, %v18186_v23  ;;  %v18675_v25 = vadd.f32 %v5386_v39, %v4818_v44  ;;  %v7152_v23 = vsel %vm1790_vm4, %v7149_v4, %v7151_v52  ;;  %v5848_v44 = vrot.slane %v16750_v55, 1  ;;  %v16777_v21 = vld [vmem:[%s17160_s18 + $0x7c] sm:$0xff]   ;;  %v16778_v39 = vld [vmem:[%s17160_s18 + $0x84] sm:$0xff]  }
 0x329   : > { %v15679_v51 = vpop.f32.mrf.mxu0  ;;  %v15769_v24 = vpop.f32.mrf.mxu1  ;;  %v7155_v55 = vrot.slane %v16778_v39, 1  ;;  %v16781_v39 = vld [vmem:[%s17160_s18 + $0x8c] sm:$0xff]  }
 0x32a   : > { %15959 = vmatmul.mubr.msk.bf16.gmra.mxu1 %vm522_vm2, %v7152_v23  ;;  %v5849_v4 = vsel %vm1790_vm4, %v5846_v62, %v5848_v44  ;;  %v16751_v24 = vld [vmem:[%s17160_s18 + $0x64] sm:$0xff]   ;;  %v16779_v62 = vld [vmem:[%s20742_s3 + $0x38] sm:$0xff]  }
 0x32b   : > { %v4630_v35 = vpop.f32.mrf.mxu0  ;;  %15873 = vmatmul.mubr.msk.bf16.gmra.mxu0 %vm522_vm2, %v5847_v15  ;;  %v5391_v53 = vpop.f32.mrf.mxu1  ;;  %15978 = vmatprep.subr.bf16.mxu1 %v16779_v62 }
 0x32c   : > { %v4821_v34 = vadd.f32 %v4630_v35, %v18194_v22  ;;  %15876 = vmatprep.mubr.msk.bf16.mxu0 %vm17070_vm1, %v20752_v33  ;;  %v18684_v12 = vadd.f32 %v5391_v53, %v4819_v18  ;;  %v7153_v22 = vrot.slane %v16777_v21, 1  ;;  %15979 = vmatpush3.bf16.msra.mxu1 %v16779_v62 }
 0x32d   : > { %v15682_v8 = vpop.f32.mrf.mxu0  ;;  %v15772_v40 = vpop.f32.mrf.mxu1 }
 0x32e   : > { %v7154_v53 = vsel %vm1790_vm4, %v7151_v52, %v7153_v22  ;;  %v5850_v52 = vrot.slane %v16751_v24, 1 }
 0x32f   : > { %v4633_v30 = vpop.f32.mrf.mxu0  ;;  %v5394_v15 = vpop.f32.mrf.mxu1  ;;  %15962 = vmatprep.mubr.msk.bf16.mxu1 %vm522_vm2, %v7154_v53 }
 0x330   : > { %v4822_v51 = vadd.f32 %v4633_v30, %v18201_v20  ;;  %v18692_v7 = vadd.f32 %v5394_v15, %v4820_v58  ;;  %v7156_v20 = vsel %vm1790_vm4, %v7153_v22, %v7155_v55  ;;  %v5851_v24 = vsel %vm1790_vm4, %v5848_v44, %v5850_v52  ;;  %v16783_v44 = vld [vmem:[%s20742_s3 + $0x28] sm:$0xff]  }
 0x331   : > { %v15683_v35 = vpop.f32.mrf.mxu0  ;;  %v15773_v18 = vpop.f32.mrf.mxu1 }
 0x332   : > { %15963 = vmatmul.mubr.msk.bf16.gmra.mxu1 %vm522_vm2, %v7156_v20  ;;  %v7157_v18 = vrot.slane %v16781_v39, 1 }
 0x333   : > { %v4638_v23 = vpop.f32.mrf.mxu0  ;;  %15877 = vmatmul.mubr.msk.bf16.gmra.mxu0 %vm522_vm2, %v5849_v4  ;;  %v5399_v58 = vpop.f32.mrf.mxu1  ;;  %v16780_v4 = vld [vmem:[%s20742_s3 + $0x30] sm:$0xff]  }
 0x334   : > { %v4823_v8 = vadd.f32 %v4638_v23, %v18209_v13  ;;  %15880 = vmatprep.mubr.msk.bf16.mxu0 %vm17070_vm1, %v20752_v33  ;;  %v18704_v40 = vadd.f32 %v5399_v58, %v4821_v34  ;;  %v16782_v13 = vld [vmem:[%s17160_s18 + $0x94] sm:$0xff]   ;;  %v18715_v34 = vld [vmem:[%s17160_s18 + $0x6c] sm:$0xff]   ;;  %15980 = vmatprep.subr.bf16.mxu1 %v16780_v4  ;;  %v7158_v58 = vsel %vm1790_vm4, %v7155_v55, %v7157_v18 }
 0x335   : > { %v15686_v21 = vpop.f32.mrf.mxu0  ;;  %v15776_v30 = vpop.f32.mrf.mxu1  ;;  %v7159_v20 = vrot.slane %v16782_v13, 1  ;;  %15981 = vmatpush3.bf16.msra.mxu1 %v16780_v4  ;;  %15966 = vmatprep.mubr.msk.bf16.mxu1 %vm522_vm2, %v7158_v58  ;;  %v5852_v55 = vrot.slane %v18715_v34, 1  ;;  %v16784_v13 = vld [vmem:[%s20742_s3 + $0xb8] sm:$0xff]  }
 0x336   : > { %15982 = vmatprep.subr.bf16.mxu1 %v16783_v44  ;;  %16090 = vmatprep.subr.bf16.mxu0 %v16784_v13 }
 0x337   : > { %v4641_v15 = vpop.f32.mrf.mxu0  ;;  %v5402_v22 = vpop.f32.mrf.mxu1  ;;  %16091 = vmatpush3.bf16.msra.mxu0 %v16784_v13 }
 0x338   : > { %v4824_v35 = vadd.f32 %v4641_v15, %v18216_v1  ;;  %v18717_v53 = vadd.f32 %v5402_v22, %v4822_v51  ;;  %v7160_v1 = vsel %vm1790_vm4, %v7157_v18, %v7159_v20  ;;  %v16786_v22 = vld [vmem:[%s17160_s18 + $0x9c] sm:$0xff]   ;;  %v16787_v18 = vld [vmem:[%s17160_s18 + $0xa4] sm:$0xff]  }
 0x339   : > { %v15687_v23 = vpop.f32.mrf.mxu0  ;;  %v15777_v62 = vpop.f32.mrf.mxu1  ;;  %15983 = vmatpush3.bf16.msra.mxu1 %v16783_v44  ;;  %v7161_v58 = vrot.slane %v16786_v22, 1  ;;  %v7163_v44 = vrot.slane %v16787_v18, 1 }
 0x33a   : > { %15967 = vmatmul.mubr.msk.bf16.gmra.mxu1 %vm522_vm2, %v7160_v1  ;;  %v5853_v23 = vsel %vm1790_vm4, %v5850_v52, %v5852_v55  ;;  %v18744_v62 = vld [vmem:[%s17160_s18 + $0x74] sm:$0xff]  }
 0x33b   : > { %v4646_v21 = vpop.f32.mrf.mxu0  ;;  %15881 = vmatmul.mubr.msk.bf16.gmra.mxu0 %vm522_vm2, %v5851_v24  ;;  %v5407_v51 = vpop.f32.mrf.mxu1  ;;  %v16785_v24 = vld [vmem:[%s20742_s3 + $0x20] sm:$0xff]   ;;  %v7164_v52 = vsel %vm1790_vm4, %v7161_v58, %v7163_v44  ;;  %v5854_v22 = vrot.slane %v18744_v62, 1  ;;  %v16791_v62 = vld [vmem:[%s20742_s3 + $0x10] sm:$0xff]  }
 0x33c   : > { %v4825_v30 = vadd.f32 %v4646_v21, %v18224_v9  ;;  %15884 = vmatprep.mubr.msk.bf16.mxu0 %vm17070_vm1, %v20752_v33  ;;  %v18730_v39 = vadd.f32 %v5407_v51, %v4823_v8  ;;  %15984 = vmatprep.subr.bf16.mxu1 %v16785_v24 }
 0x33d   : > { %v15690_v15 = vpop.f32.mrf.mxu0  ;;  %v15780_v4 = vpop.f32.mrf.mxu1  ;;  %15985 = vmatpush3.bf16.msra.mxu1 %v16785_v24 }
 0x33e   : > { %v7162_v15 = vsel %vm1790_vm4, %v7159_v20, %v7161_v58  ;;  %v16793_v58 = vld [vmem:[%s17160_s18 + $0xb4] ss:$0 sps:$4 sm:$0x11]  }
 0x33f   : > { %v4649_v9 = vpop.f32.mrf.mxu0  ;;  %v5410_v34 = vpop.f32.mrf.mxu1  ;;  %15970 = vmatprep.mubr.msk.bf16.mxu1 %vm522_vm2, %v7162_v15  ;;  %v16754_v15 = vld [vmem:[%s17160_s18 + $0x7c] sm:$0xff]  }
 0x340   : > { %v4826_v8 = vadd.f32 %v4649_v9, %v18231_v56  ;;  %v18746_v21 = vadd.f32 %v5410_v34, %v4824_v35  ;;  %v16788_v56 = vld [vmem:[%s20742_s3 + $0xb0] sm:$0xff]   ;;  %v16789_v35 = vld [vmem:[%s20742_s3 + $0x18] sm:$0xff]  }
 0x341   : > { %v15691_v1 = vpop.f32.mrf.mxu0  ;;  %v15781_v51 = vpop.f32.mrf.mxu1  ;;  %16092 = vmatprep.subr.bf16.mxu0 %v16788_v56  ;;  %15986 = vmatprep.subr.bf16.mxu1 %v16789_v35  ;;  %v16792_v34 = vld [vmem:[%s17160_s18 + $0xac] sm:$0xff]  }
 0x342   : > { %15971 = vmatmul.mubr.msk.bf16.gmra.mxu1 %vm522_vm2, %v7164_v52  ;;  %16093 = vmatpush3.bf16.msra.mxu0 %v16788_v56  ;;  %v5855_v51 = vsel %vm1790_vm4, %v5852_v55, %v5854_v22  ;;  %v7165_v56 = vrot.slane %v16792_v34, 1 }
 0x343   : > { %v4654_v4 = vpop.f32.mrf.mxu0  ;;  %15885 = vmatmul.mubr.msk.bf16.gmra.mxu0 %vm522_vm2, %v5853_v23  ;;  %v5415_v13 = vpop.f32.mrf.mxu1  ;;  %15987 = vmatpush3.bf16.msra.mxu1 %v16789_v35  ;;  %v7167_v35 = vrot.slane %v16793_v58, 1 }
 0x344   : > { %v4827_v20 = vadd.f32 %v4654_v4, %v18239_v60  ;;  %15888 = vmatprep.mubr.msk.bf16.mxu0 %vm17070_vm1, %v20752_v33  ;;  %v18762_v9 = vadd.f32 %v5415_v13, %v4825_v30  ;;  %v16790_v60 = vld [vmem:[%s20742_s3 + $0xa8] sm:$0xff]   ;;  %15988 = vmatprep.subr.bf16.mxu1 %v16791_v62 }
 0x345   : > { %v15694_v24 = vpop.f32.mrf.mxu0  ;;  %v15784_v18 = vpop.f32.mrf.mxu1  ;;  %16094 = vmatprep.subr.bf16.mxu0 %v16790_v60  ;;  %v7168_v55 = vsel %vm1790_vm4, %v7165_v56, %v7167_v35 }
 0x346   : > { %16095 = vmatpush3.bf16.msra.mxu0 %v16790_v60  ;;  %v7166_v24 = vsel %vm1790_vm4, %v7163_v44, %v7165_v56  ;;  %v16794_v18 = vld [vmem:[%s20742_s3 + $0xa0] sm:$0xff]   ;;  %v5856_v44 = vrot.slane %v16754_v15, 1 }
 0x347   : > { %v4657_v23 = vpop.f32.mrf.mxu0  ;;  %v5418_v30 = vpop.f32.mrf.mxu1  ;;  %15989 = vmatpush3.bf16.msra.mxu1 %v16791_v62  ;;  %15974 = vmatprep.mubr.msk.bf16.mxu1 %vm522_vm2, %v7166_v24 }
 0x348   : > { %v4828_v1 = vadd.f32 %v4657_v23, %v18246_v36  ;;  %v18776_v4 = vadd.f32 %v5418_v30, %v4826_v8  ;;  %v16795_v8 = vld [vmem:[%s20742_s3 + $0x8] sm:$0xff]   ;;  %16096 = vmatprep.subr.bf16.mxu0 %v16794_v18  ;;  %v16797_v30 = vld [vmem:[%s20742_s3 + $0x98] sm:$0xff]   ;;  %v5857_v56 = vsel %vm1790_vm4, %v5854_v22, %v5856_v44 }
 0x349   : > { %v15695_v52 = vpop.f32.mrf.mxu0  ;;  %v15785_v13 = vpop.f32.mrf.mxu1  ;;  %15990 = vmatprep.subr.bf16.mxu1 %v16795_v8 }
 0x34a   : > { %15975 = vmatmul.mubr.msk.bf16.gmra.mxu1 %vm522_vm2, %v7168_v55  ;;  %16097 = vmatpush3.bf16.msra.mxu0 %v16794_v18  ;;  %v16755_v52 = vld [vmem:[%s17160_s18 + $0x84] sm:$0xff]   ;;  %v16799_v18 = vld [vmem:[%s20742_s3 + $0x90] sm:$0xff]  }
 0x34b   : > { %v4662_v36 = vpop.f32.mrf.mxu0  ;;  %15889 = vmatmul.mubr.msk.bf16.gmra.mxu0 %vm522_vm2, %v5855_v51  ;;  %v5423_v34 = vpop.f32.mrf.mxu1  ;;  %15991 = vmatpush3.bf16.msra.mxu1 %v16795_v8  ;;  %v16798_v51 = vld [vmem:[%s20742_s3] sm:$0xff]  }
 0x34c   : > { %v4829_v60 = vadd.f32 %v4662_v36, %v18254_v16  ;;  %15892 = vmatprep.mubr.msk.bf16.mxu0 %vm17070_vm1, %v20752_v33  ;;  %v18791_v23 = vadd.f32 %v5423_v34, %v4827_v20  ;;  %16098 = vmatprep.subr.bf16.mxu0 %v16797_v30 }
 0x34d   : > { %v15698_v62 = vpop.f32.mrf.mxu0  ;;  %v15788_v58 = vpop.f32.mrf.mxu1  ;;  %15992 = vmatprep.subr.bf16.mxu1 %v16798_v51 }
 0x34e   : > { %16099 = vmatpush3.bf16.msra.mxu0 %v16797_v30  ;;  %v16801_v62 = vld [vmem:[%s20742_s3 + $0x88] sm:$0xff]  }
 0x34f   : > { %v4665_v16 = vpop.f32.mrf.mxu0  ;;  %v5426_v15 = vpop.f32.mrf.mxu1  ;;  %15993 = vmatpush3.bf16.msra.mxu1 %v16798_v51  ;;  %16100 = vmatprep.subr.bf16.mxu0 %v16799_v18  ;;  %v16756_v51 = vld [vmem:[%s17160_s18 + $0x8c] sm:$0xff]  }
 0x350   : > { %v4830_v20 = vadd.f32 %v4665_v16, %v18261_v61  ;;  %v18803_v35 = vadd.f32 %v5426_v15, %v4828_v1  ;;  %v5858_v1 = vrot.slane %v16755_v52, 1  ;;  %v16804_v52 = vld [vmem:[%s20742_s3 + $0x80] sm:$0xff]  }
 0x351   : > { %v15699_v13 = vpop.f32.mrf.mxu0  ;;  %v15789_v24 = vpop.f32.mrf.mxu1 }
 0x352   : > { %16101 = vmatpush3.bf16.msra.mxu0 %v16799_v18 }
 0x353   : > { %v4670_v36 = vpop.f32.mrf.mxu0  ;;  %15893 = vmatmul.mubr.msk.bf16.gmra.mxu0 %vm522_vm2, %v5857_v56  ;;  %v5431_v61 = vpop.f32.mrf.mxu1  ;;  %16102 = vmatprep.subr.bf16.mxu0 %v16801_v62 }
 0x354   : > { %v4831_v22 = vadd.f32 %v4670_v36, %v18269_v37  ;;  %15896 = vmatprep.mubr.msk.bf16.mxu0 %vm17070_vm1, %v20752_v33  ;;  %v18812_v55 = vadd.f32 %v5431_v61, %v4829_v60  ;;  %v5859_v37 = vsel %vm1790_vm4, %v5856_v44, %v5858_v1  ;;  %v5860_v44 = vrot.slane %v16756_v51, 1 }
 0x355   : > { %v15702_v8 = vpop.f32.mrf.mxu0  ;;  %v15792_v34 = vpop.f32.mrf.mxu1 }
 0x356   : > { %16103 = vmatpush3.bf16.msra.mxu0 %v16801_v62  ;;  %v5861_v62 = vsel %vm1790_vm4, %v5858_v1, %v5860_v44 }
 0x357   : > { %v4673_v58 = vpop.f32.mrf.mxu0  ;;  %v5434_v30 = vpop.f32.mrf.mxu1  ;;  %16104 = vmatprep.subr.bf16.mxu0 %v16804_v52 }
 0x358   : > { %v4832_v16 = vadd.f32 %v4673_v58, %v18276_v19  ;;  %v18820_v15 = vadd.f32 %v5434_v30, %v4830_v20  ;;  %v16757_v58 = vld [vmem:[%s17160_s18 + $0x94] sm:$0xff]  }
 0x359   : > { %v15703_v56 = vpop.f32.mrf.mxu0  ;;  %v15793_v60 = vpop.f32.mrf.mxu1 }
 0x35a   : > { %16105 = vmatpush3.bf16.msra.mxu0 %v16804_v52  ;;  %v5862_v60 = vrot.slane %v16757_v58, 1 }
 0x35b   : > { %v4678_v13 = vpop.f32.mrf.mxu0  ;;  %15897 = vmatmul.mubr.msk.bf16.gmra.mxu0 %vm522_vm2, %v5859_v37  ;;  %v5439_v24 = vpop.f32.mrf.mxu1 }
 0x35c   : > { %v4833_v19 = vadd.f32 %v4678_v13, %v18284_v57  ;;  %15900 = vmatprep.mubr.msk.bf16.mxu0 %vm17070_vm1, %v20752_v33  ;;  %v18829_v20 = vadd.f32 %v5439_v24, %v4831_v22 }
 0x35d   : > { %v15706_v18 = vpop.f32.mrf.mxu0  ;;  %v15796_v36 = vpop.f32.mrf.mxu1 }
 0x35e   : > { %v5863_v18 = vsel %vm1790_vm4, %v5860_v44, %v5862_v60  ;;  %v16758_v36 = vld [vmem:[%s17160_s18 + $0x9c] sm:$0xff]  }
 0x35f   : > { %v4681_v61 = vpop.f32.mrf.mxu0  ;;  %v5442_v8 = vpop.f32.mrf.mxu1 }
 0x360   : > { %v4834_v34 = vadd.f32 %v4681_v61, %v18291_v50  ;;  %v18834_v30 = vadd.f32 %v5442_v8, %v4832_v16 }
 0x361   : > { %v15707_v57 = vpop.f32.mrf.mxu0  ;;  %v15797_v37 = vpop.f32.mrf.mxu1 }
 0x362   : > { %v5864_v57 = vrot.slane %v16758_v36, 1 }
 0x363   : > { %v4686_v56 = vpop.f32.mrf.mxu0  ;;  %15901 = vmatmul.mubr.msk.bf16.gmra.mxu0 %vm522_vm2, %v5861_v62  ;;  %v5447_v22 = vpop.f32.mrf.mxu1 }
 0x364   : > { %v4835_v51 = vadd.f32 %v4686_v56, %v18299_v17  ;;  %15904 = vmatprep.mubr.msk.bf16.mxu0 %vm17070_vm1, %v20752_v33  ;;  %v18840_v52 = vadd.f32 %v5447_v22, %v4833_v19 }
 0x365   : > { %v15710_v50 = vpop.f32.mrf.mxu0  ;;  %v15800_v1 = vpop.f32.mrf.mxu1 }
 0x366   : > { %v5865_v50 = vsel %vm1790_vm4, %v5862_v60, %v5864_v57  ;;  %v16759_v1 = vld [vmem:[%s17160_s18 + $0xa4] sm:$0xff]  }
 0x367   : > { %v4689_v13 = vpop.f32.mrf.mxu0  ;;  %v5450_v16 = vpop.f32.mrf.mxu1 }
 0x368   : > { %v4836_v24 = vadd.f32 %v4689_v13, %v18309_v11  ;;  %v18845_v61 = vadd.f32 %v5450_v16, %v4834_v34 }
 0x369   : > { %v15711_v8 = vpop.f32.mrf.mxu0  ;;  %v15801_v17 = vpop.f32.mrf.mxu1 }
 0x36a   : > { %v5866_v8 = vrot.slane %v16759_v1, 1 }
 0x36b   : > { %v4694_v62 = vpop.f32.mrf.mxu0  ;;  %15905 = vmatmul.mubr.msk.bf16.gmra.mxu0 %vm522_vm2, %v5863_v18  ;;  %v5455_v58 = vpop.f32.mrf.mxu1 }
 0x36c   : > { %v4837_v19 = vadd.f32 %v4694_v62, %v18323_v47  ;;  %15908 = vmatprep.mubr.msk.bf16.mxu0 %vm17070_vm1, %v20752_v33  ;;  %v18851_v37 = vadd.f32 %v5455_v58, %v4835_v51 }
 0x36d   : > { %v15714_v11 = vpop.f32.mrf.mxu0  ;;  %v15804_v44 = vpop.f32.mrf.mxu1 }
 0x36e   : > { %v5867_v11 = vsel %vm1790_vm4, %v5864_v57, %v5866_v8  ;;  %v16762_v44 = vld [vmem:[%s17160_s18 + $0xac] sm:$0xff]  }
 0x36f   : > { %v4697_v56 = vpop.f32.mrf.mxu0  ;;  %v5458_v34 = vpop.f32.mrf.mxu1 }
 0x370   : > { %v4838_v22 = vadd.f32 %v4697_v56, %v18338_v42  ;;  %v18856_v13 = vadd.f32 %v5458_v34, %v4836_v24 }
 0x371   : > { %v15715_v16 = vpop.f32.mrf.mxu0  ;;  %v15805_v47 = vpop.f32.mrf.mxu1 }
 0x372   : > { %v5868_v16 = vrot.slane %v16762_v44, 1 }
 0x373   : > { %v4702_v18 = vpop.f32.mrf.mxu0  ;;  %15909 = vmatmul.mubr.msk.bf16.gmra.mxu0 %vm522_vm2, %v5865_v50  ;;  %v5463_v36 = vpop.f32.mrf.mxu1 }
 0x374   : > { %v4839_v51 = vadd.f32 %v4702_v18, %v18353_v46  ;;  %15912 = vmatprep.mubr.msk.bf16.mxu0 %vm17070_vm1, %v20752_v33  ;;  %v18862_v17 = vadd.f32 %v5463_v36, %v4837_v19 }
 0x375   : > { %v15718_v42 = vpop.f32.mrf.mxu0  ;;  %v15808_v60 = vpop.f32.mrf.mxu1 }
 0x376   : > { %v5869_v42 = vsel %vm1790_vm4, %v5866_v8, %v5868_v16  ;;  %v16765_v60 = vld [vmem:[%s17160_s18 + $0xb4] sm:$0xff]  }
 0x377   : > { %v4705_v62 = vpop.f32.mrf.mxu0  ;;  %v5466_v24 = vpop.f32.mrf.mxu1 }
 0x378   : > { %v4840_v58 = vadd.f32 %v4705_v62, %v18373_v49  ;;  %v18867_v56 = vadd.f32 %v5466_v24, %v4838_v22 }
 0x379   : > { %v15719_v34 = vpop.f32.mrf.mxu0  ;;  %v15809_v46 = vpop.f32.mrf.mxu1 }
 0x37a   : > { %v5870_v34 = vrot.slane %v16765_v60, 1 }
 0x37b   : > { %v4710_v50 = vpop.f32.mrf.mxu0  ;;  %15913 = vmatmul.mubr.msk.bf16.gmra.mxu0 %vm522_vm2, %v5867_v11  ;;  %v5471_v1 = vpop.f32.mrf.mxu1 }
 0x37c   : > { %v4841_v19 = vadd.f32 %v4710_v50, %v18389_v59  ;;  %15916 = vmatprep.mubr.msk.bf16.mxu0 %vm17070_vm1, %v20752_v33  ;;  %v18873_v47 = vadd.f32 %v5471_v1, %v4839_v51 }
 0x37d   : > { %v15722_v49 = vpop.f32.mrf.mxu0  ;;  %v15812_v57 = vpop.f32.mrf.mxu1 }
 0x37e   : > { %v5871_v49 = vsel %vm1790_vm4, %v5868_v16, %v5870_v34  ;;  %v16768_v57 = vld [vmem:[%s17160_s18 + $0xbc] sm:$0xff]  }
 0x37f   : > { %v4713_v18 = vpop.f32.mrf.mxu0  ;;  %v5474_v22 = vpop.f32.mrf.mxu1 }
 0x380   : > { %v4842_v36 = vadd.f32 %v4713_v18, %v18402_v2  ;;  %v18878_v62 = vadd.f32 %v5474_v22, %v4840_v58 }
 0x381   : > { %v15723_v24 = vpop.f32.mrf.mxu0  ;;  %v15813_v59 = vpop.f32.mrf.mxu1 }
 0x382   : > { %v5872_v24 = vrot.slane %v16768_v57, 1 }
 0x383   : > { %v4718_v11 = vpop.f32.mrf.mxu0  ;;  %15917 = vmatmul.mubr.msk.bf16.gmra.mxu0 %vm522_vm2, %v5869_v42  ;;  %v5479_v44 = vpop.f32.mrf.mxu1 }
 0x384   : > { %v4843_v51 = vadd.f32 %v4718_v11, %v18417_v29  ;;  %15920 = vmatprep.mubr.msk.bf16.mxu0 %vm17070_vm1, %v20752_v33  ;;  %v18884_v46 = vadd.f32 %v5479_v44, %v4841_v19 }
 0x385   : > { %v15726_v2 = vpop.f32.mrf.mxu0  ;;  %v15816_v8 = vpop.f32.mrf.mxu1 }
 0x386   : > { %v5873_v2 = vsel %vm1790_vm4, %v5870_v34, %v5872_v24  ;;  %v16771_v8 = vld [vmem:[%s17160_s18 + $0xc4] sm:$0x1f]  }
 0x387   : > { %v4721_v50 = vpop.f32.mrf.mxu0  ;;  %v5482_v58 = vpop.f32.mrf.mxu1  ;;  %v5874_v57 = vrot.slane %v16771_v8, 1 }
 0x388   : > { %v4844_v1 = vadd.f32 %v4721_v50, %v18430_v43  ;;  %v18889_v18 = vadd.f32 %v5482_v58, %v4842_v36 }
 0x389   : > { %v15727_v22 = vpop.f32.mrf.mxu0  ;;  %v15817_v29 = vpop.f32.mrf.mxu1 }
 0x38b   : > { %v4726_v42 = vpop.f32.mrf.mxu0  ;;  %15921 = vmatmul.mubr.msk.bf16.gmra.mxu0 %vm522_vm2, %v5871_v49  ;;  %v5487_v60 = vpop.f32.mrf.mxu1 }
 0x38c   : > { %v4845_v19 = vadd.f32 %v4726_v42, %v18444_v10  ;;  %15924 = vmatprep.mubr.msk.bf16.mxu0 %vm17070_vm1, %v20752_v33  ;;  %v18895_v59 = vadd.f32 %v5487_v60, %v4843_v51 }
 0x38d   : > { %v15730_v43 = vpop.f32.mrf.mxu0  ;;  %v15820_v16 = vpop.f32.mrf.mxu1 }
 0x38e   : > { %v5875_v43 = vsel %vm1790_vm4, %v5872_v24, %v5874_v57 }
 0x38f   : > { %v4729_v11 = vpop.f32.mrf.mxu0  ;;  %v5490_v36 = vpop.f32.mrf.mxu1 }
 0x390   : > { %v4846_v44 = vadd.f32 %v4729_v11, %v18459_v41  ;;  %v18900_v50 = vadd.f32 %v5490_v36, %v4844_v1 }
 0x391   : > { %v15731_v58 = vpop.f32.mrf.mxu0  ;;  %v15821_v49 = vpop.f32.mrf.mxu1 }
 0x393   : > { %v4734_v10 = vpop.f32.mrf.mxu0  ;;  %15925 = vmatmul.mubr.msk.bf16.gmra.mxu0 %vm522_vm2, %v5873_v2  ;;  %v5495_v22 = vpop.f32.mrf.mxu1 }
 0x394   : > { %v4847_v51 = vadd.f32 %v4734_v10, %v18474_v6  ;;  %15928 = vmatprep.mubr.msk.bf16.mxu0 %vm17070_vm1, %v20752_v33  ;;  %v18906_v29 = vadd.f32 %v5495_v22, %v4845_v19 }
 0x395   : > { %v15734_v41 = vpop.f32.mrf.mxu0  ;;  %v15824_v42 = vpop.f32.mrf.mxu1 }
 0x397   : > { %v4737_v34 = vpop.f32.mrf.mxu0  ;;  %v5498_v60 = vpop.f32.mrf.mxu1 }
 0x398   : > { %v4848_v1 = vadd.f32 %v4737_v34, %v18488_v3  ;;  %v18910_v16 = vadd.f32 %v5498_v60, %v4846_v44 }
 0x399   : > { %v15735_v11 = vpop.f32.mrf.mxu0  ;;  %v15825_v36 = vpop.f32.mrf.mxu1 }
 0x39b   : > { %v4742_v2 = vpop.f32.mrf.mxu0  ;;  %15929 = vmatmul.mubr.msk.bf16.gmra.mxu0 %vm522_vm2, %v5875_v43  ;;  %v5503_v6 = vpop.f32.mrf.mxu1 }
 0x39c   : > { %v4849_v8 = vadd.f32 %v4742_v2, %v18503_v31  ;;  %15932 = vmatprep.mubr.msk.bf16.mxu0 %vm17070_vm1, %v20752_v33  ;;  %v18916_v19 = vadd.f32 %v5503_v6, %v4847_v51 }
 0x39d   : > { %v15738_v58 = vpop.f32.mrf.mxu0  ;;  %v15828_v49 = vpop.f32.mrf.mxu1 }
 0x39f   : > { %v4745_v3 = vpop.f32.mrf.mxu0  ;;  %v5506_v10 = vpop.f32.mrf.mxu1 }
 0x3a0   : > { %v4850_v24 = vadd.f32 %v4745_v3, %v18516_v45  ;;  %v18919_v44 = vadd.f32 %v5506_v10, %v4848_v1 }
 0x3a1   : > { %v15739_v22 = vpop.f32.mrf.mxu0  ;;  %v15829_v41 = vpop.f32.mrf.mxu1 }
 0x3a3   : > { %v4750_v42 = vpop.f32.mrf.mxu0  ;;  %15933 = vmatmul.mubr.msk.bf16.gmra.mxu0 %vm522_vm2, %v5874_v57  ;;  %v5511_v34 = vpop.f32.mrf.mxu1 }
 0x3a4   : > { %v4851_v31 = vadd.f32 %v4750_v42, %v18529_v0  ;;  %v18923_v60 = vadd.f32 %v5511_v34, %v4849_v8 }
 0x3a5   : > { %v15742_v33 = vpop.f32.mrf.mxu0  ;;  %v15832_v51 = vpop.f32.mrf.mxu1 }
 0x3a7   : > { %v4753_v43 = vpop.f32.mrf.mxu0  ;;  %v5514_v11 = vpop.f32.mrf.mxu1 }
 0x3a8   : > { %v4852_v36 = vadd.f32 %v4753_v43, %v18539_v26  ;;  %v18926_v2 = vadd.f32 %v5514_v11, %v4850_v24  ;;  %v18936_v26 = vld [vmem:[%s20744_s5] ss:$0 sm:$0xff]  ;;  %v6489_v11 = vpop.permute.xlu0 %6488 }
 0x3a9   : > { %v15743_v45 = vpop.f32.mrf.mxu0  ;;  %v15833_v1 = vpop.f32.mrf.mxu1 }
 0x3ab   : > { %v4758_v6 = vpop.f32.mrf.mxu0  ;;  %v5519_v58 = vpop.f32.mrf.mxu1 }
 0x3ac   : > { %v4853_v49 = vadd.f32 %v4758_v6, %v18551_v5  ;;  %v18929_v57 = vadd.f32 %v5519_v58, %v4851_v31 }
 0x3ad   : > { %v15746_v3 = vpop.f32.mrf.mxu0  ;;  %v15836_v0 = vpop.f32.mrf.mxu1 }
 0x3af   : > { %v4761_v8 = vpop.f32.mrf.mxu0  ;;  %v5522_v10 = vpop.f32.mrf.mxu1 }
 0x3b0   : > { %v18931_v22 = vadd.f32 %v5522_v10, %v4852_v36 }
 0x3b1   : > { %v15747_v41 = vpop.f32.mrf.mxu0  ;;  %v15837_v42 = vpop.f32.mrf.mxu1 }
 0x3b2   : > { %v20763_v41 = vld [vmem:[#allocation5_spill] sm:$0xff] }
 0x3b3   : > { %v5982_v34 = vpop.f32.mrf.mxu0  ;;  %v5527_v24 = vpop.f32.mrf.mxu1 }
 0x3b4   : > { %v6209_v33 = vadd.f32 %v5982_v34, %v18581_v28  ;;  %v18939_v5 = vadd.f32 %v5527_v24, %v4853_v49  ;;  %v6494_v49 = vpop.permute.xlu0 %6493 }
 0x3b5   : > { %v15846_v31 = vpop.f32.mrf.mxu0  ;;  %v15840_v43 = vpop.f32.mrf.mxu1 }
 0x3b6   : > { %20762 = vst [vmem:[#allocation6_spill] sm:$0xff] %v18939_v5  ;;  %v6351_v51 = vadd.f32 %v18936_v26, %v6209_v33  ;;  %v6499_v31 = vpop.permute.xlu1 %6498 }
 0x3b7   : > { %v5985_v36 = vpop.f32.mrf.mxu0  ;;  %v5530_v1 = vpop.f32.mrf.mxu1 }
 0x3b8   : > { %v6210_v45 = vadd.f32 %v5985_v36, %v18595_v27  ;;  %v6396_v58 = vmax.f32 %v6351_v51, 0.0 }
 0x3b9   : > { %v15847_v6 = vpop.f32.mrf.mxu0  ;;  %v15841_v0 = vpop.f32.mrf.mxu1 }
 0x3ba   : > { %v6352_v3 = vadd.f32 %v18936_v26, %v6210_v45  ;;  %v6711_v34 = vmul.f32 %v6489_v11, %v6396_v58  ;;  %v6504_v0 = vpop.permute.xlu1 %6503 }
 0x3bb   : > { %v5990_v8 = vpop.f32.mrf.mxu0 }
 0x3bc   : > { %v6397_v10 = vmax.f32 %v6352_v3, 0.0  ;;  %v6211_v28 = vadd.f32 %v5990_v8, %v20763_v41 }
 0x3bd   : > { %v15850_v42 = vpop.f32.mrf.mxu0 }
 0x3be   : > { %v6712_v24 = vmul.f32 %v6494_v49, %v6397_v10  ;;  %v6353_v33 = vadd.f32 %v18936_v26, %v6211_v28 }
 0x3bf   : > { %v5993_v43 = vpop.f32.mrf.mxu0 }
 0x3c0   : > { %v14401_v5 = vpack.c.bf16 %v6712_v24, %v6711_v34  ;;  %v6212_v27 = vadd.f32 %v5993_v43, %v18624_v48  ;;  %v6398_v51 = vmax.f32 %v6353_v33, 0.0  ;;  %v6509_v33 = vpop.permute.xlu0 %6508 }
 0x3c1   : > { %v15851_v36 = vpop.f32.mrf.mxu0 }
 0x3c2   : > { %14402 = vst [vmem:[#allocation3] sm:$0xff] %v14401_v5   ;;  %v6354_v45 = vadd.f32 %v18936_v26, %v6212_v27  ;;  %v6713_v11 = vmul.f32 %v6499_v31, %v6398_v51  ;;  %v6514_v27 = vpop.permute.xlu1 %6513 }
 0x3c3   : > { %v5998_v1 = vpop.f32.mrf.mxu0 }
 0x3c4   : > { %v6399_v6 = vmax.f32 %v6354_v45, 0.0  ;;  %v6213_v3 = vadd.f32 %v5998_v1, %v18633_v38  ;;  %v16834_v38 = vld [vmem:[%s20742_s3 + $0x78] sm:$0xff]  }
 0x3c5   : > { %v15854_v8 = vpop.f32.mrf.mxu0  ;;  %16034 = vmatprep.subr.bf16.mxu1 %v16834_v38 }
 0x3c6   : > { %v6714_v58 = vmul.f32 %v6504_v0, %v6399_v6  ;;  %v6355_v10 = vadd.f32 %v18936_v26, %v6213_v3  ;;  %v16836_v8 = vld [vmem:[%s20742_s3 + $0x70] sm:$0xff]  }
 0x3c7   : > { %v6001_v41 = vpop.f32.mrf.mxu0 }
 0x3c8   : > { %v14406_v28 = vpack.c.bf16 %v6714_v58, %v6713_v11  ;;  %v6214_v49 = vadd.f32 %v6001_v41, %v18641_v54  ;;  %v6400_v5 = vmax.f32 %v6355_v10, 0.0 }
 0x3c9   : > { %v15855_v48 = vpop.f32.mrf.mxu0  ;;  %v16796_v42 = vld [vmem:[#allocation3] sm:$0xff]  }
 0x3ca   : > { %14508 = vst [vmem:[#allocation3 + $0x8] sm:$0xff] %v14406_v28   ;;  %v6356_v34 = vadd.f32 %v18936_v26, %v6214_v49  ;;  %15994 = vmatprep.mubr.bf16.mxu1 %v16796_v42  ;;  %v6715_v54 = vmul.f32 %v6509_v33, %v6400_v5  ;;  %v16802_v0 = vld [vmem:[#allocation3] sm:$0xfe]   ;;  %v6519_v49 = vpop.permute.xlu0 %6518  ;;  %v16838_v33 = vld [vmem:[%s20742_s3 + $0x68] sm:$0xff]  }
 0x3cb   : > { %v6006_v24 = vpop.f32.mrf.mxu0  ;;  %v8909_v5 = vrot.slane %v16802_v0, 1 }
 0x3cc   : > { %v6401_v31 = vmax.f32 %v6356_v34, 0.0  ;;  %v6215_v43 = vadd.f32 %v6006_v24, %v18650_v14  ;;  %v6524_v34 = vpop.permute.xlu1 %6523 }
 0x3cd   : > { %v15858_v36 = vpop.f32.mrf.mxu0 }
 0x3ce   : > { %v6716_v51 = vmul.f32 %v6514_v27, %v6401_v31  ;;  %v6357_v45 = vadd.f32 %v18936_v26, %v6215_v43 }
 0x3cf   : > { %v6009_v1 = vpop.f32.mrf.mxu0 }
 0x3d0   : > { %v14411_v6 = vpack.c.bf16 %v6716_v51, %v6715_v54  ;;  %v6216_v3 = vadd.f32 %v6009_v1, %v18658_v63  ;;  %v6402_v14 = vmax.f32 %v6357_v45, 0.0  ;;  %v16841_v45 = vld [vmem:[%s20742_s3 + $0x60] sm:$0xff]  }
 0x3d1   : > { %v15859_v11 = vpop.f32.mrf.mxu0  ;;  %v16800_v58 = vld [vmem:[#allocation3 + $0x8] sm:$0xff]  }
 0x3d2   : > { %14509 = vst [vmem:[#allocation3 + $0x10] sm:$0xff] %v14411_v6   ;;  %v6358_v10 = vadd.f32 %v18936_v26, %v6216_v3  ;;  %v16803_v41 = vld [vmem:[#allocation3 + $0x8] sm:$0xff]   ;;  %15995 = vmatmul.mubr.bf16.vlgmr.msra.gmra.mxu1 %v16800_v58  ;;  %v6717_v31 = vmul.f32 %v6519_v49, %v6402_v14  ;;  %v6529_v14 = vpop.permute.xlu0 %6528  ;;  %v6534_v49 = vpop.permute.xlu1 %6533 }
 0x3d3   : > { %v6014_v28 = vpop.f32.mrf.mxu0  ;;  %v8910_v63 = vrot.slane %v16803_v41, 1  ;;  %16035 = vmatpush3.bf16.msra.mxu1 %v16834_v38  ;;  %v16842_v41 = vld [vmem:[%s20742_s3 + $0x130] sm:$0xff]  }
 0x3d4   : > { %v6403_v48 = vmax.f32 %v6358_v10, 0.0  ;;  %v6217_v42 = vadd.f32 %v6014_v28, %v18667_v32  ;;  %16036 = vmatprep.subr.bf16.mxu1 %v16836_v8  ;;  %v16840_v32 = vld [vmem:[%s20742_s3 + $0x138] sm:$0xff]  }
 0x3d5   : > { %v15862_v24 = vpop.f32.mrf.mxu0  ;;  %v8911_v36 = vsel %vm1790_vm4, %v8909_v5, %v8910_v63  ;;  %16202 = vmatprep.subr.bf16.mxu0 %v16840_v32  ;;  %v16844_v28 = vld [vmem:[%s20742_s3 + $0x58] sm:$0xff]  }
 0x3d6   : > { %v6718_v43 = vmul.f32 %v6524_v34, %v6403_v48  ;;  %v6359_v27 = vadd.f32 %v18936_v26, %v6217_v42  ;;  %16106 = vmatprep.mubr.bf16.mxu0 %v8911_v36 }
 0x3d7   : > { %v6017_v54 = vpop.f32.mrf.mxu0  ;;  %16037 = vmatpush3.bf16.msra.mxu1 %v16836_v8 }
 0x3d8   : > { %v14416_v38 = vpack.c.bf16 %v6718_v43, %v6717_v31  ;;  %v6218_v51 = vadd.f32 %v6017_v54, %v18675_v25  ;;  %16038 = vmatprep.subr.bf16.mxu1 %v16838_v33  ;;  %v6404_v3 = vmax.f32 %v6359_v27, 0.0  ;;  %v16847_v27 = vld [vmem:[%s20742_s3 + $0x50] sm:$0xff]  }
 0x3d9   : > { %v15863_v1 = vpop.f32.mrf.mxu0  ;;  %v16805_v6 = vld [vmem:[#allocation3 + $0x10] sm:$0xff]  }
 0x3da   : > { %14510 = vst [vmem:[#allocation3 + $0x18] sm:$0xff] %v14416_v38   ;;  %v6360_v0 = vadd.f32 %v18936_v26, %v6218_v51  ;;  %v16806_v11 = vld [vmem:[#allocation3 + $0x10] sm:$0xff]   ;;  %15998 = vmatprep.mubr.bf16.mxu1 %v16805_v6  ;;  %v6719_v42 = vmul.f32 %v6529_v14, %v6404_v3  ;;  %v6539_v6 = vpop.permute.xlu0 %6538 }
 0x3db   : > { %v6022_v58 = vpop.f32.mrf.mxu0  ;;  %v8912_v8 = vrot.slane %v16806_v11, 1  ;;  %16039 = vmatpush3.bf16.msra.mxu1 %v16838_v33  ;;  %v16846_v33 = vld [vmem:[%s20742_s3 + $0x128] sm:$0xff]   ;;  %v6544_v11 = vpop.permute.xlu1 %6543 }
 0x3dc   : > { %v6405_v10 = vmax.f32 %v6360_v0, 0.0  ;;  %v6219_v25 = vadd.f32 %v6022_v58, %v18684_v12  ;;  %16040 = vmatprep.subr.bf16.mxu1 %v16841_v45  ;;  %v16850_v0 = vld [vmem:[%s20742_s3 + $0x48] sm:$0xff]  }
 0x3dd   : > { %v15866_v48 = vpop.f32.mrf.mxu0  ;;  %v8913_v24 = vsel %vm1790_vm4, %v8910_v63, %v8912_v8 }
 0x3de   : > { %v6720_v5 = vmul.f32 %v6534_v49, %v6405_v10  ;;  %v6361_v34 = vadd.f32 %v18936_v26, %v6219_v25  ;;  %16107 = vmatmul.mubr.bf16.vlgmr.msra.gmra.mxu0 %v8913_v24  ;;  %v16854_v48 = vld [vmem:[%s20742_s3 + $0x118] sm:$0xff]  }
 0x3df   : > { %v6025_v12 = vpop.f32.mrf.mxu0  ;;  %16203 = vmatpush3.bf16.msra.mxu0 %v16840_v32  ;;  %16041 = vmatpush3.bf16.msra.mxu1 %v16841_v45  ;;  %v16848_v45 = vld [vmem:[%s20742_s3 + $0x120] sm:$0xff]  }
 0x3e0   : > { %v14421_v31 = vpack.c.bf16 %v6720_v5, %v6719_v42  ;;  %v6220_v43 = vadd.f32 %v6025_v12, %v18692_v7  ;;  %16204 = vmatprep.subr.bf16.mxu0 %v16842_v41  ;;  %16042 = vmatprep.subr.bf16.mxu1 %v16844_v28  ;;  %v6406_v63 = vmax.f32 %v6361_v34, 0.0 }
 0x3e1   : > { %v15867_v36 = vpop.f32.mrf.mxu0  ;;  %v16807_v54 = vld [vmem:[#allocation3 + $0x18] sm:$0xff]  }
 0x3e2   : > { %14511 = vst [vmem:[#allocation3 + $0x20] sm:$0xff] %v14421_v31   ;;  %v6362_v38 = vadd.f32 %v18936_v26, %v6220_v43  ;;  %v16808_v51 = vld [vmem:[#allocation3 + $0x18] sm:$0xff]   ;;  %15999 = vmatmul.mubr.bf16.gmra.mxu1 %v16807_v54  ;;  %v6721_v14 = vmul.f32 %v6539_v6, %v6406_v63  ;;  %v6554_v36 = vpop.permute.xlu1 %6553  ;;  %v16856_v63 = vld [vmem:[%s20742_s3 + $0x110] sm:$0xff]  }
 0x3e3   : > { %v6030_v1 = vpop.f32.mrf.mxu0  ;;  %v8914_v32 = vrot.slane %v16808_v51, 1  ;;  %16205 = vmatpush3.bf16.msra.mxu0 %v16842_v41  ;;  %16043 = vmatpush3.bf16.msra.mxu1 %v16844_v28 }
 0x3e4   : > { %v6407_v3 = vmax.f32 %v6362_v38, 0.0  ;;  %v6221_v7 = vadd.f32 %v6030_v1, %v18704_v40  ;;  %16206 = vmatprep.subr.bf16.mxu0 %v16846_v33  ;;  %16044 = vmatprep.subr.bf16.mxu1 %v16847_v27 }
 0x3e5   : > { %v15870_v58 = vpop.f32.mrf.mxu0  ;;  %v8915_v40 = vsel %vm1790_vm4, %v8912_v8, %v8914_v32 }
 0x3e6   : > { %v6722_v10 = vmul.f32 %v6544_v11, %v6407_v3  ;;  %v6363_v25 = vadd.f32 %v18936_v26, %v6221_v7  ;;  %16110 = vmatprep.mubr.bf16.mxu0 %v8915_v40 }
 0x3e7   : > { %v6033_v41 = vpop.f32.mrf.mxu0  ;;  %16207 = vmatpush3.bf16.msra.mxu0 %v16846_v33  ;;  %16045 = vmatpush3.bf16.msra.mxu1 %v16847_v27  ;;  %v6549_v33 = vpop.permute.xlu0 %6548 }
 0x3e8   : > { %v14426_v28 = vpack.c.bf16 %v6722_v10, %v6721_v14  ;;  %v6222_v49 = vadd.f32 %v6033_v41, %v18717_v53  ;;  %16208 = vmatprep.subr.bf16.mxu0 %v16848_v45  ;;  %16046 = vmatprep.subr.bf16.mxu1 %v16850_v0  ;;  %v6408_v34 = vmax.f32 %v6363_v25, 0.0  ;;  %v16855_v53 = vld [vmem:[%s20742_s3 + $0x40] sm:$0xff]  }
 0x3e9   : > { %v15871_v42 = vpop.f32.mrf.mxu0  ;;  %v16809_v5 = vld [vmem:[#allocation3 + $0x20] sm:$0xff]  }
 0x3ea   : > { %14512 = vst [vmem:[#allocation3 + $0x28] sm:$0xff] %v14426_v28   ;;  %v6364_v24 = vadd.f32 %v18936_v26, %v6222_v49  ;;  %v16810_v8 = vld [vmem:[#allocation3 + $0x20] sm:$0xff]   ;;  %16002 = vmatprep.mubr.bf16.mxu1 %v16809_v5  ;;  %v6723_v38 = vmul.f32 %v6549_v33, %v6408_v34  ;;  %v6564_v28 = vpop.permute.xlu1 %6563 }
 0x3eb   : > { %v6038_v12 = vpop.f32.mrf.mxu0  ;;  %v8916_v27 = vrot.slane %v16810_v8, 1  ;;  %16209 = vmatpush3.bf16.msra.mxu0 %v16848_v45  ;;  %16047 = vmatpush3.bf16.msra.mxu1 %v16850_v0  ;;  %v16860_v45 = vld [vmem:[%s20742_s3 + $0x108] sm:$0xff]   ;;  %v6559_v25 = vpop.permute.xlu0 %6558 }
 0x3ec   : > { %v6409_v31 = vmax.f32 %v6364_v24, 0.0  ;;  %v6223_v43 = vadd.f32 %v6038_v12, %v18730_v39  ;;  %16210 = vmatprep.subr.bf16.mxu0 %v16854_v48  ;;  %16048 = vmatprep.subr.bf16.mxu1 %v16855_v53 }
 0x3ed   : > { %v15874_v54 = vpop.f32.mrf.mxu0  ;;  %v8917_v6 = vsel %vm1790_vm4, %v8914_v32, %v8916_v27 }
 0x3ee   : > { %v6724_v51 = vmul.f32 %v6554_v36, %v6409_v31  ;;  %v6365_v1 = vadd.f32 %v18936_v26, %v6223_v43  ;;  %16111 = vmatmul.mubr.bf16.gmra.mxu0 %v8917_v6 }
 0x3ef   : > { %v6041_v3 = vpop.f32.mrf.mxu0  ;;  %16211 = vmatpush3.bf16.msra.mxu0 %v16854_v48  ;;  %16049 = vmatpush3.bf16.msra.mxu1 %v16855_v53  ;;  %v16863_v48 = vld [vmem:[%s20742_s3 + $0x100] sm:$0xff]  }
 0x3f0   : > { %v14431_v39 = vpack.c.bf16 %v6724_v51, %v6723_v38  ;;  %v6224_v7 = vadd.f32 %v6041_v3, %v18746_v21  ;;  %16212 = vmatprep.subr.bf16.mxu0 %v16856_v63  ;;  %v6410_v58 = vmax.f32 %v6365_v1, 0.0  ;;  %v6574_v1 = vpop.permute.xlu1 %6573 }
 0x3f1   : > { %v15875_v0 = vpop.f32.mrf.mxu0  ;;  %v16811_v11 = vld [vmem:[#allocation3 + $0x28] sm:$0xff]  }
 0x3f2   : > { %14513 = vst [vmem:[#allocation3 + $0x30] sm:$0xff] %v14431_v39   ;;  %v6366_v14 = vadd.f32 %v18936_v26, %v6224_v7  ;;  %v16812_v10 = vld [vmem:[#allocation3 + $0x28] sm:$0xff]   ;;  %16003 = vmatmul.mubr.bf16.gmra.mxu1 %v16811_v11  ;;  %v6725_v42 = vmul.f32 %v6559_v25, %v6410_v58 }
 0x3f3   : > { %v6046_v32 = vpop.f32.mrf.mxu0  ;;  %v8918_v41 = vrot.slane %v16812_v10, 1  ;;  %16213 = vmatpush3.bf16.msra.mxu0 %v16856_v63  ;;  %v6569_v63 = vpop.permute.xlu0 %6568 }
 0x3f4   : > { %v6411_v40 = vmax.f32 %v6366_v14, 0.0  ;;  %v6225_v21 = vadd.f32 %v6046_v32, %v18762_v9  ;;  %16214 = vmatprep.subr.bf16.mxu0 %v16860_v45 }
 0x3f5   : > { %v15878_v49 = vpop.f32.mrf.mxu0  ;;  %v8919_v24 = vsel %vm1790_vm4, %v8916_v27, %v8918_v41 }
 0x3f6   : > { %v6726_v5 = vmul.f32 %v6564_v28, %v6411_v40  ;;  %v6367_v34 = vadd.f32 %v18936_v26, %v6225_v21  ;;  %16114 = vmatprep.mubr.bf16.mxu0 %v8919_v24  ;;  %v6584_v21 = vpop.permute.xlu1 %6583 }
 0x3f7   : > { %v6049_v8 = vpop.f32.mrf.mxu0  ;;  %16215 = vmatpush3.bf16.msra.mxu0 %v16860_v45  ;;  %v6579_v40 = vpop.permute.xlu0 %6578 }
 0x3f8   : > { %v14436_v12 = vpack.c.bf16 %v6726_v5, %v6725_v42  ;;  %v6226_v9 = vadd.f32 %v6049_v8, %v18776_v4  ;;  %16216 = vmatprep.subr.bf16.mxu0 %v16863_v48  ;;  %v6412_v31 = vmax.f32 %v6367_v34, 0.0  ;;  %v19035_v42 = vpop.f32.mrf.mxu1 }
 0x3f9   : > { %v15879_v53 = vpop.f32.mrf.mxu0  ;;  %v16813_v33 = vld [vmem:[#allocation3 + $0x30] sm:$0xff]  }
 0x3fa   : > { %14514 = vst [vmem:[#allocation3 + $0x38] sm:$0xff] %v14436_v12   ;;  %v6368_v43 = vadd.f32 %v18936_v26, %v6226_v9  ;;  %v16814_v36 = vld [vmem:[#allocation3 + $0x30] sm:$0xff]   ;;  %16006 = vmatprep.mubr.bf16.mxu1 %v16813_v33  ;;  %v6727_v4 = vmul.f32 %v6569_v63, %v6412_v31  ;;  %v19040_v31 = vpop.f32.mrf.mxu1 }
 0x3fb   : > { %v6054_v54 = vpop.f32.mrf.mxu0  ;;  %v8920_v51 = vrot.slane %v16814_v36, 1  ;;  %16217 = vmatpush3.bf16.msra.mxu0 %v16863_v48  ;;  %v6589_v63 = vpop.permute.xlu0 %6588 }
 0x3fc   : > { %v6413_v38 = vmax.f32 %v6368_v43, 0.0  ;;  %v6227_v27 = vadd.f32 %v6054_v54, %v18791_v23 }
 0x3fd   : > { %v15882_v6 = vpop.f32.mrf.mxu0  ;;  %v8921_v7 = vsel %vm1790_vm4, %v8918_v41, %v8920_v51 }
 0x3fe   : > { %v6728_v3 = vmul.f32 %v6574_v1, %v6413_v38  ;;  %v6369_v39 = vadd.f32 %v18936_v26, %v6227_v27  ;;  %16115 = vmatmul.mubr.bf16.gmra.mxu0 %v8921_v7  ;;  %v6594_v38 = vpop.permute.xlu1 %6593 }
 0x3ff   : > { %v6057_v45 = vpop.f32.mrf.mxu0 }
 0x400   : > { %v14441_v0 = vpack.c.bf16 %v6728_v3, %v6727_v4  ;;  %v6228_v11 = vadd.f32 %v6057_v45, %v18803_v35  ;;  %v6414_v10 = vmax.f32 %v6369_v39, 0.0  ;;  %v19044_v4 = vpop.f32.mrf.mxu1 }
 0x401   : > { %v15883_v58 = vpop.f32.mrf.mxu0  ;;  %v16815_v14 = vld [vmem:[#allocation3 + $0x38] sm:$0xff]  }
 0x402   : > { %14515 = vst [vmem:[#allocation3 + $0x40] sm:$0xff] %v14441_v0   ;;  %v6370_v23 = vadd.f32 %v18936_v26, %v6228_v11  ;;  %v16816_v32 = vld [vmem:[#allocation3 + $0x38] sm:$0xff]   ;;  %16007 = vmatmul.mubr.bf16.gmra.mxu1 %v16815_v14  ;;  %v6729_v5 = vmul.f32 %v6579_v40, %v6414_v10  ;;  %v19049_v10 = vpop.f32.mrf.mxu1  ;;  %v6599_v40 = vpop.permute.xlu0 %6598 }
 0x403   : > { %v6062_v25 = vpop.f32.mrf.mxu0  ;;  %v8922_v41 = vrot.slane %v16816_v32, 1  ;;  %20764 = vst [vmem:[#allocation7_spill] sm:$0xff] %v19049_v10 }
 0x404   : > { %v6415_v28 = vmax.f32 %v6370_v23, 0.0  ;;  %v6229_v49 = vadd.f32 %v6062_v25, %v18812_v55 }
 0x405   : > { %v15886_v48 = vpop.f32.mrf.mxu0  ;;  %v8923_v24 = vsel %vm1790_vm4, %v8920_v51, %v8922_v41 }
 0x406   : > { %v6730_v35 = vmul.f32 %v6584_v21, %v6415_v28  ;;  %v6371_v34 = vadd.f32 %v18936_v26, %v6229_v49  ;;  %16118 = vmatprep.mubr.bf16.mxu0 %v8923_v24  ;;  %v6604_v21 = vpop.permute.xlu1 %6603 }
 0x407   : > { %v6065_v8 = vpop.f32.mrf.mxu0 }
 0x408   : > { %v14446_v12 = vpack.c.bf16 %v6730_v35, %v6729_v5  ;;  %v6230_v9 = vadd.f32 %v6065_v8, %v18820_v15  ;;  %v6416_v55 = vmax.f32 %v6371_v34, 0.0  ;;  %v19053_v5 = vpop.f32.mrf.mxu1 }
 0x409   : > { %v15887_v53 = vpop.f32.mrf.mxu0  ;;  %v16817_v33 = vld [vmem:[#allocation3 + $0x40] sm:$0xff]  }
 0x40a   : > { %14516 = vst [vmem:[#allocation3 + $0x48] sm:$0xff] %v14446_v12   ;;  %v6372_v43 = vadd.f32 %v18936_v26, %v6230_v9  ;;  %v16818_v36 = vld [vmem:[#allocation3 + $0x40] sm:$0xff]   ;;  %16010 = vmatprep.mubr.bf16.mxu1 %v16817_v33  ;;  %v6731_v15 = vmul.f32 %v6589_v63, %v6416_v55  ;;  %v19058_v55 = vpop.f32.mrf.mxu1  ;;  %v6609_v63 = vpop.permute.xlu0 %6608 }
 0x40b   : > { %v6070_v54 = vpop.f32.mrf.mxu0  ;;  %v8924_v1 = vrot.slane %v16818_v36, 1 }
 0x40c   : > { %v6417_v27 = vmax.f32 %v6372_v43, 0.0  ;;  %v6231_v51 = vadd.f32 %v6070_v54, %v18829_v20 }
 0x40d   : > { %v15890_v6 = vpop.f32.mrf.mxu0  ;;  %v8925_v7 = vsel %vm1790_vm4, %v8922_v41, %v8924_v1 }
 0x40e   : > { %v6732_v3 = vmul.f32 %v6594_v38, %v6417_v27  ;;  %v6373_v39 = vadd.f32 %v18936_v26, %v6231_v51  ;;  %16119 = vmatmul.mubr.bf16.gmra.mxu0 %v8925_v7  ;;  %v6614_v38 = vpop.permute.xlu1 %6613 }
 0x40f   : > { %v6073_v45 = vpop.f32.mrf.mxu0 }
 0x410   : > { %v14451_v0 = vpack.c.bf16 %v6732_v3, %v6731_v15  ;;  %v6232_v11 = vadd.f32 %v6073_v45, %v18834_v30  ;;  %v6418_v20 = vmax.f32 %v6373_v39, 0.0  ;;  %v19062_v15 = vpop.f32.mrf.mxu1 }
 0x411   : > { %v15891_v58 = vpop.f32.mrf.mxu0  ;;  %v16819_v14 = vld [vmem:[#allocation3 + $0x48] sm:$0xff]  }
 0x412   : > { %14517 = vst [vmem:[#allocation3 + $0x50] sm:$0xff] %v14451_v0   ;;  %v6374_v23 = vadd.f32 %v18936_v26, %v6232_v11  ;;  %v16820_v32 = vld [vmem:[#allocation3 + $0x48] sm:$0xff]   ;;  %16011 = vmatmul.mubr.bf16.gmra.mxu1 %v16819_v14  ;;  %v6733_v30 = vmul.f32 %v6599_v40, %v6418_v20  ;;  %v19073_v20 = vpop.f32.mrf.mxu1 }
 0x413   : > { %v6078_v25 = vpop.f32.mrf.mxu0  ;;  %v8926_v41 = vrot.slane %v16820_v32, 1  ;;  %20765 = vst [vmem:[#allocation4_spill] sm:$0xff] %v19073_v20 }
 0x414   : > { %v6419_v28 = vmax.f32 %v6374_v23, 0.0  ;;  %v6233_v49 = vadd.f32 %v6078_v25, %v18840_v52 }
 0x415   : > { %v15894_v48 = vpop.f32.mrf.mxu0  ;;  %v8927_v24 = vsel %vm1790_vm4, %v8924_v1, %v8926_v41 }
 0x416   : > { %v6734_v35 = vmul.f32 %v6604_v21, %v6419_v28  ;;  %v6375_v34 = vadd.f32 %v18936_v26, %v6233_v49  ;;  %16122 = vmatprep.mubr.bf16.mxu0 %v8927_v24  ;;  %v6619_v21 = vpop.permute.xlu0 %6618  ;;  %v6624_v28 = vpop.permute.xlu1 %6623 }
 0x417   : > { %v6081_v8 = vpop.f32.mrf.mxu0 }
 0x418   : > { %v14456_v12 = vpack.c.bf16 %v6734_v35, %v6733_v30  ;;  %v6234_v9 = vadd.f32 %v6081_v8, %v18845_v61  ;;  %v6420_v52 = vmax.f32 %v6375_v34, 0.0  ;;  %v19067_v61 = vld [vmem:[%s20742_s3 + $0xf8] sm:$0xff]   ;;  %v19077_v35 = vpop.f32.mrf.mxu1 }
 0x419   : > { %v15895_v53 = vpop.f32.mrf.mxu0  ;;  %v16821_v33 = vld [vmem:[#allocation3 + $0x50] sm:$0xff]   ;;  %16146 = vmatprep.subr.bf16.mxu1 %v19067_v61 }
 0x41a   : > { %14518 = vst [vmem:[#allocation3 + $0x58] sm:$0xff] %v14456_v12   ;;  %v6376_v43 = vadd.f32 %v18936_v26, %v6234_v9  ;;  %v16822_v36 = vld [vmem:[#allocation3 + $0x50] sm:$0xff]   ;;  %16014 = vmatprep.mubr.bf16.mxu1 %v16821_v33  ;;  %v6735_v3 = vmul.f32 %v6609_v63, %v6420_v52  ;;  %v19084_v12 = vld [vmem:[%s20742_s3 + $0x1b8] sm:$0xff]  }
 0x41b   : > { %v6086_v54 = vpop.f32.mrf.mxu0  ;;  %v8928_v1 = vrot.slane %v16822_v36, 1  ;;  %16314 = vmatprep.subr.bf16.mxu0 %v19084_v12  ;;  %v19093_v36 = vld [vmem:[%s20744_s5] ss:$0 sm:$0xff] }
 0x41c   : > { %v6421_v27 = vmax.f32 %v6376_v43, 0.0  ;;  %v6235_v51 = vadd.f32 %v6086_v54, %v18851_v37  ;;  %v19088_v43 = vpop.f32.mrf.mxu1 }
 0x41d   : > { %v15898_v6 = vpop.f32.mrf.mxu0  ;;  %v8929_v45 = vsel %vm1790_vm4, %v8926_v41, %v8928_v1 }
 0x41e   : > { %v6736_v39 = vmul.f32 %v6614_v38, %v6421_v27  ;;  %v6377_v7 = vadd.f32 %v18936_v26, %v6235_v51  ;;  %16123 = vmatmul.mubr.bf16.gmra.mxu0 %v8929_v45  ;;  %v6629_v27 = vpop.permute.xlu0 %6628 }
 0x41f   : > { %v6089_v0 = vpop.f32.mrf.mxu0 }
 0x420   : > { %v14461_v37 = vpack.c.bf16 %v6736_v39, %v6735_v3  ;;  %v6236_v11 = vadd.f32 %v6089_v0, %v18856_v13  ;;  %v6422_v23 = vmax.f32 %v6377_v7, 0.0  ;;  %v19097_v39 = vpop.f32.mrf.mxu1 }
 0x421   : > { %v15899_v58 = vpop.f32.mrf.mxu0  ;;  %v16823_v14 = vld [vmem:[#allocation3 + $0x58] sm:$0xff]  }
 0x422   : > { %14519 = vst [vmem:[#allocation3 + $0x60] sm:$0xff] %v14461_v37   ;;  %v6378_v32 = vadd.f32 %v18936_v26, %v6236_v11  ;;  %v16824_v25 = vld [vmem:[#allocation3 + $0x58] sm:$0xff]   ;;  %16015 = vmatmul.mubr.bf16.gmra.mxu1 %v16823_v14  ;;  %v6737_v13 = vmul.f32 %v6619_v21, %v6422_v23 }
 0x423   : > { %v6094_v40 = vpop.f32.mrf.mxu0  ;;  %v8930_v48 = vrot.slane %v16824_v25, 1  ;;  %v19102_v25 = vpop.f32.mrf.mxu1 }
 0x424   : > { %v6423_v49 = vmax.f32 %v6378_v32, 0.0  ;;  %v6237_v41 = vadd.f32 %v6094_v40, %v18862_v17  ;;  %20766 = vst [vmem:[#allocation5_spill] sm:$0xff] %v19102_v25 }
 0x425   : > { %v15902_v30 = vpop.f32.mrf.mxu0  ;;  %v8931_v8 = vsel %vm1790_vm4, %v8928_v1, %v8930_v48 }
 0x426   : > { %v6738_v34 = vmul.f32 %v6624_v28, %v6423_v49  ;;  %v6379_v24 = vadd.f32 %v18936_v26, %v6237_v41  ;;  %16126 = vmatprep.mubr.bf16.mxu0 %v8931_v8  ;;  %v6639_v49 = vpop.permute.xlu0 %6638 }
 0x427   : > { %v6097_v9 = vpop.f32.mrf.mxu0 }
 0x428   : > { %v14466_v53 = vpack.c.bf16 %v6738_v34, %v6737_v13  ;;  %v6238_v17 = vadd.f32 %v6097_v9, %v18867_v56  ;;  %v6424_v26 = vmax.f32 %v6379_v24, 0.0  ;;  %v6634_v56 = vpop.permute.xlu1 %6633  ;;  %v19106_v24 = vpop.f32.mrf.mxu1 }
 0x429   : > { %v15903_v33 = vpop.f32.mrf.mxu0  ;;  %v16825_v52 = vld [vmem:[#allocation3 + $0x60] sm:$0xff]  }
 0x42a   : > { %14520 = vst [vmem:[#allocation3 + $0x68] sm:$0xff] %v14466_v53   ;;  %v6380_v54 = vadd.f32 %v19093_v36, %v6238_v17  ;;  %v16826_v63 = vld [vmem:[#allocation3 + $0x60] sm:$0xff]   ;;  %16018 = vmatprep.mubr.bf16.mxu1 %v16825_v52  ;;  %v6739_v7 = vmul.f32 %v6629_v27, %v6424_v26 }
 0x42b   : > { %v6102_v38 = vpop.f32.mrf.mxu0  ;;  %v8932_v6 = vrot.slane %v16826_v63, 1  ;;  %v19111_v63 = vpop.f32.mrf.mxu1 }
 0x42c   : > { %v6425_v51 = vmax.f32 %v6380_v54, 0.0  ;;  %v6239_v1 = vadd.f32 %v6102_v38, %v18873_v47  ;;  %v6644_v41 = vpop.permute.xlu1 %6643 }
 0x42d   : > { %v15906_v3 = vpop.f32.mrf.mxu0  ;;  %v8933_v37 = vsel %vm1790_vm4, %v8930_v48, %v8932_v6 }
 0x42e   : > { %v6740_v45 = vmul.f32 %v6634_v56, %v6425_v51  ;;  %v6381_v0 = vadd.f32 %v19093_v36, %v6239_v1  ;;  %16127 = vmatmul.mubr.bf16.gmra.mxu0 %v8933_v37  ;;  %v6649_v51 = vpop.permute.xlu0 %6648 }
 0x42f   : > { %v6105_v11 = vpop.f32.mrf.mxu0 }
 0x430   : > { %v14471_v58 = vpack.c.bf16 %v6740_v45, %v6739_v7  ;;  %v6240_v14 = vadd.f32 %v6105_v11, %v18878_v62  ;;  %v6426_v47 = vmax.f32 %v6381_v0, 0.0  ;;  %v6654_v1 = vpop.permute.xlu1 %6653  ;;  %v19115_v0 = vpop.f32.mrf.mxu1 }
 0x431   : > { %v15907_v23 = vpop.f32.mrf.mxu0  ;;  %v16827_v32 = vld [vmem:[#allocation3 + $0x68] sm:$0xff]  }
 0x432   : > { %14521 = vst [vmem:[#allocation3 + $0x70] sm:$0xff] %v14471_v58   ;;  %v6382_v40 = vadd.f32 %v19093_v36, %v6240_v14  ;;  %v16828_v21 = vld [vmem:[#allocation3 + $0x68] sm:$0xff]   ;;  %16019 = vmatmul.mubr.bf16.gmra.mxu1 %v16827_v32  ;;  %v6741_v62 = vmul.f32 %v6639_v49, %v6426_v47 }
 0x433   : > { %v6110_v28 = vpop.f32.mrf.mxu0  ;;  %v8934_v13 = vrot.slane %v16828_v21, 1  ;;  %v19120_v21 = vpop.f32.mrf.mxu1 }
 0x434   : > { %v6427_v30 = vmax.f32 %v6382_v40, 0.0  ;;  %v6241_v48 = vadd.f32 %v6110_v28, %v18884_v46  ;;  %20767 = vst [vmem:[#allocation8_spill] sm:$0xff] %v19120_v21 }
 0x435   : > { %v15910_v34 = vpop.f32.mrf.mxu0  ;;  %v8935_v53 = vsel %vm1790_vm4, %v8932_v6, %v8934_v13 }
 0x436   : > { %v6742_v8 = vmul.f32 %v6644_v41, %v6427_v30  ;;  %v6383_v9 = vadd.f32 %v19093_v36, %v6241_v48  ;;  %16130 = vmatprep.mubr.bf16.mxu0 %v8935_v53  ;;  %v6659_v30 = vpop.permute.xlu0 %6658  ;;  %v6664_v48 = vpop.permute.xlu1 %6663 }
 0x437   : > { %v6113_v17 = vpop.f32.mrf.mxu0 }
 0x438   : > { %v14476_v33 = vpack.c.bf16 %v6742_v8, %v6741_v62  ;;  %v6242_v52 = vadd.f32 %v6113_v17, %v18889_v18  ;;  %v6428_v46 = vmax.f32 %v6383_v9, 0.0  ;;  %v19124_v9 = vpop.f32.mrf.mxu1 }
 0x439   : > { %v15911_v26 = vpop.f32.mrf.mxu0  ;;  %v16829_v54 = vld [vmem:[#allocation3 + $0x70] sm:$0xff]  }
 0x43a   : > { %14522 = vst [vmem:[#allocation3 + $0x78] sm:$0xff] %v14476_v33   ;;  %v6384_v38 = vadd.f32 %v19093_v36, %v6242_v52  ;;  %v16830_v27 = vld [vmem:[#allocation3 + $0x70] sm:$0xff]   ;;  %16022 = vmatprep.mubr.bf16.mxu1 %v16829_v54  ;;  %v6743_v18 = vmul.f32 %v6649_v51, %v6428_v46 }
 0x43b   : > { %v6118_v56 = vpop.f32.mrf.mxu0  ;;  %v8936_v7 = vrot.slane %v16830_v27, 1  ;;  %v19129_v27 = vpop.f32.mrf.mxu1 }
 0x43c   : > { %v6429_v3 = vmax.f32 %v6384_v38, 0.0  ;;  %v6243_v6 = vadd.f32 %v6118_v56, %v18895_v59 }
 0x43d   : > { %v15914_v45 = vpop.f32.mrf.mxu0  ;;  %v8937_v58 = vsel %vm1790_vm4, %v8934_v13, %v8936_v7 }
 0x43e   : > { %v6744_v37 = vmul.f32 %v6654_v1, %v6429_v3  ;;  %v6385_v11 = vadd.f32 %v19093_v36, %v6243_v6  ;;  %16131 = vmatmul.mubr.bf16.gmra.mxu0 %v8937_v58  ;;  %v6669_v3 = vpop.permute.xlu0 %6668  ;;  %v6674_v6 = vpop.permute.xlu1 %6673 }
 0x43f   : > { %v6121_v14 = vpop.f32.mrf.mxu0 }
 0x440   : > { %v14481_v23 = vpack.c.bf16 %v6744_v37, %v6743_v18  ;;  %v6244_v32 = vadd.f32 %v6121_v14, %v18900_v50  ;;  %v6430_v59 = vmax.f32 %v6385_v11, 0.0  ;;  %v19133_v11 = vpop.f32.mrf.mxu1 }
 0x441   : > { %v15915_v47 = vpop.f32.mrf.mxu0  ;;  %v16831_v40 = vld [vmem:[#allocation3 + $0x78] sm:$0xff]  }
 0x442   : > { %14523 = vst [vmem:[#allocation3 + $0x80] sm:$0xff] %v14481_v23   ;;  %v6386_v28 = vadd.f32 %v19093_v36, %v6244_v32  ;;  %v16832_v49 = vld [vmem:[#allocation3 + $0x78] sm:$0xff]   ;;  %16023 = vmatmul.mubr.bf16.gmra.mxu1 %v16831_v40  ;;  %v6745_v50 = vmul.f32 %v6659_v30, %v6430_v59  ;;  %v19137_v47 = vld [vmem:[#allocation3] sm:$0xff]  }
 0x443   : > { %v6126_v41 = vpop.f32.mrf.mxu0  ;;  %v8938_v62 = vrot.slane %v16832_v49, 1  ;;  %v16893_v25 = vld [vmem:[#allocation3 + $0x78] sm:$0xff]  }
 0x444   : > { %v6431_v34 = vmax.f32 %v6386_v28, 0.0  ;;  %v6245_v13 = vadd.f32 %v6126_v41, %v18906_v29 }
 0x445   : > { %v15918_v8 = vpop.f32.mrf.mxu0  ;;  %v8939_v33 = vsel %vm1790_vm4, %v8936_v7, %v8938_v62 }
 0x446   : > { %v6746_v53 = vmul.f32 %v6664_v48, %v6431_v34  ;;  %v6387_v17 = vadd.f32 %v19093_v36, %v6245_v13  ;;  %16134 = vmatprep.mubr.bf16.mxu0 %v8939_v33  ;;  %v19143_v13 = vld [vmem:[#allocation3 + $0x8] sm:$0xff]   ;;  %v6679_v8 = vpop.permute.xlu0 %6678 }
 0x447   : > { %v6129_v52 = vpop.f32.mrf.mxu0 }
 0x448   : > { %v14486_v26 = vpack.c.bf16 %v6746_v53, %v6745_v50  ;;  %v6246_v54 = vadd.f32 %v6129_v52, %v18910_v16  ;;  %v6432_v29 = vmax.f32 %v6387_v17, 0.0  ;;  %v6684_v50 = vpop.permute.xlu1 %6683 }
 0x449   : > { %v15919_v46 = vpop.f32.mrf.mxu0  ;;  %v16833_v38 = vld [vmem:[#allocation3 + $0x80] sm:$0xff]  }
 0x44a   : > { %14524 = vst [vmem:[#allocation3 + $0x88] sm:$0xff] %v14486_v26   ;;  %v6388_v56 = vadd.f32 %v19093_v36, %v6246_v54  ;;  %v16835_v51 = vld [vmem:[#allocation3 + $0x80] sm:$0xff]   ;;  %16026 = vmatprep.mubr.bf16.mxu1 %v16833_v38  ;;  %v6747_v16 = vmul.f32 %v6669_v3, %v6432_v29  ;;  %v16861_v26 = vld [vmem:[#allocation3 + $0x8] sm:$0xfc]  }
 0x44b   : > { %v6134_v1 = vpop.f32.mrf.mxu0  ;;  %v8940_v18 = vrot.slane %v16835_v51, 1  ;;  %v8204_v51 = vshrl.u32 %v19137_v47, 16 }
 0x44c   : > { %v6433_v45 = vmax.f32 %v6388_v56, 0.0  ;;  %v6247_v7 = vadd.f32 %v6134_v1, %v18916_v19  ;;  %v19140_v19 = vpop.f32.mrf.mxu1 }
 0x44d   : > { %v15922_v37 = vpop.f32.mrf.mxu0  ;;  %v8941_v23 = vsel %vm1790_vm4, %v8938_v62, %v8940_v18  ;;  %20768 = vst [vmem:[#allocation9_spill] sm:$0xff] %v19140_v19  ;;  %v8206_v62 = vshll.u32 %v19137_v47, 16  ;;  %v16862_v47 = vld [vmem:[#allocation3 + $0x10] sm:$0xff]   ;;  %v19290_v19 = vld [vmem:[#allocation3 + $0x68] sm:$0xff]  }
 0x44e   : > { %v6748_v58 = vmul.f32 %v6674_v6, %v6433_v45  ;;  %v6389_v14 = vadd.f32 %v19093_v36, %v6247_v7  ;;  %16135 = vmatmul.mubr.bf16.gmra.mxu0 %v8941_v23  ;;  %v19147_v52 = vpop.f32.mrf.mxu1  ;;  %v19154_v45 = vld [vmem:[#allocation3 + $0x10] sm:$0xff]  }
 0x44f   : > { %v6137_v32 = vpop.f32.mrf.mxu0  ;;  %v8208_v1 = vrot.slane %v8206_v62, 1  ;;  %v8219_v62 = vshll.u32 %v19154_v45, 16 }
 0x450   : > { %v14491_v40 = vpack.c.bf16 %v6748_v58, %v6747_v16  ;;  %v6248_v59 = vadd.f32 %v6137_v32, %v18919_v44  ;;  %v6434_v41 = vmax.f32 %v6389_v14, 0.0  ;;  %v19156_v16 = vpop.f32.mrf.mxu1  ;;  %v10076_v58 = vshrl.u32 %v16861_v26, 16 }
 0x451   : > { %v15923_v28 = vpop.f32.mrf.mxu0  ;;  %v16837_v49 = vld [vmem:[#allocation3 + $0x88] sm:$0xff]  }
 0x452   : > { %14525 = vst [vmem:[#allocation3 + $0x90] sm:$0xff] %v14491_v40   ;;  %v6390_v30 = vadd.f32 %v19093_v36, %v6248_v59  ;;  %v16839_v48 = vld [vmem:[#allocation3 + $0x88] sm:$0xff]   ;;  %16027 = vmatmul.mubr.bf16.gmra.mxu1 %v16837_v49  ;;  %v6749_v54 = vmul.f32 %v6679_v8, %v6434_v41  ;;  %v10079_v40 = vshll.u32 %v16861_v26, 16  ;;  %v6694_v59 = vpop.permute.xlu1 %6693  ;;  %v19165_v8 = vpop.f32.mrf.mxu1 }
 0x453   : > { %v6142_v34 = vpop.f32.mrf.mxu0  ;;  %v8942_v17 = vrot.slane %v16839_v48, 1 }
 0x454   : > { %v6435_v53 = vmax.f32 %v6390_v30, 0.0  ;;  %v6249_v44 = vadd.f32 %v6142_v34, %v18923_v60  ;;  %v8211_v60 = vshll.u32 %v19143_v13, 16  ;;  %v8215_v34 = vshrl.u32 %v19143_v13, 16 }
 0x455   : > { %v15926_v33 = vpop.f32.mrf.mxu0  ;;  %v8943_v29 = vsel %vm1790_vm4, %v8940_v18, %v8942_v17  ;;  %v10084_v13 = vshrl.u32 %v16862_v47, 16 }
 0x456   : > { %v6750_v46 = vmul.f32 %v6684_v50, %v6435_v53  ;;  %v6391_v38 = vadd.f32 %v19093_v36, %v6249_v44  ;;  %16138 = vmatprep.mubr.bf16.mxu0 %v8943_v29  ;;  %v8213_v48 = vrot.slane %v8211_v60, 1  ;;  %v19167_v50 = vrot.slane %v10076_v58, 2 }
 0x457   : > { %v6145_v56 = vpop.f32.mrf.mxu0  ;;  %v8221_v58 = vrot.slane %v8219_v62, 1  ;;  %v10086_v62 = vrot.slane %v10084_v13, 2 }
 0x458   : > { %v14496_v3 = vpack.c.bf16 %v6750_v46, %v6749_v54  ;;  %v6250_v6 = vadd.f32 %v6145_v56, %v18926_v2  ;;  %v6436_v14 = vmax.f32 %v6391_v38, 0.0  ;;  %v6689_v2 = vpop.permute.xlu0 %6688  ;;  %v8223_v46 = vshrl.u32 %v19154_v45, 16 }
 0x459   : > { %v15927_v7 = vpop.f32.mrf.mxu0  ;;  %v16843_v37 = vld [vmem:[#allocation3 + $0x90] sm:$0xff]   ;;  %v19174_v38 = vrot.slane %v10079_v40, 3 }
 0x45a   : > { %14526 = vst [vmem:[#allocation3 + $0x98] sm:$0xff] %v14496_v3   ;;  %v6392_v18 = vadd.f32 %v19093_v36, %v6250_v6  ;;  %v19159_v23 = vld [vmem:[#allocation3 + $0x90] sm:$0xff]   ;;  %16030 = vmatprep.mubr.bf16.mxu1 %v16843_v37  ;;  %v6751_v53 = vmul.f32 %v6689_v2, %v6436_v14  ;;  %v10087_v3 = vshll.u32 %v16862_v47, 16  ;;  %v16866_v6 = vld [vmem:[#allocation3 + $0x18] sm:$0xff]   ;;  %v8209_v37 = vor.u32 %v8208_v1, %v8204_v51  ;;  %v19177_v14 = vpop.f32.mrf.mxu1  ;;  %v16867_v2 = vld [vmem:[#allocation3 + $0x20] sm:$0xff]  }
 0x45b   : > { %v6150_v32 = vpop.f32.mrf.mxu0  ;;  %v8944_v41 = vrot.slane %v19159_v23, 1  ;;  %v20769_v1 = vld [vmem:[#allocation6_spill] sm:$0xff]  ;;  %v10102_v13 = vshrl.u32 %v16867_v2, 16 }
 0x45c   : > { %v6437_v28 = vmax.f32 %v6392_v18, 0.0  ;;  %v6251_v49 = vadd.f32 %v6150_v32, %v18929_v57  ;;  %v19171_v57 = vld [vmem:[#allocation3 + $0x18] sm:$0xff]   ;;  %v6699_v18 = vpop.permute.xlu0 %6698 }
 0x45d   : > { %v15930_v30 = vpop.f32.mrf.mxu0  ;;  %v8945_v26 = vsel %vm1790_vm4, %v8942_v17, %v8944_v41  ;;  %v19179_v17 = vld [vmem:[#allocation3 + $0x20] sm:$0xff]   ;;  %v8227_v47 = vshll.u32 %v19171_v57, 16 }
 0x45e   : > { %v6752_v44 = vmul.f32 %v6694_v59, %v6437_v28  ;;  %v6393_v33 = vadd.f32 %v19093_v36, %v6251_v49  ;;  %16139 = vmatmul.mubr.bf16.gmra.mxu0 %v8945_v26  ;;  %v6704_v59 = vpop.permute.xlu1 %6703  ;;  %v8217_v49 = vor.u32 %v8215_v34, %v8213_v48  ;;  %v10096_v26 = vshll.u32 %v16866_v6, 16 }
 0x45f   : > { %v6153_v54 = vpop.f32.mrf.mxu0  ;;  %v8235_v34 = vshll.u32 %v19179_v17, 16 }
 0x460   : > { %v14501_v29 = vpack.c.bf16 %v6752_v44, %v6751_v53  ;;  %v6252_v56 = vadd.f32 %v6153_v54, %v18931_v22  ;;  %v6438_v23 = vmax.f32 %v6393_v33, 0.0  ;;  %v8214_v22 = vsel %vm1020_vm3, %v8209_v37, %v8213_v48  ;;  %v19185_v44 = vpop.f32.mrf.mxu1  ;;  %v19189_v37 = vld [vmem:[#allocation3 + $0x28] sm:$0xff]  }
 0x461   : > { %v15931_v60 = vpop.f32.mrf.mxu0  ;;  %v16849_v7 = vld [vmem:[#allocation3 + $0x98] sm:$0xff]   ;;  %v10089_v53 = vrot.slane %v10087_v3, 3  ;;  %v10093_v33 = vshrl.u32 %v16866_v6, 16  ;;  %v8231_v48 = vshrl.u32 %v19171_v57, 16  ;;  %v16888_v57 = vld [vmem:[%s20742_s3 + $0xf0] sm:$0xff]  }
 0x462   : > { %14527 = vst [vmem:[#allocation3 + $0xa0] sm:$0xff] %v14501_v29   ;;  %v6394_v45 = vadd.f32 %v19093_v36, %v6252_v56  ;;  %v16853_v32 = vld [vmem:[#allocation3 + $0x98] sm:$0xff]   ;;  %16031 = vmatmul.mubr.bf16.gmra.mxu1 %v16849_v7  ;;  %v6753_v29 = vmul.f32 %v6699_v18, %v6438_v23  ;;  %v8222_v18 = vsel %vm1020_vm3, %v8217_v49, %v8221_v58  ;;  %v19203_v49 = vld [vmem:[#allocation3 + $0x30] sm:$0xff]  }
 0x463   : > { %v6158_v40 = vpop.f32.mrf.mxu0  ;;  %16050 = vmatprep.mubr.bf16.mxu1 %v8214_v22  ;;  %v8946_v30 = vrot.slane %v16853_v32, 1  ;;  %v6709_v32 = vpop.permute.xlu0 %6708  ;;  %v10105_v22 = vshll.u32 %v16867_v2, 16  ;;  %v8225_v23 = vor.u32 %v8223_v46, %v8221_v58  ;;  %v16870_v2 = vld [vmem:[#allocation3 + $0x28] sm:$0xff]  }
 0x464   : > { %v6439_v51 = vmax.f32 %v6394_v45, 0.0  ;;  %v6253_v28 = vadd.f32 %v6158_v40, %v20769_v1  ;;  %v8229_v45 = vrot.slane %v8227_v47, 1  ;;  %v8243_v1 = vshll.u32 %v19189_v37, 16 }
 0x465   : > { %v15934_v54 = vpop.f32.mrf.mxu0  ;;  %v8947_v7 = vsel %vm1790_vm4, %v8944_v41, %v8946_v30  ;;  %v19196_v41 = vpop.f32.mrf.mxu1 }
 0x466   : > { %v6754_v56 = vmul.f32 %v6704_v59, %v6439_v51  ;;  %v6395_v60 = vadd.f32 %v19093_v36, %v6253_v28  ;;  %16142 = vmatprep.mubr.bf16.mxu0 %v8947_v7  ;;  %v19194_v59 = vor.u32 %v10089_v53, %v10086_v62  ;;  %v10095_v28 = vrot.slane %v10093_v33, 2 }
 0x467   : > { %v6161_v3 = vpop.f32.mrf.mxu0  ;;  %v10098_v54 = vrot.slane %v10096_v26, 3  ;;  %v8230_v46 = vsel %vm1020_vm3, %v8225_v23, %v8229_v45  ;;  %v10082_v53 = vor.u32 %v19174_v38, %v19167_v50  ;;  %v19209_v33 = vpop.f32.mrf.mxu1  ;;  %v10104_v26 = vrot.slane %v10102_v13, 2 }
 0x468   : > { %v14506_v40 = vpack.c.bf16 %v6754_v56, %v6753_v29  ;;  %v6440_v6 = vmax.f32 %v6395_v60, 0.0  ;;  %v8237_v29 = vrot.slane %v8235_v34, 1  ;;  %v16871_v56 = vld [vmem:[#allocation3 + $0x30] sm:$0xff]   ;;  %v10107_v7 = vrot.slane %v10105_v22, 3  ;;  %v19211_v3 = vld [vmem:[#allocation3 + $0x38] sm:$0xff]  }
 0x469   : > { %v16859_v36 = vld [vmem:[#allocation3 + $0xa0] ss:$0 sps:$4 sm:$0x11]   ;;  %v15935_v51 = vpop.f32.mrf.mxu0  ;;  %v10091_v50 = vsel %vm3054_vm6, %v10082_v53, %v19194_v59  ;;  %v8233_v38 = vor.u32 %v8231_v48, %v8229_v45  ;;  %v10114_v34 = vshll.u32 %v16870_v2, 16  ;;  %v8245_v13 = vrot.slane %v8243_v1, 1 }
 0x46a   : > { %14528 = vst [vmem:[#allocation3 + $0xa8] sm:$0xff] %v14506_v40   ;;  %v6755_v47 = vmul.f32 %v6709_v32, %v6440_v6  ;;  %16051 = vmatmul.mubr.bf16.vlgmr.msra.gmra.mxu1 %v8222_v18  ;;  %v8948_v58 = vrot.slane %v16859_v36, 1  ;;  %v16891_v32 = vld [vmem:[%s20742_s3 + $0xe8] sm:$0xff]   ;;  %v8251_v40 = vshll.u32 %v19203_v49, 16  ;;  %v16874_v6 = vld [vmem:[#allocation3 + $0x38] sm:$0xff]   ;;  %v10099_v18 = vor.u32 %v10098_v54, %v10095_v28  ;;  %v19221_v51 = vpop.f32.mrf.mxu1  ;;  %v19229_v54 = vld [vmem:[#allocation3 + $0x40] sm:$0xff]  }
 0x46b   : > { %16054 = vmatprep.mubr.bf16.mxu1 %v8230_v46  ;;  %16147 = vmatpush3.bf16.msra.mxu1 %v19067_v61  ;;  %v10111_v61 = vshrl.u32 %v16870_v2, 16  ;;  %v8238_v22 = vsel %vm1020_vm3, %v8233_v38, %v8237_v29  ;;  %v10120_v23 = vshrl.u32 %v16871_v56, 16  ;;  %v8259_v45 = vshll.u32 %v19211_v3, 16  ;;  %v16899_v38 = vld [vmem:[%s20742_s3 + $0xd8] sm:$0xff]  }
 0x46c   : > { %v14397_v62 = vpack.c.bf16 %v6755_v47, %v6755_v47  ;;  %v8949_v60 = vsel %vm1790_vm4, %v8946_v30, %v8948_v58  ;;  %16148 = vmatprep.subr.bf16.mxu1 %v16888_v57  ;;  %v8239_v30 = vshrl.u32 %v19179_v17, 16  ;;  %v8247_v47 = vshrl.u32 %v19189_v37, 16  ;;  %v16895_v17 = vld [vmem:[%s20742_s3 + $0xe0] sm:$0xff]  }
 0x46d   : > { %16143 = vmatmul.mubr.bf16.gmra.mxu0 %v8949_v60  ;;  %v10123_v48 = vshll.u32 %v16871_v56, 16  ;;  %v10108_v1 = vor.u32 %v10107_v7, %v10104_v26  ;;  %v8255_v2 = vshrl.u32 %v19203_v49, 16  ;;  %v10113_v46 = vrot.slane %v10111_v61, 2  ;;  %v16897_v56 = vld [vmem:[%s20742_s3 + $0x1b0] sm:$0xff]   ;;  %v19237_v60 = vpop.f32.mrf.mxu1 }
 0x46e   : > { %6981 = vst [vmem:[#allocation3 + $0xb0] sm:$0xf] %v14397_v62  ;;  %16218 = vmatprep.mubr.bf16.mxu0 %v10091_v50  ;;  %v8241_v36 = vor.u32 %v8239_v30, %v8237_v29  ;;  %v10116_v28 = vrot.slane %v10114_v34, 3  ;;  %v8253_v58 = vrot.slane %v8251_v40, 1  ;;  %v10129_v37 = vshrl.u32 %v16874_v6, 16  ;;  %v16875_v29 = vld [vmem:[#allocation3 + $0x40] sm:$0xff]  }
 0x46f   : > { %16149 = vmatpush3.bf16.msra.mxu1 %v16888_v57  ;;  %v10122_v62 = vrot.slane %v10120_v23, 2  ;;  %v10132_v53 = vshll.u32 %v16874_v6, 16  ;;  %v10100_v49 = vsel %vm3054_vm6, %v19194_v59, %v10099_v18  ;;  %20770 = vst [vmem:[#allocation6_spill] sm:$0xff] %v19237_v60  ;;  %v8261_v26 = vrot.slane %v8259_v45, 1  ;;  %v19245_v34 = vld [vmem:[#allocation3 + $0x48] sm:$0xff]  }
 0x470   : > { %16150 = vmatprep.subr.bf16.mxu1 %v16891_v32  ;;  %v8246_v57 = vsel %vm1020_vm3, %v8241_v36, %v8245_v13  ;;  %v10125_v7 = vrot.slane %v10123_v48, 3  ;;  %v8263_v50 = vshrl.u32 %v19211_v3, 16  ;;  %v8267_v61 = vshll.u32 %v19229_v54, 16  ;;  %v16878_v30 = vld [vmem:[#allocation3 + $0x48] sm:$0xff]   ;;  %v19252_v36 = vpop.f32.mrf.mxu1 }
 0x471   : > { %v10131_v59 = vrot.slane %v10129_v37, 2  ;;  %v8249_v40 = vor.u32 %v8247_v47, %v8245_v13  ;;  %v8271_v3 = vshrl.u32 %v19229_v54, 16  ;;  %v10134_v6 = vrot.slane %v10132_v53, 3  ;;  %20771 = vst [vmem:[#allocation10_spill] sm:$0xff] %v19252_v36  ;;  %v19262_v37 = vld [vmem:[#allocation3 + $0x58] sm:$0xff]  }
 0x472   : > { %16055 = vmatmul.mubr.bf16.gmra.mxu1 %v8238_v22  ;;  %v10138_v22 = vshrl.u32 %v16875_v29, 16  ;;  %v8257_v23 = vor.u32 %v8255_v2, %v8253_v58  ;;  %v10117_v45 = vor.u32 %v10116_v28, %v10113_v46  ;;  %v10141_v48 = vshll.u32 %v16875_v29, 16  ;;  %v16879_v28 = vld [vmem:[#allocation3 + $0x50] sm:$0xff]   ;;  %v19268_v29 = vpop.f32.mrf.mxu1 }
 0x473   : > { %16058 = vmatprep.mubr.bf16.mxu1 %v8246_v57  ;;  %16151 = vmatpush3.bf16.msra.mxu1 %v16891_v32  ;;  %v10109_v32 = vsel %vm3054_vm6, %v10099_v18, %v10108_v1  ;;  %v16902_v18 = vld [vmem:[%s20742_s3 + $0x1a8] sm:$0xff]   ;;  %v8254_v13 = vsel %vm1020_vm3, %v8249_v40, %v8253_v58  ;;  %v10126_v47 = vor.u32 %v10125_v7, %v10122_v62  ;;  %v8269_v54 = vrot.slane %v8267_v61, 1  ;;  %v16905_v58 = vld [vmem:[%s20742_s3 + $0x1a0] sm:$0xff]  }
 0x474   : > { %16152 = vmatprep.subr.bf16.mxu1 %v16895_v17  ;;  %v8262_v57 = vsel %vm1020_vm3, %v8257_v23, %v8261_v26  ;;  %v8275_v2 = vshll.u32 %v19245_v34, 16  ;;  %v10147_v46 = vshrl.u32 %v16878_v30, 16  ;;  %v10140_v53 = vrot.slane %v10138_v22, 2  ;;  %20772 = vst [vmem:[#allocation11_spill] sm:$0xff] %v19268_v29  ;;  %v16907_v7 = vld [vmem:[%s20742_s3 + $0xc8] sm:$0xff]  }
 0x475   : > { %16219 = vmatmul.mubr.bf16.vlgmr.msra.gmra.mxu0 %v10100_v49  ;;  %v10118_v62 = vsel %vm3054_vm6, %v10108_v1, %v10117_v45  ;;  %v10143_v49 = vrot.slane %v10141_v48, 3  ;;  %v10156_v22 = vshrl.u32 %v16879_v28, 16  ;;  %v8265_v23 = vor.u32 %v8263_v50, %v8261_v26 }
 0x476   : > { %16222 = vmatprep.mubr.bf16.mxu0 %v10109_v32  ;;  %16315 = vmatpush3.bf16.msra.mxu0 %v19084_v12  ;;  %v16903_v12 = vld [vmem:[%s20742_s3 + $0xd0] sm:$0xff]   ;;  %v10150_v32 = vshll.u32 %v16878_v30, 16  ;;  %v8277_v61 = vrot.slane %v8275_v2, 1  ;;  %v10149_v1 = vrot.slane %v10147_v46, 2  ;;  %v10159_v48 = vshll.u32 %v16879_v28, 16  ;;  %v16912_v2 = vld [vmem:[%s20742_s3 + $0xc0] sm:$0xff]  }
 0x477   : > { %16153 = vmatpush3.bf16.msra.mxu1 %v16895_v17  ;;  %16316 = vmatprep.subr.bf16.mxu0 %v16897_v56  ;;  %v19258_v17 = vld [vmem:[#allocation3 + $0x50] sm:$0xff]   ;;  %v8291_v30 = vshll.u32 %v19262_v37, 16  ;;  %v8270_v26 = vsel %vm1020_vm3, %v8265_v23, %v8269_v54  ;;  %v10144_v50 = vor.u32 %v10143_v49, %v10140_v53 }
 0x478   : > { %16154 = vmatprep.subr.bf16.mxu1 %v16899_v38  ;;  %v8283_v40 = vshll.u32 %v19258_v17, 16 }
 0x47a   : > { %16059 = vmatmul.mubr.bf16.gmra.mxu1 %v8254_v13  ;;  %16317 = vmatpush3.bf16.msra.mxu0 %v16897_v56  ;;  %v10127_v56 = vsel %vm3054_vm6, %v10117_v45, %v10126_v47  ;;  %v16911_v13 = vld [vmem:[%s20742_s3 + $0x198] sm:$0xff]   ;;  %v8273_v45 = vor.u32 %v8271_v3, %v8269_v54  ;;  %v8285_v28 = vrot.slane %v8283_v40, 1  ;;  %v19288_v3 = vld [vmem:[#allocation3 + $0x60] sm:$0xff]   ;;  %v16914_v54 = vld [vmem:[%s20742_s3 + $0x190] sm:$0xff]  }
 0x47b   : > { %16062 = vmatprep.mubr.bf16.mxu1 %v8262_v57  ;;  %16155 = vmatpush3.bf16.msra.mxu1 %v16899_v38  ;;  %v8279_v38 = vshrl.u32 %v19245_v34, 16  ;;  %v19279_v57 = vpop.f32.mrf.mxu1  ;;  %v10135_v34 = vor.u32 %v10134_v6, %v10131_v59  ;;  %v16883_v59 = vld [vmem:[#allocation3 + $0x60] sm:$0xff]   ;;  %v10158_v6 = vrot.slane %v10156_v22, 2  ;;  %v8299_v23 = vshll.u32 %v19288_v3, 16 }
 0x47c   : > { %16318 = vmatprep.subr.bf16.mxu0 %v16902_v18  ;;  %16156 = vmatprep.subr.bf16.mxu1 %v16903_v12  ;;  %20773 = vst [vmem:[#allocation12_spill] sm:$0xff] %v19279_v57  ;;  %v8278_v46 = vsel %vm1020_vm3, %v8273_v45, %v8277_v61  ;;  %v10177_v45 = vshll.u32 %v16883_v59, 16  ;;  %v16973_v57 = vld [vmem:[#allocation3 + $0x20] sm:$0xff]  }
 0x47d   : > { %16223 = vmatmul.mubr.bf16.gmra.mxu0 %v10118_v62  ;;  %v8287_v62 = vshrl.u32 %v19258_v17, 16  ;;  %v19295_v53 = vpop.f32.mrf.mxu1  ;;  %v10136_v49 = vsel %vm3054_vm6, %v10126_v47, %v10135_v34  ;;  %v19301_v17 = vld [vmem:[%s20742_s3 + $0x178] sm:$0xff]   ;;  %v8281_v22 = vor.u32 %v8279_v38, %v8277_v61  ;;  %v8307_v38 = vshll.u32 %v19290_v19, 16 }
 0x47e   : > { %16226 = vmatprep.mubr.bf16.mxu0 %v10127_v56  ;;  %16319 = vmatpush3.bf16.msra.mxu0 %v16902_v18  ;;  %v10152_v18 = vrot.slane %v10150_v32, 3  ;;  %v10161_v56 = vrot.slane %v10159_v48, 3  ;;  %20774 = vst [vmem:[#allocation13_spill] sm:$0xff] %v19295_v53  ;;  %v8293_v32 = vrot.slane %v8291_v30, 1  ;;  %v10174_v48 = vshrl.u32 %v16883_v59, 16  ;;  %v16918_v30 = vld [vmem:[%s20742_s3 + $0x188] sm:$0xff]  }
 0x47f   : > { %16157 = vmatpush3.bf16.msra.mxu1 %v16903_v12  ;;  %16320 = vmatprep.subr.bf16.mxu0 %v16905_v58  ;;  %v16882_v12 = vld [vmem:[#allocation3 + $0x58] sm:$0xff]  }
 0x480   : > { %16158 = vmatprep.subr.bf16.mxu1 %v16907_v7  ;;  %v10168_v40 = vshll.u32 %v16882_v12, 16  ;;  %v10153_v47 = vor.u32 %v10152_v18, %v10149_v1  ;;  %v10162_v61 = vor.u32 %v10161_v56, %v10158_v6  ;;  %v8303_v1 = vshrl.u32 %v19288_v3, 16  ;;  %v16887_v18 = vld [vmem:[#allocation3 + $0x68] sm:$0xff]   ;;  %v16884_v56 = vld [vmem:[#allocation3 + $0x70] sm:$0xff]  }
 0x481   : > { %v8309_v6 = vrot.slane %v8307_v38, 1  ;;  %v8315_v38 = vshll.u32 %v16884_v56, 16 }
 0x482   : > { %16063 = vmatmul.mubr.bf16.gmra.mxu1 %v8270_v26  ;;  %16321 = vmatpush3.bf16.msra.mxu0 %v16905_v58  ;;  %v10145_v58 = vsel %vm3054_vm6, %v10135_v34, %v10144_v50  ;;  %v19308_v26 = vpop.f32.mrf.mxu1  ;;  %v8286_v34 = vsel %vm1020_vm3, %v8281_v22, %v8285_v28  ;;  %v10154_v3 = vsel %vm3054_vm6, %v10144_v50, %v10153_v47  ;;  %v16889_v22 = vld [vmem:[#allocation3 + $0x70] sm:$0xff]  }
 0x483   : > { %16066 = vmatprep.mubr.bf16.mxu1 %v8278_v46  ;;  %16159 = vmatpush3.bf16.msra.mxu1 %v16907_v7  ;;  %v10165_v7 = vshrl.u32 %v16882_v12, 16  ;;  %20775 = vst [vmem:[#allocation14_spill] sm:$0xff] %v19308_v26  ;;  %v8289_v46 = vor.u32 %v8287_v62, %v8285_v28  ;;  %v8295_v12 = vshrl.u32 %v19262_v37, 16  ;;  %v10179_v28 = vrot.slane %v10177_v45, 3  ;;  %v16920_v37 = vld [vmem:[%s20742_s3 + $0x180] sm:$0xff]   ;;  %v19328_v45 = vld [vmem:[%s20742_s3 + $0x238] sm:$0xff]  }
 0x484   : > { %16322 = vmatprep.subr.bf16.mxu0 %v16911_v13  ;;  %16160 = vmatprep.subr.bf16.mxu1 %v16912_v2  ;;  %v19319_v62 = vpop.f32.mrf.mxu1 }
 0x485   : > { %16227 = vmatmul.mubr.bf16.gmra.mxu0 %v10136_v49  ;;  %v8294_v59 = vsel %vm1020_vm3, %v8289_v46, %v8293_v32  ;;  %v8301_v49 = vrot.slane %v8299_v23, 1  ;;  %20776 = vst [vmem:[#allocation15_spill] sm:$0xff] %v19319_v62  ;;  %v10186_v23 = vshll.u32 %v16887_v18, 16  ;;  %v16958_v62 = vld [vmem:[#allocation3 + $0x8c] sm:$0xff]  }
 0x486   : > { %16230 = vmatprep.mubr.bf16.mxu0 %v10145_v58  ;;  %16323 = vmatpush3.bf16.msra.mxu0 %v16911_v13  ;;  %v10167_v13 = vrot.slane %v10165_v7, 2  ;;  %v10176_v58 = vrot.slane %v10174_v48, 2  ;;  %v10163_v7 = vsel %vm3054_vm6, %v10153_v47, %v10162_v61  ;;  %v8297_v48 = vor.u32 %v8295_v12, %v8293_v32  ;;  %v19330_v50 = vpop.f32.mrf.mxu1 }
 0x487   : > { %16161 = vmatpush3.bf16.msra.mxu1 %v16912_v2  ;;  %16324 = vmatprep.subr.bf16.mxu0 %v16914_v54  ;;  %v10170_v2 = vrot.slane %v10168_v40, 3  ;;  %v10183_v40 = vshrl.u32 %v16887_v18, 16  ;;  %20777 = vst [vmem:[#allocation16_spill] sm:$0xff] %v19330_v50  ;;  %v8311_v47 = vshrl.u32 %v19290_v19, 16  ;;  %v10195_v18 = vshll.u32 %v16889_v22, 16 }
 0x488   : > { %16258 = vmatprep.subr.bf16.mxu1 %v19301_v17  ;;  %v10188_v21 = vrot.slane %v10186_v23, 3  ;;  %v19337_v19 = vpop.f32.mrf.mxu1  ;;  %v19341_v23 = vld [vmem:[#allocation3 + $0x88] sm:$0xff]  }
 0x489   : > { %v10171_v46 = vor.u32 %v10170_v2, %v10167_v13  ;;  %v10185_v12 = vrot.slane %v10183_v40, 2  ;;  %v16890_v13 = vld [vmem:[#allocation3 + $0x80] sm:$0xff]   ;;  %20778 = vst [vmem:[#allocation17_spill] sm:$0xff] %v19337_v19 }
 0x48a   : > { %16067 = vmatmul.mubr.bf16.gmra.mxu1 %v8286_v34  ;;  %16325 = vmatpush3.bf16.msra.mxu0 %v16914_v54  ;;  %v19323_v54 = vld [vmem:[#allocation3 + $0x78] sm:$0xff]   ;;  %v8305_v34 = vor.u32 %v8303_v1, %v8301_v49  ;;  %v8319_v1 = vshrl.u32 %v16884_v56, 16  ;;  %v8331_v56 = vshll.u32 %v16890_v13, 16 }
 0x48b   : > { %16070 = vmatprep.mubr.bf16.mxu1 %v8294_v59  ;;  %16326 = vmatprep.subr.bf16.mxu0 %v16918_v30  ;;  %v8302_v59 = vsel %vm1020_vm3, %v8297_v48, %v8301_v49  ;;  %v10172_v2 = vsel %vm3054_vm6, %v10162_v61, %v10171_v46  ;;  %v8317_v49 = vrot.slane %v8315_v38, 1  ;;  %v10197_v48 = vrot.slane %v10195_v18, 3 }
 0x48c   : > { %v8310_v32 = vsel %vm1020_vm3, %v8305_v34, %v8309_v6  ;;  %v10201_v34 = vshrl.u32 %v16893_v25, 16  ;;  %v10189_v10 = vor.u32 %v10188_v21, %v10185_v12  ;;  %v8327_v18 = vshrl.u32 %v19323_v54, 16 }
 0x48d   : > { %16231 = vmatmul.mubr.bf16.gmra.mxu0 %v10154_v3  ;;  %v10180_v3 = vor.u32 %v10179_v28, %v10176_v58  ;;  %v16896_v58 = vld [vmem:[#allocation3 + $0x80] sm:$0xff]   ;;  %v8321_v20 = vor.u32 %v8319_v1, %v8317_v49 }
 0x48e   : > { %16234 = vmatprep.mubr.bf16.mxu0 %v10163_v7  ;;  %16327 = vmatpush3.bf16.msra.mxu0 %v16918_v30  ;;  %v10192_v7 = vshrl.u32 %v16889_v22, 16  ;;  %v8323_v30 = vshll.u32 %v19323_v54, 16  ;;  %v10210_v61 = vshrl.u32 %v16896_v58, 16  ;;  %v10213_v19 = vshll.u32 %v16896_v58, 16 }
 0x48f   : > { %16328 = vmatprep.subr.bf16.mxu0 %v16920_v37  ;;  %v10181_v28 = vsel %vm3054_vm6, %v10171_v46, %v10180_v3  ;;  %v16901_v46 = vld [vmem:[#allocation3 + $0x88] sm:$0xff]   ;;  %v10190_v21 = vsel %vm3054_vm6, %v10180_v3, %v10189_v10 }
 0x490   : > { %v10194_v22 = vrot.slane %v10192_v7, 2  ;;  %v8325_v40 = vrot.slane %v8323_v30, 1  ;;  %v10212_v12 = vrot.slane %v10210_v61, 2 }
 0x492   : > { %16071 = vmatmul.mubr.bf16.gmra.mxu1 %v8302_v59  ;;  %16329 = vmatpush3.bf16.msra.mxu0 %v16920_v37  ;;  %v8313_v37 = vor.u32 %v8311_v47, %v8309_v6  ;;  %v10204_v59 = vshll.u32 %v16893_v25, 16  ;;  %v8326_v7 = vsel %vm1020_vm3, %v8321_v20, %v8325_v40  ;;  %v8339_v6 = vshll.u32 %v19341_v23, 16 }
 0x493   : > { %16074 = vmatprep.mubr.bf16.mxu1 %v8310_v32  ;;  %16426 = vmatprep.subr.bf16.mxu0 %v19328_v45  ;;  %v19343_v32 = vpop.f32.mrf.mxu1  ;;  %v8333_v47 = vrot.slane %v8331_v56, 1  ;;  %v10203_v25 = vrot.slane %v10201_v34, 2  ;;  %v10219_v20 = vshrl.u32 %v16901_v46, 16  ;;  %v8329_v54 = vor.u32 %v8327_v18, %v8325_v40 }
 0x494   : > { %20779 = vst [vmem:[#allocation18_spill] sm:$0xff] %v19343_v32  ;;  %v8318_v38 = vsel %vm1020_vm3, %v8313_v37, %v8317_v49  ;;  %v10206_v30 = vrot.slane %v10204_v59, 3  ;;  %v16904_v49 = vld [vmem:[#allocation3 + $0x90] sm:$0xff]   ;;  %v8341_v37 = vrot.slane %v8339_v6, 1  ;;  %v10222_v56 = vshll.u32 %v16901_v46, 16  ;;  %v16910_v6 = vld [vmem:[#allocation3 + $0x98] sm:$0xff]  }
 0x495   : > { %16235 = vmatmul.mubr.bf16.gmra.mxu0 %v10172_v2  ;;  %v10198_v2 = vor.u32 %v10197_v48, %v10194_v22  ;;  %v19349_v1 = vpop.f32.mrf.mxu1  ;;  %v10215_v22 = vrot.slane %v10213_v19, 3  ;;  %v8335_v48 = vshrl.u32 %v16890_v13, 16  ;;  %v10228_v61 = vshrl.u32 %v16904_v49, 16  ;;  %v16906_v46 = vld [vmem:[#allocation3 + $0xa0] ss:$0 sps:$4 sm:$0x11]  }
 0x496   : > { %16238 = vmatprep.mubr.bf16.mxu0 %v10181_v28  ;;  %v16898_v28 = vld [vmem:[#allocation3 + $0x90] sm:$0xff]   ;;  %20780 = vst [vmem:[#allocation19_spill] sm:$0xff] %v19349_v1  ;;  %v10207_v34 = vor.u32 %v10206_v30, %v10203_v25  ;;  %v10231_v19 = vshll.u32 %v16904_v49, 16  ;;  %v10224_v18 = vrot.slane %v10222_v56, 3 }
 0x497   : > { %v10199_v58 = vsel %vm3054_vm6, %v10189_v10, %v10198_v2  ;;  %v19353_v59 = vpop.f32.mrf.mxu1  ;;  %v8337_v1 = vor.u32 %v8335_v48, %v8333_v47  ;;  %v8347_v3 = vshll.u32 %v16898_v28, 16  ;;  %v10216_v32 = vor.u32 %v10215_v22, %v10212_v12  ;;  %v16913_v22 = vld [vmem:[#allocation3 + $0xa0] sm:$0xff]  }
 0x498   : > { %20781 = vst [vmem:[#allocation20_spill] sm:$0xff] %v19353_v59  ;;  %v10221_v10 = vrot.slane %v10219_v20, 2  ;;  %v10208_v30 = vsel %vm3054_vm6, %v10198_v2, %v10207_v34  ;;  %v8351_v49 = vshrl.u32 %v16898_v28, 16  ;;  %v10240_v59 = vshll.u32 %v16910_v6, 16 }
 0x499   : > { %v8342_v40 = vsel %vm1020_vm3, %v8337_v1, %v8341_v37  ;;  %v19358_v25 = vpop.f32.mrf.mxu1  ;;  %v10217_v12 = vsel %vm3054_vm6, %v10207_v34, %v10216_v32 }
 0x49a   : > { %16075 = vmatmul.mubr.bf16.gmra.mxu1 %v8318_v38  ;;  %v16900_v38 = vld [vmem:[#allocation3 + $0x98] sm:$0xff]  }
 0x49b   : > { %16078 = vmatprep.mubr.bf16.mxu1 %v8326_v7  ;;  %v8334_v7 = vsel %vm1020_vm3, %v8329_v54, %v8333_v47  ;;  %v8355_v13 = vshll.u32 %v16900_v38, 16  ;;  %v8349_v47 = vrot.slane %v8347_v3, 1  ;;  %v10237_v54 = vshrl.u32 %v16910_v6, 16  ;;  %v19362_v48 = vpop.f32.mrf.mxu1 }
 0x49c   : > { %v8359_v28 = vshrl.u32 %v16900_v38, 16 }
 0x49d   : > { %16239 = vmatmul.mubr.bf16.gmra.mxu0 %v10190_v21  ;;  %v8343_v21 = vshrl.u32 %v19341_v23, 16  ;;  %v10233_v23 = vrot.slane %v10231_v19, 3  ;;  %v8357_v20 = vrot.slane %v8355_v13, 1  ;;  %v8353_v56 = vor.u32 %v8351_v49, %v8349_v47  ;;  %v16909_v19 = vld [vmem:[#allocation3 + $0x10] sm:$0xff]   ;;  %v16908_v13 = vld [vmem:[#allocation3 + $0x8] sm:$0xfc]  }
 0x49e   : > { %16242 = vmatprep.mubr.bf16.mxu0 %v10199_v58  ;;  %v10230_v58 = vrot.slane %v10228_v61, 2  ;;  %v10246_v61 = vshrl.u32 %v16913_v22, 16 }
 0x49f   : > { %v8345_v1 = vor.u32 %v8343_v21, %v8341_v37  ;;  %v8358_v34 = vsel %vm1020_vm3, %v8353_v56, %v8357_v20  ;;  %v10239_v37 = vrot.slane %v10237_v54, 2  ;;  %v19366_v21 = vpop.f32.mrf.mxu1  ;;  %v8361_v49 = vor.u32 %v8359_v28, %v8357_v20 }
 0x4a0   : > { %v10234_v3 = vor.u32 %v10233_v23, %v10230_v58  ;;  %v9493_v23 = vrot.slane %v16909_v19, 2 }
 0x4a1   : > { %v8350_v2 = vsel %vm1020_vm3, %v8345_v1, %v8349_v47  ;;  %v10248_v47 = vrot.slane %v10246_v61, 2  ;;  %v19372_v38 = vpop.f32.mrf.mxu1  ;;  %v9492_v1 = vrot.slane %v16908_v13, 2 }
 0x4a2   : > { %16079 = vmatmul.mubr.bf16.gmra.mxu1 %v8334_v7  ;;  %v10225_v7 = vor.u32 %v10224_v18, %v10221_v10  ;;  %v10242_v10 = vrot.slane %v10240_v59, 3  ;;  %v16917_v18 = vld [vmem:[#allocation3 + $0xa8] ss:$0 sps:$4 sm:$0x77]   ;;  %20783 = vst [vmem:[#allocation22_spill] sm:$0xff] %v19372_v38 }
 0x4a3   : > { %16082 = vmatprep.mubr.bf16.mxu1 %v8342_v40  ;;  %v8363_v40 = vshll.u32 %v16906_v46, 16  ;;  %v10255_v56 = vshrl.u32 %v16917_v18, 16 }
 0x4a4   : > { %v10235_v46 = vsel %vm3054_vm6, %v10225_v7, %v10234_v3  ;;  %v10243_v54 = vor.u32 %v10242_v10, %v10239_v37 }
 0x4a5   : > { %16243 = vmatmul.mubr.bf16.gmra.mxu0 %v10208_v30  ;;  %v10249_v30 = vshll.u32 %v16913_v22, 16  ;;  %v8365_v6 = vrot.slane %v8363_v40, 1  ;;  %v19370_v22 = vpop.f32.mrf.mxu0  ;;  %v16916_v40 = vld [vmem:[#allocation3 + $0x20] sm:$0xff]  }
 0x4a6   : > { %16246 = vmatprep.mubr.bf16.mxu0 %v10217_v12  ;;  %v10226_v12 = vsel %vm3054_vm6, %v10216_v32, %v10225_v7  ;;  %20782 = vst [vmem:[#allocation21_spill] sm:$0xff] %v19370_v22  ;;  %v9494_v7 = vsel %vm2422_vm5, %v9492_v1, %v9493_v23  ;;  %v10244_v20 = vsel %vm3054_vm6, %v10234_v3, %v10243_v54  ;;  %v9497_v10 = vrot.slane %v16916_v40, 2  ;;  %v16921_v3 = vld [vmem:[#allocation3 + $0x28] sm:$0xff]   ;;  %v16922_v1 = vld [vmem:[#allocation3 + $0x30] sm:$0xff]  }
 0x4a7   : > { %v10251_v58 = vrot.slane %v10249_v30, 3  ;;  %v8366_v32 = vsel %vm1020_vm3, %v8361_v49, %v8365_v6  ;;  %v19378_v61 = vpop.f32.mrf.mxu0  ;;  %v10257_v30 = vrot.slane %v10255_v56, 2  ;;  %v16945_v6 = vld [vmem:[%s20742_s3 + $0x170] sm:$0xff]   ;;  %v9501_v40 = vrot.slane %v16922_v1, 2 }
 0x4a8   : > { %20784 = vst [vmem:[#allocation23_spill] sm:$0xff] %v19378_v61 }
 0x4a9   : > { %v10252_v59 = vor.u32 %v10251_v58, %v10248_v47 }
 0x4aa   : > { %16083 = vmatmul.mubr.bf16.gmra.mxu1 %v8350_v2  ;;  %v10258_v2 = vshll.u32 %v16917_v18, 16  ;;  %v19384_v18 = vpop.f32.mrf.mxu0 }
 0x4ab   : > { %16086 = vmatprep.mubr.bf16.mxu1 %v8358_v34  ;;  %v16915_v34 = vld [vmem:[#allocation3 + $0x18] sm:$0xff]   ;;  %v10253_v28 = vsel %vm3054_vm6, %v10243_v54, %v10252_v59  ;;  %20785 = vst [vmem:[#allocation24_spill] sm:$0xff] %v19384_v18  ;;  %v16943_v18 = vld [vmem:[#allocation3 + $0x80] sm:$0xff]  }
 0x4ac   : > { %v10260_v19 = vrot.slane %v10258_v2, 3  ;;  %v9495_v13 = vrot.slane %v16915_v34, 2  ;;  %v19393_v54 = vpop.f32.mrf.mxu0  ;;  %v16919_v2 = vld [vmem:[#allocation3 + $0x14] sm:$0xff]   ;;  %v9499_v34 = vrot.slane %v16921_v3, 2  ;;  %v16924_v3 = vld [vmem:[#allocation3 + $0x24] sm:$0xff]  }
 0x4ad   : > { %16247 = vmatmul.mubr.bf16.gmra.mxu0 %v10226_v12  ;;  %v19375_v12 = vpop.f32.mrf.mxu1  ;;  %20786 = vst [vmem:[#allocation25_spill] sm:$0xff] %v19393_v54 }
 0x4ae   : > { %16250 = vmatprep.mubr.bf16.mxu0 %v10235_v46  ;;  %v10261_v46 = vor.u32 %v10260_v19, %v10257_v30  ;;  %v9496_v47 = vsel %vm2422_vm5, %v9493_v23, %v9495_v13  ;;  %v9498_v49 = vsel %vm2422_vm5, %v9495_v13, %v9497_v10  ;;  %v16948_v23 = vld [vmem:[%s20742_s3 + $0x168] sm:$0xff]   ;;  %v9500_v30 = vsel %vm2422_vm5, %v9497_v10, %v9499_v34  ;;  %v16925_v19 = vld [vmem:[#allocation3 + $0x38] sm:$0xff]   ;;  %v16926_v13 = vld [vmem:[#allocation3 + $0x40] sm:$0xff]  }
 0x4af   : > { %v19382_v37 = vpop.f32.mrf.mxu1  ;;  %v16956_v10 = vld [vmem:[%s20742_s3 + $0x158] sm:$0xff]   ;;  %v9503_v1 = vrot.slane %v16925_v19, 2 }
 0x4b0   : > { %v10262_v56 = vsel %vm3054_vm6, %v10252_v59, %v10261_v46  ;;  %v16923_v46 = vld [vmem:[#allocation3 + $0x1c] sm:$0xff]  }
 0x4b1   : > { %v19390_v58 = vpop.f32.mrf.mxu1  ;;  %v9504_v19 = vsel %vm2422_vm5, %v9501_v40, %v9503_v1 }
 0x4b2   : > { %16087 = vmatmul.mubr.bf16.gmra.mxu1 %v8366_v32  ;;  %v19400_v32 = vpop.f32.mrf.mxu0 }
 0x4b3   : > { %16162 = vmatprep.mubr.bf16.mxu1 %v9494_v7  ;;  %20787 = vst [vmem:[#allocation26_spill] sm:$0xff] %v19400_v32  ;;  %v19402_v7 = vpop.f32.mrf.mxu1 }
 0x4b4   : > { %20788 = vst [vmem:[#allocation27_spill] sm:$0xff] %v19402_v7  ;;  %v19409_v59 = vpop.f32.mrf.mxu0 }
 0x4b5   : > { %16251 = vmatmul.mubr.bf16.gmra.mxu0 %v10244_v20  ;;  %v19404_v20 = vpop.f32.mrf.mxu1  ;;  %20789 = vst [vmem:[#allocation28_spill] sm:$0xff] %v19409_v59  ;;  %v16932_v59 = vld [vmem:[#allocation3 + $0x44] sm:$0xff]  }
 0x4b6   : > { %16254 = vmatprep.mubr.bf16.mxu0 %v10253_v28  ;;  %v9502_v28 = vsel %vm2422_vm5, %v9499_v34, %v9501_v40  ;;  %v16960_v34 = vld [vmem:[%s20742_s3 + $0x150] sm:$0xff]   ;;  %v16964_v40 = vld [vmem:[%s20742_s3 + $0x148] sm:$0xff]  }
 0x4ba   : > { %16163 = vmatmul.mubr.bf16.vlgmr.msra.gmra.mxu1 %v9496_v47  ;;  %v19416_v47 = vpop.f32.mrf.mxu1 }
 0x4bb   : > { %16166 = vmatprep.mubr.bf16.mxu1 %v9498_v49  ;;  %16259 = vmatpush3.bf16.msra.mxu1 %v19301_v17  ;;  %v16952_v17 = vld [vmem:[%s20742_s3 + $0x160] sm:$0xff]   ;;  %v19421_v49 = vpop.f32.mrf.mxu0 }
 0x4bc   : > { %16260 = vmatprep.subr.bf16.mxu1 %v16945_v6  ;;  %20790 = vst [vmem:[#allocation29_spill] sm:$0xff] %v19421_v49 }
 0x4bd   : > { %16255 = vmatmul.mubr.bf16.gmra.mxu0 %v10262_v56  ;;  %v9505_v56 = vrot.slane %v16926_v13, 2 }
 0x4be   : > { %16330 = vmatprep.mubr.bf16.mxu0 %v16919_v2  ;;  %v19424_v2 = vpop.f32.mrf.mxu1 }
 0x4bf   : > { %16261 = vmatpush3.bf16.msra.mxu1 %v16945_v6  ;;  %v16954_v6 = vld [vmem:[%s20742_s3 + $0x230] sm:$0xff]  }
 0x4c0   : > { %16262 = vmatprep.subr.bf16.mxu1 %v16948_v23  ;;  %v19441_v49 = vpop.f32.mrf.mxu1 }
 0x4c1   : > { %20793 = vst [vmem:[#allocation32_spill] sm:$0xff] %v19441_v49  ;;  %v16969_v49 = vld [vmem:[%s20742_s3 + $0x140] sm:$0xff]  }
 0x4c2   : > { %16167 = vmatmul.mubr.bf16.gmra.mxu1 %v9500_v30  ;;  %v19432_v30 = vpop.f32.mrf.mxu0 }
 0x4c3   : > { %16170 = vmatprep.mubr.bf16.mxu1 %v9502_v28  ;;  %16263 = vmatpush3.bf16.msra.mxu1 %v16948_v23  ;;  %v16959_v23 = vld [vmem:[%s20742_s3 + $0x228] sm:$0xff]   ;;  %20791 = vst [vmem:[#allocation30_spill] sm:$0xff] %v19432_v30  ;;  %v16928_v30 = vld [vmem:[#allocation3 + $0x34] sm:$0xff]  }
 0x4c4   : > { %16264 = vmatprep.subr.bf16.mxu1 %v16952_v17  ;;  %v16929_v28 = vld [vmem:[#allocation3 + $0x48] sm:$0xff]   ;;  %v19436_v13 = vpop.f32.mrf.mxu0 }
 0x4c5   : > { %16331 = vmatmul.mubr.bf16.vlgmr.msra.gmra.mxu0 %v16923_v46  ;;  %20792 = vst [vmem:[#allocation31_spill] sm:$0xff] %v19436_v13  ;;  %v16927_v46 = vld [vmem:[#allocation3 + $0x2c] sm:$0xff]  }
 0x4c6   : > { %16334 = vmatprep.mubr.bf16.mxu0 %v16924_v3  ;;  %16427 = vmatpush3.bf16.msra.mxu0 %v19328_v45  ;;  %v9506_v45 = vsel %vm2422_vm5, %v9503_v1, %v9505_v56  ;;  %v16962_v3 = vld [vmem:[%s20742_s3 + $0x220] sm:$0xff]   ;;  %v19446_v1 = vpop.f32.mrf.mxu1 }
 0x4c7   : > { %16265 = vmatpush3.bf16.msra.mxu1 %v16952_v17  ;;  %16428 = vmatprep.subr.bf16.mxu0 %v16954_v6  ;;  %v16930_v17 = vld [vmem:[#allocation3 + $0x50] sm:$0xff]  }
 0x4c8   : > { %16266 = vmatprep.subr.bf16.mxu1 %v16956_v10  ;;  %v19457_v13 = vpop.f32.mrf.mxu1 }
 0x4ca   : > { %16171 = vmatmul.mubr.bf16.gmra.mxu1 %v9504_v19  ;;  %16429 = vmatpush3.bf16.msra.mxu0 %v16954_v6  ;;  %v9507_v6 = vrot.slane %v16929_v28, 2  ;;  %v9509_v19 = vrot.slane %v16930_v17, 2  ;;  %v16931_v17 = vld [vmem:[#allocation3 + $0x3c] sm:$0xff]  }
 0x4cb   : > { %16174 = vmatprep.mubr.bf16.mxu1 %v9506_v45  ;;  %16267 = vmatpush3.bf16.msra.mxu1 %v16956_v10  ;;  %v19448_v10 = vpop.f32.mrf.mxu0  ;;  %v16968_v45 = vld [vmem:[%s20742_s3 + $0x218] sm:$0xff]  }
 0x4cc   : > { %16430 = vmatprep.subr.bf16.mxu0 %v16959_v23  ;;  %16268 = vmatprep.subr.bf16.mxu1 %v16960_v34  ;;  %20794 = vst [vmem:[#allocation33_spill] sm:$0xff] %v19448_v10  ;;  %v9508_v28 = vsel %vm2422_vm5, %v9505_v56, %v9507_v6  ;;  %v16971_v10 = vld [vmem:[%s20742_s3 + $0x210] sm:$0xff]   ;;  %v19468_v56 = vld [vmem:[%s20742_s3 + $0x1f8] sm:$0xff]  }
 0x4cd   : > { %16335 = vmatmul.mubr.bf16.gmra.mxu0 %v16927_v46  ;;  %v16933_v46 = vld [vmem:[#allocation3 + $0x58] sm:$0xff]  }
 0x4ce   : > { %16338 = vmatprep.mubr.bf16.mxu0 %v16928_v30  ;;  %16431 = vmatpush3.bf16.msra.mxu0 %v16959_v23  ;;  %v9510_v23 = vsel %vm2422_vm5, %v9507_v6, %v9509_v19  ;;  %v16934_v30 = vld [vmem:[#allocation3 + $0x60] sm:$0xff]   ;;  %v9511_v6 = vrot.slane %v16933_v46, 2  ;;  %v16937_v46 = vld [vmem:[#allocation3 + $0x68] sm:$0xff]  }
 0x4cf   : > { %16269 = vmatpush3.bf16.msra.mxu1 %v16960_v34  ;;  %16432 = vmatprep.subr.bf16.mxu0 %v16962_v3  ;;  %v19460_v34 = vpop.f32.mrf.mxu0 }
 0x4d0   : > { %16270 = vmatprep.subr.bf16.mxu1 %v16964_v40  ;;  %20795 = vst [vmem:[#allocation34_spill] sm:$0xff] %v19460_v34 }
 0x4d2   : > { %16175 = vmatmul.mubr.bf16.gmra.mxu1 %v9508_v28  ;;  %16433 = vmatpush3.bf16.msra.mxu0 %v16962_v3  ;;  %v19470_v3 = vpop.f32.mrf.mxu1  ;;  %v9513_v28 = vrot.slane %v16934_v30, 2  ;;  %v16978_v30 = vld [vmem:[%s20742_s3 + $0x200] sm:$0xff]  }
 0x4d3   : > { %16178 = vmatprep.mubr.bf16.mxu1 %v9510_v23  ;;  %16271 = vmatpush3.bf16.msra.mxu1 %v16964_v40  ;;  %v19472_v40 = vpop.f32.mrf.mxu0  ;;  %v16975_v23 = vld [vmem:[%s20742_s3 + $0x208] sm:$0xff]  }
 0x4d4   : > { %16434 = vmatprep.subr.bf16.mxu0 %v16968_v45  ;;  %16272 = vmatprep.subr.bf16.mxu1 %v16969_v49  ;;  %20796 = vst [vmem:[#allocation35_spill] sm:$0xff] %v19472_v40  ;;  %v19481_v32 = vpop.f32.mrf.mxu1 }
 0x4d5   : > { %16339 = vmatmul.mubr.bf16.gmra.mxu0 %v16931_v17  ;;  %v19478_v34 = vpop.f32.mrf.mxu0  ;;  %v9512_v17 = vsel %vm2422_vm5, %v9509_v19, %v9511_v6  ;;  %20798 = vst [vmem:[#allocation37_spill] sm:$0xff] %v19481_v32  ;;  %v9515_v19 = vrot.slane %v16937_v46, 2  ;;  %v16941_v32 = vld [vmem:[#allocation3 + $0x78] sm:$0xff]  }
 0x4d6   : > { %16342 = vmatprep.mubr.bf16.mxu0 %v16932_v59  ;;  %16435 = vmatpush3.bf16.msra.mxu0 %v16968_v45  ;;  %20797 = vst [vmem:[#allocation36_spill] sm:$0xff] %v19478_v34  ;;  %v9514_v59 = vsel %vm2422_vm5, %v9511_v6, %v9513_v28  ;;  %v16938_v45 = vld [vmem:[#allocation3 + $0x70] sm:$0xff]   ;;  %v19487_v40 = vpop.f32.mrf.mxu1 }
 0x4d7   : > { %16273 = vmatpush3.bf16.msra.mxu1 %v16969_v49  ;;  %16436 = vmatprep.subr.bf16.mxu0 %v16971_v10  ;;  %v16935_v49 = vld [vmem:[#allocation3 + $0x4c] sm:$0xff]   ;;  %v16936_v34 = vld [vmem:[#allocation3 + $0x54] sm:$0xff]   ;;  %v19489_v7 = vpop.f32.mrf.mxu0 }
 0x4d8   : > { %16370 = vmatprep.subr.bf16.mxu1 %v19468_v56  ;;  %20799 = vst [vmem:[#allocation38_spill] sm:$0xff] %v19489_v7  ;;  %v19491_v6 = vpop.f32.mrf.mxu1  ;;  %v16939_v7 = vld [vmem:[#allocation3 + $0x5c] sm:$0xff]  }
 0x4da   : > { %16179 = vmatmul.mubr.bf16.gmra.mxu1 %v9512_v17  ;;  %16437 = vmatpush3.bf16.msra.mxu0 %v16971_v10  ;;  %v9517_v17 = vrot.slane %v16938_v45, 2  ;;  %v19493_v10 = vpop.f32.mrf.mxu0  ;;  %v9521_v45 = vrot.slane %v16943_v18, 2 }
 0x4db   : > { %16182 = vmatprep.mubr.bf16.mxu1 %v9514_v59  ;;  %16438 = vmatprep.subr.bf16.mxu0 %v16975_v23  ;;  %20800 = vst [vmem:[#allocation39_spill] sm:$0xff] %v19493_v10  ;;  %v9516_v59 = vsel %vm2422_vm5, %v9513_v28, %v9515_v19 }
 0x4dc   : > { %v9518_v54 = vsel %vm2422_vm5, %v9515_v19, %v9517_v17  ;;  %v19499_v46 = vpop.f32.mrf.mxu0  ;;  %v16947_v19 = vld [vmem:[#allocation3 + $0x88] sm:$0xff]  }
 0x4dd   : > { %16343 = vmatmul.mubr.bf16.gmra.mxu0 %v16935_v49  ;;  %v19497_v49 = vpop.f32.mrf.mxu1  ;;  %20801 = vst [vmem:[#allocation40_spill] sm:$0xff] %v19499_v46  ;;  %v9523_v18 = vrot.slane %v16947_v19, 2  ;;  %v16953_v19 = vld [vmem:[#allocation3 + $0x84] sm:$0xff]  }
 0x4de   : > { %16346 = vmatprep.mubr.bf16.mxu0 %v16936_v34  ;;  %16439 = vmatpush3.bf16.msra.mxu0 %v16975_v23  ;;  %v16940_v34 = vld [vmem:[#allocation3 + $0x64] sm:$0xff]   ;;  %v9519_v23 = vrot.slane %v16941_v32, 2  ;;  %v19501_v10 = vpop.f32.mrf.mxu0  ;;  %v16946_v32 = vld [vmem:[#allocation3 + $0x74] sm:$0xff]  }
 0x4df   : > { %16440 = vmatprep.subr.bf16.mxu0 %v16978_v30  ;;  %20802 = vst [vmem:[#allocation41_spill] sm:$0xff] %v19501_v10  ;;  %v19503_v28 = vpop.f32.mrf.mxu1  ;;  %v16955_v10 = vld [vmem:[#allocation3 + $0x98] sm:$0xff]  }
 0x4e0   : > { %20803 = vst [vmem:[#allocation42_spill] sm:$0xff] %v19503_v28  ;;  %v19509_v22 = vpop.f32.mrf.mxu0 }
 0x4e1   : > { %20804 = vst [vmem:[#allocation43_spill] sm:$0xff] %v19509_v22  ;;  %v16957_v22 = vld [vmem:[#allocation3 + $0xa0] sm:$0xff]  }
 0x4e2   : > { %16183 = vmatmul.mubr.bf16.gmra.mxu1 %v9516_v59  ;;  %16441 = vmatpush3.bf16.msra.mxu0 %v16978_v30  ;;  %v9520_v59 = vsel %vm2422_vm5, %v9517_v17, %v9519_v23  ;;  %v19506_v61 = vpop.f32.mrf.mxu1  ;;  %v16949_v30 = vld [vmem:[#allocation3 + $0x90] sm:$0xff]   ;;  %v19513_v46 = vpop.f32.mrf.mxu0  ;;  %v9524_v17 = vsel %vm2422_vm5, %v9521_v45, %v9523_v18 }
 0x4e3   : > { %16186 = vmatprep.mubr.bf16.mxu1 %v9518_v54  ;;  %v9522_v54 = vsel %vm2422_vm5, %v9519_v23, %v9521_v45  ;;  %v9525_v28 = vrot.slane %v16949_v30, 2  ;;  %20805 = vst [vmem:[#allocation44_spill] sm:$0xff] %v19513_v46  ;;  %v9527_v30 = vrot.slane %v16955_v10, 2  ;;  %v9529_v45 = vrot.slane %v16957_v22, 2  ;;  %v16961_v10 = vld [vmem:[#allocation3 + $0x94] sm:$0xff]  }
 0x4e5   : > { %16347 = vmatmul.mubr.bf16.gmra.mxu0 %v16939_v7  ;;  %v16944_v7 = vld [vmem:[#allocation3 + $0x6c] sm:$0xff]   ;;  %v9526_v23 = vsel %vm2422_vm5, %v9523_v18, %v9525_v28  ;;  %v9528_v18 = vsel %vm2422_vm5, %v9525_v28, %v9527_v30 }
 0x4e6   : > { %16350 = vmatprep.mubr.bf16.mxu0 %v16940_v34  ;;  %v19511_v34 = vpop.f32.mrf.mxu1 }
 0x4ea   : > { %16187 = vmatmul.mubr.bf16.gmra.mxu1 %v9520_v59  ;;  %v19516_v59 = vpop.f32.mrf.mxu1 }
 0x4eb   : > { %16190 = vmatprep.mubr.bf16.mxu1 %v9522_v54  ;;  %v19519_v54 = vpop.f32.mrf.mxu0 }
 0x4ec   : > { %20806 = vst [vmem:[#allocation45_spill] sm:$0xff] %v19519_v54  ;;  %v16966_v54 = vld [vmem:[#allocation3 + $0x10] sm:$0xff]  }
 0x4ed   : > { %16351 = vmatmul.mubr.bf16.gmra.mxu0 %v16944_v7  ;;  %v16950_v7 = vld [vmem:[#allocation3 + $0x7c] sm:$0xff]  }
 0x4ee   : > { %16354 = vmatprep.mubr.bf16.mxu0 %v16946_v32  ;;  %v19521_v38 = vpop.f32.mrf.mxu0  ;;  %v19523_v32 = vpop.f32.mrf.mxu1 }
 0x4ef   : > { %20807 = vst [vmem:[#allocation46_spill] sm:$0xff] %v19521_v38 }
 0x4f0   : > { %v19527_v50 = vpop.f32.mrf.mxu0 }
 0x4f1   : > { %20808 = vst [vmem:[#allocation47_spill] sm:$0xff] %v19527_v50 }
 0x4f2   : > { %16191 = vmatmul.mubr.bf16.gmra.mxu1 %v9524_v17  ;;  %v19525_v46 = vpop.f32.mrf.mxu1  ;;  %v16963_v17 = vld [vmem:[#allocation3 + $0xa8] ss:$0 sps:$4 sm:$0x33]   ;;  %v19533_v26 = vpop.f32.mrf.mxu0 }
 0x4f3   : > { %16194 = vmatprep.mubr.bf16.mxu1 %v9526_v23  ;;  %v9530_v23 = vsel %vm2422_vm5, %v9527_v30, %v9529_v45  ;;  %20809 = vst [vmem:[#allocation48_spill] sm:$0xff] %v19533_v26  ;;  %v9531_v22 = vrot.slane %v16963_v17, 2  ;;  %v16967_v26 = vld [vmem:[#allocation3 + $0x9c] sm:$0xff]   ;;  %v16970_v17 = vld [vmem:[#allocation3 + $0xa4] sm:$0xff]  }
 0x4f4   : > { %v19531_v38 = vpop.f32.mrf.mxu1  ;;  %v19537_v53 = vpop.f32.mrf.mxu0 }
 0x4f5   : > { %16355 = vmatmul.mubr.bf16.gmra.mxu0 %v16950_v7  ;;  %v16965_v7 = vld [vmem:[#allocation3 + $0x8] sm:$0xf8]   ;;  %20810 = vst [vmem:[#allocation49_spill] sm:$0xff] %v19537_v53  ;;  %v9532_v30 = vsel %vm2422_vm5, %v9529_v45, %v9531_v22  ;;  %v10810_v53 = vrot.slane %v16973_v57, 3  ;;  %v16976_v22 = vld [vmem:[#allocation3 + $0x14] sm:$0xfe]  }
 0x4f6   : > { %16358 = vmatprep.mubr.bf16.mxu0 %v16953_v19  ;;  %v10806_v19 = vrot.slane %v16966_v54, 3  ;;  %v19535_v50 = vpop.f32.mrf.mxu1  ;;  %v10805_v28 = vrot.slane %v16965_v7, 3  ;;  %v16974_v57 = vld [vmem:[#allocation3 + $0xac] sm:$0xff]  }
 0x4fa   : > { %16195 = vmatmul.mubr.bf16.gmra.mxu1 %v9528_v18  ;;  %v16972_v18 = vld [vmem:[#allocation3 + $0x18] sm:$0xff]  }
 0x4fb   : > { %16198 = vmatprep.mubr.bf16.mxu1 %v9530_v23  ;;  %v10807_v23 = vsel %vm3847_vm7, %v10805_v28, %v10806_v19  ;;  %v10808_v54 = vrot.slane %v16972_v18, 3  ;;  %v17003_v28 = vld [vmem:[%s20742_s3 + $0x1f0] sm:$0xff]  }
 0x4fc   : > { %v16980_v18 = vld [vmem:[#allocation3 + $0x30] sm:$0xff]  }
 0x4fd   : > { %16359 = vmatmul.mubr.bf16.gmra.mxu0 %v16958_v62  ;;  %v19543_v62 = vpop.f32.mrf.mxu1 }
 0x4fe   : > { %16362 = vmatprep.mubr.bf16.mxu0 %v16961_v10  ;;  %v19541_v29 = vpop.f32.mrf.mxu0  ;;  %20812 = vst [vmem:[#allocation51_spill] sm:$0xff] %v19543_v62  ;;  %v16977_v10 = vld [vmem:[#allocation3 + $0x1c] sm:$0xff]  }
 0x4ff   : > { %20811 = vst [vmem:[#allocation50_spill] sm:$0xff] %v19541_v29  ;;  %v16979_v29 = vld [vmem:[#allocation3 + $0x28] sm:$0xff]  }
 0x500   : > { %v19547_v45 = vpop.f32.mrf.mxu0 }
 0x501   : > { %20814 = vst [vmem:[#allocation53_spill] sm:$0xff] %v19547_v45  ;;  %v16981_v45 = vld [vmem:[#allocation3 + $0x24] sm:$0xff]  }
 0x502   : > { %16199 = vmatmul.mubr.bf16.gmra.mxu1 %v9532_v30  ;;  %v19545_v7 = vpop.f32.mrf.mxu1  ;;  %v10809_v30 = vsel %vm3847_vm7, %v10806_v19, %v10808_v54  ;;  %v17006_v19 = vld [vmem:[%s20742_s3 + $0x1e8] sm:$0xff]  }
 0x503   : > { %16274 = vmatprep.mubr.bf16.mxu1 %v10807_v23  ;;  %20813 = vst [vmem:[#allocation52_spill] sm:$0xff] %v19545_v7  ;;  %v12633_v23 = vrot.slane %v16977_v10, 1  ;;  %v19556_v7 = vpop.f32.mrf.mxu0 }
 0x504   : > { %v19553_v36 = vpop.f32.mrf.mxu1  ;;  %20816 = vst [vmem:[#allocation55_spill] sm:$0xff] %v19556_v7  ;;  %v10814_v7 = vrot.slane %v16980_v18, 3 }
 0x505   : > { %16363 = vmatmul.mubr.bf16.gmra.mxu0 %v16967_v26  ;;  %20815 = vst [vmem:[#allocation54_spill] sm:$0xff] %v19553_v36  ;;  %v10811_v26 = vsel %vm3847_vm7, %v10808_v54, %v10810_v53  ;;  %v16982_v36 = vld [vmem:[#allocation3 + $0x2c] sm:$0xff]  }
 0x506   : > { %16366 = vmatprep.mubr.bf16.mxu0 %v16970_v17  ;;  %v12632_v17 = vrot.slane %v16976_v22, 1  ;;  %v19563_v54 = vpop.f32.mrf.mxu1  ;;  %v12635_v22 = vrot.slane %v16981_v45, 1 }
 0x507   : > { %20817 = vst [vmem:[#allocation56_spill] sm:$0xff] %v19563_v54  ;;  %v16987_v54 = vld [vmem:[#allocation3 + $0x48] sm:$0xff]  }
 0x508   : > { %v12634_v10 = vsel %vm1790_vm4, %v12632_v17, %v12633_v23  ;;  %v12637_v17 = vrot.slane %v16982_v36, 1  ;;  %v19573_v62 = vpop.f32.mrf.mxu1 }
 0x509   : > { %20820 = vst [vmem:[#allocation59_spill] sm:$0xff] %v19573_v62 }
 0x50a   : > { %16275 = vmatmul.mubr.bf16.vlgmr.msra.gmra.mxu1 %v10809_v30  ;;  %v10812_v30 = vrot.slane %v16979_v29, 3  ;;  %v16983_v29 = vld [vmem:[#allocation3 + $0x38] sm:$0xff]  }
 0x50b   : > { %16278 = vmatprep.mubr.bf16.mxu1 %v10811_v26  ;;  %16371 = vmatpush3.bf16.msra.mxu1 %v19468_v56  ;;  %v19565_v26 = vpop.f32.mrf.mxu0  ;;  %v17009_v56 = vld [vmem:[%s20742_s3 + $0x1e0] sm:$0xff]  }
 0x50c   : > { %16372 = vmatprep.subr.bf16.mxu1 %v17003_v28  ;;  %20818 = vst [vmem:[#allocation57_spill] sm:$0xff] %v19565_v26  ;;  %v10815_v18 = vsel %vm3847_vm7, %v10812_v30, %v10814_v7  ;;  %v16985_v26 = vld [vmem:[#allocation3 + $0x34] sm:$0xff]  }
 0x50d   : > { %16367 = vmatmul.mubr.bf16.gmra.mxu0 %v16974_v57  ;;  %v10813_v57 = vsel %vm3847_vm7, %v10810_v53, %v10812_v30  ;;  %v17012_v53 = vld [vmem:[%s20742_s3 + $0x1d8] sm:$0xff]  }
 0x50e   : > { %16442 = vmatprep.mubr.bf16.mxu0 %v12634_v10  ;;  %v19570_v60 = vpop.f32.mrf.mxu0  ;;  %v16984_v10 = vld [vmem:[#allocation3 + $0x40] sm:$0xff]  }
 0x50f   : > { %16373 = vmatpush3.bf16.msra.mxu1 %v17003_v28  ;;  %20819 = vst [vmem:[#allocation58_spill] sm:$0xff] %v19570_v60  ;;  %v12636_v28 = vsel %vm1790_vm4, %v12633_v23, %v12635_v22  ;;  %v10816_v60 = vrot.slane %v16983_v29, 3  ;;  %v16986_v30 = vld [vmem:[#allocation3 + $0x3c] sm:$0xff]   ;;  %v17015_v23 = vld [vmem:[%s20742_s3 + $0x1d0] sm:$0xff]  }
 0x510   : > { %16374 = vmatprep.subr.bf16.mxu1 %v17006_v19  ;;  %v19582_v36 = vpop.f32.mrf.mxu0  ;;  %v16988_v29 = vld [vmem:[#allocation3 + $0x50] sm:$0xff]  }
 0x511   : > { %20822 = vst [vmem:[#allocation61_spill] sm:$0xff] %v19582_v36  ;;  %v10817_v36 = vsel %vm3847_vm7, %v10814_v7, %v10816_v60 }
 0x512   : > { %16279 = vmatmul.mubr.bf16.gmra.mxu1 %v10813_v57  ;;  %v19576_v45 = vpop.f32.mrf.mxu1  ;;  %v12638_v57 = vsel %vm1790_vm4, %v12635_v22, %v12637_v17  ;;  %v19590_v62 = vpop.f32.mrf.mxu0 }
 0x513   : > { %16282 = vmatprep.mubr.bf16.mxu1 %v10815_v18  ;;  %16375 = vmatpush3.bf16.msra.mxu1 %v17006_v19  ;;  %20821 = vst [vmem:[#allocation60_spill] sm:$0xff] %v19576_v45  ;;  %v10818_v18 = vrot.slane %v16984_v10, 3  ;;  %v12639_v45 = vrot.slane %v16985_v26, 1  ;;  %20824 = vst [vmem:[#allocation63_spill] sm:$0xff] %v19590_v62  ;;  %v16989_v10 = vld [vmem:[#allocation3 + $0x44] sm:$0xff]  }
 0x514   : > { %16376 = vmatprep.subr.bf16.mxu1 %v17009_v56  ;;  %v19585_v19 = vpop.f32.mrf.mxu1  ;;  %v19600_v62 = vpop.f32.mrf.mxu0 }
 0x515   : > { %16443 = vmatmul.mubr.bf16.vlgmr.msra.gmra.mxu0 %v12636_v28  ;;  %20823 = vst [vmem:[#allocation62_spill] sm:$0xff] %v19585_v19  ;;  %v12641_v28 = vrot.slane %v16986_v30, 1  ;;  %v10819_v22 = vsel %vm3847_vm7, %v10816_v60, %v10818_v18  ;;  %v12640_v26 = vsel %vm1790_vm4, %v12637_v17, %v12639_v45  ;;  %20826 = vst [vmem:[#allocation65_spill] sm:$0xff] %v19600_v62  ;;  %v16990_v60 = vld [vmem:[#allocation3 + $0x4c] sm:$0xff]   ;;  %v10822_v30 = vrot.slane %v16988_v29, 3  ;;  %v16991_v19 = vld [vmem:[#allocation3 + $0x58] sm:$0xff]  }
 0x516   : > { %16446 = vmatprep.mubr.bf16.mxu0 %v12638_v57  ;;  %v17018_v57 = vld [vmem:[%s20742_s3 + $0x1c8] sm:$0xff]   ;;  %v12643_v17 = vrot.slane %v16989_v10, 1  ;;  %v16992_v29 = vld [vmem:[#allocation3 + $0x60] sm:$0xff]  }
 0x517   : > { %16377 = vmatpush3.bf16.msra.mxu1 %v17009_v56  ;;  %v19594_v56 = vpop.f32.mrf.mxu1  ;;  %v12642_v7 = vsel %vm1790_vm4, %v12639_v45, %v12641_v28 }
 0x518   : > { %16378 = vmatprep.subr.bf16.mxu1 %v17012_v53  ;;  %20825 = vst [vmem:[#allocation64_spill] sm:$0xff] %v19594_v56  ;;  %v17022_v56 = vld [vmem:[%s20742_s3 + $0x1c0] sm:$0xff]   ;;  %v12644_v10 = vsel %vm1790_vm4, %v12641_v28, %v12643_v17  ;;  %v7924_v28 = vadd.f32 %v19358_v25, %v19035_v42 }
 0x519   : > { %v16997_v25 = vld [vmem:[#allocation3 + $0x64] sm:$0xff]  }
 0x51a   : > { %16283 = vmatmul.mubr.bf16.gmra.mxu1 %v10817_v36  ;;  %v10820_v36 = vrot.slane %v16987_v54, 3 }
 0x51b   : > { %16286 = vmatprep.mubr.bf16.mxu1 %v10819_v22  ;;  %16379 = vmatpush3.bf16.msra.mxu1 %v17012_v53  ;;  %v19605_v22 = vpop.f32.mrf.mxu1 }
 0x51c   : > { %16380 = vmatprep.subr.bf16.mxu1 %v17015_v23  ;;  %20828 = vst [vmem:[#allocation67_spill] sm:$0xff] %v19605_v22  ;;  %v10821_v62 = vsel %vm3847_vm7, %v10818_v18, %v10820_v36  ;;  %v10823_v54 = vsel %vm3847_vm7, %v10820_v36, %v10822_v30  ;;  %v16994_v22 = vld [vmem:[#allocation3 + $0x5c] sm:$0xff]  }
 0x51d   : > { %16447 = vmatmul.mubr.bf16.gmra.mxu0 %v12640_v26  ;;  %v12645_v26 = vrot.slane %v16990_v60, 1  ;;  %v10824_v60 = vrot.slane %v16991_v19, 3 }
 0x51e   : > { %16450 = vmatprep.mubr.bf16.mxu0 %v12642_v7  ;;  %v19603_v53 = vpop.f32.mrf.mxu0 }
 0x51f   : > { %20827 = vst [vmem:[#allocation66_spill] sm:$0xff] %v19603_v53  ;;  %16381 = vmatpush3.bf16.msra.mxu1 %v17015_v23  ;;  %v16993_v53 = vld [vmem:[#allocation3 + $0x54] sm:$0xff]   ;;  %v12646_v18 = vsel %vm1790_vm4, %v12643_v17, %v12645_v26 }
 0x520   : > { %16382 = vmatprep.subr.bf16.mxu1 %v17018_v57  ;;  %v19614_v7 = vpop.f32.mrf.mxu0 }
 0x521   : > { %20830 = vst [vmem:[#allocation69_spill] sm:$0xff] %v19614_v7  ;;  %v10825_v7 = vsel %vm3847_vm7, %v10822_v30, %v10824_v60  ;;  %v7925_v30 = vadd.f32 %v19366_v21, %v19044_v4  ;;  %v7928_v4 = vadd.f32 %v19375_v12, %v19053_v5 }
 0x522   : > { %v19611_v45 = vpop.f32.mrf.mxu1  ;;  %16287 = vmatmul.mubr.bf16.gmra.mxu1 %v10821_v62  ;;  %v10826_v62 = vrot.slane %v16992_v29, 3  ;;  %v19622_v36 = vpop.f32.mrf.mxu0  ;;  %v7922_v29 = vadd.f32 %v19362_v48, %v19040_v31  ;;  %v16998_v48 = vld [vmem:[#allocation3 + $0x6c] sm:$0xff]  }
 0x523   : > { %20829 = vst [vmem:[#allocation68_spill] sm:$0xff] %v19611_v45  ;;  %16290 = vmatprep.mubr.bf16.mxu1 %v10823_v54  ;;  %16383 = vmatpush3.bf16.msra.mxu1 %v17018_v57  ;;  %20833 = vst [vmem:[#allocation72_spill] sm:$0xff] %v19622_v36  ;;  %v12647_v57 = vrot.slane %v16993_v53, 1  ;;  %v12651_v36 = vrot.slane %v16997_v25, 1 }
 0x524   : > { %v19616_v23 = vpop.f32.mrf.mxu1  ;;  %16384 = vmatprep.subr.bf16.mxu1 %v17022_v56  ;;  %v10827_v19 = vsel %vm3847_vm7, %v10824_v60, %v10826_v62 }
 0x525   : > { %20831 = vst [vmem:[#allocation70_spill] sm:$0xff] %v19616_v23  ;;  %16451 = vmatmul.mubr.bf16.gmra.mxu0 %v12644_v10  ;;  %v12649_v10 = vrot.slane %v16994_v22, 1  ;;  %v16995_v23 = vld [vmem:[#allocation3 + $0x68] sm:$0xff]   ;;  %v12648_v42 = vsel %vm1790_vm4, %v12645_v26, %v12647_v57 }
 0x526   : > { %v19620_v45 = vpop.f32.mrf.mxu1  ;;  %16454 = vmatprep.mubr.bf16.mxu0 %v12646_v18  ;;  %v19632_v18 = vpop.f32.mrf.mxu0  ;;  %v10828_v31 = vrot.slane %v16995_v23, 3  ;;  %v16999_v23 = vld [vmem:[#allocation3 + $0x78] sm:$0xff]  }
 0x527   : > { %20832 = vst [vmem:[#allocation71_spill] sm:$0xff] %v19620_v45  ;;  %16385 = vmatpush3.bf16.msra.mxu1 %v17022_v56  ;;  %v16996_v45 = vld [vmem:[#allocation3 + $0x70] sm:$0xff]   ;;  %20834 = vst [vmem:[#allocation73_spill] sm:$0xff] %v19632_v18  ;;  %v12650_v60 = vsel %vm1790_vm4, %v12647_v57, %v12649_v10  ;;  %v12653_v57 = vrot.slane %v16998_v48, 1  ;;  %v12652_v12 = vsel %vm1790_vm4, %v12649_v10, %v12651_v36 }
 0x528   : > { %v19624_v54 = vpop.f32.mrf.mxu1 }
 0x52a   : > { %v16052_v17 = vpop.f32.mrf.mxu1  ;;  %16291 = vmatmul.mubr.bf16.gmra.mxu1 %v10825_v7 }
 0x52b   : > { %v19634_v56 = vadd.f32 %v16052_v17, %v7924_v28  ;;  %16294 = vmatprep.mubr.bf16.mxu1 %v10827_v19  ;;  %v10830_v28 = vrot.slane %v16996_v45, 3 }
 0x52c   : > { %v8469_v53 = vpop.f32.mrf.mxu1 }
 0x52d   : > { %v19639_v22 = vadd.f32 %v8469_v53, %v7922_v29  ;;  %v19641_v7 = vpop.f32.mrf.mxu0  ;;  %16455 = vmatmul.mubr.bf16.gmra.mxu0 %v12648_v42  ;;  %v10829_v29 = vsel %vm3847_vm7, %v10826_v62, %v10828_v31  ;;  %v10831_v45 = vsel %vm3847_vm7, %v10828_v31, %v10830_v28  ;;  %v7926_v42 = vadd.f32 %v19382_v37, %v19058_v55  ;;  %v17004_v37 = vld [vmem:[#allocation3 + $0x7c] sm:$0xff]  }
 0x52e   : > { %v16053_v18 = vpop.f32.mrf.mxu1  ;;  %16458 = vmatprep.mubr.bf16.mxu0 %v12650_v60  ;;  %v17002_v60 = vld [vmem:[#allocation3 + $0x74] sm:$0xff]   ;;  %v7929_v62 = vadd.f32 %v19390_v58, %v19062_v15  ;;  %v12654_v31 = vsel %vm1790_vm4, %v12651_v36, %v12653_v57  ;;  %v10832_v55 = vrot.slane %v16999_v23, 3  ;;  %v7932_v15 = vadd.f32 %v19404_v20, %v19077_v35  ;;  %v17005_v23 = vld [vmem:[#allocation3 + $0x88] sm:$0xff]  }
 0x52f   : > { %v19644_v17 = vadd.f32 %v16053_v18, %v7925_v30  ;;  %v19646_v19 = vpop.f32.mrf.mxu0  ;;  %v17001_v18 = vld [vmem:[#allocation3 + $0x80] sm:$0xff]   ;;  %v12657_v36 = vrot.slane %v17004_v37, 1 }
 0x530   : > { %v19648_v26 = vpop.f32.mrf.mxu1 }
 0x531   : > { %v19652_v21 = vpop.f32.mrf.mxu0 }
 0x532   : > { %20835 = vst [vmem:[#allocation74_spill] sm:$0xff] %v19652_v21  ;;  %v16056_v53 = vpop.f32.mrf.mxu1  ;;  %16295 = vmatmul.mubr.bf16.gmra.mxu1 %v10829_v29  ;;  %v12655_v21 = vrot.slane %v17002_v60, 1 }
 0x533   : > { %v19658_v30 = vadd.f32 %v16056_v53, %v7928_v4  ;;  %v19660_v25 = vpop.f32.mrf.mxu0  ;;  %16298 = vmatprep.mubr.bf16.mxu1 %v10831_v45  ;;  %v10834_v53 = vrot.slane %v17001_v18, 3 }
 0x534   : > { %20836 = vst [vmem:[#allocation75_spill] sm:$0xff] %v19660_v25  ;;  %v8485_v5 = vpop.f32.mrf.mxu1  ;;  %v12656_v20 = vsel %vm1790_vm4, %v12653_v57, %v12655_v21 }
 0x535   : > { %v19665_v48 = vadd.f32 %v8485_v5, %v7926_v42  ;;  %v19667_v29 = vpop.f32.mrf.mxu0  ;;  %16459 = vmatmul.mubr.bf16.gmra.mxu0 %v12652_v12  ;;  %v10833_v42 = vsel %vm3847_vm7, %v10830_v28, %v10832_v55  ;;  %v10835_v18 = vsel %vm3847_vm7, %v10832_v55, %v10834_v53  ;;  %v17007_v12 = vld [vmem:[#allocation3 + $0x90] sm:$0xff]   ;;  %v7933_v28 = vadd.f32 %v19424_v2, %v19097_v39 }
 0x536   : > { %v16057_v4 = vpop.f32.mrf.mxu1  ;;  %16462 = vmatprep.mubr.bf16.mxu0 %v12654_v31  ;;  %v12658_v55 = vsel %vm1790_vm4, %v12655_v21, %v12657_v36  ;;  %v7936_v39 = vadd.f32 %v19446_v1, %v19106_v24 }
 0x537   : > { %v19670_v45 = vadd.f32 %v16057_v4, %v7929_v62  ;;  %v19672_v25 = vpop.f32.mrf.mxu0  ;;  %v7930_v62 = vadd.f32 %v19416_v47, %v19088_v43  ;;  %v17008_v4 = vld [vmem:[#allocation3 + $0x84] sm:$0xff]   ;;  %v10836_v43 = vrot.slane %v17005_v23, 3  ;;  %v17010_v47 = vld [vmem:[#allocation3 + $0x8c] sm:$0xff]   ;;  %v17011_v23 = vld [vmem:[#allocation3 + $0x98] sm:$0xff]  }
 0x538   : > { %v19674_v10 = vpop.f32.mrf.mxu1  ;;  %v12661_v21 = vrot.slane %v17010_v47, 1  ;;  %v17019_v47 = vld [vmem:[#allocation3 + $0x14] sm:$0xff]  }
 0x539   : > { %v19678_v58 = vpop.f32.mrf.mxu0 }
 0x53a   : > { %20837 = vst [vmem:[#allocation76_spill] sm:$0xff] %v19678_v58  ;;  %v16060_v5 = vpop.f32.mrf.mxu1  ;;  %16299 = vmatmul.mubr.bf16.gmra.mxu1 %v10833_v42  ;;  %v12659_v58 = vrot.slane %v17008_v4, 1 }
 0x53b   : > { %v19684_v31 = vadd.f32 %v16060_v5, %v7932_v15  ;;  %v19686_v60 = vpop.f32.mrf.mxu0  ;;  %16302 = vmatprep.mubr.bf16.mxu1 %v10835_v18  ;;  %v10838_v5 = vrot.slane %v17007_v12, 3 }
 0x53c   : > { %20838 = vst [vmem:[#allocation77_spill] sm:$0xff] %v19686_v60  ;;  %v8501_v35 = vpop.f32.mrf.mxu1  ;;  %v12660_v1 = vsel %vm1790_vm4, %v12657_v36, %v12659_v58 }
 0x53d   : > { %v19691_v37 = vadd.f32 %v8501_v35, %v7930_v62  ;;  %v19693_v42 = vpop.f32.mrf.mxu0  ;;  %16463 = vmatmul.mubr.bf16.gmra.mxu0 %v12656_v20  ;;  %v10837_v62 = vsel %vm3847_vm7, %v10834_v53, %v10836_v43  ;;  %v10839_v12 = vsel %vm3847_vm7, %v10836_v43, %v10838_v5  ;;  %v19708_v20 = vld [vmem:[#allocation3 + $0xa0] sm:$0xff]   ;;  %v17014_v53 = vld [vmem:[#allocation3 + $0x94] sm:$0xff]  }
 0x53e   : > { %v16061_v15 = vpop.f32.mrf.mxu1  ;;  %16466 = vmatprep.mubr.bf16.mxu0 %v12658_v55 }
 0x53f   : > { %v19696_v18 = vadd.f32 %v16061_v15, %v7933_v28  ;;  %v19698_v60 = vpop.f32.mrf.mxu0  ;;  %v7934_v28 = vadd.f32 %v19457_v13, %v19111_v63  ;;  %v7937_v15 = vadd.f32 %v19470_v3, %v19115_v0  ;;  %v12662_v63 = vsel %vm1790_vm4, %v12659_v58, %v12661_v21 }
 0x540   : > { %v19700_v57 = vpop.f32.mrf.mxu1  ;;  %v10840_v13 = vrot.slane %v17011_v23, 3  ;;  %v12663_v3 = vrot.slane %v17014_v53, 1 }
 0x541   : > { %v19704_v2 = vpop.f32.mrf.mxu0 }
 0x542   : > { %20839 = vst [vmem:[#allocation78_spill] sm:$0xff] %v19704_v2  ;;  %v16064_v35 = vpop.f32.mrf.mxu1  ;;  %16303 = vmatmul.mubr.bf16.gmra.mxu1 %v10837_v62  ;;  %v10841_v23 = vsel %vm3847_vm7, %v10838_v5, %v10840_v13 }
 0x543   : > { %v19712_v55 = vadd.f32 %v16064_v35, %v7936_v39  ;;  %v19714_v4 = vpop.f32.mrf.mxu0  ;;  %16306 = vmatprep.mubr.bf16.mxu1 %v10839_v12  ;;  %v17016_v39 = vld [vmem:[#allocation3 + $0x9c] sm:$0xff]   ;;  %v10842_v12 = vrot.slane %v19708_v20, 3 }
 0x544   : > { %20840 = vst [vmem:[#allocation79_spill] sm:$0xff] %v19714_v4  ;;  %v8517_v24 = vpop.f32.mrf.mxu1  ;;  %v19725_v4 = vld [vmem:[#allocation3 + $0x1c] sm:$0xff]  }
 0x545   : > { %v19719_v62 = vadd.f32 %v8517_v24, %v7934_v28  ;;  %v19721_v43 = vpop.f32.mrf.mxu0  ;;  %16467 = vmatmul.mubr.bf16.gmra.mxu0 %v12660_v1  ;;  %v11929_v28 = vshll.u32 %v17019_v47, 16  ;;  %v7940_v24 = vadd.f32 %v19487_v40, %v19124_v9  ;;  %v12665_v1 = vrot.slane %v17016_v39, 1  ;;  %v17021_v39 = vld [vmem:[#allocation3 + $0xa4] sm:$0xff]  }
 0x546   : > { %20842 = vst [vmem:[#allocation81_spill] sm:$0xff] %v19721_v43  ;;  %v16065_v35 = vpop.f32.mrf.mxu1  ;;  %16470 = vmatprep.mubr.bf16.mxu0 %v12662_v63  ;;  %v17017_v63 = vld [vmem:[#allocation3 + $0xa8] ss:$0 sps:$4 sm:$0x77]   ;;  %v12664_v40 = vsel %vm1790_vm4, %v12661_v21, %v12663_v3 }
 0x547   : > { %20841 = vst [vmem:[#allocation80_spill] sm:$0xff] %v19719_v62  ;;  %v19727_v36 = vadd.f32 %v16065_v35, %v7937_v15  ;;  %v19729_v2 = vpop.f32.mrf.mxu0  ;;  %v10843_v15 = vsel %vm3847_vm7, %v10840_v13, %v10842_v12  ;;  %v11934_v35 = vshll.u32 %v19725_v4, 16  ;;  %v11931_v5 = vrot.slane %v11929_v28, 1  ;;  %v19756_v28 = vld [vmem:[#allocation3 + $0x2c] sm:$0xff]  }
 0x548   : > { %20843 = vst [vmem:[#allocation82_spill] sm:$0xff] %v19729_v2  ;;  %v19731_v0 = vpop.f32.mrf.mxu1 }
 0x549   : > { %20844 = vst [vmem:[#allocation83_spill] sm:$0xff] %v19731_v0  ;;  %v19735_v58 = vpop.f32.mrf.mxu0  ;;  %v7938_v0 = vadd.f32 %v19491_v6, %v19129_v27  ;;  %v12666_v27 = vsel %vm1790_vm4, %v12663_v3, %v12665_v1  ;;  %v10844_v6 = vrot.slane %v17017_v63, 3  ;;  %v11936_v21 = vrot.slane %v11934_v35, 1 }
 0x54a   : > { %20845 = vst [vmem:[#allocation84_spill] sm:$0xff] %v19735_v58  ;;  %v16068_v20 = vpop.f32.mrf.mxu1  ;;  %16307 = vmatmul.mubr.bf16.gmra.mxu1 %v10841_v23  ;;  %v17024_v58 = vld [vmem:[#allocation3 + $0x24] sm:$0xff]   ;;  %v7941_v23 = vadd.f32 %v19497_v49, %v19133_v11  ;;  %v7944_v3 = vadd.f32 %v19506_v61, %v19147_v52 }
 0x54b   : > { %v19742_v53 = vadd.f32 %v16068_v20, %v7940_v24  ;;  %v19744_v62 = vpop.f32.mrf.mxu0  ;;  %16310 = vmatprep.mubr.bf16.mxu1 %v10843_v15  ;;  %v19754_v24 = vld [vmem:[#allocation3 + $0xac] sm:$0xff]   ;;  %v11927_v15 = vshrl.u32 %v17019_v47, 16 }
 0x54c   : > { %20846 = vst [vmem:[#allocation85_spill] sm:$0xff] %v19744_v62  ;;  %v8533_v9 = vpop.f32.mrf.mxu1  ;;  %v12669_v47 = vrot.slane %v19754_v24, 1  ;;  %v17027_v24 = vld [vmem:[#allocation3 + $0x34] sm:$0xff]  }
 0x54d   : > { %v19749_v13 = vadd.f32 %v8533_v9, %v7938_v0  ;;  %v19751_v2 = vpop.f32.mrf.mxu0  ;;  %16471 = vmatmul.mubr.bf16.gmra.mxu0 %v12664_v40  ;;  %v11932_v49 = vor.u32 %v11931_v5, %v11927_v15  ;;  %v12667_v0 = vrot.slane %v17021_v39, 1  ;;  %v11942_v9 = vshll.u32 %v17024_v58, 16 }
 0x54e   : > { %v16069_v20 = vpop.f32.mrf.mxu1  ;;  %16474 = vmatprep.mubr.bf16.mxu0 %v12666_v27  ;;  %v10845_v40 = vsel %vm3847_vm7, %v10842_v12, %v10844_v6  ;;  %v11950_v27 = vshll.u32 %v19756_v28, 16  ;;  %v7942_v5 = vadd.f32 %v19511_v34, %v19156_v16  ;;  %v17026_v6 = vld [vmem:[#allocation3 + $0xb4] ss:$0 sps:$4 sm:$0x11]   ;;  %v7945_v15 = vadd.f32 %v19516_v59, %v19165_v8 }
 0x54f   : > { %20847 = vst [vmem:[#allocation86_spill] sm:$0xff] %v19749_v13  ;;  %v19758_v62 = vadd.f32 %v16069_v20, %v7941_v23  ;;  %v19760_v43 = vpop.f32.mrf.mxu0  ;;  %v11937_v23 = vsel %vm1020_vm3, %v11932_v49, %v11936_v21  ;;  %v12668_v61 = vsel %vm1790_vm4, %v12665_v1, %v12667_v0  ;;  %v11944_v12 = vrot.slane %v11942_v9, 1  ;;  %v19787_v1 = vld [vmem:[#allocation3 + $0x3c] sm:$0xff]  }
 0x550   : > { %20848 = vst [vmem:[#allocation87_spill] sm:$0xff] %v19760_v43  ;;  %v19762_v11 = vpop.f32.mrf.mxu1  ;;  %v11938_v49 = vshrl.u32 %v19725_v4, 16  ;;  %v12670_v16 = vsel %vm1790_vm4, %v12667_v0, %v12669_v47  ;;  %v7943_v9 = vadd.f32 %v19523_v32, %v19177_v14  ;;  %v7948_v0 = vadd.f32 %v19525_v46, %v19185_v44 }
 0x551   : > { %20849 = vst [vmem:[#allocation88_spill] sm:$0xff] %v19762_v11  ;;  %v19766_v63 = vpop.f32.mrf.mxu0  ;;  %v11966_v32 = vshll.u32 %v19787_v1, 16 }
 0x552   : > { %20850 = vst [vmem:[#allocation89_spill] sm:$0xff] %v19766_v63  ;;  %v16072_v35 = vpop.f32.mrf.mxu1  ;;  %16311 = vmatmul.mubr.bf16.gmra.mxu1 %v10845_v40 }
 0x553   : > { %v19774_v39 = vadd.f32 %v16072_v35, %v7944_v3  ;;  %v19776_v20 = vpop.f32.mrf.mxu0  ;;  %16386 = vmatprep.mubr.bf16.mxu1 %v11937_v23  ;;  %v11946_v3 = vshrl.u32 %v17024_v58, 16  ;;  %v11952_v35 = vrot.slane %v11950_v27, 1  ;;  %v11940_v23 = vor.u32 %v11938_v49, %v11936_v21 }
 0x554   : > { %20851 = vst [vmem:[#allocation90_spill] sm:$0xff] %v19776_v20  ;;  %v8549_v52 = vpop.f32.mrf.mxu1  ;;  %v7946_v21 = vadd.f32 %v19531_v38, %v19196_v41  ;;  %v11954_v41 = vshrl.u32 %v19756_v28, 16 }
 0x555   : > { %v19782_v40 = vadd.f32 %v8549_v52, %v7942_v5  ;;  %v19784_v63 = vpop.f32.mrf.mxu0  ;;  %16475 = vmatmul.mubr.bf16.gmra.mxu0 %v12668_v61  ;;  %v11948_v5 = vor.u32 %v11946_v3, %v11944_v12  ;;  %v12671_v52 = vrot.slane %v17026_v6, 1  ;;  %v11958_v61 = vshll.u32 %v17027_v24, 16 }
 0x556   : > { %20853 = vst [vmem:[#allocation92_spill] sm:$0xff] %v19784_v63  ;;  %v16073_v34 = vpop.f32.mrf.mxu1  ;;  %16478 = vmatprep.mubr.bf16.mxu0 %v12670_v16  ;;  %v11945_v27 = vsel %vm1020_vm3, %v11940_v23, %v11944_v12  ;;  %v7949_v12 = vadd.f32 %v19535_v50, %v19209_v33  ;;  %v11968_v23 = vrot.slane %v11966_v32, 1  ;;  %v11956_v33 = vor.u32 %v11954_v41, %v11952_v35 }
 0x557   : > { %20852 = vst [vmem:[#allocation91_spill] sm:$0xff] %v19782_v40  ;;  %v19791_v8 = vadd.f32 %v16073_v34, %v7945_v15  ;;  %v19793_v59 = vpop.f32.mrf.mxu0  ;;  %v11953_v14 = vsel %vm1020_vm3, %v11948_v5, %v11952_v35  ;;  %v12672_v46 = vsel %vm1790_vm4, %v12669_v47, %v12671_v52  ;;  %v11960_v49 = vrot.slane %v11958_v61, 1  ;;  %v17029_v34 = vld [vmem:[#allocation3 + $0x44] sm:$0xff]   ;;  %v20860_v5 = vld [vmem:[#allocation51_spill] sm:$0xff] }
 0x558   : > { %20854 = vst [vmem:[#allocation93_spill] sm:$0xff] %v19793_v59  ;;  %v8552_v4 = vpop.f32.mrf.mxu1  ;;  %v7947_v47 = vadd.f32 %v20860_v5, %v19221_v51  ;;  %v20866_v35 = vld [vmem:[#allocation54_spill] sm:$0xff] }
 0x559   : > { %v19797_v16 = vadd.f32 %v8552_v4, %v7943_v9  ;;  %v19799_v58 = vpop.f32.mrf.mxu0  ;;  %v19818_v4 = vld [vmem:[#allocation3 + $0x4c] sm:$0xff]   ;;  %v11961_v32 = vsel %vm1020_vm3, %v11956_v33, %v11960_v49 }
 0x55a   : > { %20856 = vst [vmem:[#allocation95_spill] sm:$0xff] %v19799_v58  ;;  %v16076_v40 = vpop.f32.mrf.mxu1  ;;  %16387 = vmatmul.mubr.bf16.vlgmr.msra.gmra.mxu1 %v11945_v27  ;;  %v11974_v27 = vshll.u32 %v17029_v34, 16 }
 0x55b   : > { %20855 = vst [vmem:[#allocation94_spill] sm:$0xff] %v19797_v16  ;;  %v19806_v6 = vadd.f32 %v16076_v40, %v7948_v0  ;;  %v19808_v15 = vpop.f32.mrf.mxu0  ;;  %16390 = vmatprep.mubr.bf16.mxu1 %v11953_v14  ;;  %v11962_v40 = vshrl.u32 %v17027_v24, 16  ;;  %v20862_v14 = vld [vmem:[#allocation6_spill] sm:$0xff] }
 0x55c   : > { %20857 = vst [vmem:[#allocation96_spill] sm:$0xff] %v19808_v15  ;;  %v8565_v44 = vpop.f32.mrf.mxu1 }
 0x55d   : > { %v19813_v3 = vadd.f32 %v8565_v44, %v7946_v21  ;;  %v19815_v9 = vpop.f32.mrf.mxu0  ;;  %16479 = vmatmul.mubr.bf16.gmra.mxu0 %v12672_v46  ;;  %v11964_v0 = vor.u32 %v11962_v40, %v11960_v49  ;;  %v20863_v21 = vld [vmem:[#allocation52_spill] sm:$0xff] }
 0x55e   : > { %20859 = vst [vmem:[#allocation98_spill] sm:$0xff] %v19815_v9  ;;  %v16077_v38 = vpop.f32.mrf.mxu1  ;;  %v7952_v44 = vadd.f32 %v20863_v21, %v20862_v14  ;;  %v17031_v14 = vld [vmem:[#allocation3 + $0x54] sm:$0xff]  }
 0x55f   : > { %20858 = vst [vmem:[#allocation97_spill] sm:$0xff] %v19813_v3  ;;  %v19822_v52 = vadd.f32 %v16077_v38, %v7949_v12  ;;  %v19824_v61 = vpop.f32.mrf.mxu0  ;;  %v11969_v51 = vsel %vm1020_vm3, %v11964_v0, %v11968_v23  ;;  %v11982_v12 = vshll.u32 %v19818_v4, 16  ;;  %v20865_v38 = vld [vmem:[#allocation10_spill] sm:$0xff]  ;;  %v20868_v21 = vld [vmem:[#allocation11_spill] sm:$0xff]  ;;  %v11970_v0 = vshrl.u32 %v19787_v1, 16 }
 0x560   : > { %20861 = vst [vmem:[#allocation51_spill] sm:$0xff] %v19824_v61  ;;  %v8568_v50 = vpop.f32.mrf.mxu1  ;;  %v7950_v41 = vadd.f32 %v20866_v35, %v20865_v38  ;;  %v11978_v61 = vshrl.u32 %v17029_v34, 16  ;;  %v20872_v35 = vld [vmem:[#allocation59_spill] sm:$0xff]  ;;  %v11994_v58 = vshrl.u32 %v17031_v14, 16 }
 0x561   : > { %v19828_v28 = vadd.f32 %v8568_v50, %v7947_v47  ;;  %v19830_v24 = vpop.f32.mrf.mxu0  ;;  %v11976_v50 = vrot.slane %v11974_v27, 1  ;;  %v11984_v38 = vrot.slane %v11982_v12, 1  ;;  %v11972_v9 = vor.u32 %v11970_v0, %v11968_v23  ;;  %v20878_v23 = vld [vmem:[#allocation62_spill] sm:$0xff] }
 0x562   : > { %20864 = vst [vmem:[#allocation6_spill] sm:$0xff] %v19830_v24  ;;  %v16080_v46 = vpop.f32.mrf.mxu1  ;;  %16391 = vmatmul.mubr.bf16.gmra.mxu1 %v11961_v32  ;;  %v20869_v24 = vld [vmem:[#allocation56_spill] sm:$0xff] }
 0x563   : > { %v19837_v40 = vadd.f32 %v16080_v46, %v7952_v44  ;;  %v19839_v5 = vpop.f32.mrf.mxu0  ;;  %16394 = vmatprep.mubr.bf16.mxu1 %v11969_v51  ;;  %v7953_v49 = vadd.f32 %v20869_v24, %v20868_v21  ;;  %v19848_v44 = vld [vmem:[#allocation3 + $0x5c] sm:$0xff]   ;;  %v11977_v12 = vsel %vm1020_vm3, %v11972_v9, %v11976_v50 }
 0x564   : > { %20867 = vst [vmem:[#allocation52_spill] sm:$0xff] %v19839_v5  ;;  %v8581_v47 = vpop.f32.mrf.mxu1  ;;  %v20871_v46 = vld [vmem:[#allocation12_spill] sm:$0xff]  ;;  %v20874_v21 = vld [vmem:[#allocation13_spill] sm:$0xff] }
 0x565   : > { %v19843_v33 = vadd.f32 %v8581_v47, %v7950_v41  ;;  %v19845_v32 = vpop.f32.mrf.mxu0  ;;  %v7951_v51 = vadd.f32 %v20872_v35, %v20871_v46  ;;  %v11980_v41 = vor.u32 %v11978_v61, %v11976_v50  ;;  %v11990_v47 = vshll.u32 %v17031_v14, 16  ;;  %v20877_v46 = vld [vmem:[#allocation14_spill] sm:$0xff] }
 0x566   : > { %20870 = vst [vmem:[#allocation10_spill] sm:$0xff] %v19845_v32  ;;  %v16081_v3 = vpop.f32.mrf.mxu1  ;;  %v20875_v32 = vld [vmem:[#allocation60_spill] sm:$0xff]  ;;  %v7954_v0 = vadd.f32 %v20878_v23, %v20877_v46  ;;  %v20884_v23 = vld [vmem:[#allocation67_spill] sm:$0xff] }
 0x567   : > { %v19852_v5 = vadd.f32 %v16081_v3, %v7953_v49  ;;  %v19854_v27 = vpop.f32.mrf.mxu0  ;;  %v7956_v16 = vadd.f32 %v20875_v32, %v20874_v21  ;;  %v11985_v3 = vsel %vm1020_vm3, %v11980_v41, %v11984_v38  ;;  %v11998_v49 = vshll.u32 %v19848_v44, 16  ;;  %v20880_v21 = vld [vmem:[#allocation15_spill] sm:$0xff] }
 0x568   : > { %20873 = vst [vmem:[#allocation54_spill] sm:$0xff] %v19854_v27  ;;  %v8584_v24 = vpop.f32.mrf.mxu1  ;;  %v11986_v41 = vshrl.u32 %v19818_v4, 16 }
 0x569   : > { %v19858_v1 = vadd.f32 %v8584_v24, %v7951_v51  ;;  %v19860_v34 = vpop.f32.mrf.mxu0  ;;  %v11992_v51 = vrot.slane %v11990_v47, 1  ;;  %v17033_v24 = vld [vmem:[#allocation3 + $0x64] sm:$0xff]   ;;  %v12000_v46 = vrot.slane %v11998_v49, 1 }
 0x56a   : > { %20876 = vst [vmem:[#allocation11_spill] sm:$0xff] %v19860_v34  ;;  %v16084_v15 = vpop.f32.mrf.mxu1  ;;  %16395 = vmatmul.mubr.bf16.gmra.mxu1 %v11977_v12  ;;  %v20881_v34 = vld [vmem:[#allocation64_spill] sm:$0xff]  ;;  %v11988_v59 = vor.u32 %v11986_v41, %v11984_v38  ;;  %v20890_v38 = vld [vmem:[#allocation70_spill] sm:$0xff]  ;;  %v12010_v11 = vshrl.u32 %v17033_v24, 16 }
 0x56b   : > { %v19867_v61 = vadd.f32 %v16084_v15, %v7956_v16  ;;  %v19869_v35 = vpop.f32.mrf.mxu0  ;;  %16398 = vmatprep.mubr.bf16.mxu1 %v11985_v3  ;;  %v7957_v9 = vadd.f32 %v20881_v34, %v20880_v21  ;;  %v19878_v16 = vld [vmem:[#allocation3 + $0x6c] sm:$0xff]   ;;  %v20883_v15 = vld [vmem:[#allocation16_spill] sm:$0xff]  ;;  %v20886_v21 = vld [vmem:[#allocation17_spill] sm:$0xff] }
 0x56c   : > { %20879 = vst [vmem:[#allocation56_spill] sm:$0xff] %v19869_v35  ;;  %v8597_v32 = vpop.f32.mrf.mxu1  ;;  %v7955_v3 = vadd.f32 %v20884_v23, %v20883_v15  ;;  %v11993_v49 = vsel %vm1020_vm3, %v11988_v59, %v11992_v51  ;;  %v20889_v15 = vld [vmem:[#allocation18_spill] sm:$0xff] }
 0x56d   : > { %v19873_v50 = vadd.f32 %v8597_v32, %v7954_v0  ;;  %v19875_v12 = vpop.f32.mrf.mxu0  ;;  %v11996_v0 = vor.u32 %v11994_v58, %v11992_v51  ;;  %v12006_v32 = vshll.u32 %v17033_v24, 16  ;;  %v7958_v41 = vadd.f32 %v20890_v38, %v20889_v15 }
 0x56e   : > { %20882 = vst [vmem:[#allocation12_spill] sm:$0xff] %v19875_v12  ;;  %v16085_v27 = vpop.f32.mrf.mxu1  ;;  %v20887_v12 = vld [vmem:[#allocation68_spill] sm:$0xff] }
 0x56f   : > { %v19882_v35 = vadd.f32 %v16085_v27, %v7957_v9  ;;  %v19884_v47 = vpop.f32.mrf.mxu0  ;;  %v7960_v63 = vadd.f32 %v20887_v12, %v20886_v21  ;;  %v12001_v27 = vsel %vm1020_vm3, %v11996_v0, %v12000_v46  ;;  %v12014_v9 = vshll.u32 %v19878_v16, 16  ;;  %v20892_v21 = vld [vmem:[#allocation19_spill] sm:$0xff] }
 0x570   : > { %20885 = vst [vmem:[#allocation59_spill] sm:$0xff] %v19884_v47  ;;  %v8600_v34 = vpop.f32.mrf.mxu1  ;;  %v12002_v0 = vshrl.u32 %v19848_v44, 16 }
 0x571   : > { %v19888_v4 = vadd.f32 %v8600_v34, %v7955_v3  ;;  %v19890_v14 = vpop.f32.mrf.mxu0  ;;  %v12008_v3 = vrot.slane %v12006_v32, 1  ;;  %v17035_v34 = vld [vmem:[#allocation3 + $0x74] sm:$0xff]   ;;  %v12016_v15 = vrot.slane %v12014_v9, 1  ;;  %v20900_v9 = vld [vmem:[#allocation21_spill] sm:$0xff] }
 0x572   : > { %20888 = vst [vmem:[#allocation13_spill] sm:$0xff] %v19890_v14  ;;  %v16088_v20 = vpop.f32.mrf.mxu1  ;;  %16399 = vmatmul.mubr.bf16.gmra.mxu1 %v11993_v49  ;;  %v20893_v14 = vld [vmem:[#allocation71_spill] sm:$0xff]  ;;  %v9213_v43 = vadd.f32 %v20900_v9, %v19634_v56 }
 0x573   : > { %v19897_v58 = vadd.f32 %v16088_v20, %v7960_v63  ;;  %v19899_v23 = vpop.f32.mrf.mxu0  ;;  %16402 = vmatprep.mubr.bf16.mxu1 %v12001_v27  ;;  %v7961_v59 = vadd.f32 %v20893_v14, %v20892_v21  ;;  %v19908_v63 = vld [vmem:[#allocation3 + $0x7c] sm:$0xff]   ;;  %v20897_v21 = vld [vmem:[#allocation7_spill] sm:$0xff] }
 0x574   : > { %20891 = vst [vmem:[#allocation60_spill] sm:$0xff] %v19899_v23  ;;  %v8613_v12 = vpop.f32.mrf.mxu1  ;;  %v20895_v20 = vld [vmem:[#allocation20_spill] sm:$0xff]  ;;  %v12004_v23 = vor.u32 %v12002_v0, %v12000_v46  ;;  %v12030_v46 = vshll.u32 %v19908_v63, 16 }
 0x575   : > { %v19903_v51 = vadd.f32 %v8613_v12, %v7958_v41  ;;  %v19905_v49 = vpop.f32.mrf.mxu0  ;;  %v7959_v27 = vadd.f32 %v19624_v54, %v20895_v20  ;;  %v12012_v41 = vor.u32 %v12010_v11, %v12008_v3  ;;  %v12022_v12 = vshll.u32 %v17035_v34, 16  ;;  %v20902_v20 = vld [vmem:[#allocation23_spill] sm:$0xff] }
 0x576   : > { %20894 = vst [vmem:[#allocation14_spill] sm:$0xff] %v19905_v49  ;;  %v16089_v47 = vpop.f32.mrf.mxu1  ;;  %v20898_v49 = vld [vmem:[#allocation22_spill] sm:$0xff]  ;;  %v12009_v54 = vsel %vm1020_vm3, %v12004_v23, %v12008_v3 }
 0x577   : > { %v19912_v38 = vadd.f32 %v16089_v47, %v7961_v59  ;;  %v19914_v32 = vpop.f32.mrf.mxu0  ;;  %v7923_v13 = vadd.f32 %v20898_v49, %v20897_v21  ;;  %v12017_v59 = vsel %vm1020_vm3, %v12012_v41, %v12016_v15  ;;  %v12024_v56 = vrot.slane %v12022_v12, 1  ;;  %v17037_v21 = vld [vmem:[#allocation3 + $0x84] sm:$0xff]   ;;  %v20904_v41 = vld [vmem:[#allocation24_spill] sm:$0xff] }
 0x578   : > { %20896 = vst [vmem:[#allocation62_spill] sm:$0xff] %v19914_v32  ;;  %v8616_v14 = vpop.f32.mrf.mxu1  ;;  %v9214_v9 = vadd.f32 %v20904_v41, %v19644_v17  ;;  %v20906_v12 = vld [vmem:[#allocation25_spill] sm:$0xff]  ;;  %v20908_v32 = vld [vmem:[#allocation27_spill] sm:$0xff] }
 0x579   : > { %v19918_v44 = vadd.f32 %v8616_v14, %v7959_v27  ;;  %v19920_v24 = vpop.f32.mrf.mxu0  ;;  %v8629_v11 = vadd.f32 %v19648_v26, %v7923_v13  ;;  %v9211_v27 = vadd.f32 %v20902_v20, %v19639_v22  ;;  %v12018_v26 = vshrl.u32 %v19878_v16, 16 }
 0x57a   : > { %20899 = vst [vmem:[#allocation15_spill] sm:$0xff] %v19920_v24  ;;  %v16164_v47 = vpop.f32.mrf.mxu1  ;;  %16403 = vmatmul.mubr.bf16.gmra.mxu1 %v12009_v54  ;;  %v12026_v13 = vshrl.u32 %v17035_v34, 16  ;;  %v12032_v54 = vrot.slane %v12030_v46, 1  ;;  %v20907_v24 = vld [vmem:[#allocation4_spill] sm:$0xff]  ;;  %v20910_v34 = vld [vmem:[#allocation26_spill] sm:$0xff] }
 0x57b   : > { %v19928_v0 = vadd.f32 %v16164_v47, %v9213_v43  ;;  %v19930_v49 = vpop.f32.mrf.mxu0  ;;  %16406 = vmatprep.mubr.bf16.mxu1 %v12017_v59  ;;  %v19941_v47 = vld [vmem:[#allocation3 + $0x8c] sm:$0xff]   ;;  %v9212_v20 = vadd.f32 %v20906_v12, %v8629_v11  ;;  %v7927_v17 = vadd.f32 %v20908_v32, %v20907_v24  ;;  %v9217_v46 = vadd.f32 %v20910_v34, %v19658_v30  ;;  %v20912_v24 = vld [vmem:[#allocation28_spill] sm:$0xff] }
 0x57c   : > { %20901 = vst [vmem:[#allocation64_spill] sm:$0xff] %v19930_v49  ;;  %v9635_v14 = vpop.f32.mrf.mxu1  ;;  %v12028_v49 = vor.u32 %v12026_v13, %v12024_v56  ;;  %v9215_v12 = vadd.f32 %v20912_v24, %v19665_v48  ;;  %v20916_v48 = vld [vmem:[#allocation30_spill] sm:$0xff] }
 0x57d   : > { %v19934_v23 = vadd.f32 %v9635_v14, %v9211_v27  ;;  %v19936_v3 = vpop.f32.mrf.mxu0  ;;  %v12020_v27 = vor.u32 %v12018_v26, %v12016_v15  ;;  %v12046_v15 = vshll.u32 %v19941_v47, 16  ;;  %v8633_v26 = vadd.f32 %v19674_v10, %v7927_v17 }
 0x57e   : > { %20903 = vst [vmem:[#allocation16_spill] sm:$0xff] %v19936_v3  ;;  %v16165_v43 = vpop.f32.mrf.mxu1  ;;  %v12038_v3 = vshll.u32 %v17037_v21, 16  ;;  %v12033_v11 = vsel %vm1020_vm3, %v12028_v49, %v12032_v54  ;;  %v20914_v49 = vld [vmem:[#allocation29_spill] sm:$0xff]  ;;  %v12034_v10 = vshrl.u32 %v19908_v63, 16 }
 0x57f   : > { %v19943_v59 = vadd.f32 %v16165_v43, %v9214_v9  ;;  %v19945_v22 = vpop.f32.mrf.mxu0  ;;  %v12025_v9 = vsel %vm1020_vm3, %v12020_v27, %v12024_v56  ;;  %v9218_v34 = vadd.f32 %v20914_v49, %v19670_v45  ;;  %v20918_v45 = vld [vmem:[#allocation31_spill] sm:$0xff] }
 0x580   : > { %20905 = vst [vmem:[#allocation67_spill] sm:$0xff] %v19945_v22  ;;  %v9638_v14 = vpop.f32.mrf.mxu1  ;;  %v12040_v30 = vrot.slane %v12038_v3, 1  ;;  %v9216_v3 = vadd.f32 %v20916_v48, %v8633_v26  ;;  %v12036_v24 = vor.u32 %v12034_v10, %v12032_v54  ;;  %v9221_v63 = vadd.f32 %v20918_v45, %v19684_v31  ;;  %v20921_v31 = vld [vmem:[#allocation34_spill] sm:$0xff] }
 0x581   : > { %v19950_v41 = vadd.f32 %v9638_v14, %v9212_v20  ;;  %v19952_v16 = vpop.f32.mrf.mxu0  ;;  %v17039_v14 = vld [vmem:[#allocation3 + $0x94] sm:$0xff]   ;;  %v17042_v45 = vld [vmem:[#allocation3 + $0xac] sm:$0xff]  }
 0x582   : > { %20909 = vst [vmem:[#allocation17_spill] sm:$0xff] %v19952_v16  ;;  %v16168_v43 = vpop.f32.mrf.mxu1  ;;  %16407 = vmatmul.mubr.bf16.gmra.mxu1 %v12025_v9  ;;  %v12048_v9 = vrot.slane %v12046_v15, 1  ;;  %v12054_v16 = vshll.u32 %v17039_v14, 16 }
 0x583   : > { %v19960_v13 = vadd.f32 %v16168_v43, %v9217_v46  ;;  %v19962_v32 = vpop.f32.mrf.mxu0  ;;  %16410 = vmatprep.mubr.bf16.mxu1 %v12033_v11  ;;  %v12042_v46 = vshrl.u32 %v17037_v21, 16  ;;  %v17040_v43 = vld [vmem:[#allocation3 + $0x9c] sm:$0xff]   ;;  %v12041_v21 = vsel %vm1020_vm3, %v12036_v24, %v12040_v30 }
 0x584   : > { %20911 = vst [vmem:[#allocation68_spill] sm:$0xff] %v19962_v32  ;;  %v9651_v20 = vpop.f32.mrf.mxu1  ;;  %v12056_v10 = vrot.slane %v12054_v16, 1 }
 0x585   : > { %v19966_v56 = vadd.f32 %v9651_v20, %v9215_v12  ;;  %v19968_v27 = vpop.f32.mrf.mxu0  ;;  %v12044_v20 = vor.u32 %v12042_v46, %v12040_v30  ;;  %v17041_v46 = vld [vmem:[#allocation3 + $0xa4] sm:$0xff]   ;;  %v12050_v30 = vshrl.u32 %v19941_v47, 16 }
 0x586   : > { %20913 = vst [vmem:[#allocation18_spill] sm:$0xff] %v19968_v27  ;;  %v16169_v17 = vpop.f32.mrf.mxu1 }
 0x587   : > { %v19973_v11 = vadd.f32 %v16169_v17, %v9218_v34  ;;  %v19975_v32 = vpop.f32.mrf.mxu0  ;;  %v12049_v49 = vsel %vm1020_vm3, %v12044_v20, %v12048_v9  ;;  %v12062_v34 = vshll.u32 %v17040_v43, 16 }
 0x588   : > { %20915 = vst [vmem:[#allocation70_spill] sm:$0xff] %v19975_v32  ;;  %v9654_v12 = vpop.f32.mrf.mxu1 }
 0x589   : > { %v19978_v27 = vadd.f32 %v9654_v12, %v9216_v3  ;;  %v19980_v22 = vpop.f32.mrf.mxu0  ;;  %v9222_v3 = vadd.f32 %v20921_v31, %v19696_v18  ;;  %v12058_v12 = vshrl.u32 %v17039_v14, 16  ;;  %v12064_v20 = vrot.slane %v12062_v34, 1 }
 0x58a   : > { %20917 = vst [vmem:[#allocation19_spill] sm:$0xff] %v19980_v22  ;;  %v16172_v15 = vpop.f32.mrf.mxu1  ;;  %16411 = vmatmul.mubr.bf16.gmra.mxu1 %v12041_v21  ;;  %v12078_v34 = vshll.u32 %v17042_v45, 16 }
 0x58b   : > { %v19986_v17 = vadd.f32 %v16172_v15, %v9221_v63  ;;  %v19988_v54 = vpop.f32.mrf.mxu0  ;;  %16414 = vmatprep.mubr.bf16.mxu1 %v12049_v49  ;;  %v12052_v15 = vor.u32 %v12050_v30, %v12048_v9  ;;  %v12060_v16 = vor.u32 %v12058_v12, %v12056_v10 }
 0x58c   : > { %20919 = vst [vmem:[#allocation71_spill] sm:$0xff] %v19988_v54  ;;  %v19990_v26 = vpop.f32.mrf.mxu1  ;;  %v12070_v54 = vshll.u32 %v17041_v46, 16 }
 0x58d   : > { %v19992_v48 = vpop.f32.mrf.mxu0  ;;  %v12057_v47 = vsel %vm1020_vm3, %v12052_v15, %v12056_v10  ;;  %v12065_v14 = vsel %vm1020_vm3, %v12060_v16, %v12064_v20  ;;  %v17043_v10 = vld [vmem:[#allocation3 + $0xb4] ss:$0 sps:$4 sm:$0x11]  }
 0x58e   : > { %20920 = vst [vmem:[#allocation20_spill] sm:$0xff] %v19992_v48  ;;  %v16173_v24 = vpop.f32.mrf.mxu1  ;;  %v20924_v48 = vld [vmem:[#allocation36_spill] sm:$0xff]  ;;  %v12072_v30 = vrot.slane %v12070_v54, 1  ;;  %v20930_v54 = vld [vmem:[#allocation41_spill] sm:$0xff] }
 0x58f   : > { %v19997_v63 = vadd.f32 %v16173_v24, %v9222_v3  ;;  %v19999_v21 = vpop.f32.mrf.mxu0  ;;  %v9225_v18 = vadd.f32 %v20924_v48, %v19712_v55  ;;  %v12066_v48 = vshrl.u32 %v17040_v43, 16 }
 0x590   : > { %20922 = vst [vmem:[#allocation7_spill] sm:$0xff] %v19999_v21  ;;  %v20001_v49 = vpop.f32.mrf.mxu1  ;;  %v12080_v21 = vrot.slane %v12078_v34, 1 }
 0x591   : > { %v20003_v22 = vpop.f32.mrf.mxu0 }
 0x592   : > { %20923 = vst [vmem:[#allocation22_spill] sm:$0xff] %v20003_v22  ;;  %v16176_v31 = vpop.f32.mrf.mxu1  ;;  %16415 = vmatmul.mubr.bf16.gmra.mxu1 %v12057_v47  ;;  %v20927_v22 = vld [vmem:[#allocation39_spill] sm:$0xff]  ;;  %v12074_v47 = vshrl.u32 %v17041_v46, 16 }
 0x593   : > { %v20009_v3 = vadd.f32 %v16176_v31, %v9225_v18  ;;  %v20011_v24 = vpop.f32.mrf.mxu0  ;;  %16418 = vmatprep.mubr.bf16.mxu1 %v12065_v14  ;;  %v9226_v55 = vadd.f32 %v20927_v22, %v19727_v36  ;;  %v12068_v31 = vor.u32 %v12066_v48, %v12064_v20  ;;  %v12086_v22 = vshll.u32 %v17043_v10, 16 }
 0x594   : > { %20925 = vst [vmem:[#allocation21_spill] sm:$0xff] %v20011_v24  ;;  %v20013_v9 = vpop.f32.mrf.mxu1  ;;  %v12076_v14 = vor.u32 %v12074_v47, %v12072_v30  ;;  %v12082_v20 = vshrl.u32 %v17042_v45, 16  ;;  %v20933_v47 = vld [vmem:[#allocation44_spill] sm:$0xff]  ;;  %v20935_v45 = vld [vmem:[#allocation46_spill] sm:$0xff] }
 0x595   : > { %v20015_v12 = vpop.f32.mrf.mxu0  ;;  %v12073_v36 = vsel %vm1020_vm3, %v12068_v31, %v12072_v30  ;;  %v12088_v30 = vrot.slane %v12086_v22, 1 }
 0x596   : > { %20926 = vst [vmem:[#allocation23_spill] sm:$0xff] %v20015_v12  ;;  %v16177_v15 = vpop.f32.mrf.mxu1  ;;  %v9229_v12 = vadd.f32 %v20930_v54, %v19742_v53  ;;  %v12081_v46 = vsel %vm1020_vm3, %v12076_v14, %v12080_v21  ;;  %v9230_v53 = vadd.f32 %v20933_v47, %v19758_v62  ;;  %v12084_v54 = vor.u32 %v12082_v20, %v12080_v21  ;;  %v20938_v20 = vld [vmem:[#allocation48_spill] sm:$0xff] }
 0x597   : > { %v20019_v16 = vadd.f32 %v16177_v15, %v9226_v55  ;;  %v20021_v18 = vpop.f32.mrf.mxu0  ;;  %v9234_v47 = vadd.f32 %v20938_v20, %v19791_v8  ;;  %v20944_v20 = vld [vmem:[#allocation55_spill] sm:$0xff] }
 0x598   : > { %20928 = vst [vmem:[#allocation24_spill] sm:$0xff] %v20021_v18  ;;  %v20023_v24 = vpop.f32.mrf.mxu1 }
 0x599   : > { %v20025_v32 = vpop.f32.mrf.mxu0 }
 0x59a   : > { %20929 = vst [vmem:[#allocation25_spill] sm:$0xff] %v20025_v32  ;;  %v16180_v43 = vpop.f32.mrf.mxu1  ;;  %16419 = vmatmul.mubr.bf16.gmra.mxu1 %v12073_v36 }
 0x59b   : > { %v20031_v34 = vadd.f32 %v16180_v43, %v9229_v12  ;;  %v20033_v55 = vpop.f32.mrf.mxu0  ;;  %16422 = vmatprep.mubr.bf16.mxu1 %v12081_v46  ;;  %v9233_v43 = vadd.f32 %v20935_v45, %v19774_v39  ;;  %v12089_v46 = vsel %vm1020_vm3, %v12084_v54, %v12088_v30 }
 0x59c   : > { %20931 = vst [vmem:[#allocation4_spill] sm:$0xff] %v20033_v55  ;;  %v20035_v48 = vpop.f32.mrf.mxu1 }
 0x59d   : > { %v20037_v15 = vpop.f32.mrf.mxu0 }
 0x59e   : > { %20932 = vst [vmem:[#allocation27_spill] sm:$0xff] %v20037_v15  ;;  %v16181_v10 = vpop.f32.mrf.mxu1 }
 0x59f   : > { %v20041_v31 = vadd.f32 %v16181_v10, %v9230_v53  ;;  %v20043_v36 = vpop.f32.mrf.mxu0 }
 0x5a0   : > { %20934 = vst [vmem:[#allocation26_spill] sm:$0xff] %v20043_v36  ;;  %v20045_v12 = vpop.f32.mrf.mxu1 }
 0x5a1   : > { %v20047_v14 = vpop.f32.mrf.mxu0 }
 0x5a2   : > { %v16184_v18 = vpop.f32.mrf.mxu1  ;;  %16423 = vmatmul.mubr.bf16.gmra.mxu1 %v12089_v46 }
 0x5a3   : > { %v20052_v55 = vadd.f32 %v16184_v18, %v9233_v43  ;;  %v20054_v62 = vpop.f32.mrf.mxu0  ;;  %v20941_v18 = vld [vmem:[#allocation50_spill] sm:$0xff] }
 0x5a4   : > { %20936 = vst [vmem:[#allocation28_spill] sm:$0xff] %v20054_v62  ;;  %v20056_v21 = vpop.f32.mrf.mxu1  ;;  %v9237_v30 = vadd.f32 %v20941_v18, %v19806_v6 }
 0x5a5   : > { %v20058_v22 = vpop.f32.mrf.mxu0 }
 0x5a6   : > { %20937 = vst [vmem:[#allocation29_spill] sm:$0xff] %v20058_v22  ;;  %v16185_v53 = vpop.f32.mrf.mxu1 }
 0x5a7   : > { %v20062_v10 = vadd.f32 %v16185_v53, %v9234_v47  ;;  %v20064_v32 = vpop.f32.mrf.mxu0  ;;  %v9238_v47 = vadd.f32 %v20944_v20, %v19822_v52  ;;  %v20950_v20 = vld [vmem:[#allocation61_spill] sm:$0xff] }
 0x5a8   : > { %20939 = vst [vmem:[#allocation30_spill] sm:$0xff] %v20064_v32  ;;  %v20066_v39 = vpop.f32.mrf.mxu1 }
 0x5a9   : > { %v20068_v54 = vpop.f32.mrf.mxu0 }
 0x5aa   : > { %20940 = vst [vmem:[#allocation31_spill] sm:$0xff] %v20068_v54  ;;  %v16188_v45 = vpop.f32.mrf.mxu1  ;;  %v20946_v54 = vld [vmem:[#allocation57_spill] sm:$0xff] }
 0x5ab   : > { %v20072_v43 = vadd.f32 %v16188_v45, %v9237_v30  ;;  %v20074_v46 = vpop.f32.mrf.mxu0  ;;  %v9236_v6 = vadd.f32 %v20946_v54, %v19828_v28  ;;  %v20952_v54 = vld [vmem:[#allocation63_spill] sm:$0xff] }
 0x5ac   : > { %20942 = vst [vmem:[#allocation34_spill] sm:$0xff] %v20074_v46  ;;  %v20076_v22 = vpop.f32.mrf.mxu1  ;;  %v20948_v46 = vld [vmem:[#allocation58_spill] sm:$0xff] }
 0x5ad   : > { %v20078_v8 = vpop.f32.mrf.mxu0  ;;  %v9241_v62 = vadd.f32 %v20948_v46, %v19837_v40 }
 0x5ae   : > { %20943 = vst [vmem:[#allocation36_spill] sm:$0xff] %v20078_v8  ;;  %v16189_v53 = vpop.f32.mrf.mxu1 }
 0x5af   : > { %v20082_v32 = vadd.f32 %v16189_v53, %v9238_v47  ;;  %v20084_v36 = vpop.f32.mrf.mxu0  ;;  %v9239_v47 = vadd.f32 %v20950_v20, %v19843_v33  ;;  %v20956_v20 = vld [vmem:[#allocation66_spill] sm:$0xff] }
 0x5b0   : > { %20945 = vst [vmem:[#allocation39_spill] sm:$0xff] %v20084_v36  ;;  %v9734_v18 = vpop.f32.mrf.mxu1 }
 0x5b1   : > { %v20088_v30 = vadd.f32 %v9734_v18, %v9236_v6  ;;  %v20090_v45 = vpop.f32.mrf.mxu0  ;;  %v9242_v6 = vadd.f32 %v20952_v54, %v19852_v5  ;;  %v20958_v54 = vld [vmem:[#allocation69_spill] sm:$0xff] }
 0x5b2   : > { %20947 = vst [vmem:[#allocation41_spill] sm:$0xff] %v20090_v45  ;;  %v16192_v8 = vpop.f32.mrf.mxu1 }
 0x5b3   : > { %v20094_v15 = vadd.f32 %v16192_v8, %v9241_v62  ;;  %v20096_v52 = vpop.f32.mrf.mxu0  ;;  %v20954_v62 = vld [vmem:[#allocation65_spill] sm:$0xff] }
 0x5b4   : > { %20949 = vst [vmem:[#allocation44_spill] sm:$0xff] %v20096_v52  ;;  %v9747_v53 = vpop.f32.mrf.mxu1  ;;  %v9240_v46 = vadd.f32 %v20954_v62, %v19858_v1  ;;  %v20959_v62 = vld [vmem:[#allocation72_spill] sm:$0xff] }
 0x5b5   : > { %v20100_v36 = vadd.f32 %v9747_v53, %v9239_v47  ;;  %v20102_v28 = vpop.f32.mrf.mxu0  ;;  %v9245_v47 = vadd.f32 %v20956_v20, %v19867_v61  ;;  %v20961_v20 = vld [vmem:[#allocation73_spill] sm:$0xff] }
 0x5b6   : > { %20951 = vst [vmem:[#allocation46_spill] sm:$0xff] %v20102_v28  ;;  %v16193_v18 = vpop.f32.mrf.mxu1 }
 0x5b7   : > { %v20106_v45 = vadd.f32 %v16193_v18, %v9242_v6  ;;  %v20108_v40 = vpop.f32.mrf.mxu0  ;;  %v9243_v6 = vadd.f32 %v20958_v54, %v19873_v50  ;;  %v9249_v54 = vadd.f32 %v19641_v7, %v19897_v58  ;;  %v20966_v58 = vld [vmem:[#allocation75_spill] sm:$0xff] }
 0x5b8   : > { %20953 = vst [vmem:[#allocation48_spill] sm:$0xff] %v20108_v40  ;;  %v9750_v8 = vpop.f32.mrf.mxu1 }
 0x5b9   : > { %v20112_v52 = vadd.f32 %v9750_v8, %v9240_v46  ;;  %v20114_v33 = vpop.f32.mrf.mxu0  ;;  %v9246_v46 = vadd.f32 %v20959_v62, %v19882_v35  ;;  %v9247_v62 = vadd.f32 %v19646_v19, %v19903_v51  ;;  %v10526_v51 = vadd.f32 %v19667_v29, %v19928_v0  ;;  %v20972_v0 = vld [vmem:[#allocation77_spill] sm:$0xff] }
 0x5ba   : > { %20955 = vst [vmem:[#allocation50_spill] sm:$0xff] %v20114_v33  ;;  %v16196_v53 = vpop.f32.mrf.mxu1 }
 0x5bb   : > { %v20118_v28 = vadd.f32 %v16196_v53, %v9245_v47  ;;  %v20120_v5 = vpop.f32.mrf.mxu0  ;;  %v9244_v47 = vadd.f32 %v20961_v20, %v19888_v4  ;;  %v20964_v20 = vld [vmem:[#allocation74_spill] sm:$0xff] }
 0x5bc   : > { %20957 = vst [vmem:[#allocation55_spill] sm:$0xff] %v20120_v5  ;;  %v9763_v18 = vpop.f32.mrf.mxu1 }
 0x5bd   : > { %v20124_v40 = vadd.f32 %v9763_v18, %v9243_v6  ;;  %v20126_v1 = vpop.f32.mrf.mxu0 }
 0x5be   : > { %v16197_v8 = vpop.f32.mrf.mxu1 }
 0x5bf   : > { %v20130_v33 = vadd.f32 %v16197_v8, %v9246_v46  ;;  %v20132_v61 = vpop.f32.mrf.mxu0 }
 0x5c0   : > { %20960 = vst [vmem:[#allocation57_spill] sm:$0xff] %v20132_v61  ;;  %v9766_v53 = vpop.f32.mrf.mxu1 }
 0x5c1   : > { %v20136_v5 = vadd.f32 %v9766_v53, %v9244_v47  ;;  %v20138_v50 = vpop.f32.mrf.mxu0  ;;  %v9250_v47 = vadd.f32 %v20964_v20, %v19912_v38  ;;  %v10524_v20 = vadd.f32 %v19672_v25, %v19934_v23  ;;  %v10530_v23 = vadd.f32 %v19693_v42, %v19960_v13  ;;  %v20979_v13 = vld [vmem:[#allocation78_spill] sm:$0xff] }
 0x5c2   : > { %v16200_v6 = vpop.f32.mrf.mxu1 }
 0x5c3   : > { %v20142_v18 = vadd.f32 %v16200_v6, %v9249_v54  ;;  %v20144_v35 = vpop.f32.mrf.mxu0  ;;  %v9248_v54 = vadd.f32 %v20966_v58, %v19918_v44  ;;  %v20970_v58 = vld [vmem:[#allocation76_spill] sm:$0xff] }
 0x5c4   : > { %20962 = vst [vmem:[#allocation58_spill] sm:$0xff] %v20144_v35  ;;  %v9779_v46 = vpop.f32.mrf.mxu1 }
 0x5c5   : > { %v20148_v8 = vadd.f32 %v9779_v46, %v9247_v62  ;;  %v20150_v4 = vpop.f32.mrf.mxu0 }
 0x5c6   : > { %20963 = vst [vmem:[#allocation61_spill] sm:$0xff] %v20150_v4  ;;  %v16201_v53 = vpop.f32.mrf.mxu1  ;;  %v20975_v4 = vld [vmem:[#allocation32_spill] sm:$0xff] }
 0x5c7   : > { %v20154_v61 = vadd.f32 %v16201_v53, %v9250_v47  ;;  %v20156_v7 = vpop.f32.mrf.mxu0 }
 0x5c8   : > { %20965 = vst [vmem:[#allocation63_spill] sm:$0xff] %v20156_v7  ;;  %v9782_v6 = vpop.f32.mrf.mxu1 }
 0x5c9   : > { %v20160_v35 = vadd.f32 %v9782_v6, %v9248_v54  ;;  %v20162_v19 = vpop.f32.mrf.mxu0  ;;  %v10527_v54 = vadd.f32 %v20970_v58, %v19943_v59 }
 0x5ca   : > { %20967 = vst [vmem:[#allocation65_spill] sm:$0xff] %v20162_v19  ;;  %v16276_v62 = vpop.f32.mrf.mxu1 }
 0x5cb   : > { %v20166_v46 = vadd.f32 %v16276_v62, %v10526_v51  ;;  %v20168_v38 = vpop.f32.mrf.mxu0  ;;  %v10525_v51 = vadd.f32 %v20972_v0, %v19950_v41  ;;  %v20977_v0 = vld [vmem:[#allocation33_spill] sm:$0xff] }
 0x5cc   : > { %20968 = vst [vmem:[#allocation66_spill] sm:$0xff] %v20168_v38  ;;  %v10948_v47 = vpop.f32.mrf.mxu1 }
 0x5cd   : > { %v20172_v53 = vadd.f32 %v10948_v47, %v10524_v20  ;;  %v20174_v44 = vpop.f32.mrf.mxu0  ;;  %v20974_v47 = vld [vmem:[#allocation5_spill] sm:$0xff] }
 0x5ce   : > { %20969 = vst [vmem:[#allocation69_spill] sm:$0xff] %v20174_v44  ;;  %v16277_v6 = vpop.f32.mrf.mxu1  ;;  %v7931_v59 = vadd.f32 %v20975_v4, %v20974_v47  ;;  %v10531_v4 = vadd.f32 %v20979_v13, %v19973_v11 }
 0x5cf   : > { %v20178_v7 = vadd.f32 %v16277_v6, %v10527_v54  ;;  %v20180_v29 = vpop.f32.mrf.mxu0  ;;  %v10528_v6 = vadd.f32 %v19698_v60, %v19966_v56  ;;  %v20981_v60 = vld [vmem:[#allocation79_spill] sm:$0xff] }
 0x5d0   : > { %20971 = vst [vmem:[#allocation72_spill] sm:$0xff] %v20180_v29  ;;  %v10951_v62 = vpop.f32.mrf.mxu1  ;;  %v10529_v56 = vadd.f32 %v20981_v60, %v19978_v27 }
 0x5d1   : > { %v20184_v38 = vadd.f32 %v10951_v62, %v10525_v51  ;;  %v20186_v25 = vpop.f32.mrf.mxu0  ;;  %v9219_v51 = vadd.f32 %v20977_v0, %v19691_v37  ;;  %v8637_v62 = vadd.f32 %v19700_v57, %v7931_v59  ;;  %v20982_v0 = vld [vmem:[#allocation35_spill] sm:$0xff] }
 0x5d2   : > { %20973 = vst [vmem:[#allocation73_spill] sm:$0xff] %v20186_v25  ;;  %v16280_v20 = vpop.f32.mrf.mxu1 }
 0x5d3   : > { %v20192_v58 = vadd.f32 %v16280_v20, %v10530_v23  ;;  %v20194_v54 = vpop.f32.mrf.mxu0  ;;  %v9802_v20 = vadd.f32 %v19990_v26, %v9219_v51  ;;  %v9220_v57 = vadd.f32 %v20982_v0, %v8637_v62  ;;  %v20986_v26 = vld [vmem:[#allocation37_spill] sm:$0xff] }
 0x5d4   : > { %20976 = vst [vmem:[#allocation74_spill] sm:$0xff] %v20194_v54  ;;  %v10964_v41 = vpop.f32.mrf.mxu1 }
 0x5d5   : > { %v20201_v19 = vadd.f32 %v10964_v41, %v10528_v6  ;;  %v20203_v42 = vpop.f32.mrf.mxu0  ;;  %v20984_v41 = vld [vmem:[#allocation81_spill] sm:$0xff] }
 0x5d6   : > { %20978 = vst [vmem:[#allocation75_spill] sm:$0xff] %v20203_v42  ;;  %v16281_v23 = vpop.f32.mrf.mxu1  ;;  %v10534_v11 = vadd.f32 %v20984_v41, %v19986_v17  ;;  %v20985_v42 = vld [vmem:[#allocation8_spill] sm:$0xff] }
 0x5d7   : > { %v20208_v47 = vadd.f32 %v16281_v23, %v10531_v4  ;;  %v20210_v29 = vpop.f32.mrf.mxu0  ;;  %v7935_v51 = vadd.f32 %v20986_v26, %v20985_v42  ;;  %v9803_v4 = vadd.f32 %v20001_v49, %v9220_v57  ;;  %v20992_v17 = vld [vmem:[#allocation84_spill] sm:$0xff] }
 0x5d8   : > { %20980 = vst [vmem:[#allocation76_spill] sm:$0xff] %v20210_v29  ;;  %v10967_v37 = vpop.f32.mrf.mxu1  ;;  %v20987_v29 = vld [vmem:[#allocation82_spill] sm:$0xff]  ;;  %v10535_v41 = vadd.f32 %v20992_v17, %v19997_v63  ;;  %v20995_v26 = vld [vmem:[#allocation40_spill] sm:$0xff] }
 0x5d9   : > { %v20215_v59 = vadd.f32 %v10967_v37, %v10529_v56  ;;  %v20217_v6 = vpop.f32.mrf.mxu0  ;;  %v10532_v27 = vadd.f32 %v20987_v29, %v9802_v20  ;;  %v20989_v56 = vld [vmem:[#allocation80_spill] sm:$0xff]  ;;  %v20990_v37 = vld [vmem:[#allocation38_spill] sm:$0xff] }
 0x5da   : > { %20983 = vst [vmem:[#allocation77_spill] sm:$0xff] %v20217_v6  ;;  %v16284_v13 = vpop.f32.mrf.mxu1  ;;  %v9223_v0 = vadd.f32 %v20990_v37, %v20989_v56  ;;  %v20991_v6 = vld [vmem:[#allocation83_spill] sm:$0xff]  ;;  %v20997_v63 = vld [vmem:[#allocation42_spill] sm:$0xff] }
 0x5db   : > { %v20224_v23 = vadd.f32 %v16284_v13, %v10534_v11  ;;  %v20227_v60 = vpop.f32.mrf.mxu0  ;;  %v8641_v54 = vadd.f32 %v20991_v6, %v7935_v51  ;;  %v20993_v11 = vld [vmem:[#allocation85_spill] sm:$0xff]  ;;  %v10538_v6 = vadd.f32 %v19751_v2, %v20009_v3 }
 0x5dc   : > { %20988 = vst [vmem:[#allocation5_spill] sm:$0xff] %v20227_v60  ;;  %v10980_v62 = vpop.f32.mrf.mxu1  ;;  %v9806_v49 = vadd.f32 %v20013_v9, %v9223_v0  ;;  %v10533_v29 = vadd.f32 %v20993_v11, %v9803_v4  ;;  %v20998_v0 = vld [vmem:[#allocation87_spill] sm:$0xff]  ;;  %v21003_v2 = vld [vmem:[#allocation89_spill] sm:$0xff] }
 0x5dd   : > { %v20232_v25 = vadd.f32 %v10980_v62, %v10532_v27  ;;  %v20240_v20 = vpop.f32.mrf.mxu0  ;;  %v9224_v60 = vadd.f32 %v20995_v26, %v8641_v54  ;;  %v20996_v27 = vld [vmem:[#allocation9_spill] sm:$0xff]  ;;  %v21001_v54 = vld [vmem:[#allocation43_spill] sm:$0xff]  ;;  %v10539_v3 = vadd.f32 %v21003_v2, %v20019_v16 }
 0x5de   : > { %v16285_v42 = vpop.f32.mrf.mxu1  ;;  %20994 = vst [vmem:[#allocation32_spill] sm:$0xff] %v20240_v20  ;;  %v7939_v62 = vadd.f32 %v20997_v63, %v20996_v27  ;;  %v10536_v4 = vadd.f32 %v20998_v0, %v9806_v49  ;;  %v21005_v0 = vld [vmem:[#allocation45_spill] sm:$0xff]  ;;  %v21010_v2 = vld [vmem:[#allocation91_spill] sm:$0xff] }
 0x5df   : > { %v20237_v57 = vadd.f32 %v16285_v42, %v10535_v41  ;;  %v9807_v9 = vadd.f32 %v20023_v24, %v9224_v60  ;;  %v20253_v17 = vpop.f32.mrf.mxu0  ;;  %v21000_v42 = vld [vmem:[#allocation86_spill] sm:$0xff] }
 0x5e0   : > { %v10983_v13 = vpop.f32.mrf.mxu1  ;;  %20999 = vst [vmem:[#allocation33_spill] sm:$0xff] %v20253_v17  ;;  %v9227_v11 = vadd.f32 %v21001_v54, %v21000_v42 }
 0x5e1   : > { %v20243_v56 = vadd.f32 %v10983_v13, %v10533_v29  ;;  %v21002_v29 = vld [vmem:[#allocation88_spill] sm:$0xff] }
 0x5e2   : > { %v16288_v51 = vpop.f32.mrf.mxu1  ;;  %v8645_v13 = vadd.f32 %v21002_v29, %v7939_v62  ;;  %v9810_v24 = vadd.f32 %v20035_v48, %v9227_v11  ;;  %v21006_v62 = vld [vmem:[#allocation92_spill] sm:$0xff]  ;;  %v21008_v48 = vld [vmem:[#allocation93_spill] sm:$0xff] }
 0x5e3   : > { %v20250_v37 = vadd.f32 %v16288_v51, %v10538_v6  ;;  %v21004_v6 = vld [vmem:[#allocation90_spill] sm:$0xff]  ;;  %v20266_v51 = vpop.f32.mrf.mxu0 }
 0x5e4   : > { %v10996_v41 = vpop.f32.mrf.mxu1  ;;  %v10537_v49 = vadd.f32 %v21004_v6, %v9807_v9  ;;  %v9228_v17 = vadd.f32 %v21005_v0, %v8645_v13  ;;  %v10540_v11 = vadd.f32 %v21008_v48, %v9810_v24  ;;  %v21013_v13 = vld [vmem:[#allocation95_spill] sm:$0xff] }
 0x5e5   : > { %v20258_v26 = vadd.f32 %v10996_v41, %v10536_v4  ;;  %v10542_v4 = vadd.f32 %v21006_v62, %v20031_v34  ;;  %v20277_v29 = vpop.f32.mrf.mxu0 }
 0x5e6   : > { %v16289_v27 = vpop.f32.mrf.mxu1  ;;  %v9811_v16 = vadd.f32 %v20045_v12, %v9228_v17  ;;  %21009 = vst [vmem:[#allocation79_spill] sm:$0xff] %v20277_v29  ;;  %v21015_v12 = vld [vmem:[#allocation96_spill] sm:$0xff] }
 0x5e7   : > { %v20263_v60 = vadd.f32 %v16289_v27, %v10539_v3  ;;  %v21011_v3 = vld [vmem:[#allocation47_spill] sm:$0xff]  ;;  %v20289_v62 = vpop.f32.mrf.mxu0 }
 0x5e8   : > { %v10999_v63 = vpop.f32.mrf.mxu1  ;;  %v9231_v27 = vadd.f32 %v21011_v3, %v21010_v2  ;;  %v10541_v17 = vadd.f32 %v21015_v12, %v9811_v16 }
 0x5e9   : > { %v20269_v42 = vadd.f32 %v10999_v63, %v10537_v49  ;;  %v10543_v49 = vadd.f32 %v21013_v13, %v20041_v31  ;;  %v20301_v13 = vpop.f32.mrf.mxu0 }
 0x5ea   : > { %v16292_v41 = vpop.f32.mrf.mxu1  ;;  %v9814_v34 = vadd.f32 %v20056_v21, %v9231_v27  ;;  %v21020_v21 = vld [vmem:[#allocation51_spill] sm:$0xff]  ;;  %21021 = vst [vmem:[#allocation37_spill] sm:$0xff] %v20301_v13 }
 0x5eb   : > { %v20274_v54 = vadd.f32 %v16292_v41, %v10542_v4  ;;  %v21016_v4 = vld [vmem:[#allocation94_spill] sm:$0xff]  ;;  %v21017_v41 = vld [vmem:[#allocation49_spill] sm:$0xff]  ;;  %v21086_v13 = vld [vmem:[#allocation27_spill] sm:$0xff] }
 0x5ec   : > { %v11012_v9 = vpop.f32.mrf.mxu1  ;;  %v9232_v48 = vadd.f32 %v21017_v41, %v21016_v4  ;;  %v10544_v27 = vadd.f32 %v21020_v21, %v9814_v34 }
 0x5ed   : > { %21007 = vst [vmem:[#allocation78_spill] sm:$0xff] %v20274_v54  ;;  %v20281_v6 = vadd.f32 %v11012_v9, %v10540_v11  ;;  %v21019_v11 = vld [vmem:[#allocation98_spill] sm:$0xff] }
 0x5ee   : > { %v16293_v63 = vpop.f32.mrf.mxu1  ;;  %v10546_v9 = vadd.f32 %v21019_v11, %v20052_v55  ;;  %v9815_v31 = vadd.f32 %v20066_v39, %v9232_v48  ;;  %v21026_v39 = vld [vmem:[#allocation52_spill] sm:$0xff]  ;;  %v20313_v11 = vpop.f32.mrf.mxu0  ;;  %v21087_v54 = vld [vmem:[#allocation58_spill] sm:$0xff] }
 0x5ef   : > { %21012 = vst [vmem:[#allocation35_spill] sm:$0xff] %v20281_v6  ;;  %v20286_v0 = vadd.f32 %v16293_v63, %v10543_v49  ;;  %v21022_v49 = vld [vmem:[#allocation97_spill] sm:$0xff] }
 0x5f0   : > { %v11015_v24 = vpop.f32.mrf.mxu1  ;;  %v21023_v63 = vld [vmem:[#allocation53_spill] sm:$0xff]  ;;  %v10545_v48 = vadd.f32 %v21026_v39, %v9815_v31  ;;  %v21032_v39 = vld [vmem:[#allocation56_spill] sm:$0xff] }
 0x5f1   : > { %21014 = vst [vmem:[#allocation81_spill] sm:$0xff] %v20286_v0  ;;  %v20293_v29 = vadd.f32 %v11015_v24, %v10541_v17  ;;  %v9235_v12 = vadd.f32 %v21023_v63, %v21022_v49  ;;  %v21025_v17 = vld [vmem:[#allocation6_spill] sm:$0xff]  ;;  %v20325_v63 = vpop.f32.mrf.mxu0 }
 0x5f2   : > { %v16296_v2 = vpop.f32.mrf.mxu1  ;;  %v10547_v24 = vadd.f32 %v21025_v17, %v20062_v10  ;;  %v13015_v10 = vld [vmem:[%s20746_s7 + $0x8] sm:$0xff]  ;;  %21030 = vst [vmem:[#allocation38_spill] sm:$0xff] %v20325_v63  ;;  %v21031_v17 = vld [vmem:[#allocation11_spill] sm:$0xff] }
 0x5f3   : > { %21018 = vst [vmem:[#allocation8_spill] sm:$0xff] %v20293_v29  ;;  %v20298_v3 = vadd.f32 %v16296_v2, %v10546_v9  ;;  %v9818_v55 = vadd.f32 %v20076_v22, %v9235_v12  ;;  %v21028_v2 = vld [vmem:[#allocation10_spill] sm:$0xff]  ;;  %13174 = vmatprep.mubr.f32.mxu1 %v13015_v10 }
 0x5f4   : > { %v11028_v16 = vpop.f32.mrf.mxu1  ;;  %v10550_v21 = vadd.f32 %v21028_v2, %v20072_v43  ;;  %v21029_v22 = vld [vmem:[#allocation54_spill] sm:$0xff] }
 0x5f5   : > { %v20305_v20 = vadd.f32 %v11028_v16, %v10544_v27  ;;  %v10548_v49 = vadd.f32 %v21029_v22, %v9818_v55  ;;  %v21033_v55 = vld [vmem:[#allocation12_spill] sm:$0xff] }
 0x5f6   : > { %v16297_v4 = vpop.f32.mrf.mxu1 }
 0x5f7   : > { %21024 = vst [vmem:[#allocation82_spill] sm:$0xff] %v20305_v20  ;;  %v20310_v41 = vadd.f32 %v16297_v4, %v10547_v24  ;;  %v10551_v24 = vadd.f32 %v21031_v17, %v20082_v32  ;;  %v11660_v20 = vadd.f32 %v20047_v14, %v20263_v60  ;;  %v21088_v60 = vld [vmem:[#allocation28_spill] sm:$0xff] }
 0x5f8   : > { %v11031_v34 = vpop.f32.mrf.mxu1 }
 0x5f9   : > { %v20315_v9 = vadd.f32 %v11031_v34, %v10545_v48  ;;  %v10549_v48 = vadd.f32 %v21032_v39, %v20088_v30  ;;  %v20335_v34 = vpop.f32.mrf.mxu0  ;;  %v21035_v30 = vld [vmem:[#allocation13_spill] sm:$0xff] }
 0x5fa   : > { %v16300_v27 = vpop.f32.mrf.mxu1 }
 0x5fb   : > { %21027 = vst [vmem:[#allocation80_spill] sm:$0xff] %v20315_v9  ;;  %v20322_v16 = vadd.f32 %v16300_v27, %v10550_v21  ;;  %v10554_v27 = vadd.f32 %v21033_v55, %v20094_v15 }
 0x5fc   : > { %v11044_v31 = vpop.f32.mrf.mxu1 }
 0x5fd   : > { %v20327_v12 = vadd.f32 %v11044_v31, %v10548_v49  ;;  %v21034_v49 = vld [vmem:[#allocation59_spill] sm:$0xff]  ;;  %v20345_v31 = vpop.f32.mrf.mxu0 }
 0x5fe   : > { %v16301_v4 = vpop.f32.mrf.mxu1  ;;  %v10552_v32 = vadd.f32 %v21034_v49, %v20100_v36  ;;  %v21037_v36 = vld [vmem:[#allocation14_spill] sm:$0xff] }
 0x5ff   : > { %v20331_v43 = vadd.f32 %v16301_v4, %v10551_v24  ;;  %v10555_v4 = vadd.f32 %v21035_v30, %v20106_v45  ;;  %v20355_v55 = vpop.f32.mrf.mxu0  ;;  %v10558_v49 = vadd.f32 %v21037_v36, %v20118_v28  ;;  %v21039_v45 = vld [vmem:[#allocation62_spill] sm:$0xff]  ;;  %v13016_v30 = vld [vmem:[%s20746_s7 + $0x10] sm:$0xff] }
 0x600   : > { %v11047_v2 = vpop.f32.mrf.mxu1  ;;  %16498 = vmatprep.mubr.msk.f32.mxu0 %vm13085_vm8, %v13016_v30  ;;  %v21041_v28 = vld [vmem:[#allocation15_spill] sm:$0xff] }
 0x601   : > { %v20337_v21 = vadd.f32 %v11047_v2, %v10549_v48  ;;  %v21036_v2 = vld [vmem:[#allocation60_spill] sm:$0xff] }
 0x602   : > { %v16304_v10 = vpop.f32.mrf.mxu1  ;;  %v10553_v15 = vadd.f32 %v21036_v2, %v20112_v52  ;;  %v20368_v52 = vpop.f32.mrf.mxu0  ;;  %v10559_v2 = vadd.f32 %v21041_v28, %v20130_v33 }
 0x603   : > { %v20341_v22 = vadd.f32 %v16304_v10, %v10554_v27 }
 0x604   : > { %v11060_v17 = vpop.f32.mrf.mxu1  ;;  %v20379_v36 = vpop.f32.mrf.mxu0 }
 0x605   : > { %v20347_v24 = vadd.f32 %v11060_v17, %v10552_v32  ;;  %v10556_v17 = vadd.f32 %v21039_v45, %v20124_v40  ;;  %21044 = vst [vmem:[#allocation40_spill] sm:$0xff] %v20379_v36  ;;  %v11675_v6 = vadd.f32 %v20126_v1, %v20341_v22  ;;  %v21089_v22 = vld [vmem:[#allocation57_spill] sm:$0xff] }
 0x606   : > { %v16305_v39 = vpop.f32.mrf.mxu1  ;;  %v20389_v28 = vpop.f32.mrf.mxu0 }
 0x607   : > { %v20351_v48 = vadd.f32 %v16305_v39, %v10555_v4  ;;  %21048 = vst [vmem:[#allocation42_spill] sm:$0xff] %v20389_v28 }
 0x608   : > { %v11063_v27 = vpop.f32.mrf.mxu1 }
 0x609   : > { %v20357_v10 = vadd.f32 %v11063_v27, %v10553_v15  ;;  %v21043_v27 = vld [vmem:[#allocation64_spill] sm:$0xff] }
 0x60a   : > { %v16308_v29 = vpop.f32.mrf.mxu1  ;;  %v10557_v40 = vadd.f32 %v21043_v27, %v20136_v5  ;;  %v21050_v5 = vld [vmem:[#allocation17_spill] sm:$0xff] }
 0x60b   : > { %v20361_v32 = vadd.f32 %v16308_v29, %v10558_v49  ;;  %v10563_v27 = vadd.f32 %v21050_v5, %v20154_v61 }
 0x60c   : > { %v11076_v4 = vpop.f32.mrf.mxu1 }
 0x60d   : > { %21038 = vst [vmem:[#allocation83_spill] sm:$0xff] %v20361_v32  ;;  %v20371_v39 = vadd.f32 %v11076_v4, %v10556_v17  ;;  %v21046_v32 = vld [vmem:[#allocation16_spill] sm:$0xff]  ;;  %v21047_v4 = vld [vmem:[#allocation67_spill] sm:$0xff] }
 0x60e   : > { %v16309_v15 = vpop.f32.mrf.mxu1  ;;  %v10562_v0 = vadd.f32 %v21046_v32, %v20142_v18  ;;  %v10560_v33 = vadd.f32 %v21047_v4, %v20148_v8  ;;  %v20399_v32 = vpop.f32.mrf.mxu0  ;;  %v21055_v8 = vld [vmem:[#allocation18_spill] sm:$0xff] }
 0x60f   : > { %21040 = vst [vmem:[#allocation84_spill] sm:$0xff] %v20371_v39  ;;  %v20375_v29 = vadd.f32 %v16309_v15, %v10559_v2  ;;  %21053 = vst [vmem:[#allocation43_spill] sm:$0xff] %v20399_v32  ;;  %v11647_v4 = vadd.f32 %v21055_v8, %v20166_v46 }
 0x610   : > { %v11079_v49 = vpop.f32.mrf.mxu1  ;;  %v20409_v5 = vpop.f32.mrf.mxu0 }
 0x611   : > { %21042 = vst [vmem:[#allocation85_spill] sm:$0xff] %v20375_v29  ;;  %v20381_v45 = vadd.f32 %v11079_v49, %v10557_v40  ;;  %v21052_v49 = vld [vmem:[#allocation68_spill] sm:$0xff]  ;;  %21058 = vst [vmem:[#allocation90_spill] sm:$0xff] %v20409_v5 }
 0x612   : > { %v16312_v30 = vpop.f32.mrf.mxu1  ;;  %v10561_v18 = vadd.f32 %v21052_v49, %v20160_v35  ;;  %v21060_v35 = vld [vmem:[#allocation19_spill] sm:$0xff]  ;;  %v20419_v8 = vpop.f32.mrf.mxu0 }
 0x613   : > { %21045 = vst [vmem:[#allocation9_spill] sm:$0xff] %v20381_v45  ;;  %v20385_v17 = vadd.f32 %v16312_v30, %v10562_v0  ;;  %v11648_v49 = vadd.f32 %v21060_v35, %v20178_v7  ;;  %21063 = vst [vmem:[#allocation93_spill] sm:$0xff] %v20419_v8 }
 0x614   : > { %v11092_v2 = vpop.f32.mrf.mxu1  ;;  %v20429_v35 = vpop.f32.mrf.mxu0 }
 0x615   : > { %v20391_v15 = vadd.f32 %v11092_v2, %v10560_v33  ;;  %v21057_v2 = vld [vmem:[#allocation70_spill] sm:$0xff]  ;;  %21068 = vst [vmem:[#allocation95_spill] sm:$0xff] %v20429_v35 }
 0x616   : > { %v16313_v36 = vpop.f32.mrf.mxu1  ;;  %v11645_v61 = vadd.f32 %v21057_v2, %v20172_v53  ;;  %v21065_v53 = vld [vmem:[#allocation20_spill] sm:$0xff] }
 0x617   : > { %21049 = vst [vmem:[#allocation87_spill] sm:$0xff] %v20391_v15  ;;  %v20395_v40 = vadd.f32 %v16313_v36, %v10563_v27  ;;  %v11651_v2 = vadd.f32 %v21065_v53, %v20192_v58  ;;  %v20437_v58 = vpop.f32.mrf.mxu0 }
 0x618   : > { %v11095_v0 = vpop.f32.mrf.mxu1  ;;  %21072 = vst [vmem:[#allocation94_spill] sm:$0xff] %v20437_v58 }
 0x619   : > { %21051 = vst [vmem:[#allocation86_spill] sm:$0xff] %v20395_v40  ;;  %v20401_v30 = vadd.f32 %v11095_v0, %v10561_v18  ;;  %v21062_v0 = vld [vmem:[#allocation71_spill] sm:$0xff]  ;;  %v11658_v40 = vadd.f32 %v21088_v60, %v20269_v42 }
 0x61a   : > { %v16388_v28 = vpop.f32.mrf.mxu1  ;;  %v11646_v46 = vadd.f32 %v21062_v0, %v20184_v38  ;;  %v21070_v38 = vld [vmem:[#allocation22_spill] sm:$0xff] }
 0x61b   : > { %21054 = vst [vmem:[#allocation88_spill] sm:$0xff] %v20401_v30  ;;  %v20405_v33 = vadd.f32 %v16388_v28, %v11647_v4  ;;  %v11652_v0 = vadd.f32 %v21070_v38, %v20208_v47  ;;  %v11659_v30 = vadd.f32 %v21086_v13, %v20250_v37 }
 0x61c   : > { %v12192_v36 = vpop.f32.mrf.mxu1 }
 0x61d   : > { %21056 = vst [vmem:[#allocation89_spill] sm:$0xff] %v20405_v33  ;;  %v20411_v27 = vadd.f32 %v12192_v36, %v11645_v61  ;;  %v21067_v36 = vld [vmem:[#allocation7_spill] sm:$0xff] }
 0x61e   : > { %v16389_v39 = vpop.f32.mrf.mxu1  ;;  %v11649_v7 = vadd.f32 %v21067_v36, %v20201_v19  ;;  %v20446_v36 = vpop.f32.mrf.mxu0 }
 0x61f   : > { %21059 = vst [vmem:[#allocation45_spill] sm:$0xff] %v20411_v27  ;;  %v20415_v18 = vadd.f32 %v16389_v39, %v11648_v49  ;;  %21075 = vst [vmem:[#allocation51_spill] sm:$0xff] %v20446_v36 }
 0x620   : > { %v12195_v28 = vpop.f32.mrf.mxu1 }
 0x621   : > { %21061 = vst [vmem:[#allocation92_spill] sm:$0xff] %v20415_v18  ;;  %v20421_v4 = vadd.f32 %v12195_v28, %v11646_v46  ;;  %v21071_v28 = vld [vmem:[#allocation21_spill] sm:$0xff] }
 0x622   : > { %v16392_v5 = vpop.f32.mrf.mxu1 }
 0x623   : > { %21064 = vst [vmem:[#allocation91_spill] sm:$0xff] %v20421_v4  ;;  %v20425_v61 = vadd.f32 %v16392_v5, %v11651_v2  ;;  %v11650_v4 = vadd.f32 %v21071_v28, %v20215_v59 }
 0x624   : > { %v12208_v39 = vpop.f32.mrf.mxu1 }
 0x625   : > { %21066 = vst [vmem:[#allocation47_spill] sm:$0xff] %v20425_v61  ;;  %v20431_v49 = vadd.f32 %v12208_v39, %v11649_v7 }
 0x626   : > { %v16393_v27 = vpop.f32.mrf.mxu1 }
 0x627   : > { %21069 = vst [vmem:[#allocation96_spill] sm:$0xff] %v20431_v49  ;;  %v12358_v46 = vadd.f32 %v16393_v27, %v11652_v0  ;;  %v20452_v27 = vpop.f32.mrf.mxu0 }
 0x628   : > { %v12211_v5 = vpop.f32.mrf.mxu1 }
 0x629   : > { %v20440_v53 = vadd.f32 %v20266_v51, %v12358_v46  ;;  %v20442_v19 = vadd.f32 %v12211_v5, %v11650_v4  ;;  %v20456_v38 = vpop.f32.mrf.mxu0 }
 0x62a   : > { %v20444_v2 = vpop.f32.mrf.mxu1  ;;  %21076 = vst [vmem:[#allocation97_spill] sm:$0xff] %v20456_v38 }
 0x62b   : > { %21073 = vst [vmem:[#allocation49_spill] sm:$0xff] %v20440_v53  ;;  %21074 = vst [vmem:[#allocation98_spill] sm:$0xff] %v20442_v19  ;;  %v20458_v46 = vpop.f32.mrf.mxu0 }
 0x62c   : > { %v20448_v7 = vpop.f32.mrf.mxu1 }
 0x62d   : > { %v20462_v5 = vpop.f32.mrf.mxu0 }
 0x62e   : > { %v20450_v47 = vpop.f32.mrf.mxu1 }
 0x62f   : > { %v16472_v32 = vpop.f32.mrf.mxu0 }
 0x630   : > { %v20454_v39 = vpop.f32.mrf.mxu1 }
 0x631   : > { %v12887_v45 = vpop.f32.mrf.mxu0 }
 0x632   : > { %v16400_v59 = vpop.f32.mrf.mxu1 }
 0x633   : > { %v16473_v53 = vpop.f32.mrf.mxu0  ;;  %v12365_v14 = vadd.f32 %v16400_v59, %v11659_v30 }
 0x634   : > { %v12240_v0 = vpop.f32.mrf.mxu1 }
 0x635   : > { %v12890_v29 = vpop.f32.mrf.mxu0 }
 0x636   : > { %v16401_v51 = vpop.f32.mrf.mxu1 }
 0x637   : > { %v20480_v58 = vpop.f32.mrf.mxu0  ;;  %v12366_v38 = vadd.f32 %v16401_v51, %v11660_v20  ;;  %v21090_v20 = vld [vmem:[#allocation26_spill] sm:$0xff] }
 0x638   : > { %v12243_v4 = vpop.f32.mrf.mxu1  ;;  %21084 = vst [vmem:[#allocation12_spill] sm:$0xff] %v20480_v58  ;;  %v11657_v37 = vadd.f32 %v21090_v20, %v20258_v26 }
 0x639   : > { %v12364_v13 = vadd.f32 %v12243_v4, %v11658_v40 }
 0x63a   : > { %v20460_v28 = vpop.f32.mrf.mxu1 }
 0x63b   : > { %21077 = vst [vmem:[#allocation53_spill] sm:$0xff] %v20460_v28 }
 0x63c   : > { %v20464_v33 = vpop.f32.mrf.mxu1 }
 0x63d   : > { %21078 = vst [vmem:[#allocation6_spill] sm:$0xff] %v20464_v33 }
 0x63e   : > { %v20466_v18 = vpop.f32.mrf.mxu1 }
 0x63f   : > { %21079 = vst [vmem:[#allocation52_spill] sm:$0xff] %v20466_v18 }
 0x640   : > { %v20468_v49 = vpop.f32.mrf.mxu1 }
 0x641   : > { %21080 = vst [vmem:[#allocation10_spill] sm:$0xff] %v20468_v49  ;;  %v20482_v49 = vpop.f32.mrf.mxu0 }
 0x642   : > { %v20470_v35 = vpop.f32.mrf.mxu1  ;;  %21085 = vst [vmem:[#allocation59_spill] sm:$0xff] %v20482_v49  ;;  %v11674_v49 = vadd.f32 %v21087_v54, %v20357_v10  ;;  %v21091_v54 = vld [vmem:[#allocation50_spill] sm:$0xff] }
 0x643   : > { %21081 = vst [vmem:[#allocation54_spill] sm:$0xff] %v20470_v35  ;;  %v20494_v63 = vpop.f32.mrf.mxu0  ;;  %v11672_v10 = vadd.f32 %v21091_v54, %v20331_v43  ;;  %v21094_v43 = vld [vmem:[#allocation23_spill] sm:$0xff]  ;;  %v21105_v54 = vld [vmem:[#allocation78_spill] sm:$0xff] }
 0x644   : > { %v20472_v19 = vpop.f32.mrf.mxu1 }
 0x645   : > { %21082 = vst [vmem:[#allocation11_spill] sm:$0xff] %v20472_v19  ;;  %v20507_v42 = vpop.f32.mrf.mxu0 }
 0x646   : > { %v20474_v36 = vpop.f32.mrf.mxu1 }
 0x648   : > { %v20476_v61 = vpop.f32.mrf.mxu1 }
 0x649   : > { %21083 = vst [vmem:[#allocation56_spill] sm:$0xff] %v20476_v61  ;;  %v11676_v61 = vadd.f32 %v20138_v50, %v20351_v48  ;;  %v11673_v50 = vadd.f32 %v21089_v22, %v20347_v24  ;;  %v21092_v24 = vld [vmem:[#allocation25_spill] sm:$0xff] }
 0x64a   : > { %v16412_v28 = vpop.f32.mrf.mxu1 }
 0x64c   : > { %v20478_v8 = vpop.f32.mrf.mxu1 }
 0x64e   : > { %v16413_v33 = vpop.f32.mrf.mxu1 }
 0x650   : > { %v12291_v18 = vpop.f32.mrf.mxu1 }
 0x652   : > { %v16416_v15 = vpop.f32.mrf.mxu1 }
 0x653   : > { %v12381_v58 = vadd.f32 %v16416_v15, %v11675_v6  ;;  %v12949_v6 = vadd.f32 %v20355_v55, %v12366_v38  ;;  %v21093_v55 = vld [vmem:[#allocation46_spill] sm:$0xff]  ;;  %v21095_v38 = vld [vmem:[#allocation55_spill] sm:$0xff] }
 0x654   : > { %v12304_v19 = vpop.f32.mrf.mxu1  ;;  %v11671_v40 = vadd.f32 %v21093_v55, %v20322_v16  ;;  %v16480_v16 = vpop.f32.mrf.mxu0  ;;  %v21111_v55 = vld [vmem:[#allocation88_spill] sm:$0xff] }
 0x655   : > { %v12964_v15 = vadd.f32 %v16472_v32, %v12381_v58  ;;  %v12379_v30 = vadd.f32 %v12304_v19, %v11673_v50  ;;  %v11655_v32 = vadd.f32 %v21094_v43, %v20224_v23  ;;  %v12947_v19 = vadd.f32 %v20368_v52, %v12364_v13  ;;  %v21097_v52 = vld [vmem:[#allocation48_spill] sm:$0xff]  ;;  %v21104_v13 = vld [vmem:[#allocation38_spill] sm:$0xff]  ;;  %v21113_v43 = vld [vmem:[#allocation37_spill] sm:$0xff] }
 0x656   : > { %v16417_v9 = vpop.f32.mrf.mxu1  ;;  %v11669_v4 = vadd.f32 %v21097_v52, %v20327_v12  ;;  %v21120_v52 = vld [vmem:[#allocation94_spill] sm:$0xff] }
 0x657   : > { %v12382_v35 = vadd.f32 %v16417_v9, %v11676_v61  ;;  %v11656_v61 = vadd.f32 %v21092_v24, %v20237_v57  ;;  %v12962_v51 = vadd.f32 %v12887_v45, %v12379_v30  ;;  %v21108_v30 = vld [vmem:[#allocation80_spill] sm:$0xff] }
 0x658   : > { %v12307_v1 = vpop.f32.mrf.mxu1  ;;  %v12375_v12 = vadd.f32 %v20478_v8, %v11669_v4  ;;  %v21102_v8 = vld [vmem:[#allocation86_spill] sm:$0xff]  ;;  %v21109_v24 = vld [vmem:[#allocation44_spill] sm:$0xff] }
 0x659   : > { %v12965_v48 = vadd.f32 %v16473_v53, %v12382_v35  ;;  %v12380_v44 = vadd.f32 %v12307_v1, %v11674_v49  ;;  %v12948_v35 = vadd.f32 %v20335_v34, %v12365_v14  ;;  %v12363_v49 = vadd.f32 %v12240_v0, %v11657_v37  ;;  %v21103_v37 = vld [vmem:[#allocation73_spill] sm:$0xff] }
 0x65a   : > { %v20503_v9 = vpop.f32.mrf.mxu1  ;;  %v12378_v53 = vadd.f32 %v16413_v33, %v11672_v10  ;;  %v12362_v58 = vadd.f32 %v20450_v47, %v11656_v61  ;;  %v12377_v34 = vadd.f32 %v16412_v28, %v11671_v40  ;;  %v11670_v0 = vadd.f32 %v21095_v38, %v20337_v21  ;;  %v21098_v21 = vld [vmem:[#allocation24_spill] sm:$0xff]  ;;  %v21112_v40 = vld [vmem:[#allocation74_spill] sm:$0xff] }
 0x65b   : > { %15018 = vmatprep.subr.mxu1 %v12965_v48  ;;  %v12963_v59 = vadd.f32 %v12890_v29, %v12380_v44  ;;  %v12361_v44 = vadd.f32 %v20444_v2, %v11655_v32  ;;  %v21096_v29 = vld [vmem:[#allocation4_spill] sm:$0xff]  ;;  %v12946_v23 = vadd.f32 %v20345_v31, %v12363_v49  ;;  %v11653_v45 = vadd.f32 %v21098_v21, %v20232_v25  ;;  %v21099_v31 = vld [vmem:[#allocation41_spill] sm:$0xff]  ;;  %v21116_v38 = vld [vmem:[#allocation82_spill] sm:$0xff] }
 0x65c   : > { %v20512_v26 = vpop.f32.mrf.mxu1  ;;  %15019 = vmatpush3.msra.mxu1 %v12949_v6  ;;  %v11654_v33 = vadd.f32 %v21096_v29, %v20243_v56  ;;  %v12961_v28 = vadd.f32 %v20458_v46, %v12378_v53  ;;  %v12376_v14 = vadd.f32 %v12291_v18, %v11670_v0  ;;  %v12945_v2 = vadd.f32 %v20313_v11, %v12362_v58  ;;  %v12919_v46 = vpop.f32.mrf.mxu0  ;;  %v21100_v25 = vld [vmem:[#allocation36_spill] sm:$0xff]  ;;  %v21114_v58 = vld [vmem:[#allocation35_spill] sm:$0xff] }
 0x65d   : > { %15020 = vmatprep.subr.mxu1 %v12964_v15  ;;  %v11668_v1 = vadd.f32 %v21099_v31, %v20310_v41  ;;  %v12960_v22 = vadd.f32 %v20452_v27, %v12377_v34  ;;  %v12944_v18 = vadd.f32 %v20289_v62, %v12361_v44  ;;  %v12359_v50 = vadd.f32 %v20448_v7, %v11653_v45  ;;  %v21101_v41 = vld [vmem:[#allocation69_spill] sm:$0xff]  ;;  %v21107_v15 = vld [vmem:[#allocation54_spill] sm:$0xff]  ;;  %v21117_v0 = vld [vmem:[#allocation39_spill] sm:$0xff] }
 0x65e   : > { %v20520_v57 = vpop.f32.mrf.mxu1  ;;  %15021 = vmatpush3.msra.mxu1 %v12948_v35  ;;  %v12360_v60 = vadd.f32 %v20454_v39, %v11654_v33  ;;  %v11667_v11 = vadd.f32 %v21100_v25, %v20298_v3  ;;  %v12959_v20 = vadd.f32 %v20462_v5, %v12376_v14  ;;  %v11683_v27 = vadd.f32 %v21101_v41, %v20385_v17  ;;  %v21106_v7 = vld [vmem:[#allocation29_spill] sm:$0xff]  ;;  %v21118_v44 = vld [vmem:[#allocation87_spill] sm:$0xff]  ;;  %v21119_v29 = vld [vmem:[#allocation72_spill] sm:$0xff] }
 0x65f   : > { %15022 = vmatprep.subr.mxu1 %v12963_v59  ;;  %v12374_v39 = vadd.f32 %v20474_v36, %v11668_v1  ;;  %v11684_v6 = vadd.f32 %v21103_v37, %v21102_v8  ;;  %v11663_v10 = vadd.f32 %v21106_v7, %v21105_v54  ;;  %v11666_v61 = vadd.f32 %v21109_v24, %v21108_v30  ;;  %v21110_v5 = vld [vmem:[#allocation97_spill] sm:$0xff]  ;;  %v16481_v59 = vpop.f32.mrf.mxu0  ;;  %v21124_v31 = vld [vmem:[#allocation8_spill] sm:$0xff]  ;;  %v21125_v1 = vld [vmem:[#allocation34_spill] sm:$0xff] }
 0x660   : > { %v20528_v47 = vpop.f32.mrf.mxu1  ;;  %15023 = vmatpush3.msra.mxu1 %v12947_v19  ;;  %v12943_v62 = vadd.f32 %v21104_v13, %v12360_v60  ;;  %v12373_v3 = vadd.f32 %v21107_v15, %v11667_v11  ;;  %v12958_v35 = vadd.f32 %v21110_v5, %v12375_v12  ;;  %v11682_v53 = vadd.f32 %v21112_v40, %v21111_v55  ;;  %v21115_v19 = vld [vmem:[#allocation30_spill] sm:$0xff]  ;;  %v21123_v60 = vld [vmem:[#allocation31_spill] sm:$0xff]  ;;  %v21126_v12 = vld [vmem:[#allocation93_spill] sm:$0xff] }
 0x661   : > { %15024 = vmatprep.subr.mxu1 %v12962_v51  ;;  %v12942_v32 = vadd.f32 %v21113_v43, %v12359_v50  ;;  %v11661_v34 = vadd.f32 %v21115_v19, %v21114_v58  ;;  %v11665_v51 = vadd.f32 %v21117_v0, %v21116_v38  ;;  %v11681_v33 = vadd.f32 %v21119_v29, %v21118_v44  ;;  %v21127_v50 = vld [vmem:[#allocation85_spill] sm:$0xff]  ;;  %v21130_v8 = vld [vmem:[#allocation47_spill] sm:$0xff]  ;;  %v21131_v37 = vld [vmem:[#allocation32_spill] sm:$0xff]  ;;  %v12922_v13 = vpop.f32.mrf.mxu0 }
 0x662   : > { %v16424_v56 = vpop.f32.mrf.mxu1  ;;  %15025 = vmatpush3.msra.mxu1 %v12946_v23  ;;  %v12957_v4 = vadd.f32 %v21120_v52, %v12374_v39  ;;  %v21128_v25 = vld [vmem:[#allocation65_spill] sm:$0xff]  ;;  %v21133_v7 = vld [vmem:[#allocation83_spill] sm:$0xff]  ;;  %v21141_v40 = vld [vmem:[#allocation66_spill] sm:$0xff] }
 0x663   : > { %15026 = vmatprep.subr.mxu1 %v12961_v28  ;;  %v12389_v49 = vadd.f32 %v16424_v56, %v11683_v27  ;;  %v21121_v28 = vld [vmem:[#allocation56_spill] sm:$0xff]  ;;  %v11680_v11 = vadd.f32 %v21128_v25, %v21127_v50  ;;  %v21134_v15 = vld [vmem:[#allocation61_spill] sm:$0xff]  ;;  %v21136_v24 = vld [vmem:[#allocation51_spill] sm:$0xff] }
 0x664   : > { %v12336_v48 = vpop.f32.mrf.mxu1  ;;  %15027 = vmatpush3.msra.mxu1 %v12945_v2  ;;  %v12372_v14 = vadd.f32 %v21121_v28, %v11666_v61  ;;  %v21122_v2 = vld [vmem:[#allocation81_spill] sm:$0xff]  ;;  %v21138_v5 = vld [vmem:[#allocation79_spill] sm:$0xff]  ;;  %v21143_v58 = vld [vmem:[#allocation96_spill] sm:$0xff] }
 0x665   : > { %15028 = vmatprep.subr.mxu1 %v12960_v22  ;;  %v11664_v56 = vadd.f32 %v21123_v60, %v21122_v2  ;;  %v11662_v22 = vadd.f32 %v21125_v1, %v21124_v31  ;;  %v20579_v41 = vadd.f32 %v16480_v16, %v12389_v49  ;;  %v12387_v27 = vadd.f32 %v12336_v48, %v11681_v33  ;;  %v21135_v30 = vld [vmem:[#allocation49_spill] sm:$0xff]  ;;  %v21145_v0 = vld [vmem:[#allocation43_spill] sm:$0xff]  ;;  %v21148_v33 = vld [vmem:[#allocation10_spill] sm:$0xff] }
 0x666   : > { %v16425_v36 = vpop.f32.mrf.mxu1  ;;  %15029 = vmatpush3.msra.mxu1 %v12944_v18  ;;  %v12956_v18 = vadd.f32 %v21126_v12, %v12373_v3  ;;  %v11679_v3 = vadd.f32 %v21134_v15, %v21133_v7  ;;  %v12955_v16 = vadd.f32 %v21136_v24, %v12372_v14  ;;  %v12386_v48 = vadd.f32 %v20520_v57, %v11680_v11  ;;  %v21139_v49 = vld [vmem:[#allocation53_spill] sm:$0xff]  ;;  %v21147_v44 = vld [vmem:[#allocation63_spill] sm:$0xff]  ;;  %v21149_v52 = vld [vmem:[#allocation92_spill] sm:$0xff] }
 0x667   : > { %v12390_v17 = vadd.f32 %v16425_v36, %v11684_v6  ;;  %15030 = vmatprep.subr.mxu1 %v12959_v20  ;;  %v21129_v20 = vld [vmem:[#allocation11_spill] sm:$0xff]  ;;  %v12940_v6 = vadd.f32 %v21131_v37, %v21130_v8  ;;  %v21137_v36 = vld [vmem:[#allocation98_spill] sm:$0xff]  ;;  %v21140_v55 = vld [vmem:[#allocation9_spill] sm:$0xff] }
 0x668   : > { %v12339_v23 = vpop.f32.mrf.mxu1  ;;  %15031 = vmatpush3.msra.mxu1 %v12943_v62  ;;  %v12371_v39 = vadd.f32 %v21129_v20, %v11665_v51  ;;  %v21132_v62 = vld [vmem:[#allocation52_spill] sm:$0xff]  ;;  %v12385_v57 = vadd.f32 %v20503_v9, %v11679_v3  ;;  %v21144_v19 = vld [vmem:[#allocation33_spill] sm:$0xff]  ;;  %v12969_v9 = vadd.f32 %v20494_v63, %v12386_v48  ;;  %v21152_v2 = vld [vmem:[#allocation6_spill] sm:$0xff] }
 0x669   : > { %v20569_v21 = vadd.f32 %v16481_v59, %v12390_v17  ;;  %v12388_v45 = vadd.f32 %v12339_v23, %v11682_v53  ;;  %15032 = vmatprep.subr.mxu1 %v12958_v35  ;;  %v12370_v54 = vadd.f32 %v21132_v62, %v11664_v56  ;;  %v12939_v35 = vadd.f32 %v21138_v5, %v21137_v36  ;;  %v21142_v59 = vld [vmem:[#allocation95_spill] sm:$0xff]  ;;  %v21146_v51 = vld [vmem:[#allocation84_spill] sm:$0xff]  ;;  %v21154_v63 = vld [vmem:[#allocation89_spill] sm:$0xff] }
 0x66a   : > { %15033 = vmatpush3.msra.mxu1 %v12942_v32  ;;  %v12369_v17 = vadd.f32 %v21139_v49, %v11663_v10  ;;  %v11678_v53 = vadd.f32 %v21141_v40, %v21140_v55  ;;  %v12954_v43 = vadd.f32 %v21142_v59, %v12371_v39  ;;  %v20602_v32 = vadd.f32 %v12919_v46, %v12387_v27  ;;  %v21151_v14 = vld [vmem:[#allocation40_spill] sm:$0xff]  ;;  %v21156_v12 = vld [vmem:[#allocation90_spill] sm:$0xff]  ;;  %v21157_v25 = vld [vmem:[#allocation91_spill] sm:$0xff] }
 0x66b   : > { %15034 = vmatprep.subr.mxu1 %v12957_v4  ;;  %16482 = vmatprep.subr.mxu0 %v20569_v21  ;;  %v20591_v61 = vadd.f32 %v12922_v13, %v12388_v45  ;;  %v12938_v38 = vadd.f32 %v21144_v19, %v21143_v58  ;;  %v12953_v10 = vadd.f32 %v21145_v0, %v12370_v54  ;;  %v21150_v4 = vld [vmem:[#allocation77_spill] sm:$0xff]  ;;  %v21153_v56 = vld [vmem:[#allocation12_spill] sm:$0xff]  ;;  %v21159_v20 = vld [vmem:[#allocation42_spill] sm:$0xff] }
 0x66c   : > { %15035 = vmatpush3.msra.mxu1 %v21135_v30  ;;  %16483 = vmatpush3.msra.mxu0 %v20569_v21  ;;  %v11677_v29 = vadd.f32 %v21147_v44, %v21146_v51  ;;  %v12368_v23 = vadd.f32 %v21148_v33, %v11662_v22  ;;  %v12384_v46 = vadd.f32 %v20528_v47, %v11678_v53  ;;  %v21155_v47 = vld [vmem:[#allocation75_spill] sm:$0xff]  ;;  %v21158_v11 = vld [vmem:[#allocation5_spill] sm:$0xff]  ;;  %v21162_v37 = vld [vmem:[#allocation76_spill] sm:$0xff] }
 0x66d   : > { %15036 = vmatprep.subr.mxu1 %v12956_v18  ;;  %16484 = vmatprep.subr.mxu0 %v20579_v41  ;;  %v12937_v28 = vadd.f32 %v21150_v4, %v21149_v52  ;;  %v12952_v45 = vadd.f32 %v21151_v14, %v12369_v17  ;;  %v12367_v60 = vadd.f32 %v21152_v2, %v11661_v34  ;;  %v21160_v39 = vld [vmem:[#allocation59_spill] sm:$0xff]  ;;  %v21161_v8 = vld [vmem:[#allocation45_spill] sm:$0xff]  ;;  %v13019_v62 = vld [vmem:[%s20746_s7 + $0x28] sm:$0xff] }
 0x66e   : > { %15037 = vmatpush3.msra.mxu1 %v12940_v6  ;;  %16485 = vmatpush3.msra.mxu0 %v20579_v41  ;;  %v12968_v31 = vadd.f32 %v21153_v56, %v12385_v57  ;;  %v12383_v1 = vadd.f32 %v20512_v26, %v11677_v29  ;;  %v12936_v22 = vadd.f32 %v21155_v47, %v21154_v63  ;;  %v13018_v13 = vld [vmem:[%s20746_s7 + $0x20] sm:$0xff]  ;;  %v13017_v7 = vld [vmem:[%s20746_s7 + $0x18] sm:$0xff]  ;;  %v13028_v3 = vld [vmem:[%s20746_s7 + $0x70] sm:$0xff] }
 0x66f   : > { %15038 = vmatprep.subr.mxu1 %v12955_v16  ;;  %16486 = vmatprep.subr.mxu0 %v20591_v61  ;;  %v12951_v18 = vadd.f32 %v21156_v12, %v12368_v23  ;;  %v12967_v50 = vadd.f32 %v20507_v42, %v12384_v46  ;;  %v12935_v34 = vadd.f32 %v21158_v11, %v21157_v25  ;;  %v13014_v42 = vld [vmem:[%s20746_s7] sm:$0xff]  ;;  %v13021_v15 = vld [vmem:[%s20746_s7 + $0x38] sm:$0xff]  ;;  %v13024_v30 = vld [vmem:[%s20746_s7 + $0x50] sm:$0xff] }
 0x670   : > { %15039 = vmatpush3.msra.mxu1 %v12939_v35  ;;  %16487 = vmatpush3.msra.mxu0 %v20591_v61  ;;  %v12950_v26 = vadd.f32 %v21159_v20, %v12367_v60  ;;  %v12966_v27 = vadd.f32 %v21160_v39, %v12383_v1  ;;  %v12934_v6 = vadd.f32 %v21162_v37, %v21161_v8  ;;  %v13022_v54 = vld [vmem:[%s20746_s7 + $0x40] sm:$0xff]  ;;  %v13031_v24 = vld [vmem:[%s20746_s7 + $0x88] sm:$0xff]  ;;  %v13029_v5 = vld [vmem:[%s20746_s7 + $0x78] sm:$0xff] }
 0x671   : > { %15040 = vmatprep.subr.mxu1 %v12954_v43  ;;  %16488 = vmatprep.subr.mxu0 %v20602_v32  ;;  %v13023_v16 = vld [vmem:[%s20746_s7 + $0x48] sm:$0xff]  ;;  %v13030_v36 = vld [vmem:[%s20746_s7 + $0x80] sm:$0xff]  ;;  %v13033_v35 = vld [vmem:[%s20746_s7 + $0x98] sm:$0xff] }
 0x672   : > { %15041 = vmatpush3.msra.mxu1 %v12938_v38  ;;  %16489 = vmatpush3.msra.mxu0 %v20602_v32  ;;  %v13027_v48 = vld [vmem:[%s20746_s7 + $0x68] sm:$0xff]  ;;  %v13032_v49 = vld [vmem:[%s20746_s7 + $0x90] sm:$0xff]  ;;  %v13034_v40 = vld [vmem:[%s20746_s7 + $0xa0] sm:$0xff] }
 0x673   : > { %15042 = vmatprep.subr.mxu1 %v12953_v10  ;;  %16490 = vmatprep.subr.mxu0 %v12969_v9  ;;  %v13036_v17 = vld [vmem:[%s20746_s7 + $0xb0] sm:$0xff]  ;;  %v13035_v55 = vld [vmem:[%s20746_s7 + $0xa8] sm:$0xff]  ;;  %v13037_v53 = vld [vmem:[%s20746_s7 + $0xb8] sm:$0xff] }
 0x674   : > { %15043 = vmatpush3.msra.mxu1 %v12937_v28  ;;  %16491 = vmatpush3.msra.mxu0 %v12969_v9  ;;  %v14341_v57 = vld [vmem:[%s20745_s6] ss:$0 sm:$0xff] }
 0x675   : > { %15044 = vmatprep.subr.mxu1 %v12952_v45  ;;  %16492 = vmatprep.subr.mxu0 %v12968_v31 }
 0x676   : > { %15045 = vmatpush3.msra.mxu1 %v12936_v22  ;;  %16493 = vmatpush3.msra.mxu0 %v12968_v31 }
 0x677   : > { %15046 = vmatprep.subr.mxu1 %v12951_v18  ;;  %16494 = vmatprep.subr.mxu0 %v12967_v50 }
 0x678   : > { %15047 = vmatpush3.msra.mxu1 %v12935_v34  ;;  %16495 = vmatpush3.msra.mxu0 %v12967_v50 }
 0x679   : > { %15048 = vmatprep.subr.mxu1 %v12950_v26  ;;  %16496 = vmatprep.subr.mxu0 %v12966_v27 }
 0x67a   : > { %15049 = vmatpush3.msra.mxu1 %v12934_v6  ;;  %16497 = vmatpush3.msra.mxu0 %v12966_v27 }
 0x67b   : > { %16510 = vmatprep.subr.mxu1 %v20569_v21  ;;  %13175 = vmatmul.mubr.f32.vlgmr.msra.gmra.mxu1 %v13014_v42 }
 0x67c   : > { %16518 = vmatpush3.msra.mxu1 %v20569_v21  ;;  %13179 = vmatprep.mubr.f32.mxu1 %v13018_v13  ;;  %v13025_v21 = vld [vmem:[%s20746_s7 + $0x58] sm:$0xff] }
 0x67d   : > { %16511 = vmatprep.subr.mxu1 %v20579_v41  ;;  %16499 = vmatmul.mubr.msk.f32.vlgmr.msra.gmra.mxu0 %vm13085_vm8, %v13019_v62 }
 0x67e   : > { %16519 = vmatpush3.msra.mxu1 %v20579_v41  ;;  %16501 = vmatprep.mubr.msk.f32.mxu0 %vm13085_vm8, %v13022_v54  ;;  %v13020_v41 = vld [vmem:[%s20746_s7 + $0x30] sm:$0xff] }
 0x67f   : > { %16512 = vmatprep.subr.mxu1 %v20591_v61  ;;  %13180 = vmatmul.mubr.f32.gmra.mxu1 %v13017_v7 }
 0x680   : > { %16520 = vmatpush3.msra.mxu1 %v20591_v61  ;;  %13184 = vmatprep.mubr.f32.mxu1 %v13021_v15  ;;  %v13026_v61 = vld [vmem:[%s20746_s7 + $0x60] sm:$0xff] }
 0x681   : > { %16513 = vmatprep.subr.mxu1 %v20602_v32  ;;  %16502 = vmatmul.mubr.msk.f32.gmra.mxu0 %vm13085_vm8, %v13025_v21 }
 0x682   : > { %16521 = vmatpush3.msra.mxu1 %v20602_v32  ;;  %16504 = vmatprep.mubr.msk.f32.mxu0 %vm13085_vm8, %v13028_v3 }
 0x683   : > { %16514 = vmatprep.subr.mxu1 %v12969_v9  ;;  %13185 = vmatmul.mubr.f32.gmra.mxu1 %v13020_v41 }
 0x684   : > { %16522 = vmatpush3.msra.mxu1 %v12969_v9  ;;  %13189 = vmatprep.mubr.f32.mxu1 %v13024_v30 }
 0x685   : > { %16515 = vmatprep.subr.mxu1 %v12968_v31  ;;  %16505 = vmatmul.mubr.msk.f32.gmra.mxu0 %vm13085_vm8, %v13031_v24 }
 0x686   : > { %16523 = vmatpush3.msra.mxu1 %v12968_v31 }
 0x687   : > { %16516 = vmatprep.subr.mxu1 %v12967_v50  ;;  %13190 = vmatmul.mubr.f32.gmra.mxu1 %v13023_v16 }
 0x688   : > { %16524 = vmatpush3.msra.mxu1 %v12967_v50  ;;  %13194 = vmatprep.mubr.f32.mxu1 %v13027_v48 }
 0x689   : > { %16517 = vmatprep.subr.mxu1 %v12966_v27 }
 0x68a   : > { %16525 = vmatpush3.msra.mxu1 %v12966_v27 }
 0x68b   : > { %13195 = vmatmul.mubr.f32.gmra.mxu1 %v13026_v61 }
 0x68c   : > { %13199 = vmatprep.mubr.f32.mxu1 %v13030_v36 }
 0x68f   : > { %13200 = vmatmul.mubr.f32.gmra.mxu1 %v13029_v5 }
 0x690   : > { %13204 = vmatprep.mubr.f32.mxu1 %v13033_v35 }
 0x693   : > { %13205 = vmatmul.mubr.f32.gmra.mxu1 %v13032_v49 }
 0x694   : > { %13209 = vmatprep.mubr.f32.mxu1 %v13036_v17 }
 0x697   : > { %13210 = vmatmul.mubr.f32.gmra.mxu1 %v13035_v55 }
 0x698   : > { %16507 = vmatprep.mubr.msk.f32.mxu1 %vm13085_vm8, %v13034_v40 }
 0x69b   : > { %16508 = vmatmul.mubr.msk.f32.vlgmr.msra.gmra.mxu1 %vm13085_vm8, %v13037_v53 }
 0x73b   : > { %v15050_v59 = vpop.f32.mrf.mxu1 }
 0x73d   : > { %v15051_v43 = vpop.f32.mrf.mxu1  ;;  %v16500_v32 = vpop.f32.mrf.mxu0 }
 0x73e   : > { %v15052_v58 = vadd.f32 %v15051_v43, %v15050_v59 }
 0x73f   : > { %v15053_v19 = vpop.f32.mrf.mxu1  ;;  %v13281_v38 = vpop.f32.mrf.mxu0 }
 0x740   : > { %v13177_v0 = vadd.f32 %v15052_v58, %v14341_v57 }
 0x741   : > { %v15054_v10 = vpop.f32.mrf.mxu1  ;;  %v16503_v33 = vpop.f32.mrf.mxu0 }
 0x742   : > { %v15055_v51 = vadd.f32 %v15054_v10, %v15053_v19  ;;  %v13282_v44 = vadd.f32 %v13281_v38, %v13177_v0 }
 0x743   : > { %v15056_v29 = vpop.f32.mrf.mxu1  ;;  %v13291_v28 = vpop.f32.mrf.mxu0 }
 0x744   : > { %v13182_v23 = vadd.f32 %v15055_v51, %v14341_v57  ;;  %13320 = vst [vmem:[%s20720_s25] sm:$0xff] %v13282_v44 }
 0x745   : > { %v15057_v9 = vpop.f32.mrf.mxu1  ;;  %v16506_v31 = vpop.f32.mrf.mxu0 }
 0x746   : > { %v13287_v46 = vadd.f32 %v16500_v32, %v13182_v23  ;;  %v15058_v52 = vadd.f32 %v15057_v9, %v15056_v29 }
 0x747   : > { %v15059_v4 = vpop.f32.mrf.mxu1  ;;  %v13301_v18 = vpop.f32.mrf.mxu0 }
 0x748   : > { %13321 = vst [vmem:[%s20720_s25 + $0x8] sm:$0xff] %v13287_v46  ;;  %v13187_v14 = vadd.f32 %v15058_v52, %v14341_v57 }
 0x749   : > { %v15060_v45 = vpop.f32.mrf.mxu1 }
 0x74a   : > { %v15061_v2 = vadd.f32 %v15060_v45, %v15059_v4  ;;  %v13292_v60 = vadd.f32 %v13291_v28, %v13187_v14 }
 0x74b   : > { %v15062_v56 = vpop.f32.mrf.mxu1 }
 0x74c   : > { %v13192_v1 = vadd.f32 %v15061_v2, %v14341_v57  ;;  %13322 = vst [vmem:[%s20720_s25 + $0x10] sm:$0xff] %v13292_v60 }
 0x74d   : > { %v15063_v63 = vpop.f32.mrf.mxu1 }
 0x74e   : > { %v13297_v47 = vadd.f32 %v16503_v33, %v13192_v1  ;;  %v15064_v22 = vadd.f32 %v15063_v63, %v15062_v56 }
 0x74f   : > { %v15065_v12 = vpop.f32.mrf.mxu1 }
 0x750   : > { %13323 = vst [vmem:[%s20720_s25 + $0x18] sm:$0xff] %v13297_v47  ;;  %v13197_v50 = vadd.f32 %v15064_v22, %v14341_v57 }
 0x751   : > { %v15066_v25 = vpop.f32.mrf.mxu1 }
 0x752   : > { %v15067_v11 = vadd.f32 %v15066_v25, %v15065_v12  ;;  %v13302_v34 = vadd.f32 %v13301_v18, %v13197_v50 }
 0x753   : > { %v15068_v20 = vpop.f32.mrf.mxu1 }
 0x754   : > { %v13202_v26 = vadd.f32 %v15067_v11, %v14341_v57  ;;  %13324 = vst [vmem:[%s20720_s25 + $0x20] sm:$0xff] %v13302_v34 }
 0x755   : > { %v15069_v39 = vpop.f32.mrf.mxu1 }
 0x756   : > { %v13307_v27 = vadd.f32 %v16506_v31, %v13202_v26  ;;  %v15070_v37 = vadd.f32 %v15069_v39, %v15068_v20 }
 0x757   : > { %v15071_v8 = vpop.f32.mrf.mxu1 }
 0x758   : > { %13325 = vst [vmem:[%s20720_s25 + $0x28] sm:$0xff] %v13307_v27  ;;  %v13207_v54 = vadd.f32 %v15070_v37, %v14341_v57 }
 0x759   : > { %v15072_v6 = vpop.f32.mrf.mxu1 }
 0x75a   : > { %v15073_v42 = vadd.f32 %v15072_v6, %v15071_v8 }
 0x75b   : > { %v16509_v13 = vpop.f32.mrf.mxu1 }
 0x75c   : > { %v13212_v62 = vadd.f32 %v15073_v42, %v14341_v57 }
 0x75d   : > { %v13311_v7 = vpop.f32.mrf.mxu1 }
 0x75e   : > { %v13317_v15 = vadd.f32 %v16509_v13, %v13212_v62  ;;  %v13312_v21 = vadd.f32 %v13311_v7, %v13207_v54 }
 0x760   : > { %13327 = vst [vmem:[%s20720_s25 + $0x38] sm:$0xff] %v13317_v15  ;;  %13326 = vst [vmem:[%s20720_s25 + $0x30] sm:$0xff] %v13312_v21 }
 0x761 PF: > { %s18_s29 = sadd.s32 1, %s17067_s29   ;;  %s21163_s27 = smov %s17063_s28 }
 0x762   : > { %p15_p5 = scmp.ge.s32.totalorder %s18_s29, 4   ;;  %s21164_s28 = smov %s21166_s30 }
 0x764   :  { %17 = sbr.rel (!%p15_p5) target bundleno = 2 (0x2), region = 101 }

</bundles_post_ra>
